<compile_context>
chip_gen: v5e
topology: v5e:2x2
jax: 0.10.0
libtpu: 0.0.40
codegen_flags: <defaults>
</compile_context>

<pallas_src>
import functools

import jax
import jax.numpy as jnp
from jax.experimental import pallas as pl
from jax.experimental.pallas import tpu as pltpu

# ----------------------- small synthetic configuration -----------------------
B, F = 2, 4                       # batch, frames
C, H, W, PATCH = 3, 16, 16, 8     # per-frame image, patch size
HP, WP = H // PATCH, W // PATCH
NPATCH = HP * WP                  # 4 patches per frame
BF = B * F                        # 8 frames total
DV = 32                           # ViT embed dim (stand-in for 768)
VIT_DEPTH, VIT_HEADS, VIT_MLP = 2, 4, 4 * 32    # mlp_ratio = 4
TR_DIM, TR_HEADS, TR_LAYERS, TR_FF = 32, 4, 2, 64
OUT_FEATURES = 16
NTOK_V = 1 + NPATCH               # ViT tokens per frame (cls + patches) = 5
NV = NTOK_V * BF                  # flattened ViT rows   = 40
NT = BF + B                       # flattened temporal rows (frames + cls/batch) = 10
VIT_EPS = 1e-6                    # partial(nn.LayerNorm, eps=1e-6)
TR_EPS = 1e-5                     # default nn.LayerNorm eps
NEG_INF = -1e30

VMEM = pl.BlockSpec(memory_space=pltpu.MemorySpace.VMEM)

# number of flat kernel inputs (must match _flatten_inputs / _mae_kernel order)
NUM_INPUTS = 7 + 12 * VIT_DEPTH + 2 + 4 + 1 + 11 * TR_LAYERS + 2 + 2


# ------------------------------ kernel helpers -------------------------------
def _layernorm(x, w, b, eps):
    mu = jnp.mean(x, axis=-1, keepdims=True)
    xc = x - mu
    var = jnp.mean(xc * xc, axis=-1, keepdims=True)
    return xc * jax.lax.rsqrt(var + eps) * w + b


def _erf(x):
    # Abramowitz & Stegun 7.1.26 (|err| < 1.5e-7) -- matches torch's exact-erf
    # GELU to ~1e-7 using only Mosaic-supported elementwise ops.
    a1, a2, a3, a4, a5 = 0.254829592, -0.284496736, 1.421413741, -1.453152027, 1.061405429
    p = 0.3275911
    sgn = jnp.where(x >= 0.0, 1.0, -1.0)
    ax = jnp.abs(x)
    t = 1.0 / (1.0 + p * ax)
    poly = ((((a5 * t + a4) * t + a3) * t + a2) * t + a1) * t
    return sgn * (1.0 - poly * jnp.exp(-ax * ax))


def _gelu(x):
    return 0.5 * x * (1.0 + _erf(x * 0.7071067811865476))


def _block(x, mask_bias, ln1w, ln1b, wqkv, bqkv, wo, bo,
           ln2w, ln2b, w1, b1, w2, b2, *, heads, eps):
    """Pre-norm attention + pre-norm GELU MLP with residuals on flat (rows, dim) x.

    `mask_bias` is an additive (rows, rows) bias (0 inside a sequence, -1e30
    across sequences) so the whole flattened batch shares one score/softmax."""
    d = x.shape[-1]
    dh = d // heads
    scale = dh ** -0.5

    # ---- x = x + Attn(LN(x)) ----
    xn = _layernorm(x, ln1w, ln1b, eps)
    qkv = jnp.dot(xn, wqkv, preferred_element_type=jnp.float32)   # (rows, 3d) q|k|v
    if bqkv is not None:                                          # qkv_bias=False -> skip
        qkv = qkv + bqkv
    attn = None
    for h in range(heads):                                        # static unroll
        qh = qkv[:, h * dh:(h + 1) * dh]
        kh = qkv[:, d + h * dh:d + (h + 1) * dh]
        vh = qkv[:, 2 * d + h * dh:2 * d + (h + 1) * dh]
        s = jax.lax.dot_general(qh, kh, (((1,), (1,)), ((), ())),
                                preferred_element_type=jnp.float32) * scale + mask_bias
        s = s - jnp.max(s, axis=-1, keepdims=True)
        e = jnp.exp(s)                                            # masked entries -> 0
        a = e * pl.reciprocal(jnp.sum(e, axis=-1, keepdims=True), approx=True)
        ctx = jnp.dot(a, vh, preferred_element_type=jnp.float32)  # (rows, dh)
        # accumulate ctx_h @ Wo[h*dh:(h+1)*dh]  ==  concat(ctx_h) @ Wo, no lane concat
        part = jnp.dot(ctx, wo[h * dh:(h + 1) * dh, :],
                       preferred_element_type=jnp.float32)
        attn = part if attn is None else attn + part
    x = x + attn + bo

    # ---- x = x + MLP(LN(x)) ----
    xn = _layernorm(x, ln2w, ln2b, eps)
    hdn = _gelu(jnp.dot(xn, w1, preferred_element_type=jnp.float32) + b1)
    return x + jnp.dot(hdn, w2, preferred_element_type=jnp.float32) + b2


# ----------------------------- the fused kernel -------------------------------
def _mae_kernel(*refs, num_inputs):
    out_ref = refs[num_inputs]
    xv_ref = refs[num_inputs + 1]      # (NV, DV)  ViT sequence assembly scratch
    xt_ref = refs[num_inputs + 2]      # (NT, TR_DIM) temporal sequence scratch
    it = iter(refs[:num_inputs])

    def nxt():
        return next(it)[...]

    patches = nxt()      # (NPATCH*BF, C*P*P), patch-major rows (p*BF + f)
    pos40 = nxt()        # (NV, DV) pos-embed, token-major rows (t*BF + f)
    vit_bias = nxt()     # (NV, NV) additive block-diagonal mask
    tr_bias = nxt()      # (NT, NT)
    patch_w = nxt()      # (C*P*P, DV)
    patch_b = nxt()      # (1, DV)
    cls_tok = nxt()      # (1, DV)

    # ---- patch embed + [cls; patches] + pos-embed (token-major flat layout) ----
    tok = jnp.dot(patches, patch_w, preferred_element_type=jnp.float32) + patch_b
    xv_ref[0:BF, :] = jnp.broadcast_to(cls_tok, (BF, DV))
    for t in range(NPATCH):            # aligned 8-row writes
        xv_ref[BF * (t + 1):BF * (t + 2), :] = tok[BF * t:BF * (t + 1), :]
    x = xv_ref[...] + pos40            # (NV, DV)

    # ---- ViT encoder ----
    for _ in range(VIT_DEPTH):
        blk = [nxt() for _ in range(12)]     # ln1w ln1b wqkv bqkv wo bo ln2w ln2b w1 b1 w2 b2
        x = _block(x, vit_bias, *blk, heads=VIT_HEADS, eps=VIT_EPS)

    vit_nw = nxt(); vit_nb = nxt()
    x = _layernorm(x, vit_nw, vit_nb, VIT_EPS)

    # ---- cls pooling + F.normalize(dim=-1) ----
    feats = x[0:BF, :]                                       # cls rows = frames (b*F + f)
    ss = jnp.sum(feats * feats, axis=-1, keepdims=True)
    feats = feats * jax.lax.rsqrt(jnp.maximum(ss, 1e-24))    # == x / max(||x||, 1e-12)

    # ---- proj: LayerNorm -> (Dropout = id) -> Linear ----
    proj_lnw = nxt(); proj_lnb = nxt(); proj_w = nxt(); proj_b = nxt()
    pr = _layernorm(feats, proj_lnw, proj_lnb, TR_EPS)
    pr = jnp.dot(pr, proj_w, preferred_element_type=jnp.float32) + proj_b   # (BF, TR_DIM)

    # ---- temporal sequence: rows 0..BF-1 = frames (b-major), rows BF.. = cls/batch ----
    t_tok = nxt()
    xt_ref[0:BF, :] = pr
    xt_ref[BF:BF + B, :] = jnp.broadcast_to(t_tok, (B, TR_DIM))
    xt = xt_ref[...]                                        # (NT, TR_DIM)

    # ---- temporal transformer (no qkv bias) ----
    for _ in range(TR_LAYERS):
        ln1w = nxt(); ln1b = nxt(); wqkv = nxt(); wo = nxt(); bo = nxt()
        ln2w = nxt(); ln2b = nxt(); w1 = nxt(); b1 = nxt(); w2 = nxt(); b2 = nxt()
        xt = _block(xt, tr_bias, ln1w, ln1b, wqkv, None, wo, bo,
                    ln2w, ln2b, w1, b1, w2, b2, heads=TR_HEADS, eps=TR_EPS)

    # ---- final LN (rowwise, cls rows dropped) + head ----
    tr_nw = nxt(); tr_nb = nxt()
    frames = _layernorm(xt[0:BF, :], tr_nw, tr_nb, TR_EPS)
    head_w = nxt(); head_b = nxt()
    out_ref[...] = (jnp.dot(frames, head_w, preferred_element_type=jnp.float32)
                    + head_b).astype(out_ref.dtype)


# ----------------------------- model composition -----------------------------
def _flatten_inputs(params, patches, pos40, vit_bias, tr_bias):
    vit = params["vit"]
    flat = [patches, pos40, vit_bias, tr_bias,
            vit["patch_w"], vit["patch_b"], vit["cls_token"]]
    for blk in vit["blocks"]:
        flat += [blk["ln1_w"], blk["ln1_b"], blk["wqkv"], blk["bqkv"],
                 blk["wo"], blk["bo"], blk["ln2_w"], blk["ln2_b"],
                 blk["w1"], blk["b1"], blk["w2"], blk["b2"]]
    flat += [vit["norm_w"], vit["norm_b"],
             params["proj_ln_w"], params["proj_ln_b"], params["proj_w"], params["proj_b"],
             params["temporal_token"]]
    for blk in params["tr_blocks"]:
        flat += [blk["ln1_w"], blk["ln1_b"], blk["wqkv"],
                 blk["wo"], blk["bo"], blk["ln2_w"], blk["ln2_b"],
                 blk["w1"], blk["b1"], blk["w2"], blk["b2"]]
    flat += [params["tr_norm_w"], params["tr_norm_b"], params["head_w"], params["head_b"]]
    return flat


def mae_forward(params, x):
    # x: (B, F, C, H, W)
    assert x.shape == (B, F, C, H, W), x.shape
    # TODO(synk): real MAE loads pretrained ViT-B/16 weights from a checkpoint
    # (get_state_dict / load_from_pretrain / interpolate_pos_embed); here a small
    # synthetic ViT with the identical forward structure is used instead.

    # glue: unfold frames into patch rows, patch-major ordering (row = p*BF + f),
    # columns flattened in (c, ph, pw) order like torch Conv2d weights.
    patches = (x.reshape(BF, C, HP, PATCH, WP, PATCH)
                 .transpose(2, 4, 0, 1, 3, 5)
                 .reshape(NPATCH * BF, C * PATCH * PATCH))

    # glue: pre-tile pos-embed to the token-major flat layout (row = t*BF + f).
    pos40 = jnp.repeat(params["vit"]["pos_embed"], BF, axis=0)

    # glue: additive block-diagonal attention masks for the flattened batches.
    g_vit = jnp.tile(jnp.arange(BF, dtype=jnp.int32), NTOK_V)            # frame id per row
    vit_bias = jnp.where(g_vit[:, None] == g_vit[None, :], 0.0, NEG_INF).astype(jnp.float32)
    g_tr = jnp.concatenate([jnp.repeat(jnp.arange(B, dtype=jnp.int32), F),
                            jnp.arange(B, dtype=jnp.int32)])             # batch id per row
    tr_bias = jnp.where(g_tr[:, None] == g_tr[None, :], 0.0, NEG_INF).astype(jnp.float32)

    flat = _flatten_inputs(params, patches, pos40, vit_bias, tr_bias)
    assert len(flat) == NUM_INPUTS, len(flat)

    out = pl.pallas_call(
        functools.partial(_mae_kernel, num_inputs=NUM_INPUTS),
        out_shape=jax.ShapeDtypeStruct((BF, OUT_FEATURES), jnp.float32),
        in_specs=[VMEM] * NUM_INPUTS,
        out_specs=VMEM,
        scratch_shapes=[pltpu.VMEM((NV, DV), jnp.float32),
                        pltpu.VMEM((NT, TR_DIM), jnp.float32)],
    )(*flat)
    return out.reshape(B, F, OUT_FEATURES)


# ------------------------------ parameter init --------------------------------
def init_params(key):
    keys = jax.random.split(key, 256)
    kit = iter(keys)

    def w(shape, scale=0.02):
        return scale * jax.random.normal(next(kit), shape, dtype=jnp.float32)

    zeros = lambda s: jnp.zeros(s, jnp.float32)
    ones = lambda s: jnp.ones(s, jnp.float32)

    def block(dim, dff, qkv_bias):
        p = dict(ln1_w=ones((1, dim)), ln1_b=zeros((1, dim)),
                 wqkv=w((dim, 3 * dim)),
                 wo=w((dim, dim)), bo=zeros((1, dim)),
                 ln2_w=ones((1, dim)), ln2_b=zeros((1, dim)),
                 w1=w((dim, dff)), b1=zeros((1, dff)),
                 w2=w((dff, dim)), b2=zeros((1, dim)))
        if qkv_bias:
            p["bqkv"] = w((1, 3 * dim))
        return p

    vit = dict(
        patch_w=w((C * PATCH * PATCH, DV)),
        patch_b=zeros((1, DV)),
        cls_token=w((1, DV), 1.0),
        pos_embed=w((NTOK_V, DV)),
        blocks=[block(DV, VIT_MLP, qkv_bias=True) for _ in range(VIT_DEPTH)],
        norm_w=ones((1, DV)),
        norm_b=zeros((1, DV)),
    )
    return dict(
        vit=vit,
        proj_ln_w=ones((1, DV)), proj_ln_b=zeros((1, DV)),
        proj_w=w((DV, TR_DIM)), proj_b=zeros((1, TR_DIM)),
        temporal_token=w((1, TR_DIM), 1.0),
        tr_blocks=[block(TR_DIM, TR_FF, qkv_bias=False) for _ in range(TR_LAYERS)],
        tr_norm_w=ones((1, TR_DIM)), tr_norm_b=zeros((1, TR_DIM)),
        head_w=w((TR_DIM, OUT_FEATURES)), head_b=zeros((1, OUT_FEATURES)),
    )


# ----------------------------------- main -------------------------------------
if __name__ == "__main__":
    root = jax.random.PRNGKey(0)
    pkey, xkey = jax.random.split(root)
    params = init_params(pkey)
    x = jax.random.normal(xkey, (B, F, C, H, W), dtype=jnp.float32)

    out = jax.jit(mae_forward)(params, x)
    out = jax.block_until_ready(out)
    assert out.shape == (B, F, OUT_FEATURES), out.shape
    assert bool(jnp.all(jnp.isfinite(out)))
    print("KERNEL_OK")
</pallas_src>

<mosaic_0001>
module attributes {stable_mosaic.version = 11 : i64} {
  func.func @_mae_kernel(%arg0: memref<32x192xf32, #tpu.memory_space<vmem>>, %arg1: memref<40x32xf32, #tpu.memory_space<vmem>>, %arg2: memref<40x40xf32, #tpu.memory_space<vmem>>, %arg3: memref<10x10xf32, #tpu.memory_space<vmem>>, %arg4: memref<192x32xf32, #tpu.memory_space<vmem>>, %arg5: memref<1x32xf32, #tpu.memory_space<vmem>>, %arg6: memref<1x32xf32, #tpu.memory_space<vmem>>, %arg7: memref<1x32xf32, #tpu.memory_space<vmem>>, %arg8: memref<1x32xf32, #tpu.memory_space<vmem>>, %arg9: memref<32x96xf32, #tpu.memory_space<vmem>>, %arg10: memref<1x96xf32, #tpu.memory_space<vmem>>, %arg11: memref<32x32xf32, #tpu.memory_space<vmem>>, %arg12: memref<1x32xf32, #tpu.memory_space<vmem>>, %arg13: memref<1x32xf32, #tpu.memory_space<vmem>>, %arg14: memref<1x32xf32, #tpu.memory_space<vmem>>, %arg15: memref<32x128xf32, #tpu.memory_space<vmem>>, %arg16: memref<1x128xf32, #tpu.memory_space<vmem>>, %arg17: memref<128x32xf32, #tpu.memory_space<vmem>>, %arg18: memref<1x32xf32, #tpu.memory_space<vmem>>, %arg19: memref<1x32xf32, #tpu.memory_space<vmem>>, %arg20: memref<1x32xf32, #tpu.memory_space<vmem>>, %arg21: memref<32x96xf32, #tpu.memory_space<vmem>>, %arg22: memref<1x96xf32, #tpu.memory_space<vmem>>, %arg23: memref<32x32xf32, #tpu.memory_space<vmem>>, %arg24: memref<1x32xf32, #tpu.memory_space<vmem>>, %arg25: memref<1x32xf32, #tpu.memory_space<vmem>>, %arg26: memref<1x32xf32, #tpu.memory_space<vmem>>, %arg27: memref<32x128xf32, #tpu.memory_space<vmem>>, %arg28: memref<1x128xf32, #tpu.memory_space<vmem>>, %arg29: memref<128x32xf32, #tpu.memory_space<vmem>>, %arg30: memref<1x32xf32, #tpu.memory_space<vmem>>, %arg31: memref<1x32xf32, #tpu.memory_space<vmem>>, %arg32: memref<1x32xf32, #tpu.memory_space<vmem>>, %arg33: memref<1x32xf32, #tpu.memory_space<vmem>>, %arg34: memref<1x32xf32, #tpu.memory_space<vmem>>, %arg35: memref<32x32xf32, #tpu.memory_space<vmem>>, %arg36: memref<1x32xf32, #tpu.memory_space<vmem>>, %arg37: memref<1x32xf32, #tpu.memory_space<vmem>>, %arg38: memref<1x32xf32, #tpu.memory_space<vmem>>, %arg39: memref<1x32xf32, #tpu.memory_space<vmem>>, %arg40: memref<32x96xf32, #tpu.memory_space<vmem>>, %arg41: memref<32x32xf32, #tpu.memory_space<vmem>>, %arg42: memref<1x32xf32, #tpu.memory_space<vmem>>, %arg43: memref<1x32xf32, #tpu.memory_space<vmem>>, %arg44: memref<1x32xf32, #tpu.memory_space<vmem>>, %arg45: memref<32x64xf32, #tpu.memory_space<vmem>>, %arg46: memref<1x64xf32, #tpu.memory_space<vmem>>, %arg47: memref<64x32xf32, #tpu.memory_space<vmem>>, %arg48: memref<1x32xf32, #tpu.memory_space<vmem>>, %arg49: memref<1x32xf32, #tpu.memory_space<vmem>>, %arg50: memref<1x32xf32, #tpu.memory_space<vmem>>, %arg51: memref<32x96xf32, #tpu.memory_space<vmem>>, %arg52: memref<32x32xf32, #tpu.memory_space<vmem>>, %arg53: memref<1x32xf32, #tpu.memory_space<vmem>>, %arg54: memref<1x32xf32, #tpu.memory_space<vmem>>, %arg55: memref<1x32xf32, #tpu.memory_space<vmem>>, %arg56: memref<32x64xf32, #tpu.memory_space<vmem>>, %arg57: memref<1x64xf32, #tpu.memory_space<vmem>>, %arg58: memref<64x32xf32, #tpu.memory_space<vmem>>, %arg59: memref<1x32xf32, #tpu.memory_space<vmem>>, %arg60: memref<1x32xf32, #tpu.memory_space<vmem>>, %arg61: memref<1x32xf32, #tpu.memory_space<vmem>>, %arg62: memref<32x16xf32, #tpu.memory_space<vmem>>, %arg63: memref<1x16xf32, #tpu.memory_space<vmem>>, %arg64: memref<8x16xf32, #tpu.memory_space<vmem>>, %arg65: memref<40x32xf32, #tpu.memory_space<vmem>>, %arg66: memref<10x32xf32, #tpu.memory_space<vmem>>) attributes {dimension_semantics = [], scalar_prefetch = 0 : i64, scratch_operands = 2 : i64, tpu.core_type = #tpu.core_type<tc>} {
    %c0 = arith.constant 0 : index
    %c0_0 = arith.constant 0 : index
    %0 = vector.load %arg0[%c0, %c0_0] : memref<32x192xf32, #tpu.memory_space<vmem>>, vector<32x192xf32>
    %c0_1 = arith.constant 0 : index
    %c0_2 = arith.constant 0 : index
    %1 = vector.load %arg1[%c0_1, %c0_2] : memref<40x32xf32, #tpu.memory_space<vmem>>, vector<40x32xf32>
    %c0_3 = arith.constant 0 : index
    %c0_4 = arith.constant 0 : index
    %2 = vector.load %arg2[%c0_3, %c0_4] : memref<40x40xf32, #tpu.memory_space<vmem>>, vector<40x40xf32>
    %c0_5 = arith.constant 0 : index
    %c0_6 = arith.constant 0 : index
    %3 = vector.load %arg3[%c0_5, %c0_6] : memref<10x10xf32, #tpu.memory_space<vmem>>, vector<10x10xf32>
    %c0_7 = arith.constant 0 : index
    %c0_8 = arith.constant 0 : index
    %4 = vector.load %arg4[%c0_7, %c0_8] : memref<192x32xf32, #tpu.memory_space<vmem>>, vector<192x32xf32>
    %c0_9 = arith.constant 0 : index
    %c0_10 = arith.constant 0 : index
    %5 = vector.load %arg5[%c0_9, %c0_10] : memref<1x32xf32, #tpu.memory_space<vmem>>, vector<1x32xf32>
    %c0_11 = arith.constant 0 : index
    %c0_12 = arith.constant 0 : index
    %6 = vector.load %arg6[%c0_11, %c0_12] : memref<1x32xf32, #tpu.memory_space<vmem>>, vector<1x32xf32>
    %cst = arith.constant dense<0.000000e+00> : vector<32x32xf32>
    %7 = tpu.matmul %0, %4, %cst {dimension_numbers = #tpu.dot_dimension_numbers<[1], [0], [0], [1], [0, 0, 1, 1], [], []>} : vector<32x192xf32>, vector<192x32xf32>, vector<32x32xf32> -> vector<32x32xf32>
    %8 = vector.broadcast %5 : vector<1x32xf32> to vector<32x32xf32>
    %9 = arith.addf %7, %8 : vector<32x32xf32>
    %10 = vector.shape_cast %6 : vector<1x32xf32> to vector<1x32xf32>
    %11 = vector.broadcast %10 : vector<1x32xf32> to vector<8x32xf32>
    %c0_13 = arith.constant 0 : index
    %c0_14 = arith.constant 0 : index
    %12 = vector.load %arg65[%c0_13, %c0_14] : memref<40x32xf32, #tpu.memory_space<vmem>>, vector<8x32xf32>
    tpu.vector_store %arg65[%c0_13, %c0_14], %11 {strides = array<i32>} : memref<40x32xf32, #tpu.memory_space<vmem>>, vector<8x32xf32>,
    %13 = vector.extract_strided_slice %9 {offsets = [0, 0], sizes = [8, 32], strides = [1, 1]} : vector<32x32xf32> to vector<8x32xf32>
    %c8 = arith.constant 8 : index
    %c0_15 = arith.constant 0 : index
    %14 = vector.load %arg65[%c8, %c0_15] : memref<40x32xf32, #tpu.memory_space<vmem>>, vector<8x32xf32>
    tpu.vector_store %arg65[%c8, %c0_15], %13 {strides = array<i32>} : memref<40x32xf32, #tpu.memory_space<vmem>>, vector<8x32xf32>,
    %15 = vector.extract_strided_slice %9 {offsets = [8, 0], sizes = [8, 32], strides = [1, 1]} : vector<32x32xf32> to vector<8x32xf32>
    %c16 = arith.constant 16 : index
    %c0_16 = arith.constant 0 : index
    %16 = vector.load %arg65[%c16, %c0_16] : memref<40x32xf32, #tpu.memory_space<vmem>>, vector<8x32xf32>
    tpu.vector_store %arg65[%c16, %c0_16], %15 {strides = array<i32>} : memref<40x32xf32, #tpu.memory_space<vmem>>, vector<8x32xf32>,
    %17 = vector.extract_strided_slice %9 {offsets = [16, 0], sizes = [8, 32], strides = [1, 1]} : vector<32x32xf32> to vector<8x32xf32>
    %c24 = arith.constant 24 : index
    %c0_17 = arith.constant 0 : index
    %18 = vector.load %arg65[%c24, %c0_17] : memref<40x32xf32, #tpu.memory_space<vmem>>, vector<8x32xf32>
    tpu.vector_store %arg65[%c24, %c0_17], %17 {strides = array<i32>} : memref<40x32xf32, #tpu.memory_space<vmem>>, vector<8x32xf32>,
    %19 = vector.extract_strided_slice %9 {offsets = [24, 0], sizes = [8, 32], strides = [1, 1]} : vector<32x32xf32> to vector<8x32xf32>
    %c32 = arith.constant 32 : index
    %c0_18 = arith.constant 0 : index
    %20 = vector.load %arg65[%c32, %c0_18] : memref<40x32xf32, #tpu.memory_space<vmem>>, vector<8x32xf32>
    tpu.vector_store %arg65[%c32, %c0_18], %19 {strides = array<i32>} : memref<40x32xf32, #tpu.memory_space<vmem>>, vector<8x32xf32>,
    %c0_19 = arith.constant 0 : index
    %c0_20 = arith.constant 0 : index
    %21 = vector.load %arg65[%c0_19, %c0_20] : memref<40x32xf32, #tpu.memory_space<vmem>>, vector<40x32xf32>
    %22 = arith.addf %21, %1 : vector<40x32xf32>
    %c0_21 = arith.constant 0 : index
    %c0_22 = arith.constant 0 : index
    %23 = vector.load %arg7[%c0_21, %c0_22] : memref<1x32xf32, #tpu.memory_space<vmem>>, vector<1x32xf32>
    %c0_23 = arith.constant 0 : index
    %c0_24 = arith.constant 0 : index
    %24 = vector.load %arg8[%c0_23, %c0_24] : memref<1x32xf32, #tpu.memory_space<vmem>>, vector<1x32xf32>
    %c0_25 = arith.constant 0 : index
    %c0_26 = arith.constant 0 : index
    %25 = vector.load %arg9[%c0_25, %c0_26] : memref<32x96xf32, #tpu.memory_space<vmem>>, vector<32x96xf32>
    %c0_27 = arith.constant 0 : index
    %c0_28 = arith.constant 0 : index
    %26 = vector.load %arg10[%c0_27, %c0_28] : memref<1x96xf32, #tpu.memory_space<vmem>>, vector<1x96xf32>
    %c0_29 = arith.constant 0 : index
    %c0_30 = arith.constant 0 : index
    %27 = vector.load %arg11[%c0_29, %c0_30] : memref<32x32xf32, #tpu.memory_space<vmem>>, vector<32x32xf32>
    %c0_31 = arith.constant 0 : index
    %c0_32 = arith.constant 0 : index
    %28 = vector.load %arg12[%c0_31, %c0_32] : memref<1x32xf32, #tpu.memory_space<vmem>>, vector<1x32xf32>
    %c0_33 = arith.constant 0 : index
    %c0_34 = arith.constant 0 : index
    %29 = vector.load %arg13[%c0_33, %c0_34] : memref<1x32xf32, #tpu.memory_space<vmem>>, vector<1x32xf32>
    %c0_35 = arith.constant 0 : index
    %c0_36 = arith.constant 0 : index
    %30 = vector.load %arg14[%c0_35, %c0_36] : memref<1x32xf32, #tpu.memory_space<vmem>>, vector<1x32xf32>
    %c0_37 = arith.constant 0 : index
    %c0_38 = arith.constant 0 : index
    %31 = vector.load %arg15[%c0_37, %c0_38] : memref<32x128xf32, #tpu.memory_space<vmem>>, vector<32x128xf32>
    %c0_39 = arith.constant 0 : index
    %c0_40 = arith.constant 0 : index
    %32 = vector.load %arg16[%c0_39, %c0_40] : memref<1x128xf32, #tpu.memory_space<vmem>>, vector<1x128xf32>
    %c0_41 = arith.constant 0 : index
    %c0_42 = arith.constant 0 : index
    %33 = vector.load %arg17[%c0_41, %c0_42] : memref<128x32xf32, #tpu.memory_space<vmem>>, vector<128x32xf32>
    %c0_43 = arith.constant 0 : index
    %c0_44 = arith.constant 0 : index
    %34 = vector.load %arg18[%c0_43, %c0_44] : memref<1x32xf32, #tpu.memory_space<vmem>>, vector<1x32xf32>
    %cst_45 = arith.constant dense<0.000000e+00> : vector<40xf32>
    %35 = vector.multi_reduction <add>, %22, %cst_45 [1] : vector<40x32xf32> to vector<40xf32>
    %36 = vector.shape_cast %35 : vector<40xf32> to vector<40x1xf32>
    %cst_46 = arith.constant 3.200000e+01 : f32
    %37 = vector.broadcast %cst_46 : f32 to vector<40x1xf32>
    %38 = arith.divf %36, %37 : vector<40x1xf32>
    %39 = vector.broadcast %38 : vector<40x1xf32> to vector<40x32xf32>
    %40 = arith.subf %22, %39 : vector<40x32xf32>
    %41 = arith.mulf %40, %40 : vector<40x32xf32>
    %cst_47 = arith.constant dense<0.000000e+00> : vector<40xf32>
    %42 = vector.multi_reduction <add>, %41, %cst_47 [1] : vector<40x32xf32> to vector<40xf32>
    %43 = vector.shape_cast %42 : vector<40xf32> to vector<40x1xf32>
    %cst_48 = arith.constant 3.200000e+01 : f32
    %44 = vector.broadcast %cst_48 : f32 to vector<40x1xf32>
    %45 = arith.divf %43, %44 : vector<40x1xf32>
    %cst_49 = arith.constant 9.99999997E-7 : f32
    %46 = vector.broadcast %cst_49 : f32 to vector<40x1xf32>
    %47 = arith.addf %45, %46 : vector<40x1xf32>
    %48 = math.rsqrt %47 : vector<40x1xf32>
    %49 = vector.broadcast %48 : vector<40x1xf32> to vector<40x32xf32>
    %50 = arith.mulf %40, %49 : vector<40x32xf32>
    %51 = vector.broadcast %23 : vector<1x32xf32> to vector<40x32xf32>
    %52 = arith.mulf %50, %51 : vector<40x32xf32>
    %53 = vector.broadcast %24 : vector<1x32xf32> to vector<40x32xf32>
    %54 = arith.addf %52, %53 : vector<40x32xf32>
    %cst_50 = arith.constant dense<0.000000e+00> : vector<40x96xf32>
    %55 = tpu.matmul %54, %25, %cst_50 {dimension_numbers = #tpu.dot_dimension_numbers<[1], [0], [0], [1], [0, 0, 1, 1], [], []>} : vector<40x32xf32>, vector<32x96xf32>, vector<40x96xf32> -> vector<40x96xf32>
    %56 = vector.broadcast %26 : vector<1x96xf32> to vector<40x96xf32>
    %57 = arith.addf %55, %56 : vector<40x96xf32>
    %58 = vector.extract_strided_slice %57 {offsets = [0, 0], sizes = [40, 8], strides = [1, 1]} : vector<40x96xf32> to vector<40x8xf32>
    %59 = vector.extract_strided_slice %57 {offsets = [0, 32], sizes = [40, 8], strides = [1, 1]} : vector<40x96xf32> to vector<40x8xf32>
    %60 = vector.extract_strided_slice %57 {offsets = [0, 64], sizes = [40, 8], strides = [1, 1]} : vector<40x96xf32> to vector<40x8xf32>
    %cst_51 = arith.constant dense<0.000000e+00> : vector<40x40xf32>
    %61 = tpu.matmul %58, %59, %cst_51 {dimension_numbers = #tpu.dot_dimension_numbers<[1], [1], [0], [0], [0, 0, 1, 0], [], []>} : vector<40x8xf32>, vector<40x8xf32>, vector<40x40xf32> -> vector<40x40xf32>
    %cst_52 = arith.constant 0.353553385 : f32
    %62 = vector.broadcast %cst_52 : f32 to vector<40x40xf32>
    %63 = arith.mulf %61, %62 : vector<40x40xf32>
    %64 = arith.addf %63, %2 : vector<40x40xf32>
    %cst_53 = arith.constant dense<0xFF800000> : vector<40xf32>
    %65 = vector.multi_reduction <maximumf>, %64, %cst_53 [1] : vector<40x40xf32> to vector<40xf32>
    %66 = vector.shape_cast %65 : vector<40xf32> to vector<40x1xf32>
    %67 = vector.broadcast %66 : vector<40x1xf32> to vector<40x40xf32>
    %68 = arith.subf %64, %67 : vector<40x40xf32>
    %69 = math.exp %68 : vector<40x40xf32>
    %cst_54 = arith.constant dense<0.000000e+00> : vector<40xf32>
    %70 = vector.multi_reduction <add>, %69, %cst_54 [1] : vector<40x40xf32> to vector<40xf32>
    %71 = vector.shape_cast %70 : vector<40xf32> to vector<40x1xf32>
    %72 = tpu.reciprocal %71 {approx = true} : vector<40x1xf32> -> vector<40x1xf32>
    %73 = vector.broadcast %72 : vector<40x1xf32> to vector<40x40xf32>
    %74 = arith.mulf %69, %73 : vector<40x40xf32>
    %cst_55 = arith.constant dense<0.000000e+00> : vector<40x8xf32>
    %75 = tpu.matmul %74, %60, %cst_55 {dimension_numbers = #tpu.dot_dimension_numbers<[1], [0], [0], [1], [0, 0, 1, 1], [], []>} : vector<40x40xf32>, vector<40x8xf32>, vector<40x8xf32> -> vector<40x8xf32>
    %76 = vector.extract_strided_slice %27 {offsets = [0, 0], sizes = [8, 32], strides = [1, 1]} : vector<32x32xf32> to vector<8x32xf32>
    %cst_56 = arith.constant dense<0.000000e+00> : vector<40x32xf32>
    %77 = tpu.matmul %75, %76, %cst_56 {dimension_numbers = #tpu.dot_dimension_numbers<[1], [0], [0], [1], [0, 0, 1, 1], [], []>} : vector<40x8xf32>, vector<8x32xf32>, vector<40x32xf32> -> vector<40x32xf32>
    %78 = vector.extract_strided_slice %57 {offsets = [0, 8], sizes = [40, 8], strides = [1, 1]} : vector<40x96xf32> to vector<40x8xf32>
    %79 = vector.extract_strided_slice %57 {offsets = [0, 40], sizes = [40, 8], strides = [1, 1]} : vector<40x96xf32> to vector<40x8xf32>
    %80 = vector.extract_strided_slice %57 {offsets = [0, 72], sizes = [40, 8], strides = [1, 1]} : vector<40x96xf32> to vector<40x8xf32>
    %cst_57 = arith.constant dense<0.000000e+00> : vector<40x40xf32>
    %81 = tpu.matmul %78, %79, %cst_57 {dimension_numbers = #tpu.dot_dimension_numbers<[1], [1], [0], [0], [0, 0, 1, 0], [], []>} : vector<40x8xf32>, vector<40x8xf32>, vector<40x40xf32> -> vector<40x40xf32>
    %cst_58 = arith.constant 0.353553385 : f32
    %82 = vector.broadcast %cst_58 : f32 to vector<40x40xf32>
    %83 = arith.mulf %81, %82 : vector<40x40xf32>
    %84 = arith.addf %83, %2 : vector<40x40xf32>
    %cst_59 = arith.constant dense<0xFF800000> : vector<40xf32>
    %85 = vector.multi_reduction <maximumf>, %84, %cst_59 [1] : vector<40x40xf32> to vector<40xf32>
    %86 = vector.shape_cast %85 : vector<40xf32> to vector<40x1xf32>
    %87 = vector.broadcast %86 : vector<40x1xf32> to vector<40x40xf32>
    %88 = arith.subf %84, %87 : vector<40x40xf32>
    %89 = math.exp %88 : vector<40x40xf32>
    %cst_60 = arith.constant dense<0.000000e+00> : vector<40xf32>
    %90 = vector.multi_reduction <add>, %89, %cst_60 [1] : vector<40x40xf32> to vector<40xf32>
    %91 = vector.shape_cast %90 : vector<40xf32> to vector<40x1xf32>
    %92 = tpu.reciprocal %91 {approx = true} : vector<40x1xf32> -> vector<40x1xf32>
    %93 = vector.broadcast %92 : vector<40x1xf32> to vector<40x40xf32>
    %94 = arith.mulf %89, %93 : vector<40x40xf32>
    %cst_61 = arith.constant dense<0.000000e+00> : vector<40x8xf32>
    %95 = tpu.matmul %94, %80, %cst_61 {dimension_numbers = #tpu.dot_dimension_numbers<[1], [0], [0], [1], [0, 0, 1, 1], [], []>} : vector<40x40xf32>, vector<40x8xf32>, vector<40x8xf32> -> vector<40x8xf32>
    %96 = vector.extract_strided_slice %27 {offsets = [8, 0], sizes = [8, 32], strides = [1, 1]} : vector<32x32xf32> to vector<8x32xf32>
    %cst_62 = arith.constant dense<0.000000e+00> : vector<40x32xf32>
    %97 = tpu.matmul %95, %96, %cst_62 {dimension_numbers = #tpu.dot_dimension_numbers<[1], [0], [0], [1], [0, 0, 1, 1], [], []>} : vector<40x8xf32>, vector<8x32xf32>, vector<40x32xf32> -> vector<40x32xf32>
    %98 = arith.addf %77, %97 : vector<40x32xf32>
    %99 = vector.extract_strided_slice %57 {offsets = [0, 16], sizes = [40, 8], strides = [1, 1]} : vector<40x96xf32> to vector<40x8xf32>
    %100 = vector.extract_strided_slice %57 {offsets = [0, 48], sizes = [40, 8], strides = [1, 1]} : vector<40x96xf32> to vector<40x8xf32>
    %101 = vector.extract_strided_slice %57 {offsets = [0, 80], sizes = [40, 8], strides = [1, 1]} : vector<40x96xf32> to vector<40x8xf32>
    %cst_63 = arith.constant dense<0.000000e+00> : vector<40x40xf32>
    %102 = tpu.matmul %99, %100, %cst_63 {dimension_numbers = #tpu.dot_dimension_numbers<[1], [1], [0], [0], [0, 0, 1, 0], [], []>} : vector<40x8xf32>, vector<40x8xf32>, vector<40x40xf32> -> vector<40x40xf32>
    %cst_64 = arith.constant 0.353553385 : f32
    %103 = vector.broadcast %cst_64 : f32 to vector<40x40xf32>
    %104 = arith.mulf %102, %103 : vector<40x40xf32>
    %105 = arith.addf %104, %2 : vector<40x40xf32>
    %cst_65 = arith.constant dense<0xFF800000> : vector<40xf32>
    %106 = vector.multi_reduction <maximumf>, %105, %cst_65 [1] : vector<40x40xf32> to vector<40xf32>
    %107 = vector.shape_cast %106 : vector<40xf32> to vector<40x1xf32>
    %108 = vector.broadcast %107 : vector<40x1xf32> to vector<40x40xf32>
    %109 = arith.subf %105, %108 : vector<40x40xf32>
    %110 = math.exp %109 : vector<40x40xf32>
    %cst_66 = arith.constant dense<0.000000e+00> : vector<40xf32>
    %111 = vector.multi_reduction <add>, %110, %cst_66 [1] : vector<40x40xf32> to vector<40xf32>
    %112 = vector.shape_cast %111 : vector<40xf32> to vector<40x1xf32>
    %113 = tpu.reciprocal %112 {approx = true} : vector<40x1xf32> -> vector<40x1xf32>
    %114 = vector.broadcast %113 : vector<40x1xf32> to vector<40x40xf32>
    %115 = arith.mulf %110, %114 : vector<40x40xf32>
    %cst_67 = arith.constant dense<0.000000e+00> : vector<40x8xf32>
    %116 = tpu.matmul %115, %101, %cst_67 {dimension_numbers = #tpu.dot_dimension_numbers<[1], [0], [0], [1], [0, 0, 1, 1], [], []>} : vector<40x40xf32>, vector<40x8xf32>, vector<40x8xf32> -> vector<40x8xf32>
    %117 = vector.extract_strided_slice %27 {offsets = [16, 0], sizes = [8, 32], strides = [1, 1]} : vector<32x32xf32> to vector<8x32xf32>
    %cst_68 = arith.constant dense<0.000000e+00> : vector<40x32xf32>
    %118 = tpu.matmul %116, %117, %cst_68 {dimension_numbers = #tpu.dot_dimension_numbers<[1], [0], [0], [1], [0, 0, 1, 1], [], []>} : vector<40x8xf32>, vector<8x32xf32>, vector<40x32xf32> -> vector<40x32xf32>
    %119 = arith.addf %98, %118 : vector<40x32xf32>
    %120 = vector.extract_strided_slice %57 {offsets = [0, 24], sizes = [40, 8], strides = [1, 1]} : vector<40x96xf32> to vector<40x8xf32>
    %121 = vector.extract_strided_slice %57 {offsets = [0, 56], sizes = [40, 8], strides = [1, 1]} : vector<40x96xf32> to vector<40x8xf32>
    %122 = vector.extract_strided_slice %57 {offsets = [0, 88], sizes = [40, 8], strides = [1, 1]} : vector<40x96xf32> to vector<40x8xf32>
    %cst_69 = arith.constant dense<0.000000e+00> : vector<40x40xf32>
    %123 = tpu.matmul %120, %121, %cst_69 {dimension_numbers = #tpu.dot_dimension_numbers<[1], [1], [0], [0], [0, 0, 1, 0], [], []>} : vector<40x8xf32>, vector<40x8xf32>, vector<40x40xf32> -> vector<40x40xf32>
    %cst_70 = arith.constant 0.353553385 : f32
    %124 = vector.broadcast %cst_70 : f32 to vector<40x40xf32>
    %125 = arith.mulf %123, %124 : vector<40x40xf32>
    %126 = arith.addf %125, %2 : vector<40x40xf32>
    %cst_71 = arith.constant dense<0xFF800000> : vector<40xf32>
    %127 = vector.multi_reduction <maximumf>, %126, %cst_71 [1] : vector<40x40xf32> to vector<40xf32>
    %128 = vector.shape_cast %127 : vector<40xf32> to vector<40x1xf32>
    %129 = vector.broadcast %128 : vector<40x1xf32> to vector<40x40xf32>
    %130 = arith.subf %126, %129 : vector<40x40xf32>
    %131 = math.exp %130 : vector<40x40xf32>
    %cst_72 = arith.constant dense<0.000000e+00> : vector<40xf32>
    %132 = vector.multi_reduction <add>, %131, %cst_72 [1] : vector<40x40xf32> to vector<40xf32>
    %133 = vector.shape_cast %132 : vector<40xf32> to vector<40x1xf32>
    %134 = tpu.reciprocal %133 {approx = true} : vector<40x1xf32> -> vector<40x1xf32>
    %135 = vector.broadcast %134 : vector<40x1xf32> to vector<40x40xf32>
    %136 = arith.mulf %131, %135 : vector<40x40xf32>
    %cst_73 = arith.constant dense<0.000000e+00> : vector<40x8xf32>
    %137 = tpu.matmul %136, %122, %cst_73 {dimension_numbers = #tpu.dot_dimension_numbers<[1], [0], [0], [1], [0, 0, 1, 1], [], []>} : vector<40x40xf32>, vector<40x8xf32>, vector<40x8xf32> -> vector<40x8xf32>
    %138 = vector.extract_strided_slice %27 {offsets = [24, 0], sizes = [8, 32], strides = [1, 1]} : vector<32x32xf32> to vector<8x32xf32>
    %cst_74 = arith.constant dense<0.000000e+00> : vector<40x32xf32>
    %139 = tpu.matmul %137, %138, %cst_74 {dimension_numbers = #tpu.dot_dimension_numbers<[1], [0], [0], [1], [0, 0, 1, 1], [], []>} : vector<40x8xf32>, vector<8x32xf32>, vector<40x32xf32> -> vector<40x32xf32>
    %140 = arith.addf %119, %139 : vector<40x32xf32>
    %141 = arith.addf %22, %140 : vector<40x32xf32>
    %142 = vector.broadcast %28 : vector<1x32xf32> to vector<40x32xf32>
    %143 = arith.addf %141, %142 : vector<40x32xf32>
    %cst_75 = arith.constant dense<0.000000e+00> : vector<40xf32>
    %144 = vector.multi_reduction <add>, %143, %cst_75 [1] : vector<40x32xf32> to vector<40xf32>
    %145 = vector.shape_cast %144 : vector<40xf32> to vector<40x1xf32>
    %cst_76 = arith.constant 3.200000e+01 : f32
    %146 = vector.broadcast %cst_76 : f32 to vector<40x1xf32>
    %147 = arith.divf %145, %146 : vector<40x1xf32>
    %148 = vector.broadcast %147 : vector<40x1xf32> to vector<40x32xf32>
    %149 = arith.subf %143, %148 : vector<40x32xf32>
    %150 = arith.mulf %149, %149 : vector<40x32xf32>
    %cst_77 = arith.constant dense<0.000000e+00> : vector<40xf32>
    %151 = vector.multi_reduction <add>, %150, %cst_77 [1] : vector<40x32xf32> to vector<40xf32>
    %152 = vector.shape_cast %151 : vector<40xf32> to vector<40x1xf32>
    %cst_78 = arith.constant 3.200000e+01 : f32
    %153 = vector.broadcast %cst_78 : f32 to vector<40x1xf32>
    %154 = arith.divf %152, %153 : vector<40x1xf32>
    %cst_79 = arith.constant 9.99999997E-7 : f32
    %155 = vector.broadcast %cst_79 : f32 to vector<40x1xf32>
    %156 = arith.addf %154, %155 : vector<40x1xf32>
    %157 = math.rsqrt %156 : vector<40x1xf32>
    %158 = vector.broadcast %157 : vector<40x1xf32> to vector<40x32xf32>
    %159 = arith.mulf %149, %158 : vector<40x32xf32>
    %160 = vector.broadcast %29 : vector<1x32xf32> to vector<40x32xf32>
    %161 = arith.mulf %159, %160 : vector<40x32xf32>
    %162 = vector.broadcast %30 : vector<1x32xf32> to vector<40x32xf32>
    %163 = arith.addf %161, %162 : vector<40x32xf32>
    %cst_80 = arith.constant dense<0.000000e+00> : vector<40x128xf32>
    %164 = tpu.matmul %163, %31, %cst_80 {dimension_numbers = #tpu.dot_dimension_numbers<[1], [0], [0], [1], [0, 0, 1, 1], [], []>} : vector<40x32xf32>, vector<32x128xf32>, vector<40x128xf32> -> vector<40x128xf32>
    %165 = vector.broadcast %32 : vector<1x128xf32> to vector<40x128xf32>
    %166 = arith.addf %164, %165 : vector<40x128xf32>
    %cst_81 = arith.constant 5.000000e-01 : f32
    %167 = vector.broadcast %cst_81 : f32 to vector<40x128xf32>
    %168 = arith.mulf %167, %166 : vector<40x128xf32>
    %cst_82 = arith.constant 0.707106769 : f32
    %169 = vector.broadcast %cst_82 : f32 to vector<40x128xf32>
    %170 = arith.mulf %166, %169 : vector<40x128xf32>
    %cst_83 = arith.constant 0.000000e+00 : f32
    %171 = vector.broadcast %cst_83 : f32 to vector<40x128xf32>
    %172 = arith.cmpf oge, %170, %171 : vector<40x128xf32>
    %cst_84 = arith.constant 1.000000e+00 : f32
    %cst_85 = arith.constant -1.000000e+00 : f32
    %173 = vector.broadcast %cst_84 : f32 to vector<40x128xf32>
    %174 = vector.broadcast %cst_85 : f32 to vector<40x128xf32>
    %175 = arith.select %172, %173, %174 : vector<40x128xi1>, vector<40x128xf32>
    %176 = math.absf %170 : vector<40x128xf32>
    %cst_86 = arith.constant 0.327591091 : f32
    %177 = vector.broadcast %cst_86 : f32 to vector<40x128xf32>
    %178 = arith.mulf %177, %176 : vector<40x128xf32>
    %cst_87 = arith.constant 1.000000e+00 : f32
    %179 = vector.broadcast %cst_87 : f32 to vector<40x128xf32>
    %180 = arith.addf %179, %178 : vector<40x128xf32>
    %cst_88 = arith.constant 1.000000e+00 : f32
    %181 = vector.broadcast %cst_88 : f32 to vector<40x128xf32>
    %182 = arith.divf %181, %180 : vector<40x128xf32>
    %cst_89 = arith.constant 1.06140542 : f32
    %183 = vector.broadcast %cst_89 : f32 to vector<40x128xf32>
    %184 = arith.mulf %183, %182 : vector<40x128xf32>
    %cst_90 = arith.constant -1.45315206 : f32
    %185 = vector.broadcast %cst_90 : f32 to vector<40x128xf32>
    %186 = arith.addf %184, %185 : vector<40x128xf32>
    %187 = arith.mulf %186, %182 : vector<40x128xf32>
    %cst_91 = arith.constant 1.42141378 : f32
    %188 = vector.broadcast %cst_91 : f32 to vector<40x128xf32>
    %189 = arith.addf %187, %188 : vector<40x128xf32>
    %190 = arith.mulf %189, %182 : vector<40x128xf32>
    %cst_92 = arith.constant -0.284496725 : f32
    %191 = vector.broadcast %cst_92 : f32 to vector<40x128xf32>
    %192 = arith.addf %190, %191 : vector<40x128xf32>
    %193 = arith.mulf %192, %182 : vector<40x128xf32>
    %cst_93 = arith.constant 0.254829586 : f32
    %194 = vector.broadcast %cst_93 : f32 to vector<40x128xf32>
    %195 = arith.addf %193, %194 : vector<40x128xf32>
    %196 = arith.mulf %195, %182 : vector<40x128xf32>
    %cst_94 = arith.constant 0.000000e+00 : f32
    %197 = vector.broadcast %cst_94 : f32 to vector<40x128xf32>
    %198 = arith.subf %197, %176 : vector<40x128xf32>
    %199 = arith.mulf %198, %176 : vector<40x128xf32>
    %200 = math.exp %199 : vector<40x128xf32>
    %201 = arith.mulf %196, %200 : vector<40x128xf32>
    %cst_95 = arith.constant 1.000000e+00 : f32
    %202 = vector.broadcast %cst_95 : f32 to vector<40x128xf32>
    %203 = arith.subf %202, %201 : vector<40x128xf32>
    %204 = arith.mulf %175, %203 : vector<40x128xf32>
    %cst_96 = arith.constant 1.000000e+00 : f32
    %205 = vector.broadcast %cst_96 : f32 to vector<40x128xf32>
    %206 = arith.addf %205, %204 : vector<40x128xf32>
    %207 = arith.mulf %168, %206 : vector<40x128xf32>
    %cst_97 = arith.constant dense<0.000000e+00> : vector<40x32xf32>
    %208 = tpu.matmul %207, %33, %cst_97 {dimension_numbers = #tpu.dot_dimension_numbers<[1], [0], [0], [1], [0, 0, 1, 1], [], []>} : vector<40x128xf32>, vector<128x32xf32>, vector<40x32xf32> -> vector<40x32xf32>
    %209 = arith.addf %143, %208 : vector<40x32xf32>
    %210 = vector.broadcast %34 : vector<1x32xf32> to vector<40x32xf32>
    %211 = arith.addf %209, %210 : vector<40x32xf32>
    %c0_98 = arith.constant 0 : index
    %c0_99 = arith.constant 0 : index
    %212 = vector.load %arg19[%c0_98, %c0_99] : memref<1x32xf32, #tpu.memory_space<vmem>>, vector<1x32xf32>
    %c0_100 = arith.constant 0 : index
    %c0_101 = arith.constant 0 : index
    %213 = vector.load %arg20[%c0_100, %c0_101] : memref<1x32xf32, #tpu.memory_space<vmem>>, vector<1x32xf32>
    %c0_102 = arith.constant 0 : index
    %c0_103 = arith.constant 0 : index
    %214 = vector.load %arg21[%c0_102, %c0_103] : memref<32x96xf32, #tpu.memory_space<vmem>>, vector<32x96xf32>
    %c0_104 = arith.constant 0 : index
    %c0_105 = arith.constant 0 : index
    %215 = vector.load %arg22[%c0_104, %c0_105] : memref<1x96xf32, #tpu.memory_space<vmem>>, vector<1x96xf32>
    %c0_106 = arith.constant 0 : index
    %c0_107 = arith.constant 0 : index
    %216 = vector.load %arg23[%c0_106, %c0_107] : memref<32x32xf32, #tpu.memory_space<vmem>>, vector<32x32xf32>
    %c0_108 = arith.constant 0 : index
    %c0_109 = arith.constant 0 : index
    %217 = vector.load %arg24[%c0_108, %c0_109] : memref<1x32xf32, #tpu.memory_space<vmem>>, vector<1x32xf32>
    %c0_110 = arith.constant 0 : index
    %c0_111 = arith.constant 0 : index
    %218 = vector.load %arg25[%c0_110, %c0_111] : memref<1x32xf32, #tpu.memory_space<vmem>>, vector<1x32xf32>
    %c0_112 = arith.constant 0 : index
    %c0_113 = arith.constant 0 : index
    %219 = vector.load %arg26[%c0_112, %c0_113] : memref<1x32xf32, #tpu.memory_space<vmem>>, vector<1x32xf32>
    %c0_114 = arith.constant 0 : index
    %c0_115 = arith.constant 0 : index
    %220 = vector.load %arg27[%c0_114, %c0_115] : memref<32x128xf32, #tpu.memory_space<vmem>>, vector<32x128xf32>
    %c0_116 = arith.constant 0 : index
    %c0_117 = arith.constant 0 : index
    %221 = vector.load %arg28[%c0_116, %c0_117] : memref<1x128xf32, #tpu.memory_space<vmem>>, vector<1x128xf32>
    %c0_118 = arith.constant 0 : index
    %c0_119 = arith.constant 0 : index
    %222 = vector.load %arg29[%c0_118, %c0_119] : memref<128x32xf32, #tpu.memory_space<vmem>>, vector<128x32xf32>
    %c0_120 = arith.constant 0 : index
    %c0_121 = arith.constant 0 : index
    %223 = vector.load %arg30[%c0_120, %c0_121] : memref<1x32xf32, #tpu.memory_space<vmem>>, vector<1x32xf32>
    %cst_122 = arith.constant dense<0.000000e+00> : vector<40xf32>
    %224 = vector.multi_reduction <add>, %211, %cst_122 [1] : vector<40x32xf32> to vector<40xf32>
    %225 = vector.shape_cast %224 : vector<40xf32> to vector<40x1xf32>
    %cst_123 = arith.constant 3.200000e+01 : f32
    %226 = vector.broadcast %cst_123 : f32 to vector<40x1xf32>
    %227 = arith.divf %225, %226 : vector<40x1xf32>
    %228 = vector.broadcast %227 : vector<40x1xf32> to vector<40x32xf32>
    %229 = arith.subf %211, %228 : vector<40x32xf32>
    %230 = arith.mulf %229, %229 : vector<40x32xf32>
    %cst_124 = arith.constant dense<0.000000e+00> : vector<40xf32>
    %231 = vector.multi_reduction <add>, %230, %cst_124 [1] : vector<40x32xf32> to vector<40xf32>
    %232 = vector.shape_cast %231 : vector<40xf32> to vector<40x1xf32>
    %cst_125 = arith.constant 3.200000e+01 : f32
    %233 = vector.broadcast %cst_125 : f32 to vector<40x1xf32>
    %234 = arith.divf %232, %233 : vector<40x1xf32>
    %cst_126 = arith.constant 9.99999997E-7 : f32
    %235 = vector.broadcast %cst_126 : f32 to vector<40x1xf32>
    %236 = arith.addf %234, %235 : vector<40x1xf32>
    %237 = math.rsqrt %236 : vector<40x1xf32>
    %238 = vector.broadcast %237 : vector<40x1xf32> to vector<40x32xf32>
    %239 = arith.mulf %229, %238 : vector<40x32xf32>
    %240 = vector.broadcast %212 : vector<1x32xf32> to vector<40x32xf32>
    %241 = arith.mulf %239, %240 : vector<40x32xf32>
    %242 = vector.broadcast %213 : vector<1x32xf32> to vector<40x32xf32>
    %243 = arith.addf %241, %242 : vector<40x32xf32>
    %cst_127 = arith.constant dense<0.000000e+00> : vector<40x96xf32>
    %244 = tpu.matmul %243, %214, %cst_127 {dimension_numbers = #tpu.dot_dimension_numbers<[1], [0], [0], [1], [0, 0, 1, 1], [], []>} : vector<40x32xf32>, vector<32x96xf32>, vector<40x96xf32> -> vector<40x96xf32>
    %245 = vector.broadcast %215 : vector<1x96xf32> to vector<40x96xf32>
    %246 = arith.addf %244, %245 : vector<40x96xf32>
    %247 = vector.extract_strided_slice %246 {offsets = [0, 0], sizes = [40, 8], strides = [1, 1]} : vector<40x96xf32> to vector<40x8xf32>
    %248 = vector.extract_strided_slice %246 {offsets = [0, 32], sizes = [40, 8], strides = [1, 1]} : vector<40x96xf32> to vector<40x8xf32>
    %249 = vector.extract_strided_slice %246 {offsets = [0, 64], sizes = [40, 8], strides = [1, 1]} : vector<40x96xf32> to vector<40x8xf32>
    %cst_128 = arith.constant dense<0.000000e+00> : vector<40x40xf32>
    %250 = tpu.matmul %247, %248, %cst_128 {dimension_numbers = #tpu.dot_dimension_numbers<[1], [1], [0], [0], [0, 0, 1, 0], [], []>} : vector<40x8xf32>, vector<40x8xf32>, vector<40x40xf32> -> vector<40x40xf32>
    %cst_129 = arith.constant 0.353553385 : f32
    %251 = vector.broadcast %cst_129 : f32 to vector<40x40xf32>
    %252 = arith.mulf %250, %251 : vector<40x40xf32>
    %253 = arith.addf %252, %2 : vector<40x40xf32>
    %cst_130 = arith.constant dense<0xFF800000> : vector<40xf32>
    %254 = vector.multi_reduction <maximumf>, %253, %cst_130 [1] : vector<40x40xf32> to vector<40xf32>
    %255 = vector.shape_cast %254 : vector<40xf32> to vector<40x1xf32>
    %256 = vector.broadcast %255 : vector<40x1xf32> to vector<40x40xf32>
    %257 = arith.subf %253, %256 : vector<40x40xf32>
    %258 = math.exp %257 : vector<40x40xf32>
    %cst_131 = arith.constant dense<0.000000e+00> : vector<40xf32>
    %259 = vector.multi_reduction <add>, %258, %cst_131 [1] : vector<40x40xf32> to vector<40xf32>
    %260 = vector.shape_cast %259 : vector<40xf32> to vector<40x1xf32>
    %261 = tpu.reciprocal %260 {approx = true} : vector<40x1xf32> -> vector<40x1xf32>
    %262 = vector.broadcast %261 : vector<40x1xf32> to vector<40x40xf32>
    %263 = arith.mulf %258, %262 : vector<40x40xf32>
    %cst_132 = arith.constant dense<0.000000e+00> : vector<40x8xf32>
    %264 = tpu.matmul %263, %249, %cst_132 {dimension_numbers = #tpu.dot_dimension_numbers<[1], [0], [0], [1], [0, 0, 1, 1], [], []>} : vector<40x40xf32>, vector<40x8xf32>, vector<40x8xf32> -> vector<40x8xf32>
    %265 = vector.extract_strided_slice %216 {offsets = [0, 0], sizes = [8, 32], strides = [1, 1]} : vector<32x32xf32> to vector<8x32xf32>
    %cst_133 = arith.constant dense<0.000000e+00> : vector<40x32xf32>
    %266 = tpu.matmul %264, %265, %cst_133 {dimension_numbers = #tpu.dot_dimension_numbers<[1], [0], [0], [1], [0, 0, 1, 1], [], []>} : vector<40x8xf32>, vector<8x32xf32>, vector<40x32xf32> -> vector<40x32xf32>
    %267 = vector.extract_strided_slice %246 {offsets = [0, 8], sizes = [40, 8], strides = [1, 1]} : vector<40x96xf32> to vector<40x8xf32>
    %268 = vector.extract_strided_slice %246 {offsets = [0, 40], sizes = [40, 8], strides = [1, 1]} : vector<40x96xf32> to vector<40x8xf32>
    %269 = vector.extract_strided_slice %246 {offsets = [0, 72], sizes = [40, 8], strides = [1, 1]} : vector<40x96xf32> to vector<40x8xf32>
    %cst_134 = arith.constant dense<0.000000e+00> : vector<40x40xf32>
    %270 = tpu.matmul %267, %268, %cst_134 {dimension_numbers = #tpu.dot_dimension_numbers<[1], [1], [0], [0], [0, 0, 1, 0], [], []>} : vector<40x8xf32>, vector<40x8xf32>, vector<40x40xf32> -> vector<40x40xf32>
    %cst_135 = arith.constant 0.353553385 : f32
    %271 = vector.broadcast %cst_135 : f32 to vector<40x40xf32>
    %272 = arith.mulf %270, %271 : vector<40x40xf32>
    %273 = arith.addf %272, %2 : vector<40x40xf32>
    %cst_136 = arith.constant dense<0xFF800000> : vector<40xf32>
    %274 = vector.multi_reduction <maximumf>, %273, %cst_136 [1] : vector<40x40xf32> to vector<40xf32>
    %275 = vector.shape_cast %274 : vector<40xf32> to vector<40x1xf32>
    %276 = vector.broadcast %275 : vector<40x1xf32> to vector<40x40xf32>
    %277 = arith.subf %273, %276 : vector<40x40xf32>
    %278 = math.exp %277 : vector<40x40xf32>
    %cst_137 = arith.constant dense<0.000000e+00> : vector<40xf32>
    %279 = vector.multi_reduction <add>, %278, %cst_137 [1] : vector<40x40xf32> to vector<40xf32>
    %280 = vector.shape_cast %279 : vector<40xf32> to vector<40x1xf32>
    %281 = tpu.reciprocal %280 {approx = true} : vector<40x1xf32> -> vector<40x1xf32>
    %282 = vector.broadcast %281 : vector<40x1xf32> to vector<40x40xf32>
    %283 = arith.mulf %278, %282 : vector<40x40xf32>
    %cst_138 = arith.constant dense<0.000000e+00> : vector<40x8xf32>
    %284 = tpu.matmul %283, %269, %cst_138 {dimension_numbers = #tpu.dot_dimension_numbers<[1], [0], [0], [1], [0, 0, 1, 1], [], []>} : vector<40x40xf32>, vector<40x8xf32>, vector<40x8xf32> -> vector<40x8xf32>
    %285 = vector.extract_strided_slice %216 {offsets = [8, 0], sizes = [8, 32], strides = [1, 1]} : vector<32x32xf32> to vector<8x32xf32>
    %cst_139 = arith.constant dense<0.000000e+00> : vector<40x32xf32>
    %286 = tpu.matmul %284, %285, %cst_139 {dimension_numbers = #tpu.dot_dimension_numbers<[1], [0], [0], [1], [0, 0, 1, 1], [], []>} : vector<40x8xf32>, vector<8x32xf32>, vector<40x32xf32> -> vector<40x32xf32>
    %287 = arith.addf %266, %286 : vector<40x32xf32>
    %288 = vector.extract_strided_slice %246 {offsets = [0, 16], sizes = [40, 8], strides = [1, 1]} : vector<40x96xf32> to vector<40x8xf32>
    %289 = vector.extract_strided_slice %246 {offsets = [0, 48], sizes = [40, 8], strides = [1, 1]} : vector<40x96xf32> to vector<40x8xf32>
    %290 = vector.extract_strided_slice %246 {offsets = [0, 80], sizes = [40, 8], strides = [1, 1]} : vector<40x96xf32> to vector<40x8xf32>
    %cst_140 = arith.constant dense<0.000000e+00> : vector<40x40xf32>
    %291 = tpu.matmul %288, %289, %cst_140 {dimension_numbers = #tpu.dot_dimension_numbers<[1], [1], [0], [0], [0, 0, 1, 0], [], []>} : vector<40x8xf32>, vector<40x8xf32>, vector<40x40xf32> -> vector<40x40xf32>
    %cst_141 = arith.constant 0.353553385 : f32
    %292 = vector.broadcast %cst_141 : f32 to vector<40x40xf32>
    %293 = arith.mulf %291, %292 : vector<40x40xf32>
    %294 = arith.addf %293, %2 : vector<40x40xf32>
    %cst_142 = arith.constant dense<0xFF800000> : vector<40xf32>
    %295 = vector.multi_reduction <maximumf>, %294, %cst_142 [1] : vector<40x40xf32> to vector<40xf32>
    %296 = vector.shape_cast %295 : vector<40xf32> to vector<40x1xf32>
    %297 = vector.broadcast %296 : vector<40x1xf32> to vector<40x40xf32>
    %298 = arith.subf %294, %297 : vector<40x40xf32>
    %299 = math.exp %298 : vector<40x40xf32>
    %cst_143 = arith.constant dense<0.000000e+00> : vector<40xf32>
    %300 = vector.multi_reduction <add>, %299, %cst_143 [1] : vector<40x40xf32> to vector<40xf32>
    %301 = vector.shape_cast %300 : vector<40xf32> to vector<40x1xf32>
    %302 = tpu.reciprocal %301 {approx = true} : vector<40x1xf32> -> vector<40x1xf32>
    %303 = vector.broadcast %302 : vector<40x1xf32> to vector<40x40xf32>
    %304 = arith.mulf %299, %303 : vector<40x40xf32>
    %cst_144 = arith.constant dense<0.000000e+00> : vector<40x8xf32>
    %305 = tpu.matmul %304, %290, %cst_144 {dimension_numbers = #tpu.dot_dimension_numbers<[1], [0], [0], [1], [0, 0, 1, 1], [], []>} : vector<40x40xf32>, vector<40x8xf32>, vector<40x8xf32> -> vector<40x8xf32>
    %306 = vector.extract_strided_slice %216 {offsets = [16, 0], sizes = [8, 32], strides = [1, 1]} : vector<32x32xf32> to vector<8x32xf32>
    %cst_145 = arith.constant dense<0.000000e+00> : vector<40x32xf32>
    %307 = tpu.matmul %305, %306, %cst_145 {dimension_numbers = #tpu.dot_dimension_numbers<[1], [0], [0], [1], [0, 0, 1, 1], [], []>} : vector<40x8xf32>, vector<8x32xf32>, vector<40x32xf32> -> vector<40x32xf32>
    %308 = arith.addf %287, %307 : vector<40x32xf32>
    %309 = vector.extract_strided_slice %246 {offsets = [0, 24], sizes = [40, 8], strides = [1, 1]} : vector<40x96xf32> to vector<40x8xf32>
    %310 = vector.extract_strided_slice %246 {offsets = [0, 56], sizes = [40, 8], strides = [1, 1]} : vector<40x96xf32> to vector<40x8xf32>
    %311 = vector.extract_strided_slice %246 {offsets = [0, 88], sizes = [40, 8], strides = [1, 1]} : vector<40x96xf32> to vector<40x8xf32>
    %cst_146 = arith.constant dense<0.000000e+00> : vector<40x40xf32>
    %312 = tpu.matmul %309, %310, %cst_146 {dimension_numbers = #tpu.dot_dimension_numbers<[1], [1], [0], [0], [0, 0, 1, 0], [], []>} : vector<40x8xf32>, vector<40x8xf32>, vector<40x40xf32> -> vector<40x40xf32>
    %cst_147 = arith.constant 0.353553385 : f32
    %313 = vector.broadcast %cst_147 : f32 to vector<40x40xf32>
    %314 = arith.mulf %312, %313 : vector<40x40xf32>
    %315 = arith.addf %314, %2 : vector<40x40xf32>
    %cst_148 = arith.constant dense<0xFF800000> : vector<40xf32>
    %316 = vector.multi_reduction <maximumf>, %315, %cst_148 [1] : vector<40x40xf32> to vector<40xf32>
    %317 = vector.shape_cast %316 : vector<40xf32> to vector<40x1xf32>
    %318 = vector.broadcast %317 : vector<40x1xf32> to vector<40x40xf32>
    %319 = arith.subf %315, %318 : vector<40x40xf32>
    %320 = math.exp %319 : vector<40x40xf32>
    %cst_149 = arith.constant dense<0.000000e+00> : vector<40xf32>
    %321 = vector.multi_reduction <add>, %320, %cst_149 [1] : vector<40x40xf32> to vector<40xf32>
    %322 = vector.shape_cast %321 : vector<40xf32> to vector<40x1xf32>
    %323 = tpu.reciprocal %322 {approx = true} : vector<40x1xf32> -> vector<40x1xf32>
    %324 = vector.broadcast %323 : vector<40x1xf32> to vector<40x40xf32>
    %325 = arith.mulf %320, %324 : vector<40x40xf32>
    %cst_150 = arith.constant dense<0.000000e+00> : vector<40x8xf32>
    %326 = tpu.matmul %325, %311, %cst_150 {dimension_numbers = #tpu.dot_dimension_numbers<[1], [0], [0], [1], [0, 0, 1, 1], [], []>} : vector<40x40xf32>, vector<40x8xf32>, vector<40x8xf32> -> vector<40x8xf32>
    %327 = vector.extract_strided_slice %216 {offsets = [24, 0], sizes = [8, 32], strides = [1, 1]} : vector<32x32xf32> to vector<8x32xf32>
    %cst_151 = arith.constant dense<0.000000e+00> : vector<40x32xf32>
    %328 = tpu.matmul %326, %327, %cst_151 {dimension_numbers = #tpu.dot_dimension_numbers<[1], [0], [0], [1], [0, 0, 1, 1], [], []>} : vector<40x8xf32>, vector<8x32xf32>, vector<40x32xf32> -> vector<40x32xf32>
    %329 = arith.addf %308, %328 : vector<40x32xf32>
    %330 = arith.addf %211, %329 : vector<40x32xf32>
    %331 = vector.broadcast %217 : vector<1x32xf32> to vector<40x32xf32>
    %332 = arith.addf %330, %331 : vector<40x32xf32>
    %cst_152 = arith.constant dense<0.000000e+00> : vector<40xf32>
    %333 = vector.multi_reduction <add>, %332, %cst_152 [1] : vector<40x32xf32> to vector<40xf32>
    %334 = vector.shape_cast %333 : vector<40xf32> to vector<40x1xf32>
    %cst_153 = arith.constant 3.200000e+01 : f32
    %335 = vector.broadcast %cst_153 : f32 to vector<40x1xf32>
    %336 = arith.divf %334, %335 : vector<40x1xf32>
    %337 = vector.broadcast %336 : vector<40x1xf32> to vector<40x32xf32>
    %338 = arith.subf %332, %337 : vector<40x32xf32>
    %339 = arith.mulf %338, %338 : vector<40x32xf32>
    %cst_154 = arith.constant dense<0.000000e+00> : vector<40xf32>
    %340 = vector.multi_reduction <add>, %339, %cst_154 [1] : vector<40x32xf32> to vector<40xf32>
    %341 = vector.shape_cast %340 : vector<40xf32> to vector<40x1xf32>
    %cst_155 = arith.constant 3.200000e+01 : f32
    %342 = vector.broadcast %cst_155 : f32 to vector<40x1xf32>
    %343 = arith.divf %341, %342 : vector<40x1xf32>
    %cst_156 = arith.constant 9.99999997E-7 : f32
    %344 = vector.broadcast %cst_156 : f32 to vector<40x1xf32>
    %345 = arith.addf %343, %344 : vector<40x1xf32>
    %346 = math.rsqrt %345 : vector<40x1xf32>
    %347 = vector.broadcast %346 : vector<40x1xf32> to vector<40x32xf32>
    %348 = arith.mulf %338, %347 : vector<40x32xf32>
    %349 = vector.broadcast %218 : vector<1x32xf32> to vector<40x32xf32>
    %350 = arith.mulf %348, %349 : vector<40x32xf32>
    %351 = vector.broadcast %219 : vector<1x32xf32> to vector<40x32xf32>
    %352 = arith.addf %350, %351 : vector<40x32xf32>
    %cst_157 = arith.constant dense<0.000000e+00> : vector<40x128xf32>
    %353 = tpu.matmul %352, %220, %cst_157 {dimension_numbers = #tpu.dot_dimension_numbers<[1], [0], [0], [1], [0, 0, 1, 1], [], []>} : vector<40x32xf32>, vector<32x128xf32>, vector<40x128xf32> -> vector<40x128xf32>
    %354 = vector.broadcast %221 : vector<1x128xf32> to vector<40x128xf32>
    %355 = arith.addf %353, %354 : vector<40x128xf32>
    %cst_158 = arith.constant 5.000000e-01 : f32
    %356 = vector.broadcast %cst_158 : f32 to vector<40x128xf32>
    %357 = arith.mulf %356, %355 : vector<40x128xf32>
    %cst_159 = arith.constant 0.707106769 : f32
    %358 = vector.broadcast %cst_159 : f32 to vector<40x128xf32>
    %359 = arith.mulf %355, %358 : vector<40x128xf32>
    %cst_160 = arith.constant 0.000000e+00 : f32
    %360 = vector.broadcast %cst_160 : f32 to vector<40x128xf32>
    %361 = arith.cmpf oge, %359, %360 : vector<40x128xf32>
    %cst_161 = arith.constant 1.000000e+00 : f32
    %cst_162 = arith.constant -1.000000e+00 : f32
    %362 = vector.broadcast %cst_161 : f32 to vector<40x128xf32>
    %363 = vector.broadcast %cst_162 : f32 to vector<40x128xf32>
    %364 = arith.select %361, %362, %363 : vector<40x128xi1>, vector<40x128xf32>
    %365 = math.absf %359 : vector<40x128xf32>
    %cst_163 = arith.constant 0.327591091 : f32
    %366 = vector.broadcast %cst_163 : f32 to vector<40x128xf32>
    %367 = arith.mulf %366, %365 : vector<40x128xf32>
    %cst_164 = arith.constant 1.000000e+00 : f32
    %368 = vector.broadcast %cst_164 : f32 to vector<40x128xf32>
    %369 = arith.addf %368, %367 : vector<40x128xf32>
    %cst_165 = arith.constant 1.000000e+00 : f32
    %370 = vector.broadcast %cst_165 : f32 to vector<40x128xf32>
    %371 = arith.divf %370, %369 : vector<40x128xf32>
    %cst_166 = arith.constant 1.06140542 : f32
    %372 = vector.broadcast %cst_166 : f32 to vector<40x128xf32>
    %373 = arith.mulf %372, %371 : vector<40x128xf32>
    %cst_167 = arith.constant -1.45315206 : f32
    %374 = vector.broadcast %cst_167 : f32 to vector<40x128xf32>
    %375 = arith.addf %373, %374 : vector<40x128xf32>
    %376 = arith.mulf %375, %371 : vector<40x128xf32>
    %cst_168 = arith.constant 1.42141378 : f32
    %377 = vector.broadcast %cst_168 : f32 to vector<40x128xf32>
    %378 = arith.addf %376, %377 : vector<40x128xf32>
    %379 = arith.mulf %378, %371 : vector<40x128xf32>
    %cst_169 = arith.constant -0.284496725 : f32
    %380 = vector.broadcast %cst_169 : f32 to vector<40x128xf32>
    %381 = arith.addf %379, %380 : vector<40x128xf32>
    %382 = arith.mulf %381, %371 : vector<40x128xf32>
    %cst_170 = arith.constant 0.254829586 : f32
    %383 = vector.broadcast %cst_170 : f32 to vector<40x128xf32>
    %384 = arith.addf %382, %383 : vector<40x128xf32>
    %385 = arith.mulf %384, %371 : vector<40x128xf32>
    %cst_171 = arith.constant 0.000000e+00 : f32
    %386 = vector.broadcast %cst_171 : f32 to vector<40x128xf32>
    %387 = arith.subf %386, %365 : vector<40x128xf32>
    %388 = arith.mulf %387, %365 : vector<40x128xf32>
    %389 = math.exp %388 : vector<40x128xf32>
    %390 = arith.mulf %385, %389 : vector<40x128xf32>
    %cst_172 = arith.constant 1.000000e+00 : f32
    %391 = vector.broadcast %cst_172 : f32 to vector<40x128xf32>
    %392 = arith.subf %391, %390 : vector<40x128xf32>
    %393 = arith.mulf %364, %392 : vector<40x128xf32>
    %cst_173 = arith.constant 1.000000e+00 : f32
    %394 = vector.broadcast %cst_173 : f32 to vector<40x128xf32>
    %395 = arith.addf %394, %393 : vector<40x128xf32>
    %396 = arith.mulf %357, %395 : vector<40x128xf32>
    %cst_174 = arith.constant dense<0.000000e+00> : vector<40x32xf32>
    %397 = tpu.matmul %396, %222, %cst_174 {dimension_numbers = #tpu.dot_dimension_numbers<[1], [0], [0], [1], [0, 0, 1, 1], [], []>} : vector<40x128xf32>, vector<128x32xf32>, vector<40x32xf32> -> vector<40x32xf32>
    %398 = arith.addf %332, %397 : vector<40x32xf32>
    %399 = vector.broadcast %223 : vector<1x32xf32> to vector<40x32xf32>
    %400 = arith.addf %398, %399 : vector<40x32xf32>
    %c0_175 = arith.constant 0 : index
    %c0_176 = arith.constant 0 : index
    %401 = vector.load %arg31[%c0_175, %c0_176] : memref<1x32xf32, #tpu.memory_space<vmem>>, vector<1x32xf32>
    %c0_177 = arith.constant 0 : index
    %c0_178 = arith.constant 0 : index
    %402 = vector.load %arg32[%c0_177, %c0_178] : memref<1x32xf32, #tpu.memory_space<vmem>>, vector<1x32xf32>
    %cst_179 = arith.constant dense<0.000000e+00> : vector<40xf32>
    %403 = vector.multi_reduction <add>, %400, %cst_179 [1] : vector<40x32xf32> to vector<40xf32>
    %404 = vector.shape_cast %403 : vector<40xf32> to vector<40x1xf32>
    %cst_180 = arith.constant 3.200000e+01 : f32
    %405 = vector.broadcast %cst_180 : f32 to vector<40x1xf32>
    %406 = arith.divf %404, %405 : vector<40x1xf32>
    %407 = vector.broadcast %406 : vector<40x1xf32> to vector<40x32xf32>
    %408 = arith.subf %400, %407 : vector<40x32xf32>
    %409 = arith.mulf %408, %408 : vector<40x32xf32>
    %cst_181 = arith.constant dense<0.000000e+00> : vector<40xf32>
    %410 = vector.multi_reduction <add>, %409, %cst_181 [1] : vector<40x32xf32> to vector<40xf32>
    %411 = vector.shape_cast %410 : vector<40xf32> to vector<40x1xf32>
    %cst_182 = arith.constant 3.200000e+01 : f32
    %412 = vector.broadcast %cst_182 : f32 to vector<40x1xf32>
    %413 = arith.divf %411, %412 : vector<40x1xf32>
    %cst_183 = arith.constant 9.99999997E-7 : f32
    %414 = vector.broadcast %cst_183 : f32 to vector<40x1xf32>
    %415 = arith.addf %413, %414 : vector<40x1xf32>
    %416 = math.rsqrt %415 : vector<40x1xf32>
    %417 = vector.broadcast %416 : vector<40x1xf32> to vector<40x32xf32>
    %418 = arith.mulf %408, %417 : vector<40x32xf32>
    %419 = vector.broadcast %401 : vector<1x32xf32> to vector<40x32xf32>
    %420 = arith.mulf %418, %419 : vector<40x32xf32>
    %421 = vector.broadcast %402 : vector<1x32xf32> to vector<40x32xf32>
    %422 = arith.addf %420, %421 : vector<40x32xf32>
    %423 = vector.extract_strided_slice %422 {offsets = [0, 0], sizes = [8, 32], strides = [1, 1]} : vector<40x32xf32> to vector<8x32xf32>
    %424 = arith.mulf %423, %423 : vector<8x32xf32>
    %cst_184 = arith.constant dense<0.000000e+00> : vector<8xf32>
    %425 = vector.multi_reduction <add>, %424, %cst_184 [1] : vector<8x32xf32> to vector<8xf32>
    %426 = vector.shape_cast %425 : vector<8xf32> to vector<8x1xf32>
    %cst_185 = arith.constant 1.000000e-24 : f32
    %427 = vector.broadcast %cst_185 : f32 to vector<8x1xf32>
    %428 = arith.maximumf %426, %427 : vector<8x1xf32>
    %429 = math.rsqrt %428 : vector<8x1xf32>
    %430 = vector.broadcast %429 : vector<8x1xf32> to vector<8x32xf32>
    %431 = arith.mulf %423, %430 : vector<8x32xf32>
    %c0_186 = arith.constant 0 : index
    %c0_187 = arith.constant 0 : index
    %432 = vector.load %arg33[%c0_186, %c0_187] : memref<1x32xf32, #tpu.memory_space<vmem>>, vector<1x32xf32>
    %c0_188 = arith.constant 0 : index
    %c0_189 = arith.constant 0 : index
    %433 = vector.load %arg34[%c0_188, %c0_189] : memref<1x32xf32, #tpu.memory_space<vmem>>, vector<1x32xf32>
    %c0_190 = arith.constant 0 : index
    %c0_191 = arith.constant 0 : index
    %434 = vector.load %arg35[%c0_190, %c0_191] : memref<32x32xf32, #tpu.memory_space<vmem>>, vector<32x32xf32>
    %c0_192 = arith.constant 0 : index
    %c0_193 = arith.constant 0 : index
    %435 = vector.load %arg36[%c0_192, %c0_193] : memref<1x32xf32, #tpu.memory_space<vmem>>, vector<1x32xf32>
    %cst_194 = arith.constant dense<0.000000e+00> : vector<8xf32>
    %436 = vector.multi_reduction <add>, %431, %cst_194 [1] : vector<8x32xf32> to vector<8xf32>
    %437 = vector.shape_cast %436 : vector<8xf32> to vector<8x1xf32>
    %cst_195 = arith.constant 3.200000e+01 : f32
    %438 = vector.broadcast %cst_195 : f32 to vector<8x1xf32>
    %439 = arith.divf %437, %438 : vector<8x1xf32>
    %440 = vector.broadcast %439 : vector<8x1xf32> to vector<8x32xf32>
    %441 = arith.subf %431, %440 : vector<8x32xf32>
    %442 = arith.mulf %441, %441 : vector<8x32xf32>
    %cst_196 = arith.constant dense<0.000000e+00> : vector<8xf32>
    %443 = vector.multi_reduction <add>, %442, %cst_196 [1] : vector<8x32xf32> to vector<8xf32>
    %444 = vector.shape_cast %443 : vector<8xf32> to vector<8x1xf32>
    %cst_197 = arith.constant 3.200000e+01 : f32
    %445 = vector.broadcast %cst_197 : f32 to vector<8x1xf32>
    %446 = arith.divf %444, %445 : vector<8x1xf32>
    %cst_198 = arith.constant 9.99999974E-6 : f32
    %447 = vector.broadcast %cst_198 : f32 to vector<8x1xf32>
    %448 = arith.addf %446, %447 : vector<8x1xf32>
    %449 = math.rsqrt %448 : vector<8x1xf32>
    %450 = vector.broadcast %449 : vector<8x1xf32> to vector<8x32xf32>
    %451 = arith.mulf %441, %450 : vector<8x32xf32>
    %452 = vector.broadcast %432 : vector<1x32xf32> to vector<8x32xf32>
    %453 = arith.mulf %451, %452 : vector<8x32xf32>
    %454 = vector.broadcast %433 : vector<1x32xf32> to vector<8x32xf32>
    %455 = arith.addf %453, %454 : vector<8x32xf32>
    %cst_199 = arith.constant dense<0.000000e+00> : vector<8x32xf32>
    %456 = tpu.matmul %455, %434, %cst_199 {dimension_numbers = #tpu.dot_dimension_numbers<[1], [0], [0], [1], [0, 0, 1, 1], [], []>} : vector<8x32xf32>, vector<32x32xf32>, vector<8x32xf32> -> vector<8x32xf32>
    %457 = vector.broadcast %435 : vector<1x32xf32> to vector<8x32xf32>
    %458 = arith.addf %456, %457 : vector<8x32xf32>
    %c0_200 = arith.constant 0 : index
    %c0_201 = arith.constant 0 : index
    %459 = vector.load %arg37[%c0_200, %c0_201] : memref<1x32xf32, #tpu.memory_space<vmem>>, vector<1x32xf32>
    %c0_202 = arith.constant 0 : index
    %c0_203 = arith.constant 0 : index
    %460 = vector.load %arg66[%c0_202, %c0_203] : memref<10x32xf32, #tpu.memory_space<vmem>>, vector<8x32xf32>
    tpu.vector_store %arg66[%c0_202, %c0_203], %458 {strides = array<i32>} : memref<10x32xf32, #tpu.memory_space<vmem>>, vector<8x32xf32>,
    %461 = vector.shape_cast %459 : vector<1x32xf32> to vector<1x32xf32>
    %462 = vector.broadcast %461 : vector<1x32xf32> to vector<2x32xf32>
    %c8_204 = arith.constant 8 : index
    %c0_205 = arith.constant 0 : index
    %463 = vector.load %arg66[%c8_204, %c0_205] : memref<10x32xf32, #tpu.memory_space<vmem>>, vector<2x32xf32>
    tpu.vector_store %arg66[%c8_204, %c0_205], %462 {strides = array<i32>} : memref<10x32xf32, #tpu.memory_space<vmem>>, vector<2x32xf32>,
    %c0_206 = arith.constant 0 : index
    %c0_207 = arith.constant 0 : index
    %464 = vector.load %arg66[%c0_206, %c0_207] : memref<10x32xf32, #tpu.memory_space<vmem>>, vector<10x32xf32>
    %c0_208 = arith.constant 0 : index
    %c0_209 = arith.constant 0 : index
    %465 = vector.load %arg38[%c0_208, %c0_209] : memref<1x32xf32, #tpu.memory_space<vmem>>, vector<1x32xf32>
    %c0_210 = arith.constant 0 : index
    %c0_211 = arith.constant 0 : index
    %466 = vector.load %arg39[%c0_210, %c0_211] : memref<1x32xf32, #tpu.memory_space<vmem>>, vector<1x32xf32>
    %c0_212 = arith.constant 0 : index
    %c0_213 = arith.constant 0 : index
    %467 = vector.load %arg40[%c0_212, %c0_213] : memref<32x96xf32, #tpu.memory_space<vmem>>, vector<32x96xf32>
    %c0_214 = arith.constant 0 : index
    %c0_215 = arith.constant 0 : index
    %468 = vector.load %arg41[%c0_214, %c0_215] : memref<32x32xf32, #tpu.memory_space<vmem>>, vector<32x32xf32>
    %c0_216 = arith.constant 0 : index
    %c0_217 = arith.constant 0 : index
    %469 = vector.load %arg42[%c0_216, %c0_217] : memref<1x32xf32, #tpu.memory_space<vmem>>, vector<1x32xf32>
    %c0_218 = arith.constant 0 : index
    %c0_219 = arith.constant 0 : index
    %470 = vector.load %arg43[%c0_218, %c0_219] : memref<1x32xf32, #tpu.memory_space<vmem>>, vector<1x32xf32>
    %c0_220 = arith.constant 0 : index
    %c0_221 = arith.constant 0 : index
    %471 = vector.load %arg44[%c0_220, %c0_221] : memref<1x32xf32, #tpu.memory_space<vmem>>, vector<1x32xf32>
    %c0_222 = arith.constant 0 : index
    %c0_223 = arith.constant 0 : index
    %472 = vector.load %arg45[%c0_222, %c0_223] : memref<32x64xf32, #tpu.memory_space<vmem>>, vector<32x64xf32>
    %c0_224 = arith.constant 0 : index
    %c0_225 = arith.constant 0 : index
    %473 = vector.load %arg46[%c0_224, %c0_225] : memref<1x64xf32, #tpu.memory_space<vmem>>, vector<1x64xf32>
    %c0_226 = arith.constant 0 : index
    %c0_227 = arith.constant 0 : index
    %474 = vector.load %arg47[%c0_226, %c0_227] : memref<64x32xf32, #tpu.memory_space<vmem>>, vector<64x32xf32>
    %c0_228 = arith.constant 0 : index
    %c0_229 = arith.constant 0 : index
    %475 = vector.load %arg48[%c0_228, %c0_229] : memref<1x32xf32, #tpu.memory_space<vmem>>, vector<1x32xf32>
    %cst_230 = arith.constant dense<0.000000e+00> : vector<10xf32>
    %476 = vector.multi_reduction <add>, %464, %cst_230 [1] : vector<10x32xf32> to vector<10xf32>
    %477 = vector.shape_cast %476 : vector<10xf32> to vector<10x1xf32>
    %cst_231 = arith.constant 3.200000e+01 : f32
    %478 = vector.broadcast %cst_231 : f32 to vector<10x1xf32>
    %479 = arith.divf %477, %478 : vector<10x1xf32>
    %480 = vector.broadcast %479 : vector<10x1xf32> to vector<10x32xf32>
    %481 = arith.subf %464, %480 : vector<10x32xf32>
    %482 = arith.mulf %481, %481 : vector<10x32xf32>
    %cst_232 = arith.constant dense<0.000000e+00> : vector<10xf32>
    %483 = vector.multi_reduction <add>, %482, %cst_232 [1] : vector<10x32xf32> to vector<10xf32>
    %484 = vector.shape_cast %483 : vector<10xf32> to vector<10x1xf32>
    %cst_233 = arith.constant 3.200000e+01 : f32
    %485 = vector.broadcast %cst_233 : f32 to vector<10x1xf32>
    %486 = arith.divf %484, %485 : vector<10x1xf32>
    %cst_234 = arith.constant 9.99999974E-6 : f32
    %487 = vector.broadcast %cst_234 : f32 to vector<10x1xf32>
    %488 = arith.addf %486, %487 : vector<10x1xf32>
    %489 = math.rsqrt %488 : vector<10x1xf32>
    %490 = vector.broadcast %489 : vector<10x1xf32> to vector<10x32xf32>
    %491 = arith.mulf %481, %490 : vector<10x32xf32>
    %492 = vector.broadcast %465 : vector<1x32xf32> to vector<10x32xf32>
    %493 = arith.mulf %491, %492 : vector<10x32xf32>
    %494 = vector.broadcast %466 : vector<1x32xf32> to vector<10x32xf32>
    %495 = arith.addf %493, %494 : vector<10x32xf32>
    %cst_235 = arith.constant dense<0.000000e+00> : vector<10x96xf32>
    %496 = tpu.matmul %495, %467, %cst_235 {dimension_numbers = #tpu.dot_dimension_numbers<[1], [0], [0], [1], [0, 0, 1, 1], [], []>} : vector<10x32xf32>, vector<32x96xf32>, vector<10x96xf32> -> vector<10x96xf32>
    %497 = vector.extract_strided_slice %496 {offsets = [0, 0], sizes = [10, 8], strides = [1, 1]} : vector<10x96xf32> to vector<10x8xf32>
    %498 = vector.extract_strided_slice %496 {offsets = [0, 32], sizes = [10, 8], strides = [1, 1]} : vector<10x96xf32> to vector<10x8xf32>
    %499 = vector.extract_strided_slice %496 {offsets = [0, 64], sizes = [10, 8], strides = [1, 1]} : vector<10x96xf32> to vector<10x8xf32>
    %cst_236 = arith.constant dense<0.000000e+00> : vector<10x10xf32>
    %500 = tpu.matmul %497, %498, %cst_236 {dimension_numbers = #tpu.dot_dimension_numbers<[1], [1], [0], [0], [0, 0, 1, 0], [], []>} : vector<10x8xf32>, vector<10x8xf32>, vector<10x10xf32> -> vector<10x10xf32>
    %cst_237 = arith.constant 0.353553385 : f32
    %501 = vector.broadcast %cst_237 : f32 to vector<10x10xf32>
    %502 = arith.mulf %500, %501 : vector<10x10xf32>
    %503 = arith.addf %502, %3 : vector<10x10xf32>
    %cst_238 = arith.constant dense<0xFF800000> : vector<10xf32>
    %504 = vector.multi_reduction <maximumf>, %503, %cst_238 [1] : vector<10x10xf32> to vector<10xf32>
    %505 = vector.shape_cast %504 : vector<10xf32> to vector<10x1xf32>
    %506 = vector.broadcast %505 : vector<10x1xf32> to vector<10x10xf32>
    %507 = arith.subf %503, %506 : vector<10x10xf32>
    %508 = math.exp %507 : vector<10x10xf32>
    %cst_239 = arith.constant dense<0.000000e+00> : vector<10xf32>
    %509 = vector.multi_reduction <add>, %508, %cst_239 [1] : vector<10x10xf32> to vector<10xf32>
    %510 = vector.shape_cast %509 : vector<10xf32> to vector<10x1xf32>
    %511 = tpu.reciprocal %510 {approx = true} : vector<10x1xf32> -> vector<10x1xf32>
    %512 = vector.broadcast %511 : vector<10x1xf32> to vector<10x10xf32>
    %513 = arith.mulf %508, %512 : vector<10x10xf32>
    %cst_240 = arith.constant dense<0.000000e+00> : vector<10x8xf32>
    %514 = tpu.matmul %513, %499, %cst_240 {dimension_numbers = #tpu.dot_dimension_numbers<[1], [0], [0], [1], [0, 0, 1, 1], [], []>} : vector<10x10xf32>, vector<10x8xf32>, vector<10x8xf32> -> vector<10x8xf32>
    %515 = vector.extract_strided_slice %468 {offsets = [0, 0], sizes = [8, 32], strides = [1, 1]} : vector<32x32xf32> to vector<8x32xf32>
    %cst_241 = arith.constant dense<0.000000e+00> : vector<10x32xf32>
    %516 = tpu.matmul %514, %515, %cst_241 {dimension_numbers = #tpu.dot_dimension_numbers<[1], [0], [0], [1], [0, 0, 1, 1], [], []>} : vector<10x8xf32>, vector<8x32xf32>, vector<10x32xf32> -> vector<10x32xf32>
    %517 = vector.extract_strided_slice %496 {offsets = [0, 8], sizes = [10, 8], strides = [1, 1]} : vector<10x96xf32> to vector<10x8xf32>
    %518 = vector.extract_strided_slice %496 {offsets = [0, 40], sizes = [10, 8], strides = [1, 1]} : vector<10x96xf32> to vector<10x8xf32>
    %519 = vector.extract_strided_slice %496 {offsets = [0, 72], sizes = [10, 8], strides = [1, 1]} : vector<10x96xf32> to vector<10x8xf32>
    %cst_242 = arith.constant dense<0.000000e+00> : vector<10x10xf32>
    %520 = tpu.matmul %517, %518, %cst_242 {dimension_numbers = #tpu.dot_dimension_numbers<[1], [1], [0], [0], [0, 0, 1, 0], [], []>} : vector<10x8xf32>, vector<10x8xf32>, vector<10x10xf32> -> vector<10x10xf32>
    %cst_243 = arith.constant 0.353553385 : f32
    %521 = vector.broadcast %cst_243 : f32 to vector<10x10xf32>
    %522 = arith.mulf %520, %521 : vector<10x10xf32>
    %523 = arith.addf %522, %3 : vector<10x10xf32>
    %cst_244 = arith.constant dense<0xFF800000> : vector<10xf32>
    %524 = vector.multi_reduction <maximumf>, %523, %cst_244 [1] : vector<10x10xf32> to vector<10xf32>
    %525 = vector.shape_cast %524 : vector<10xf32> to vector<10x1xf32>
    %526 = vector.broadcast %525 : vector<10x1xf32> to vector<10x10xf32>
    %527 = arith.subf %523, %526 : vector<10x10xf32>
    %528 = math.exp %527 : vector<10x10xf32>
    %cst_245 = arith.constant dense<0.000000e+00> : vector<10xf32>
    %529 = vector.multi_reduction <add>, %528, %cst_245 [1] : vector<10x10xf32> to vector<10xf32>
    %530 = vector.shape_cast %529 : vector<10xf32> to vector<10x1xf32>
    %531 = tpu.reciprocal %530 {approx = true} : vector<10x1xf32> -> vector<10x1xf32>
    %532 = vector.broadcast %531 : vector<10x1xf32> to vector<10x10xf32>
    %533 = arith.mulf %528, %532 : vector<10x10xf32>
    %cst_246 = arith.constant dense<0.000000e+00> : vector<10x8xf32>
    %534 = tpu.matmul %533, %519, %cst_246 {dimension_numbers = #tpu.dot_dimension_numbers<[1], [0], [0], [1], [0, 0, 1, 1], [], []>} : vector<10x10xf32>, vector<10x8xf32>, vector<10x8xf32> -> vector<10x8xf32>
    %535 = vector.extract_strided_slice %468 {offsets = [8, 0], sizes = [8, 32], strides = [1, 1]} : vector<32x32xf32> to vector<8x32xf32>
    %cst_247 = arith.constant dense<0.000000e+00> : vector<10x32xf32>
    %536 = tpu.matmul %534, %535, %cst_247 {dimension_numbers = #tpu.dot_dimension_numbers<[1], [0], [0], [1], [0, 0, 1, 1], [], []>} : vector<10x8xf32>, vector<8x32xf32>, vector<10x32xf32> -> vector<10x32xf32>
    %537 = arith.addf %516, %536 : vector<10x32xf32>
    %538 = vector.extract_strided_slice %496 {offsets = [0, 16], sizes = [10, 8], strides = [1, 1]} : vector<10x96xf32> to vector<10x8xf32>
    %539 = vector.extract_strided_slice %496 {offsets = [0, 48], sizes = [10, 8], strides = [1, 1]} : vector<10x96xf32> to vector<10x8xf32>
    %540 = vector.extract_strided_slice %496 {offsets = [0, 80], sizes = [10, 8], strides = [1, 1]} : vector<10x96xf32> to vector<10x8xf32>
    %cst_248 = arith.constant dense<0.000000e+00> : vector<10x10xf32>
    %541 = tpu.matmul %538, %539, %cst_248 {dimension_numbers = #tpu.dot_dimension_numbers<[1], [1], [0], [0], [0, 0, 1, 0], [], []>} : vector<10x8xf32>, vector<10x8xf32>, vector<10x10xf32> -> vector<10x10xf32>
    %cst_249 = arith.constant 0.353553385 : f32
    %542 = vector.broadcast %cst_249 : f32 to vector<10x10xf32>
    %543 = arith.mulf %541, %542 : vector<10x10xf32>
    %544 = arith.addf %543, %3 : vector<10x10xf32>
    %cst_250 = arith.constant dense<0xFF800000> : vector<10xf32>
    %545 = vector.multi_reduction <maximumf>, %544, %cst_250 [1] : vector<10x10xf32> to vector<10xf32>
    %546 = vector.shape_cast %545 : vector<10xf32> to vector<10x1xf32>
    %547 = vector.broadcast %546 : vector<10x1xf32> to vector<10x10xf32>
    %548 = arith.subf %544, %547 : vector<10x10xf32>
    %549 = math.exp %548 : vector<10x10xf32>
    %cst_251 = arith.constant dense<0.000000e+00> : vector<10xf32>
    %550 = vector.multi_reduction <add>, %549, %cst_251 [1] : vector<10x10xf32> to vector<10xf32>
    %551 = vector.shape_cast %550 : vector<10xf32> to vector<10x1xf32>
    %552 = tpu.reciprocal %551 {approx = true} : vector<10x1xf32> -> vector<10x1xf32>
    %553 = vector.broadcast %552 : vector<10x1xf32> to vector<10x10xf32>
    %554 = arith.mulf %549, %553 : vector<10x10xf32>
    %cst_252 = arith.constant dense<0.000000e+00> : vector<10x8xf32>
    %555 = tpu.matmul %554, %540, %cst_252 {dimension_numbers = #tpu.dot_dimension_numbers<[1], [0], [0], [1], [0, 0, 1, 1], [], []>} : vector<10x10xf32>, vector<10x8xf32>, vector<10x8xf32> -> vector<10x8xf32>
    %556 = vector.extract_strided_slice %468 {offsets = [16, 0], sizes = [8, 32], strides = [1, 1]} : vector<32x32xf32> to vector<8x32xf32>
    %cst_253 = arith.constant dense<0.000000e+00> : vector<10x32xf32>
    %557 = tpu.matmul %555, %556, %cst_253 {dimension_numbers = #tpu.dot_dimension_numbers<[1], [0], [0], [1], [0, 0, 1, 1], [], []>} : vector<10x8xf32>, vector<8x32xf32>, vector<10x32xf32> -> vector<10x32xf32>
    %558 = arith.addf %537, %557 : vector<10x32xf32>
    %559 = vector.extract_strided_slice %496 {offsets = [0, 24], sizes = [10, 8], strides = [1, 1]} : vector<10x96xf32> to vector<10x8xf32>
    %560 = vector.extract_strided_slice %496 {offsets = [0, 56], sizes = [10, 8], strides = [1, 1]} : vector<10x96xf32> to vector<10x8xf32>
    %561 = vector.extract_strided_slice %496 {offsets = [0, 88], sizes = [10, 8], strides = [1, 1]} : vector<10x96xf32> to vector<10x8xf32>
    %cst_254 = arith.constant dense<0.000000e+00> : vector<10x10xf32>
    %562 = tpu.matmul %559, %560, %cst_254 {dimension_numbers = #tpu.dot_dimension_numbers<[1], [1], [0], [0], [0, 0, 1, 0], [], []>} : vector<10x8xf32>, vector<10x8xf32>, vector<10x10xf32> -> vector<10x10xf32>
    %cst_255 = arith.constant 0.353553385 : f32
    %563 = vector.broadcast %cst_255 : f32 to vector<10x10xf32>
    %564 = arith.mulf %562, %563 : vector<10x10xf32>
    %565 = arith.addf %564, %3 : vector<10x10xf32>
    %cst_256 = arith.constant dense<0xFF800000> : vector<10xf32>
    %566 = vector.multi_reduction <maximumf>, %565, %cst_256 [1] : vector<10x10xf32> to vector<10xf32>
    %567 = vector.shape_cast %566 : vector<10xf32> to vector<10x1xf32>
    %568 = vector.broadcast %567 : vector<10x1xf32> to vector<10x10xf32>
    %569 = arith.subf %565, %568 : vector<10x10xf32>
    %570 = math.exp %569 : vector<10x10xf32>
    %cst_257 = arith.constant dense<0.000000e+00> : vector<10xf32>
    %571 = vector.multi_reduction <add>, %570, %cst_257 [1] : vector<10x10xf32> to vector<10xf32>
    %572 = vector.shape_cast %571 : vector<10xf32> to vector<10x1xf32>
    %573 = tpu.reciprocal %572 {approx = true} : vector<10x1xf32> -> vector<10x1xf32>
    %574 = vector.broadcast %573 : vector<10x1xf32> to vector<10x10xf32>
    %575 = arith.mulf %570, %574 : vector<10x10xf32>
    %cst_258 = arith.constant dense<0.000000e+00> : vector<10x8xf32>
    %576 = tpu.matmul %575, %561, %cst_258 {dimension_numbers = #tpu.dot_dimension_numbers<[1], [0], [0], [1], [0, 0, 1, 1], [], []>} : vector<10x10xf32>, vector<10x8xf32>, vector<10x8xf32> -> vector<10x8xf32>
    %577 = vector.extract_strided_slice %468 {offsets = [24, 0], sizes = [8, 32], strides = [1, 1]} : vector<32x32xf32> to vector<8x32xf32>
    %cst_259 = arith.constant dense<0.000000e+00> : vector<10x32xf32>
    %578 = tpu.matmul %576, %577, %cst_259 {dimension_numbers = #tpu.dot_dimension_numbers<[1], [0], [0], [1], [0, 0, 1, 1], [], []>} : vector<10x8xf32>, vector<8x32xf32>, vector<10x32xf32> -> vector<10x32xf32>
    %579 = arith.addf %558, %578 : vector<10x32xf32>
    %580 = arith.addf %464, %579 : vector<10x32xf32>
    %581 = vector.broadcast %469 : vector<1x32xf32> to vector<10x32xf32>
    %582 = arith.addf %580, %581 : vector<10x32xf32>
    %cst_260 = arith.constant dense<0.000000e+00> : vector<10xf32>
    %583 = vector.multi_reduction <add>, %582, %cst_260 [1] : vector<10x32xf32> to vector<10xf32>
    %584 = vector.shape_cast %583 : vector<10xf32> to vector<10x1xf32>
    %cst_261 = arith.constant 3.200000e+01 : f32
    %585 = vector.broadcast %cst_261 : f32 to vector<10x1xf32>
    %586 = arith.divf %584, %585 : vector<10x1xf32>
    %587 = vector.broadcast %586 : vector<10x1xf32> to vector<10x32xf32>
    %588 = arith.subf %582, %587 : vector<10x32xf32>
    %589 = arith.mulf %588, %588 : vector<10x32xf32>
    %cst_262 = arith.constant dense<0.000000e+00> : vector<10xf32>
    %590 = vector.multi_reduction <add>, %589, %cst_262 [1] : vector<10x32xf32> to vector<10xf32>
    %591 = vector.shape_cast %590 : vector<10xf32> to vector<10x1xf32>
    %cst_263 = arith.constant 3.200000e+01 : f32
    %592 = vector.broadcast %cst_263 : f32 to vector<10x1xf32>
    %593 = arith.divf %591, %592 : vector<10x1xf32>
    %cst_264 = arith.constant 9.99999974E-6 : f32
    %594 = vector.broadcast %cst_264 : f32 to vector<10x1xf32>
    %595 = arith.addf %593, %594 : vector<10x1xf32>
    %596 = math.rsqrt %595 : vector<10x1xf32>
    %597 = vector.broadcast %596 : vector<10x1xf32> to vector<10x32xf32>
    %598 = arith.mulf %588, %597 : vector<10x32xf32>
    %599 = vector.broadcast %470 : vector<1x32xf32> to vector<10x32xf32>
    %600 = arith.mulf %598, %599 : vector<10x32xf32>
    %601 = vector.broadcast %471 : vector<1x32xf32> to vector<10x32xf32>
    %602 = arith.addf %600, %601 : vector<10x32xf32>
    %cst_265 = arith.constant dense<0.000000e+00> : vector<10x64xf32>
    %603 = tpu.matmul %602, %472, %cst_265 {dimension_numbers = #tpu.dot_dimension_numbers<[1], [0], [0], [1], [0, 0, 1, 1], [], []>} : vector<10x32xf32>, vector<32x64xf32>, vector<10x64xf32> -> vector<10x64xf32>
    %604 = vector.broadcast %473 : vector<1x64xf32> to vector<10x64xf32>
    %605 = arith.addf %603, %604 : vector<10x64xf32>
    %cst_266 = arith.constant 5.000000e-01 : f32
    %606 = vector.broadcast %cst_266 : f32 to vector<10x64xf32>
    %607 = arith.mulf %606, %605 : vector<10x64xf32>
    %cst_267 = arith.constant 0.707106769 : f32
    %608 = vector.broadcast %cst_267 : f32 to vector<10x64xf32>
    %609 = arith.mulf %605, %608 : vector<10x64xf32>
    %cst_268 = arith.constant 0.000000e+00 : f32
    %610 = vector.broadcast %cst_268 : f32 to vector<10x64xf32>
    %611 = arith.cmpf oge, %609, %610 : vector<10x64xf32>
    %cst_269 = arith.constant 1.000000e+00 : f32
    %cst_270 = arith.constant -1.000000e+00 : f32
    %612 = vector.broadcast %cst_269 : f32 to vector<10x64xf32>
    %613 = vector.broadcast %cst_270 : f32 to vector<10x64xf32>
    %614 = arith.select %611, %612, %613 : vector<10x64xi1>, vector<10x64xf32>
    %615 = math.absf %609 : vector<10x64xf32>
    %cst_271 = arith.constant 0.327591091 : f32
    %616 = vector.broadcast %cst_271 : f32 to vector<10x64xf32>
    %617 = arith.mulf %616, %615 : vector<10x64xf32>
    %cst_272 = arith.constant 1.000000e+00 : f32
    %618 = vector.broadcast %cst_272 : f32 to vector<10x64xf32>
    %619 = arith.addf %618, %617 : vector<10x64xf32>
    %cst_273 = arith.constant 1.000000e+00 : f32
    %620 = vector.broadcast %cst_273 : f32 to vector<10x64xf32>
    %621 = arith.divf %620, %619 : vector<10x64xf32>
    %cst_274 = arith.constant 1.06140542 : f32
    %622 = vector.broadcast %cst_274 : f32 to vector<10x64xf32>
    %623 = arith.mulf %622, %621 : vector<10x64xf32>
    %cst_275 = arith.constant -1.45315206 : f32
    %624 = vector.broadcast %cst_275 : f32 to vector<10x64xf32>
    %625 = arith.addf %623, %624 : vector<10x64xf32>
    %626 = arith.mulf %625, %621 : vector<10x64xf32>
    %cst_276 = arith.constant 1.42141378 : f32
    %627 = vector.broadcast %cst_276 : f32 to vector<10x64xf32>
    %628 = arith.addf %626, %627 : vector<10x64xf32>
    %629 = arith.mulf %628, %621 : vector<10x64xf32>
    %cst_277 = arith.constant -0.284496725 : f32
    %630 = vector.broadcast %cst_277 : f32 to vector<10x64xf32>
    %631 = arith.addf %629, %630 : vector<10x64xf32>
    %632 = arith.mulf %631, %621 : vector<10x64xf32>
    %cst_278 = arith.constant 0.254829586 : f32
    %633 = vector.broadcast %cst_278 : f32 to vector<10x64xf32>
    %634 = arith.addf %632, %633 : vector<10x64xf32>
    %635 = arith.mulf %634, %621 : vector<10x64xf32>
    %cst_279 = arith.constant 0.000000e+00 : f32
    %636 = vector.broadcast %cst_279 : f32 to vector<10x64xf32>
    %637 = arith.subf %636, %615 : vector<10x64xf32>
    %638 = arith.mulf %637, %615 : vector<10x64xf32>
    %639 = math.exp %638 : vector<10x64xf32>
    %640 = arith.mulf %635, %639 : vector<10x64xf32>
    %cst_280 = arith.constant 1.000000e+00 : f32
    %641 = vector.broadcast %cst_280 : f32 to vector<10x64xf32>
    %642 = arith.subf %641, %640 : vector<10x64xf32>
    %643 = arith.mulf %614, %642 : vector<10x64xf32>
    %cst_281 = arith.constant 1.000000e+00 : f32
    %644 = vector.broadcast %cst_281 : f32 to vector<10x64xf32>
    %645 = arith.addf %644, %643 : vector<10x64xf32>
    %646 = arith.mulf %607, %645 : vector<10x64xf32>
    %cst_282 = arith.constant dense<0.000000e+00> : vector<10x32xf32>
    %647 = tpu.matmul %646, %474, %cst_282 {dimension_numbers = #tpu.dot_dimension_numbers<[1], [0], [0], [1], [0, 0, 1, 1], [], []>} : vector<10x64xf32>, vector<64x32xf32>, vector<10x32xf32> -> vector<10x32xf32>
    %648 = arith.addf %582, %647 : vector<10x32xf32>
    %649 = vector.broadcast %475 : vector<1x32xf32> to vector<10x32xf32>
    %650 = arith.addf %648, %649 : vector<10x32xf32>
    %c0_283 = arith.constant 0 : index
    %c0_284 = arith.constant 0 : index
    %651 = vector.load %arg49[%c0_283, %c0_284] : memref<1x32xf32, #tpu.memory_space<vmem>>, vector<1x32xf32>
    %c0_285 = arith.constant 0 : index
    %c0_286 = arith.constant 0 : index
    %652 = vector.load %arg50[%c0_285, %c0_286] : memref<1x32xf32, #tpu.memory_space<vmem>>, vector<1x32xf32>
    %c0_287 = arith.constant 0 : index
    %c0_288 = arith.constant 0 : index
    %653 = vector.load %arg51[%c0_287, %c0_288] : memref<32x96xf32, #tpu.memory_space<vmem>>, vector<32x96xf32>
    %c0_289 = arith.constant 0 : index
    %c0_290 = arith.constant 0 : index
    %654 = vector.load %arg52[%c0_289, %c0_290] : memref<32x32xf32, #tpu.memory_space<vmem>>, vector<32x32xf32>
    %c0_291 = arith.constant 0 : index
    %c0_292 = arith.constant 0 : index
    %655 = vector.load %arg53[%c0_291, %c0_292] : memref<1x32xf32, #tpu.memory_space<vmem>>, vector<1x32xf32>
    %c0_293 = arith.constant 0 : index
    %c0_294 = arith.constant 0 : index
    %656 = vector.load %arg54[%c0_293, %c0_294] : memref<1x32xf32, #tpu.memory_space<vmem>>, vector<1x32xf32>
    %c0_295 = arith.constant 0 : index
    %c0_296 = arith.constant 0 : index
    %657 = vector.load %arg55[%c0_295, %c0_296] : memref<1x32xf32, #tpu.memory_space<vmem>>, vector<1x32xf32>
    %c0_297 = arith.constant 0 : index
    %c0_298 = arith.constant 0 : index
    %658 = vector.load %arg56[%c0_297, %c0_298] : memref<32x64xf32, #tpu.memory_space<vmem>>, vector<32x64xf32>
    %c0_299 = arith.constant 0 : index
    %c0_300 = arith.constant 0 : index
    %659 = vector.load %arg57[%c0_299, %c0_300] : memref<1x64xf32, #tpu.memory_space<vmem>>, vector<1x64xf32>
    %c0_301 = arith.constant 0 : index
    %c0_302 = arith.constant 0 : index
    %660 = vector.load %arg58[%c0_301, %c0_302] : memref<64x32xf32, #tpu.memory_space<vmem>>, vector<64x32xf32>
    %c0_303 = arith.constant 0 : index
    %c0_304 = arith.constant 0 : index
    %661 = vector.load %arg59[%c0_303, %c0_304] : memref<1x32xf32, #tpu.memory_space<vmem>>, vector<1x32xf32>
    %cst_305 = arith.constant dense<0.000000e+00> : vector<10xf32>
    %662 = vector.multi_reduction <add>, %650, %cst_305 [1] : vector<10x32xf32> to vector<10xf32>
    %663 = vector.shape_cast %662 : vector<10xf32> to vector<10x1xf32>
    %cst_306 = arith.constant 3.200000e+01 : f32
    %664 = vector.broadcast %cst_306 : f32 to vector<10x1xf32>
    %665 = arith.divf %663, %664 : vector<10x1xf32>
    %666 = vector.broadcast %665 : vector<10x1xf32> to vector<10x32xf32>
    %667 = arith.subf %650, %666 : vector<10x32xf32>
    %668 = arith.mulf %667, %667 : vector<10x32xf32>
    %cst_307 = arith.constant dense<0.000000e+00> : vector<10xf32>
    %669 = vector.multi_reduction <add>, %668, %cst_307 [1] : vector<10x32xf32> to vector<10xf32>
    %670 = vector.shape_cast %669 : vector<10xf32> to vector<10x1xf32>
    %cst_308 = arith.constant 3.200000e+01 : f32
    %671 = vector.broadcast %cst_308 : f32 to vector<10x1xf32>
    %672 = arith.divf %670, %671 : vector<10x1xf32>
    %cst_309 = arith.constant 9.99999974E-6 : f32
    %673 = vector.broadcast %cst_309 : f32 to vector<10x1xf32>
    %674 = arith.addf %672, %673 : vector<10x1xf32>
    %675 = math.rsqrt %674 : vector<10x1xf32>
    %676 = vector.broadcast %675 : vector<10x1xf32> to vector<10x32xf32>
    %677 = arith.mulf %667, %676 : vector<10x32xf32>
    %678 = vector.broadcast %651 : vector<1x32xf32> to vector<10x32xf32>
    %679 = arith.mulf %677, %678 : vector<10x32xf32>
    %680 = vector.broadcast %652 : vector<1x32xf32> to vector<10x32xf32>
    %681 = arith.addf %679, %680 : vector<10x32xf32>
    %cst_310 = arith.constant dense<0.000000e+00> : vector<10x96xf32>
    %682 = tpu.matmul %681, %653, %cst_310 {dimension_numbers = #tpu.dot_dimension_numbers<[1], [0], [0], [1], [0, 0, 1, 1], [], []>} : vector<10x32xf32>, vector<32x96xf32>, vector<10x96xf32> -> vector<10x96xf32>
    %683 = vector.extract_strided_slice %682 {offsets = [0, 0], sizes = [10, 8], strides = [1, 1]} : vector<10x96xf32> to vector<10x8xf32>
    %684 = vector.extract_strided_slice %682 {offsets = [0, 32], sizes = [10, 8], strides = [1, 1]} : vector<10x96xf32> to vector<10x8xf32>
    %685 = vector.extract_strided_slice %682 {offsets = [0, 64], sizes = [10, 8], strides = [1, 1]} : vector<10x96xf32> to vector<10x8xf32>
    %cst_311 = arith.constant dense<0.000000e+00> : vector<10x10xf32>
    %686 = tpu.matmul %683, %684, %cst_311 {dimension_numbers = #tpu.dot_dimension_numbers<[1], [1], [0], [0], [0, 0, 1, 0], [], []>} : vector<10x8xf32>, vector<10x8xf32>, vector<10x10xf32> -> vector<10x10xf32>
    %cst_312 = arith.constant 0.353553385 : f32
    %687 = vector.broadcast %cst_312 : f32 to vector<10x10xf32>
    %688 = arith.mulf %686, %687 : vector<10x10xf32>
    %689 = arith.addf %688, %3 : vector<10x10xf32>
    %cst_313 = arith.constant dense<0xFF800000> : vector<10xf32>
    %690 = vector.multi_reduction <maximumf>, %689, %cst_313 [1] : vector<10x10xf32> to vector<10xf32>
    %691 = vector.shape_cast %690 : vector<10xf32> to vector<10x1xf32>
    %692 = vector.broadcast %691 : vector<10x1xf32> to vector<10x10xf32>
    %693 = arith.subf %689, %692 : vector<10x10xf32>
    %694 = math.exp %693 : vector<10x10xf32>
    %cst_314 = arith.constant dense<0.000000e+00> : vector<10xf32>
    %695 = vector.multi_reduction <add>, %694, %cst_314 [1] : vector<10x10xf32> to vector<10xf32>
    %696 = vector.shape_cast %695 : vector<10xf32> to vector<10x1xf32>
    %697 = tpu.reciprocal %696 {approx = true} : vector<10x1xf32> -> vector<10x1xf32>
    %698 = vector.broadcast %697 : vector<10x1xf32> to vector<10x10xf32>
    %699 = arith.mulf %694, %698 : vector<10x10xf32>
    %cst_315 = arith.constant dense<0.000000e+00> : vector<10x8xf32>
    %700 = tpu.matmul %699, %685, %cst_315 {dimension_numbers = #tpu.dot_dimension_numbers<[1], [0], [0], [1], [0, 0, 1, 1], [], []>} : vector<10x10xf32>, vector<10x8xf32>, vector<10x8xf32> -> vector<10x8xf32>
    %701 = vector.extract_strided_slice %654 {offsets = [0, 0], sizes = [8, 32], strides = [1, 1]} : vector<32x32xf32> to vector<8x32xf32>
    %cst_316 = arith.constant dense<0.000000e+00> : vector<10x32xf32>
    %702 = tpu.matmul %700, %701, %cst_316 {dimension_numbers = #tpu.dot_dimension_numbers<[1], [0], [0], [1], [0, 0, 1, 1], [], []>} : vector<10x8xf32>, vector<8x32xf32>, vector<10x32xf32> -> vector<10x32xf32>
    %703 = vector.extract_strided_slice %682 {offsets = [0, 8], sizes = [10, 8], strides = [1, 1]} : vector<10x96xf32> to vector<10x8xf32>
    %704 = vector.extract_strided_slice %682 {offsets = [0, 40], sizes = [10, 8], strides = [1, 1]} : vector<10x96xf32> to vector<10x8xf32>
    %705 = vector.extract_strided_slice %682 {offsets = [0, 72], sizes = [10, 8], strides = [1, 1]} : vector<10x96xf32> to vector<10x8xf32>
    %cst_317 = arith.constant dense<0.000000e+00> : vector<10x10xf32>
    %706 = tpu.matmul %703, %704, %cst_317 {dimension_numbers = #tpu.dot_dimension_numbers<[1], [1], [0], [0], [0, 0, 1, 0], [], []>} : vector<10x8xf32>, vector<10x8xf32>, vector<10x10xf32> -> vector<10x10xf32>
    %cst_318 = arith.constant 0.353553385 : f32
    %707 = vector.broadcast %cst_318 : f32 to vector<10x10xf32>
    %708 = arith.mulf %706, %707 : vector<10x10xf32>
    %709 = arith.addf %708, %3 : vector<10x10xf32>
    %cst_319 = arith.constant dense<0xFF800000> : vector<10xf32>
    %710 = vector.multi_reduction <maximumf>, %709, %cst_319 [1] : vector<10x10xf32> to vector<10xf32>
    %711 = vector.shape_cast %710 : vector<10xf32> to vector<10x1xf32>
    %712 = vector.broadcast %711 : vector<10x1xf32> to vector<10x10xf32>
    %713 = arith.subf %709, %712 : vector<10x10xf32>
    %714 = math.exp %713 : vector<10x10xf32>
    %cst_320 = arith.constant dense<0.000000e+00> : vector<10xf32>
    %715 = vector.multi_reduction <add>, %714, %cst_320 [1] : vector<10x10xf32> to vector<10xf32>
    %716 = vector.shape_cast %715 : vector<10xf32> to vector<10x1xf32>
    %717 = tpu.reciprocal %716 {approx = true} : vector<10x1xf32> -> vector<10x1xf32>
    %718 = vector.broadcast %717 : vector<10x1xf32> to vector<10x10xf32>
    %719 = arith.mulf %714, %718 : vector<10x10xf32>
    %cst_321 = arith.constant dense<0.000000e+00> : vector<10x8xf32>
    %720 = tpu.matmul %719, %705, %cst_321 {dimension_numbers = #tpu.dot_dimension_numbers<[1], [0], [0], [1], [0, 0, 1, 1], [], []>} : vector<10x10xf32>, vector<10x8xf32>, vector<10x8xf32> -> vector<10x8xf32>
    %721 = vector.extract_strided_slice %654 {offsets = [8, 0], sizes = [8, 32], strides = [1, 1]} : vector<32x32xf32> to vector<8x32xf32>
    %cst_322 = arith.constant dense<0.000000e+00> : vector<10x32xf32>
    %722 = tpu.matmul %720, %721, %cst_322 {dimension_numbers = #tpu.dot_dimension_numbers<[1], [0], [0], [1], [0, 0, 1, 1], [], []>} : vector<10x8xf32>, vector<8x32xf32>, vector<10x32xf32> -> vector<10x32xf32>
    %723 = arith.addf %702, %722 : vector<10x32xf32>
    %724 = vector.extract_strided_slice %682 {offsets = [0, 16], sizes = [10, 8], strides = [1, 1]} : vector<10x96xf32> to vector<10x8xf32>
    %725 = vector.extract_strided_slice %682 {offsets = [0, 48], sizes = [10, 8], strides = [1, 1]} : vector<10x96xf32> to vector<10x8xf32>
    %726 = vector.extract_strided_slice %682 {offsets = [0, 80], sizes = [10, 8], strides = [1, 1]} : vector<10x96xf32> to vector<10x8xf32>
    %cst_323 = arith.constant dense<0.000000e+00> : vector<10x10xf32>
    %727 = tpu.matmul %724, %725, %cst_323 {dimension_numbers = #tpu.dot_dimension_numbers<[1], [1], [0], [0], [0, 0, 1, 0], [], []>} : vector<10x8xf32>, vector<10x8xf32>, vector<10x10xf32> -> vector<10x10xf32>
    %cst_324 = arith.constant 0.353553385 : f32
    %728 = vector.broadcast %cst_324 : f32 to vector<10x10xf32>
    %729 = arith.mulf %727, %728 : vector<10x10xf32>
    %730 = arith.addf %729, %3 : vector<10x10xf32>
    %cst_325 = arith.constant dense<0xFF800000> : vector<10xf32>
    %731 = vector.multi_reduction <maximumf>, %730, %cst_325 [1] : vector<10x10xf32> to vector<10xf32>
    %732 = vector.shape_cast %731 : vector<10xf32> to vector<10x1xf32>
    %733 = vector.broadcast %732 : vector<10x1xf32> to vector<10x10xf32>
    %734 = arith.subf %730, %733 : vector<10x10xf32>
    %735 = math.exp %734 : vector<10x10xf32>
    %cst_326 = arith.constant dense<0.000000e+00> : vector<10xf32>
    %736 = vector.multi_reduction <add>, %735, %cst_326 [1] : vector<10x10xf32> to vector<10xf32>
    %737 = vector.shape_cast %736 : vector<10xf32> to vector<10x1xf32>
    %738 = tpu.reciprocal %737 {approx = true} : vector<10x1xf32> -> vector<10x1xf32>
    %739 = vector.broadcast %738 : vector<10x1xf32> to vector<10x10xf32>
    %740 = arith.mulf %735, %739 : vector<10x10xf32>
    %cst_327 = arith.constant dense<0.000000e+00> : vector<10x8xf32>
    %741 = tpu.matmul %740, %726, %cst_327 {dimension_numbers = #tpu.dot_dimension_numbers<[1], [0], [0], [1], [0, 0, 1, 1], [], []>} : vector<10x10xf32>, vector<10x8xf32>, vector<10x8xf32> -> vector<10x8xf32>
    %742 = vector.extract_strided_slice %654 {offsets = [16, 0], sizes = [8, 32], strides = [1, 1]} : vector<32x32xf32> to vector<8x32xf32>
    %cst_328 = arith.constant dense<0.000000e+00> : vector<10x32xf32>
    %743 = tpu.matmul %741, %742, %cst_328 {dimension_numbers = #tpu.dot_dimension_numbers<[1], [0], [0], [1], [0, 0, 1, 1], [], []>} : vector<10x8xf32>, vector<8x32xf32>, vector<10x32xf32> -> vector<10x32xf32>
    %744 = arith.addf %723, %743 : vector<10x32xf32>
    %745 = vector.extract_strided_slice %682 {offsets = [0, 24], sizes = [10, 8], strides = [1, 1]} : vector<10x96xf32> to vector<10x8xf32>
    %746 = vector.extract_strided_slice %682 {offsets = [0, 56], sizes = [10, 8], strides = [1, 1]} : vector<10x96xf32> to vector<10x8xf32>
    %747 = vector.extract_strided_slice %682 {offsets = [0, 88], sizes = [10, 8], strides = [1, 1]} : vector<10x96xf32> to vector<10x8xf32>
    %cst_329 = arith.constant dense<0.000000e+00> : vector<10x10xf32>
    %748 = tpu.matmul %745, %746, %cst_329 {dimension_numbers = #tpu.dot_dimension_numbers<[1], [1], [0], [0], [0, 0, 1, 0], [], []>} : vector<10x8xf32>, vector<10x8xf32>, vector<10x10xf32> -> vector<10x10xf32>
    %cst_330 = arith.constant 0.353553385 : f32
    %749 = vector.broadcast %cst_330 : f32 to vector<10x10xf32>
    %750 = arith.mulf %748, %749 : vector<10x10xf32>
    %751 = arith.addf %750, %3 : vector<10x10xf32>
    %cst_331 = arith.constant dense<0xFF800000> : vector<10xf32>
    %752 = vector.multi_reduction <maximumf>, %751, %cst_331 [1] : vector<10x10xf32> to vector<10xf32>
    %753 = vector.shape_cast %752 : vector<10xf32> to vector<10x1xf32>
    %754 = vector.broadcast %753 : vector<10x1xf32> to vector<10x10xf32>
    %755 = arith.subf %751, %754 : vector<10x10xf32>
    %756 = math.exp %755 : vector<10x10xf32>
    %cst_332 = arith.constant dense<0.000000e+00> : vector<10xf32>
    %757 = vector.multi_reduction <add>, %756, %cst_332 [1] : vector<10x10xf32> to vector<10xf32>
    %758 = vector.shape_cast %757 : vector<10xf32> to vector<10x1xf32>
    %759 = tpu.reciprocal %758 {approx = true} : vector<10x1xf32> -> vector<10x1xf32>
    %760 = vector.broadcast %759 : vector<10x1xf32> to vector<10x10xf32>
    %761 = arith.mulf %756, %760 : vector<10x10xf32>
    %cst_333 = arith.constant dense<0.000000e+00> : vector<10x8xf32>
    %762 = tpu.matmul %761, %747, %cst_333 {dimension_numbers = #tpu.dot_dimension_numbers<[1], [0], [0], [1], [0, 0, 1, 1], [], []>} : vector<10x10xf32>, vector<10x8xf32>, vector<10x8xf32> -> vector<10x8xf32>
    %763 = vector.extract_strided_slice %654 {offsets = [24, 0], sizes = [8, 32], strides = [1, 1]} : vector<32x32xf32> to vector<8x32xf32>
    %cst_334 = arith.constant dense<0.000000e+00> : vector<10x32xf32>
    %764 = tpu.matmul %762, %763, %cst_334 {dimension_numbers = #tpu.dot_dimension_numbers<[1], [0], [0], [1], [0, 0, 1, 1], [], []>} : vector<10x8xf32>, vector<8x32xf32>, vector<10x32xf32> -> vector<10x32xf32>
    %765 = arith.addf %744, %764 : vector<10x32xf32>
    %766 = arith.addf %650, %765 : vector<10x32xf32>
    %767 = vector.broadcast %655 : vector<1x32xf32> to vector<10x32xf32>
    %768 = arith.addf %766, %767 : vector<10x32xf32>
    %cst_335 = arith.constant dense<0.000000e+00> : vector<10xf32>
    %769 = vector.multi_reduction <add>, %768, %cst_335 [1] : vector<10x32xf32> to vector<10xf32>
    %770 = vector.shape_cast %769 : vector<10xf32> to vector<10x1xf32>
    %cst_336 = arith.constant 3.200000e+01 : f32
    %771 = vector.broadcast %cst_336 : f32 to vector<10x1xf32>
    %772 = arith.divf %770, %771 : vector<10x1xf32>
    %773 = vector.broadcast %772 : vector<10x1xf32> to vector<10x32xf32>
    %774 = arith.subf %768, %773 : vector<10x32xf32>
    %775 = arith.mulf %774, %774 : vector<10x32xf32>
    %cst_337 = arith.constant dense<0.000000e+00> : vector<10xf32>
    %776 = vector.multi_reduction <add>, %775, %cst_337 [1] : vector<10x32xf32> to vector<10xf32>
    %777 = vector.shape_cast %776 : vector<10xf32> to vector<10x1xf32>
    %cst_338 = arith.constant 3.200000e+01 : f32
    %778 = vector.broadcast %cst_338 : f32 to vector<10x1xf32>
    %779 = arith.divf %777, %778 : vector<10x1xf32>
    %cst_339 = arith.constant 9.99999974E-6 : f32
    %780 = vector.broadcast %cst_339 : f32 to vector<10x1xf32>
    %781 = arith.addf %779, %780 : vector<10x1xf32>
    %782 = math.rsqrt %781 : vector<10x1xf32>
    %783 = vector.broadcast %782 : vector<10x1xf32> to vector<10x32xf32>
    %784 = arith.mulf %774, %783 : vector<10x32xf32>
    %785 = vector.broadcast %656 : vector<1x32xf32> to vector<10x32xf32>
    %786 = arith.mulf %784, %785 : vector<10x32xf32>
    %787 = vector.broadcast %657 : vector<1x32xf32> to vector<10x32xf32>
    %788 = arith.addf %786, %787 : vector<10x32xf32>
    %cst_340 = arith.constant dense<0.000000e+00> : vector<10x64xf32>
    %789 = tpu.matmul %788, %658, %cst_340 {dimension_numbers = #tpu.dot_dimension_numbers<[1], [0], [0], [1], [0, 0, 1, 1], [], []>} : vector<10x32xf32>, vector<32x64xf32>, vector<10x64xf32> -> vector<10x64xf32>
    %790 = vector.broadcast %659 : vector<1x64xf32> to vector<10x64xf32>
    %791 = arith.addf %789, %790 : vector<10x64xf32>
    %cst_341 = arith.constant 5.000000e-01 : f32
    %792 = vector.broadcast %cst_341 : f32 to vector<10x64xf32>
    %793 = arith.mulf %792, %791 : vector<10x64xf32>
    %cst_342 = arith.constant 0.707106769 : f32
    %794 = vector.broadcast %cst_342 : f32 to vector<10x64xf32>
    %795 = arith.mulf %791, %794 : vector<10x64xf32>
    %cst_343 = arith.constant 0.000000e+00 : f32
    %796 = vector.broadcast %cst_343 : f32 to vector<10x64xf32>
    %797 = arith.cmpf oge, %795, %796 : vector<10x64xf32>
    %cst_344 = arith.constant 1.000000e+00 : f32
    %cst_345 = arith.constant -1.000000e+00 : f32
    %798 = vector.broadcast %cst_344 : f32 to vector<10x64xf32>
    %799 = vector.broadcast %cst_345 : f32 to vector<10x64xf32>
    %800 = arith.select %797, %798, %799 : vector<10x64xi1>, vector<10x64xf32>
    %801 = math.absf %795 : vector<10x64xf32>
    %cst_346 = arith.constant 0.327591091 : f32
    %802 = vector.broadcast %cst_346 : f32 to vector<10x64xf32>
    %803 = arith.mulf %802, %801 : vector<10x64xf32>
    %cst_347 = arith.constant 1.000000e+00 : f32
    %804 = vector.broadcast %cst_347 : f32 to vector<10x64xf32>
    %805 = arith.addf %804, %803 : vector<10x64xf32>
    %cst_348 = arith.constant 1.000000e+00 : f32
    %806 = vector.broadcast %cst_348 : f32 to vector<10x64xf32>
    %807 = arith.divf %806, %805 : vector<10x64xf32>
    %cst_349 = arith.constant 1.06140542 : f32
    %808 = vector.broadcast %cst_349 : f32 to vector<10x64xf32>
    %809 = arith.mulf %808, %807 : vector<10x64xf32>
    %cst_350 = arith.constant -1.45315206 : f32
    %810 = vector.broadcast %cst_350 : f32 to vector<10x64xf32>
    %811 = arith.addf %809, %810 : vector<10x64xf32>
    %812 = arith.mulf %811, %807 : vector<10x64xf32>
    %cst_351 = arith.constant 1.42141378 : f32
    %813 = vector.broadcast %cst_351 : f32 to vector<10x64xf32>
    %814 = arith.addf %812, %813 : vector<10x64xf32>
    %815 = arith.mulf %814, %807 : vector<10x64xf32>
    %cst_352 = arith.constant -0.284496725 : f32
    %816 = vector.broadcast %cst_352 : f32 to vector<10x64xf32>
    %817 = arith.addf %815, %816 : vector<10x64xf32>
    %818 = arith.mulf %817, %807 : vector<10x64xf32>
    %cst_353 = arith.constant 0.254829586 : f32
    %819 = vector.broadcast %cst_353 : f32 to vector<10x64xf32>
    %820 = arith.addf %818, %819 : vector<10x64xf32>
    %821 = arith.mulf %820, %807 : vector<10x64xf32>
    %cst_354 = arith.constant 0.000000e+00 : f32
    %822 = vector.broadcast %cst_354 : f32 to vector<10x64xf32>
    %823 = arith.subf %822, %801 : vector<10x64xf32>
    %824 = arith.mulf %823, %801 : vector<10x64xf32>
    %825 = math.exp %824 : vector<10x64xf32>
    %826 = arith.mulf %821, %825 : vector<10x64xf32>
    %cst_355 = arith.constant 1.000000e+00 : f32
    %827 = vector.broadcast %cst_355 : f32 to vector<10x64xf32>
    %828 = arith.subf %827, %826 : vector<10x64xf32>
    %829 = arith.mulf %800, %828 : vector<10x64xf32>
    %cst_356 = arith.constant 1.000000e+00 : f32
    %830 = vector.broadcast %cst_356 : f32 to vector<10x64xf32>
    %831 = arith.addf %830, %829 : vector<10x64xf32>
    %832 = arith.mulf %793, %831 : vector<10x64xf32>
    %cst_357 = arith.constant dense<0.000000e+00> : vector<10x32xf32>
    %833 = tpu.matmul %832, %660, %cst_357 {dimension_numbers = #tpu.dot_dimension_numbers<[1], [0], [0], [1], [0, 0, 1, 1], [], []>} : vector<10x64xf32>, vector<64x32xf32>, vector<10x32xf32> -> vector<10x32xf32>
    %834 = arith.addf %768, %833 : vector<10x32xf32>
    %835 = vector.broadcast %661 : vector<1x32xf32> to vector<10x32xf32>
    %836 = arith.addf %834, %835 : vector<10x32xf32>
    %c0_358 = arith.constant 0 : index
    %c0_359 = arith.constant 0 : index
    %837 = vector.load %arg60[%c0_358, %c0_359] : memref<1x32xf32, #tpu.memory_space<vmem>>, vector<1x32xf32>
    %c0_360 = arith.constant 0 : index
    %c0_361 = arith.constant 0 : index
    %838 = vector.load %arg61[%c0_360, %c0_361] : memref<1x32xf32, #tpu.memory_space<vmem>>, vector<1x32xf32>
    %839 = vector.extract_strided_slice %836 {offsets = [0, 0], sizes = [8, 32], strides = [1, 1]} : vector<10x32xf32> to vector<8x32xf32>
    %cst_362 = arith.constant dense<0.000000e+00> : vector<8xf32>
    %840 = vector.multi_reduction <add>, %839, %cst_362 [1] : vector<8x32xf32> to vector<8xf32>
    %841 = vector.shape_cast %840 : vector<8xf32> to vector<8x1xf32>
    %cst_363 = arith.constant 3.200000e+01 : f32
    %842 = vector.broadcast %cst_363 : f32 to vector<8x1xf32>
    %843 = arith.divf %841, %842 : vector<8x1xf32>
    %844 = vector.broadcast %843 : vector<8x1xf32> to vector<8x32xf32>
    %845 = arith.subf %839, %844 : vector<8x32xf32>
    %846 = arith.mulf %845, %845 : vector<8x32xf32>
    %cst_364 = arith.constant dense<0.000000e+00> : vector<8xf32>
    %847 = vector.multi_reduction <add>, %846, %cst_364 [1] : vector<8x32xf32> to vector<8xf32>
    %848 = vector.shape_cast %847 : vector<8xf32> to vector<8x1xf32>
    %cst_365 = arith.constant 3.200000e+01 : f32
    %849 = vector.broadcast %cst_365 : f32 to vector<8x1xf32>
    %850 = arith.divf %848, %849 : vector<8x1xf32>
    %cst_366 = arith.constant 9.99999974E-6 : f32
    %851 = vector.broadcast %cst_366 : f32 to vector<8x1xf32>
    %852 = arith.addf %850, %851 : vector<8x1xf32>
    %853 = math.rsqrt %852 : vector<8x1xf32>
    %854 = vector.broadcast %853 : vector<8x1xf32> to vector<8x32xf32>
    %855 = arith.mulf %845, %854 : vector<8x32xf32>
    %856 = vector.broadcast %837 : vector<1x32xf32> to vector<8x32xf32>
    %857 = arith.mulf %855, %856 : vector<8x32xf32>
    %858 = vector.broadcast %838 : vector<1x32xf32> to vector<8x32xf32>
    %859 = arith.addf %857, %858 : vector<8x32xf32>
    %c0_367 = arith.constant 0 : index
    %c0_368 = arith.constant 0 : index
    %860 = vector.load %arg62[%c0_367, %c0_368] : memref<32x16xf32, #tpu.memory_space<vmem>>, vector<32x16xf32>
    %c0_369 = arith.constant 0 : index
    %c0_370 = arith.constant 0 : index
    %861 = vector.load %arg63[%c0_369, %c0_370] : memref<1x16xf32, #tpu.memory_space<vmem>>, vector<1x16xf32>
    %cst_371 = arith.constant dense<0.000000e+00> : vector<8x16xf32>
    %862 = tpu.matmul %859, %860, %cst_371 {dimension_numbers = #tpu.dot_dimension_numbers<[1], [0], [0], [1], [0, 0, 1, 1], [], []>} : vector<8x32xf32>, vector<32x16xf32>, vector<8x16xf32> -> vector<8x16xf32>
    %863 = vector.broadcast %861 : vector<1x16xf32> to vector<8x16xf32>
    %864 = arith.addf %862, %863 : vector<8x16xf32>
    %c0_372 = arith.constant 0 : index
    %c0_373 = arith.constant 0 : index
    %865 = vector.load %arg64[%c0_372, %c0_373] : memref<8x16xf32, #tpu.memory_space<vmem>>, vector<8x16xf32>
    tpu.vector_store %arg64[%c0_372, %c0_373], %864 {strides = array<i32>} : memref<8x16xf32, #tpu.memory_space<vmem>>, vector<8x16xf32>,
    return
  }
}

</mosaic_0001>

<bundles_post_ra>
// kernel: eq.15
= control target key start
LH: loop header
LB: loop body
LE: loop exit
PB: predicated region body
PF: predicated region fallthrough
CT: control target
= control target key end

     0   :  { %s43_s10 = smov 32   ;;  %s44_s11 = smov 16   ;;  %vm3_vm0 = vcmask 64512   ;;  %vm9_vm1 = vcmask 326912   ;;  %vm15_vm2 = vcmask 261312   ;;  %vm21_vm3 = vcmask 195712   ;;  %s75_s0 = inlined_call_operand.vmem [shape: s32[5,8], index: 0, kind: input, shape index: {}]   ;;  %s76_s1 = inlined_call_operand.vmem [shape: s32[40], index: 1, kind: output, shape index: {}]  }
   0x1   :  { %v35_v0 = vld [vmem:[%s75_s0 + $0x4] sm:$0x1]   ;;  %v37_v1 = vld [vmem:[%s75_s0 + $0x2] sm:$0x1]   ;;  %v36_v2 = vld [vmem:[%s75_s0 + $0x3] sm:$0x1]  }
   0x2   :  { %7 = vrot.lane.b32.xlu0 %v35_v0, %s43_s10  ;;  %19 = vrot.lane.b32.xlu1 %v37_v1, %s44_s11  ;;  %v38_v3 = vld [vmem:[%s75_s0 + $0x1] sm:$0x1]   ;;  %s45_s16 = smov 24   ;;  %s46_s17 = smov 8   ;;  %v2_v4 = vld [vmem:[%s75_s0] sm:$0x1]  }
   0x3   :  { %4 = vst.msk [vmem:[#allocation0] sm:$0x1] %vm3_vm0, %v2_v4   ;;  %vm27_vm4 = vcmask 130112  }
   0xa   :  { %13 = vrot.lane.b32.xlu0 %v36_v2, %s45_s16  ;;  %25 = vrot.lane.b32.xlu1 %v38_v3, %s46_s17 }
  0x74   :  { %v8_v5 = vpop.permute.xlu0 %7   ;;  %v20_v6 = vpop.permute.xlu1 %19  }
  0x75   :  { %10 = vst.msk [vmem:[#allocation0] sm:$0x1] %vm9_vm1, %v8_v5  }
  0x7c   :  { %v14_v7 = vpop.permute.xlu0 %13   ;;  %v26_v8 = vpop.permute.xlu1 %25  }
  0x7d   :  { %16 = vst.msk [vmem:[#allocation0] sm:$0x1] %vm15_vm2, %v14_v7  }
  0x7e   :  { %22 = vst.msk [vmem:[#allocation0] sm:$0x1] %vm21_vm3, %v20_v6  }
  0x7f   :  { %28 = vst.msk [vmem:[#allocation0] sm:$0x1] %vm27_vm4, %v26_v8  }
  0x86   :  { %v31_v9 = vld [vmem:[#allocation0] sm:$0x1] }
  0x87   :  { %34 = vst [vmem:[%s76_s1] sm:$0x1] %v31_v9 }

// kernel: mae_forward.1
= control target key start
LH: loop header
LB: loop body
LE: loop exit
PB: predicated region body
PF: predicated region fallthrough
CT: control target
= control target key end

     0   :  { %s7275_s6 = smov 1   ;;  %s7276_s10 = smov 2   ;;  %s9537_s0 = inlined_call_operand.smem [shape: u32[65], index: -1, kind: input, shape index: {}] }
   0x1   :  { %s7381_s5 = sld [smem:[%s9537_s0]]   ;;  %s7277_s14 = smov 3  }
   0x2   :  { %s7386_s9 = sld [smem:[%s9537_s0 + %s7275_s6]]   ;;  %s7278_s18 = smov 4  }
   0x3   :  { %s7391_s13 = sld [smem:[%s9537_s0 + %s7276_s10]]   ;;  %s7279_s22 = smov 5  }
   0x4   :  { %s7396_s17 = sld [smem:[%s9537_s0 + %s7277_s14]]   ;;  %s7280_s26 = smov 6  }
   0x5   :  { %s7401_s21 = sld [smem:[%s9537_s0 + %s7278_s18]]   ;;  %s7281_s30 = smov 7  }
   0x6   :  { %s7406_s25 = sld [smem:[%s9537_s0 + %s7279_s22]]   ;;  %s7282_s4 = smov 8  }
   0x7   :  { %9565 = sst [smem:[#allocation49_spill]] %s7381_s5  ;;  %s7283_s10 = smov 9  }
   0x8   :  { %9566 = sst [smem:[#allocation50_spill]] %s7386_s9  ;;  %s7284_s15 = smov 10  }
   0x9   :  { %9567 = sst [smem:[#allocation51_spill]] %s7391_s13  ;;  %s7285_s20 = smov 11  }
   0xa   :  { %9568 = sst [smem:[#allocation52_spill]] %s7396_s17  ;;  %s7287_s1 = smov 13  }
   0xb   :  { %9569 = sst [smem:[#allocation53_spill]] %s7401_s21  ;;  %s7288_s7 = smov 14  }
   0xc   :  { %9570 = sst [smem:[#allocation54_spill]] %s7406_s25  ;;  %s7290_s22 = smov 16  }
   0xd   :  { %s7411_s29 = sld [smem:[%s9537_s0 + %s7280_s26]]   ;;  %s7286_s26 = smov 12  }
   0xe   :  { %s7416_s3 = sld [smem:[%s9537_s0 + %s7281_s30]]   ;;  %s7291_s28 = smov 17  }
   0xf   :  { %s7421_s8 = sld [smem:[%s9537_s0 + %s7282_s4]]  }
  0x10   :  { %s7426_s14 = sld [smem:[%s9537_s0 + %s7283_s10]]  }
  0x11   :  { %s7431_s19 = sld [smem:[%s9537_s0 + %s7284_s15]]   ;;  %s7289_s15 = smov 15  }
  0x12   :  { %s7436_s24 = sld [smem:[%s9537_s0 + %s7285_s20]]  }
  0x13   :  { %9571 = sst [smem:[#allocation55_spill]] %s7411_s29 }
  0x14   :  { %9572 = sst [smem:[#allocation56_spill]] %s7416_s3 }
  0x15   :  { %9573 = sst [smem:[#allocation57_spill]] %s7421_s8 }
  0x16   :  { %9574 = sst [smem:[#allocation58_spill]] %s7426_s14 }
  0x17   :  { %9575 = sst [smem:[#allocation59_spill]] %s7431_s19 }
  0x18   :  { %9576 = sst [smem:[#allocation60_spill]] %s7436_s24 }
  0x19   :  { %s7441_s30 = sld [smem:[%s9537_s0 + %s7286_s26]]  }
  0x1a   :  { %s7446_s6 = sld [smem:[%s9537_s0 + %s7287_s1]]  }
  0x1b   :  { %s7451_s12 = sld [smem:[%s9537_s0 + %s7288_s7]]   ;;  %s7292_s7 = smov 18  }
  0x1c   :  { %s7456_s20 = sld [smem:[%s9537_s0 + %s7289_s15]]   ;;  %s7293_s15 = smov 19  }
  0x1d   :  { %s7461_s27 = sld [smem:[%s9537_s0 + %s7290_s22]]   ;;  %s7294_s22 = smov 20  }
  0x1e   :  { %s7466_s4 = sld [smem:[%s9537_s0 + %s7291_s28]]   ;;  %s7295_s28 = smov 21  }
  0x1f   :  { %9577 = sst [smem:[#allocation61_spill]] %s7441_s30 }
  0x20   :  { %9578 = sst [smem:[#allocation62_spill]] %s7446_s6 }
  0x21   :  { %9579 = sst [smem:[#allocation63_spill]] %s7451_s12 }
  0x22   :  { %9580 = sst [smem:[#allocation64_spill]] %s7456_s20 }
  0x23   :  { %9581 = sst [smem:[#allocation65_spill]] %s7461_s27 }
  0x24   :  { %9582 = sst [smem:[#allocation66_spill]] %s7466_s4 }
  0x25   :  { %s7471_s17 = sld [smem:[%s9537_s0 + %s7292_s7]]   ;;  %s7296_s7 = smov 22  }
  0x26   :  { %s7476_s12 = sld [smem:[%s9537_s0 + %s7293_s15]]   ;;  %s7297_s15 = smov 23  }
  0x27   :  { %s7481_s27 = sld [smem:[%s9537_s0 + %s7294_s22]]   ;;  %s7298_s22 = smov 24  }
  0x28   :  { %s7486_s4 = sld [smem:[%s9537_s0 + %s7295_s28]]   ;;  %s7299_s28 = smov 25  }
  0x2b   :  { %9583 = sst [smem:[#allocation67_spill]] %s7471_s17 }
  0x2c   :  { %9584 = sst [smem:[#allocation68_spill]] %s7476_s12 }
  0x2d   :  { %9585 = sst [smem:[#allocation69_spill]] %s7481_s27 }
  0x2e   :  { %9586 = sst [smem:[#allocation70_spill]] %s7486_s4 }
  0x2f   :  { %s7491_s17 = sld [smem:[%s9537_s0 + %s7296_s7]]   ;;  %s7300_s7 = smov 26  }
  0x30   :  { %s7496_s12 = sld [smem:[%s9537_s0 + %s7297_s15]]   ;;  %s7301_s15 = smov 27  }
  0x31   :  { %s7501_s27 = sld [smem:[%s9537_s0 + %s7298_s22]]   ;;  %s7302_s22 = smov 28  }
  0x32   :  { %s7506_s4 = sld [smem:[%s9537_s0 + %s7299_s28]]   ;;  %s7303_s28 = smov 29  }
  0x35   :  { %9587 = sst [smem:[#allocation71_spill]] %s7491_s17 }
  0x36   :  { %9588 = sst [smem:[#allocation72_spill]] %s7496_s12 }
  0x37   :  { %9589 = sst [smem:[#allocation73_spill]] %s7501_s27 }
  0x38   :  { %9590 = sst [smem:[#allocation74_spill]] %s7506_s4 }
  0x39   :  { %s7511_s17 = sld [smem:[%s9537_s0 + %s7300_s7]]   ;;  %s7304_s7 = smov 30  }
  0x3a   :  { %s7516_s12 = sld [smem:[%s9537_s0 + %s7301_s15]]   ;;  %s7305_s15 = smov 31  }
  0x3b   :  { %s7521_s27 = sld [smem:[%s9537_s0 + %s7302_s22]]   ;;  %s7306_s22 = smov 32  }
  0x3c   :  { %s7526_s4 = sld [smem:[%s9537_s0 + %s7303_s28]]   ;;  %s7307_s28 = smov 33  }
  0x3f   :  { %9591 = sst [smem:[#allocation75_spill]] %s7511_s17 }
  0x40   :  { %9592 = sst [smem:[#allocation76_spill]] %s7516_s12 }
  0x41   :  { %9593 = sst [smem:[#allocation77_spill]] %s7521_s27 }
  0x42   :  { %9594 = sst [smem:[#allocation78_spill]] %s7526_s4 }
  0x43   :  { %s7531_s17 = sld [smem:[%s9537_s0 + %s7304_s7]]   ;;  %s7308_s7 = smov 34  }
  0x44   :  { %s7536_s12 = sld [smem:[%s9537_s0 + %s7305_s15]]   ;;  %s7309_s15 = smov 35  }
  0x45   :  { %s7541_s27 = sld [smem:[%s9537_s0 + %s7306_s22]]   ;;  %s7310_s22 = smov 36  }
  0x46   :  { %s7546_s4 = sld [smem:[%s9537_s0 + %s7307_s28]]   ;;  %s7311_s28 = smov 37  }
  0x49   :  { %9595 = sst [smem:[#allocation79_spill]] %s7531_s17 }
  0x4a   :  { %9596 = sst [smem:[#allocation80_spill]] %s7536_s12 }
  0x4b   :  { %9597 = sst [smem:[#allocation81_spill]] %s7541_s27 }
  0x4c   :  { %9598 = sst [smem:[#allocation82_spill]] %s7546_s4 }
  0x4d   :  { %s7551_s17 = sld [smem:[%s9537_s0 + %s7308_s7]]   ;;  %s7312_s7 = smov 38  }
  0x4e   :  { %s7556_s12 = sld [smem:[%s9537_s0 + %s7309_s15]]   ;;  %s7313_s15 = smov 39  }
  0x4f   :  { %s7561_s27 = sld [smem:[%s9537_s0 + %s7310_s22]]   ;;  %s7314_s22 = smov 40  }
  0x50   :  { %s7566_s4 = sld [smem:[%s9537_s0 + %s7311_s28]]   ;;  %s7315_s28 = smov 41  }
  0x51   :  { %s7571_s6 = sld [smem:[%s9537_s0 + %s7312_s7]]   ;;  %s7316_s7 = smov 42  }
  0x52   :  { %s7581_s20 = sld [smem:[%s9537_s0 + %s7314_s22]]   ;;  %s7318_s22 = smov 44  }
  0x53   :  { %s7586_s30 = sld [smem:[%s9537_s0 + %s7315_s28]]   ;;  %s7319_s28 = smov 45  }
  0x54   :  { %9599 = sst [smem:[#allocation83_spill]] %s7556_s12 }
  0x55   :  { %s7576_s12 = sld [smem:[%s9537_s0 + %s7313_s15]]   ;;  %s7317_s15 = smov 43  }
  0x56   :  { %s7591_s24 = sld [smem:[%s9537_s0 + %s7316_s7]]   ;;  %s7320_s7 = smov 46  }
  0x57   :  { %s7596_s13 = sld [smem:[%s9537_s0 + %s7317_s15]]   ;;  %s7321_s15 = smov 47  }
  0x58   :  { %9600 = sst [smem:[#allocation84_spill]] %s7581_s20 }
  0x59   :  { %9601 = sst [smem:[#allocation85_spill]] %s7586_s30 }
  0x5a   :  { %s7601_s20 = sld [smem:[%s9537_s0 + %s7318_s22]]   ;;  %s7322_s22 = smov 48  }
  0x5b   :  { %s7606_s30 = sld [smem:[%s9537_s0 + %s7319_s28]]   ;;  %s7323_s28 = smov 49  }
  0x5c   :  { %s7611_s19 = sld [smem:[%s9537_s0 + %s7320_s7]]   ;;  %s7324_s7 = smov 50  }
  0x5d   :  { %s7616_s8 = sld [smem:[%s9537_s0 + %s7321_s15]]   ;;  %s7325_s15 = smov 51  }
  0x5e   :  { %s7621_s3 = sld [smem:[%s9537_s0 + %s7322_s22]]   ;;  %s7326_s22 = smov 52  }
  0x5f   :  { %s7631_s14 = sld [smem:[%s9537_s0 + %s7324_s7]]   ;;  %s7328_s7 = smov 54  }
  0x60   :  { %s7641_s25 = sld [smem:[%s9537_s0 + %s7326_s22]]   ;;  %s7330_s22 = smov 56  }
  0x61   :  { %9602 = sst [smem:[#allocation86_spill]] %s7606_s30 }
  0x62   :  { %s7626_s30 = sld [smem:[%s9537_s0 + %s7323_s28]]   ;;  %s7327_s28 = smov 53  }
  0x63   :  { %9603 = sst [smem:[#allocation87_spill]] %s7616_s8 }
  0x64   :  { %s7636_s8 = sld [smem:[%s9537_s0 + %s7325_s15]]   ;;  %s7329_s15 = smov 55  }
  0x65   :  { %s7646_s9 = sld [smem:[%s9537_s0 + %s7327_s28]]   ;;  %s7331_s28 = smov 57  }
  0x66   :  { %9606 = sst [smem:[#allocation90_spill]] %s7641_s25 }
  0x67   :  { %s7651_s29 = sld [smem:[%s9537_s0 + %s7328_s7]]   ;;  %s7332_s7 = smov 58  }
  0x68   :  { %9604 = sst [smem:[#allocation88_spill]] %s7626_s30 }
  0x69   :  { %s7661_s25 = sld [smem:[%s9537_s0 + %s7330_s22]]   ;;  %s7334_s22 = smov 60  }
  0x6a   :  { %9605 = sst [smem:[#allocation89_spill]] %s7636_s8 }
  0x6b   :  { %9607 = sst [smem:[#allocation91_spill]] %s7646_s9 }
  0x6c   :  { %s7656_s8 = sld [smem:[%s9537_s0 + %s7329_s15]]   ;;  %s7333_s15 = smov 59  }
  0x6d   :  { %s7666_s5 = sld [smem:[%s9537_s0 + %s7331_s28]]   ;;  %s7335_s28 = smov 61  }
  0x6e   :  { %s7671_s21 = sld [smem:[%s9537_s0 + %s7332_s7]]   ;;  %s7336_s7 = smov 62  }
  0x6f   :  { %9609 = sst [smem:[#allocation93_spill]] %s7661_s25 }
  0x70   :  { %s7681_s25 = sld [smem:[%s9537_s0 + %s7334_s22]]   ;;  %s7338_s22 = smov 64  }
  0x71   :  { %s7686_s9 = sld [smem:[%s9537_s0 + %s7335_s28]]  }
  0x72   :  { %9608 = sst [smem:[#allocation92_spill]] %s7656_s8 }
  0x73   :  { %s7676_s8 = sld [smem:[%s9537_s0 + %s7333_s15]]   ;;  %s7337_s15 = smov 63  }
  0x74   :  { %9610 = sst [smem:[#allocation94_spill]] %s7671_s21 }
  0x75   :  { %s7691_s21 = sld [smem:[%s9537_s0 + %s7336_s7]]  }
  0x76   :  { %s7701_s30 = sld [smem:[%s9537_s0 + %s7338_s22]]  }
  0x79   :  { %9611 = sst [smem:[#allocation95_spill]] %s7676_s8 }
  0x7a   :  { %s7696_s8 = sld [smem:[%s9537_s0 + %s7337_s15]]  }
  0x7b   :  { %134 = vsyncpa [#allocation5], 0 }
  0x7c   :  { %135 = vsyncpa [#allocation8], 0 }
  0x7d   :  { %136 = vsyncpa [#allocation11], 0 }
  0x7e   :  { %137 = vsyncpa [#allocation14], 0 }
  0x7f   :  { %138 = vsyncpa [#allocation17], 0 }
  0x80   :  { %139 = vsyncpa [#allocation20], 0 }
  0x81   :  { %140 = vsyncpa [#allocation23], 0 }
  0x82   :  { %141 = vsyncpa [#allocation26], 0 }
  0x83   :  { %142 = vsyncpa [#allocation29], 0 }
  0x84   :  { %143 = vsyncpa [#allocation32], 0 }
  0x85   :  { %144 = vsyncpa [#allocation35], 0  ;;  %s232_s28 = sshll.u32 %s7561_s27, 4  ;;  %s233_s28 = int_to_ptr.hbm [resolvable:$true] %s232_s28 }
  0x86   :  { %145 = vsyncpa [#allocation6], 0  ;;  %s7339_s0 = smov [#allocation7]   ;;  %s254_s2 = sshll.u32 %s7571_s6, 4  ;;  %s255_s2 = int_to_ptr.hbm [resolvable:$true] %s254_s2 }
  0x87   :  { %s234_s1 = sshll.u32 %s7339_s0, 4  ;;  %s6747_s7 = sshra.s32 %s233_s28, 4  ;;  %s235_s1 = int_to_ptr.vmem [resolvable:$true] %s234_s1  ;;  %s6748_s7 = int_to_ptr.hbm [resolvable:$true] %s6747_s7 }
  0x88   :  { %s6749_s10 = scalar_lea.hbm %s6748_s7, 1  ;;  %s6751_s11 = scalar_lea.hbm %s7561_s27, 1 }
  0x89   :  { %p6750_p0 = scmp.ne.s32.totalorder %s6748_s7, %s6749_s10  ;;  %p6752_p1 = scmp.lt.s32.totalorder %s6748_s7, %s7561_s27 }
  0x8a   :  { %p6753_p2 = scmp.lt.s32.totalorder %s6751_s11, %s6749_s10 }
  0x8c   :  { %p6754_p3 = por %p6753_p2, %p6752_p1 }
  0x8e   :  { %p6755_p4 = pnand %p6754_p3, %p6750_p0 }
  0x90   :  { %6758 = shalt.err (!%p6755_p4)
}
  0x91   :  { %237 = dma.hbm_to_vmem [thread:$0]  %s233_s28, 16, %s235_s1, [#allocation8]  }
  0x92   :  { %s7340_s15 = smov [#allocation10]   ;;  %s280_s18 = sshll.u32 %s7591_s24, 4  ;;  %s281_s18 = int_to_ptr.hbm [resolvable:$true] %s280_s18 }
  0x93   :  { %s256_s16 = sshll.u32 %s7340_s15, 4  ;;  %s6771_s22 = sshra.s32 %s255_s2, 4  ;;  %s257_s16 = int_to_ptr.vmem [resolvable:$true] %s256_s16  ;;  %s6772_s22 = int_to_ptr.hbm [resolvable:$true] %s6771_s22 }
  0x94   :  { %s6773_s23 = scalar_lea.hbm %s6772_s22, 1  ;;  %s6775_s26 = scalar_lea.hbm %s7571_s6, 1 }
  0x95   :  { %p6774_p5 = scmp.ne.s32.totalorder %s6772_s22, %s6773_s23  ;;  %p6776_p6 = scmp.lt.s32.totalorder %s6772_s22, %s7571_s6 }
  0x96   :  { %p6777_p7 = scmp.lt.s32.totalorder %s6775_s26, %s6773_s23 }
  0x98   :  { %p6778_p8 = por %p6777_p7, %p6776_p6 }
  0x9a   :  { %p6779_p9 = pnand %p6778_p8, %p6774_p5 }
  0x9c   :  { %6782 = shalt.err (!%p6779_p9)
}
  0x9d   :  { %259 = dma.hbm_to_vmem [thread:$0]  %s255_s2, 16, %s257_s16, [#allocation11]  }
  0x9e   :  { %s302_s27 = sshll.u32 %s7601_s20, 4  ;;  %s7341_s28 = smov [#allocation13]   ;;  %s303_s27 = int_to_ptr.hbm [resolvable:$true] %s302_s27 }
  0x9f   :  { %s282_s0 = sshll.u32 %s7341_s28, 4  ;;  %s6795_s1 = sshra.s32 %s281_s18, 4  ;;  %s283_s0 = int_to_ptr.vmem [resolvable:$true] %s282_s0  ;;  %s6796_s1 = int_to_ptr.hbm [resolvable:$true] %s6795_s1 }
  0xa0   :  { %s6797_s7 = scalar_lea.hbm %s6796_s1, 1  ;;  %s6799_s10 = scalar_lea.hbm %s7591_s24, 1 }
  0xa1   :  { %p6798_p10 = scmp.ne.s32.totalorder %s6796_s1, %s6797_s7  ;;  %p6800_p11 = scmp.lt.s32.totalorder %s6796_s1, %s7591_s24 }
  0xa2   :  { %p6801_p12 = scmp.lt.s32.totalorder %s6799_s10, %s6797_s7 }
  0xa4   :  { %p6802_p13 = por %p6801_p12, %p6800_p11 }
  0xa6   :  { %p6803_p0 = pnand %p6802_p13, %p6798_p10 }
  0xa8   :  { %6806 = shalt.err (!%p6803_p0)
}
  0xa9   :  { %285 = dma.hbm_to_vmem [thread:$0]  %s281_s18, 16, %s283_s0, [#allocation14]  }
  0xaa   :  { %s7342_s6 = smov [#allocation16]   ;;  %s328_s11 = sshll.u32 %s7621_s3, 4  ;;  %s329_s11 = int_to_ptr.hbm [resolvable:$true] %s328_s11 }
  0xab   :  { %s304_s2 = sshll.u32 %s7342_s6, 4  ;;  %s6819_s15 = sshra.s32 %s303_s27, 4  ;;  %s305_s2 = int_to_ptr.vmem [resolvable:$true] %s304_s2  ;;  %s6820_s15 = int_to_ptr.hbm [resolvable:$true] %s6819_s15 }
  0xac   :  { %s6821_s16 = scalar_lea.hbm %s6820_s15, 1  ;;  %s6823_s22 = scalar_lea.hbm %s7601_s20, 1 }
  0xad   :  { %p6822_p1 = scmp.ne.s32.totalorder %s6820_s15, %s6821_s16  ;;  %p6824_p2 = scmp.lt.s32.totalorder %s6820_s15, %s7601_s20 }
  0xae   :  { %p6825_p3 = scmp.lt.s32.totalorder %s6823_s22, %s6821_s16 }
  0xb0   :  { %p6826_p4 = por %p6825_p3, %p6824_p2 }
  0xb2   :  { %p6827_p5 = pnand %p6826_p4, %p6822_p1 }
  0xb4   :  { %6830 = shalt.err (!%p6827_p5)
}
  0xb5   :  { %307 = dma.hbm_to_vmem [thread:$0]  %s303_s27, 16, %s305_s2, [#allocation17]  }
  0xb6   :  { %s350_s24 = sshll.u32 %s7631_s14, 4  ;;  %s7343_s18 = smov [#allocation19]   ;;  %s351_s24 = int_to_ptr.hbm [resolvable:$true] %s350_s24 }
  0xb7   :  { %s330_s23 = sshll.u32 %s7343_s18, 4  ;;  %s6843_s26 = sshra.s32 %s329_s11, 4  ;;  %s331_s23 = int_to_ptr.vmem [resolvable:$true] %s330_s23  ;;  %s6844_s26 = int_to_ptr.hbm [resolvable:$true] %s6843_s26 }
  0xb8   :  { %s6845_s28 = scalar_lea.hbm %s6844_s26, 1  ;;  %s6847_s0 = scalar_lea.hbm %s7621_s3, 1 }
  0xb9   :  { %p6846_p6 = scmp.ne.s32.totalorder %s6844_s26, %s6845_s28  ;;  %p6848_p7 = scmp.lt.s32.totalorder %s6844_s26, %s7621_s3 }
  0xba   :  { %p6849_p8 = scmp.lt.s32.totalorder %s6847_s0, %s6845_s28 }
  0xbc   :  { %p6850_p9 = por %p6849_p8, %p6848_p7 }
  0xbe   :  { %p6851_p10 = pnand %p6850_p9, %p6846_p6 }
  0xc0   :  { %6854 = shalt.err (!%p6851_p10)
}
  0xc1   :  { %333 = dma.hbm_to_vmem [thread:$0]  %s329_s11, 16, %s331_s23, [#allocation20]  }
  0xc2   :  { %s7344_s20 = smov [#allocation22]   ;;  %s376_s1 = sshll.u32 %s7651_s29, 4  ;;  %s377_s1 = int_to_ptr.hbm [resolvable:$true] %s376_s1 }
  0xc3   :  { %s352_s27 = sshll.u32 %s7344_s20, 4  ;;  %s6867_s7 = sshra.s32 %s351_s24, 4  ;;  %s353_s27 = int_to_ptr.vmem [resolvable:$true] %s352_s27  ;;  %s6868_s7 = int_to_ptr.hbm [resolvable:$true] %s6867_s7 }
  0xc4   :  { %s6869_s10 = scalar_lea.hbm %s6868_s7, 1  ;;  %s6871_s6 = scalar_lea.hbm %s7631_s14, 1 }
  0xc5   :  { %p6870_p11 = scmp.ne.s32.totalorder %s6868_s7, %s6869_s10  ;;  %p6872_p12 = scmp.lt.s32.totalorder %s6868_s7, %s7631_s14 }
  0xc6   :  { %p6873_p13 = scmp.lt.s32.totalorder %s6871_s6, %s6869_s10 }
  0xc8   :  { %p6874_p0 = por %p6873_p13, %p6872_p12 }
  0xca   :  { %p6875_p1 = pnand %p6874_p0, %p6870_p11 }
  0xcc   :  { %6878 = shalt.err (!%p6875_p1)
}
  0xcd   :  { %355 = dma.hbm_to_vmem [thread:$0]  %s351_s24, 16, %s353_s27, [#allocation23]  }
  0xce   :  { %s400_s3 = sshll.u32 %s7666_s5, 4  ;;  %s7345_s2 = smov [#allocation25]   ;;  %s401_s3 = int_to_ptr.hbm [resolvable:$true] %s400_s3 }
  0xcf   :  { %s378_s11 = sshll.u32 %s7345_s2, 4  ;;  %s6891_s15 = sshra.s32 %s377_s1, 4  ;;  %s379_s11 = int_to_ptr.vmem [resolvable:$true] %s378_s11  ;;  %s6892_s15 = int_to_ptr.hbm [resolvable:$true] %s6891_s15 }
  0xd0   :  { %s6893_s16 = scalar_lea.hbm %s6892_s15, 1  ;;  %s6895_s22 = scalar_lea.hbm %s7651_s29, 1 }
  0xd1   :  { %p6894_p2 = scmp.ne.s32.totalorder %s6892_s15, %s6893_s16  ;;  %p6896_p3 = scmp.lt.s32.totalorder %s6892_s15, %s7651_s29 }
  0xd2   :  { %p6897_p4 = scmp.lt.s32.totalorder %s6895_s22, %s6893_s16 }
  0xd4   :  { %p6898_p5 = por %p6897_p4, %p6896_p3 }
  0xd6   :  { %p6899_p6 = pnand %p6898_p5, %p6894_p2 }
  0xd8   :  { %6902 = shalt.err (!%p6899_p6)
}
  0xd9   :  { %381 = dma.hbm_to_vmem [thread:$0]  %s377_s1, 16, %s379_s11, [#allocation26]  }
  0xda   :  { %s7346_s14 = smov [#allocation28]   ;;  %s424_s18 = sshll.u32 %s7681_s25, 4  ;;  %s425_s18 = int_to_ptr.hbm [resolvable:$true] %s424_s18 }
  0xdb   :  { %s402_s24 = sshll.u32 %s7346_s14, 4  ;;  %s6915_s23 = sshra.s32 %s401_s3, 4  ;;  %s403_s24 = int_to_ptr.vmem [resolvable:$true] %s402_s24  ;;  %s6916_s23 = int_to_ptr.hbm [resolvable:$true] %s6915_s23 }
  0xdc   :  { %s6917_s26 = scalar_lea.hbm %s6916_s23, 1  ;;  %s6919_s28 = scalar_lea.hbm %s7666_s5, 1 }
  0xdd   :  { %p6918_p7 = scmp.ne.s32.totalorder %s6916_s23, %s6917_s26  ;;  %p6920_p8 = scmp.lt.s32.totalorder %s6916_s23, %s7666_s5 }
  0xde   :  { %p6921_p9 = scmp.lt.s32.totalorder %s6919_s28, %s6917_s26 }
  0xe0   :  { %p6922_p10 = por %p6921_p9, %p6920_p8 }
  0xe2   :  { %p6923_p11 = pnand %p6922_p10, %p6918_p7 }
  0xe4   :  { %6926 = shalt.err (!%p6923_p11)
}
  0xe5   :  { %405 = dma.hbm_to_vmem [thread:$0]  %s401_s3, 16, %s403_s24, [#allocation29]  }
  0xe6   :  { %s219_s29 = sshll.u32 %s7551_s17, 4  ;;  %s7347_s0 = smov [#allocation31]   ;;  %s220_s29 = int_to_ptr.hbm [resolvable:$true] %s219_s29 }
  0xe7   :  { %s426_s20 = sshll.u32 %s7347_s0, 4  ;;  %s6939_s27 = sshra.s32 %s425_s18, 4  ;;  %s427_s20 = int_to_ptr.vmem [resolvable:$true] %s426_s20  ;;  %s6940_s27 = int_to_ptr.hbm [resolvable:$true] %s6939_s27 }
  0xe8   :  { %s6941_s1 = scalar_lea.hbm %s6940_s27, 1  ;;  %s6943_s7 = scalar_lea.hbm %s7681_s25, 1 }
  0xe9   :  { %p6942_p12 = scmp.ne.s32.totalorder %s6940_s27, %s6941_s1  ;;  %p6944_p13 = scmp.lt.s32.totalorder %s6940_s27, %s7681_s25 }
  0xea   :  { %p6945_p0 = scmp.lt.s32.totalorder %s6943_s7, %s6941_s1 }
  0xec   :  { %p6946_p1 = por %p6945_p0, %p6944_p13 }
  0xee   :  { %p6947_p2 = pnand %p6946_p1, %p6942_p12 }
  0xf0   :  { %6950 = shalt.err (!%p6947_p2)
}
  0xf1   :  { %429 = dma.hbm_to_vmem [thread:$0]  %s425_s18, 16, %s427_s20, [#allocation32]  }
  0xf2   :  { %s7348_s5 = smov [#allocation4]   ;;  %s243_s6 = sshll.u32 %s7566_s4, 4  ;;  %s244_s6 = int_to_ptr.hbm [resolvable:$true] %s243_s6 }
  0xf3   :  { %s221_s10 = sshll.u32 %s7348_s5, 4  ;;  %s6963_s3 = sshra.s32 %s220_s29, 4  ;;  %s222_s10 = int_to_ptr.vmem [resolvable:$true] %s221_s10  ;;  %s6964_s3 = int_to_ptr.hbm [resolvable:$true] %s6963_s3 }
  0xf4   :  { %s6965_s2 = scalar_lea.hbm %s6964_s3, 1  ;;  %s6967_s11 = scalar_lea.hbm %s7551_s17, 1 }
  0xf5   :  { %p6966_p3 = scmp.ne.s32.totalorder %s6964_s3, %s6965_s2  ;;  %p6968_p4 = scmp.lt.s32.totalorder %s6964_s3, %s7551_s17 }
  0xf6   :  { %p6969_p5 = scmp.lt.s32.totalorder %s6967_s11, %s6965_s2 }
  0xf8   :  { %p6970_p6 = por %p6969_p5, %p6968_p4 }
  0xfa   :  { %p6971_p7 = pnand %p6970_p6, %p6966_p3 }
  0xfc   :  { %6974 = shalt.err (!%p6971_p7)
}
  0xfd   :  { %224 = dma.hbm_to_vmem [thread:$0]  %s220_s29, 16, %s222_s10, [#allocation5]  }
  0xfe   :  { %s265_s25 = sshll.u32 %s7576_s12, 4  ;;  %s7349_s15 = smov [#allocation9]   ;;  %s266_s25 = int_to_ptr.hbm [resolvable:$true] %s265_s25 }
  0xff   :  { %s245_s16 = sshll.u32 %s7349_s15, 4  ;;  %s6987_s22 = sshra.s32 %s244_s6, 4  ;;  %s246_s16 = int_to_ptr.vmem [resolvable:$true] %s245_s16  ;;  %s6988_s22 = int_to_ptr.hbm [resolvable:$true] %s6987_s22 }
 0x100   :  { %s6989_s14 = scalar_lea.hbm %s6988_s22, 1  ;;  %s6991_s24 = scalar_lea.hbm %s7566_s4, 1 }
 0x101   :  { %p6990_p8 = scmp.ne.s32.totalorder %s6988_s22, %s6989_s14  ;;  %p6992_p9 = scmp.lt.s32.totalorder %s6988_s22, %s7566_s4 }
 0x102   :  { %p6993_p10 = scmp.lt.s32.totalorder %s6991_s24, %s6989_s14 }
 0x104   :  { %p6994_p11 = por %p6993_p10, %p6992_p9 }
 0x106   :  { %p6995_p12 = pnand %p6994_p11, %p6990_p8 }
 0x108   :  { %6998 = shalt.err (!%p6995_p12)
}
 0x109   :  { %248 = dma.hbm_to_vmem [thread:$0]  %s244_s6, 16, %s246_s16, [#allocation8]  }
 0x10a   :  { %s7350_s17 = smov [#allocation12]   ;;  %s291_s23 = sshll.u32 %s7596_s13, 4  ;;  %s292_s23 = int_to_ptr.hbm [resolvable:$true] %s291_s23 }
 0x10b   :  { %s267_s18 = sshll.u32 %s7350_s17, 4  ;;  %s7011_s26 = sshra.s32 %s266_s25, 4  ;;  %s268_s18 = int_to_ptr.vmem [resolvable:$true] %s267_s18  ;;  %s7012_s26 = int_to_ptr.hbm [resolvable:$true] %s7011_s26 }
 0x10c   :  { %s7013_s28 = scalar_lea.hbm %s7012_s26, 1  ;;  %s7015_s29 = scalar_lea.hbm %s7576_s12, 1 }
 0x10d   :  { %p7014_p13 = scmp.ne.s32.totalorder %s7012_s26, %s7013_s28  ;;  %p7016_p0 = scmp.lt.s32.totalorder %s7012_s26, %s7576_s12 }
 0x10e   :  { %p7017_p1 = scmp.lt.s32.totalorder %s7015_s29, %s7013_s28 }
 0x110   :  { %p7018_p2 = por %p7017_p1, %p7016_p0 }
 0x112   :  { %p7019_p3 = pnand %p7018_p2, %p7014_p13 }
 0x114   :  { %7022 = shalt.err (!%p7019_p3)
}
 0x115   :  { %270 = dma.hbm_to_vmem [thread:$0]  %s266_s25, 16, %s268_s18, [#allocation11]  }
 0x116   :  { %s315_s4 = sshll.u32 %s7611_s19, 4  ;;  %s7351_s0 = smov [#allocation15]   ;;  %s316_s4 = int_to_ptr.hbm [resolvable:$true] %s315_s4 }
 0x117   :  { %s293_s20 = sshll.u32 %s7351_s0, 4  ;;  %s7035_s27 = sshra.s32 %s292_s23, 4  ;;  %s294_s20 = int_to_ptr.vmem [resolvable:$true] %s293_s20  ;;  %s7036_s27 = int_to_ptr.hbm [resolvable:$true] %s7035_s27 }
 0x118   :  { %s7037_s1 = scalar_lea.hbm %s7036_s27, 1  ;;  %s7039_s7 = scalar_lea.hbm %s7596_s13, 1 }
 0x119   :  { %p7038_p4 = scmp.ne.s32.totalorder %s7036_s27, %s7037_s1  ;;  %p7040_p5 = scmp.lt.s32.totalorder %s7036_s27, %s7596_s13 }
 0x11a   :  { %p7041_p6 = scmp.lt.s32.totalorder %s7039_s7, %s7037_s1 }
 0x11c   :  { %p7042_p7 = por %p7041_p6, %p7040_p5 }
 0x11e   :  { %p7043_p8 = pnand %p7042_p7, %p7038_p4 }
 0x120   :  { %7046 = shalt.err (!%p7043_p8)
}
 0x121   :  { %296 = dma.hbm_to_vmem [thread:$0]  %s292_s23, 16, %s294_s20, [#allocation14]  }
 0x122   :  { %s9612_s12 = sld [smem:[#allocation88_spill]]  ;;  %s7352_s5 = smov [#allocation18]  }
 0x123   :  { %s317_s10 = sshll.u32 %s7352_s5, 4  ;;  %s7059_s3 = sshra.s32 %s316_s4, 4  ;;  %s318_s10 = int_to_ptr.vmem [resolvable:$true] %s317_s10  ;;  %s7060_s3 = int_to_ptr.hbm [resolvable:$true] %s7059_s3 }
 0x124   :  { %s7061_s2 = scalar_lea.hbm %s7060_s3, 1  ;;  %s7063_s11 = scalar_lea.hbm %s7611_s19, 1 }
 0x125   :  { %p7062_p9 = scmp.ne.s32.totalorder %s7060_s3, %s7061_s2  ;;  %p7064_p10 = scmp.lt.s32.totalorder %s7060_s3, %s7611_s19 }
 0x126   :  { %p7065_p11 = scmp.lt.s32.totalorder %s7063_s11, %s7061_s2 }
 0x128   :  { %s339_s6 = sshll.u32 %s9612_s12, 4  ;;  %p7066_p12 = por %p7065_p11, %p7064_p10  ;;  %s340_s6 = int_to_ptr.hbm [resolvable:$true] %s339_s6 }
 0x12a   :  { %p7067_p13 = pnand %p7066_p12, %p7062_p9 }
 0x12c   :  { %7070 = shalt.err (!%p7067_p13)
}
 0x12d   :  { %320 = dma.hbm_to_vmem [thread:$0]  %s316_s4, 16, %s318_s10, [#allocation17]  }
 0x12e   :  { %s9613_s13 = sld [smem:[#allocation91_spill]]  ;;  %s7353_s15 = smov [#allocation21]  }
 0x12f   :  { %s341_s16 = sshll.u32 %s7353_s15, 4  ;;  %s7083_s22 = sshra.s32 %s340_s6, 4  ;;  %s342_s16 = int_to_ptr.vmem [resolvable:$true] %s341_s16  ;;  %s7084_s22 = int_to_ptr.hbm [resolvable:$true] %s7083_s22 }
 0x130   :  { %s7085_s14 = scalar_lea.hbm %s7084_s22, 1  ;;  %s7087_s24 = scalar_lea.hbm %s9612_s12, 1 }
 0x131   :  { %p7086_p0 = scmp.ne.s32.totalorder %s7084_s22, %s7085_s14  ;;  %p7088_p1 = scmp.lt.s32.totalorder %s7084_s22, %s9612_s12 }
 0x132   :  { %p7089_p2 = scmp.lt.s32.totalorder %s7087_s24, %s7085_s14 }
 0x134   :  { %s365_s25 = sshll.u32 %s9613_s13, 4  ;;  %p7090_p3 = por %p7089_p2, %p7088_p1  ;;  %s366_s25 = int_to_ptr.hbm [resolvable:$true] %s365_s25 }
 0x136   :  { %p7091_p4 = pnand %p7090_p3, %p7086_p0 }
 0x138   :  { %7094 = shalt.err (!%p7091_p4)
}
 0x139   :  { %344 = dma.hbm_to_vmem [thread:$0]  %s340_s6, 16, %s342_s16, [#allocation20]  }
 0x13a   :  { %s9614_s19 = sld [smem:[#allocation92_spill]]  ;;  %s7354_s17 = smov [#allocation24]  }
 0x13b   :  { %s367_s18 = sshll.u32 %s7354_s17, 4  ;;  %s7107_s26 = sshra.s32 %s366_s25, 4  ;;  %s368_s18 = int_to_ptr.vmem [resolvable:$true] %s367_s18  ;;  %s7108_s26 = int_to_ptr.hbm [resolvable:$true] %s7107_s26 }
 0x13c   :  { %s7109_s28 = scalar_lea.hbm %s7108_s26, 1  ;;  %s7111_s29 = scalar_lea.hbm %s9613_s13, 1 }
 0x13d   :  { %p7110_p5 = scmp.ne.s32.totalorder %s7108_s26, %s7109_s28  ;;  %p7112_p6 = scmp.lt.s32.totalorder %s7108_s26, %s9613_s13 }
 0x13e   :  { %p7113_p7 = scmp.lt.s32.totalorder %s7111_s29, %s7109_s28 }
 0x140   :  { %s387_s23 = sshll.u32 %s9614_s19, 4  ;;  %p7114_p8 = por %p7113_p7, %p7112_p6  ;;  %s388_s23 = int_to_ptr.hbm [resolvable:$true] %s387_s23 }
 0x142   :  { %p7115_p9 = pnand %p7114_p8, %p7110_p5 }
 0x144   :  { %7118 = shalt.err (!%p7115_p9)
}
 0x145   :  { %370 = dma.hbm_to_vmem [thread:$0]  %s366_s25, 16, %s368_s18, [#allocation23]  }
 0x146   :  { %s9615_s4 = sld [smem:[#allocation95_spill]]  ;;  %s7355_s20 = smov [#allocation27]  }
 0x147   :  { %s389_s27 = sshll.u32 %s7355_s20, 4  ;;  %s7131_s1 = sshra.s32 %s388_s23, 4  ;;  %s390_s27 = int_to_ptr.vmem [resolvable:$true] %s389_s27  ;;  %s7132_s1 = int_to_ptr.hbm [resolvable:$true] %s7131_s1 }
 0x148   :  { %s7133_s7 = scalar_lea.hbm %s7132_s1, 1  ;;  %s7135_s12 = scalar_lea.hbm %s9614_s19, 1 }
 0x149   :  { %p7134_p10 = scmp.ne.s32.totalorder %s7132_s1, %s7133_s7  ;;  %p7136_p11 = scmp.lt.s32.totalorder %s7132_s1, %s9614_s19 }
 0x14a   :  { %p7137_p12 = scmp.lt.s32.totalorder %s7135_s12, %s7133_s7 }
 0x14c   :  { %s413_s0 = sshll.u32 %s9615_s4, 4  ;;  %p7138_p13 = por %p7137_p12, %p7136_p11  ;;  %s414_s0 = int_to_ptr.hbm [resolvable:$true] %s413_s0 }
 0x14e   :  { %p7139_p0 = pnand %p7138_p13, %p7134_p10 }
 0x150   :  { %7142 = shalt.err (!%p7139_p0)
}
 0x151   :  { %392 = dma.hbm_to_vmem [thread:$0]  %s388_s23, 16, %s390_s27, [#allocation26]  }
 0x152   :  { %s7356_s5 = smov [#allocation30]   ;;  %s435_s6 = sshll.u32 %s7686_s9, 4  ;;  %s436_s6 = int_to_ptr.hbm [resolvable:$true] %s435_s6 }
 0x153   :  { %s415_s10 = sshll.u32 %s7356_s5, 4  ;;  %s7155_s3 = sshra.s32 %s414_s0, 4  ;;  %s416_s10 = int_to_ptr.vmem [resolvable:$true] %s415_s10  ;;  %s7156_s3 = int_to_ptr.hbm [resolvable:$true] %s7155_s3 }
 0x154   :  { %s7157_s2 = scalar_lea.hbm %s7156_s3, 1  ;;  %s7159_s11 = scalar_lea.hbm %s9615_s4, 1 }
 0x155   :  { %p7158_p1 = scmp.ne.s32.totalorder %s7156_s3, %s7157_s2  ;;  %p7160_p2 = scmp.lt.s32.totalorder %s7156_s3, %s9615_s4 }
 0x156   :  { %p7161_p3 = scmp.lt.s32.totalorder %s7159_s11, %s7157_s2 }
 0x158   :  { %p7162_p4 = por %p7161_p3, %p7160_p2 }
 0x15a   :  { %p7163_p5 = pnand %p7162_p4, %p7158_p1 }
 0x15c   :  { %7166 = shalt.err (!%p7163_p5)
}
 0x15d   :  { %418 = dma.hbm_to_vmem [thread:$0]  %s414_s0, 16, %s416_s10, [#allocation29]  }
 0x15e   :  { %s448_s13 = sshll.u32 %s7696_s8, 4  ;;  %s7357_s25 = smov [#allocation33]   ;;  %s449_s13 = int_to_ptr.hbm [resolvable:$true] %s448_s13 }
 0x15f   :  { %s437_s15 = sshll.u32 %s7357_s25, 4  ;;  %s7179_s16 = sshra.s32 %s436_s6, 4  ;;  %s438_s15 = int_to_ptr.vmem [resolvable:$true] %s437_s15  ;;  %s7180_s16 = int_to_ptr.hbm [resolvable:$true] %s7179_s16 }
 0x160   :  { %s7181_s22 = scalar_lea.hbm %s7180_s16, 1  ;;  %s7183_s14 = scalar_lea.hbm %s7686_s9, 1 }
 0x161   :  { %p7182_p6 = scmp.ne.s32.totalorder %s7180_s16, %s7181_s22  ;;  %p7184_p7 = scmp.lt.s32.totalorder %s7180_s16, %s7686_s9 }
 0x162   :  { %p7185_p8 = scmp.lt.s32.totalorder %s7183_s14, %s7181_s22 }
 0x164   :  { %p7186_p9 = por %p7185_p8, %p7184_p7 }
 0x166   :  { %p7187_p10 = pnand %p7186_p9, %p7182_p6 }
 0x168   :  { %7190 = shalt.err (!%p7187_p10)
}
 0x169   :  { %440 = dma.hbm_to_vmem [thread:$0]  %s436_s6, 16, %s438_s15, [#allocation32]  }
 0x16a   :  { %s7358_s24 = smov [#allocation34]   ;;  %s7203_s17 = sshra.s32 %s449_s13, 4  ;;  %s7204_s17 = int_to_ptr.hbm [resolvable:$true] %s7203_s17 }
 0x16b   :  { %s450_s19 = sshll.u32 %s7358_s24, 4  ;;  %s7205_s18 = scalar_lea.hbm %s7204_s17, 1  ;;  %s451_s19 = int_to_ptr.vmem [resolvable:$true] %s450_s19 }
 0x16c   :  { %p7206_p11 = scmp.ne.s32.totalorder %s7204_s17, %s7205_s18  ;;  %s7207_s23 = scalar_lea.hbm %s7696_s8, 1 }
 0x16d   :  { %p7208_p12 = scmp.lt.s32.totalorder %s7204_s17, %s7696_s8  ;;  %p7209_p13 = scmp.lt.s32.totalorder %s7207_s23, %s7205_s18 }
 0x16f   :  { %p7210_p0 = por %p7209_p13, %p7208_p12 }
 0x171   :  { %p7211_p1 = pnand %p7210_p0, %p7206_p11 }
 0x173   :  { %7214 = shalt.err (!%p7211_p1)
}
 0x174   :  { %453 = dma.hbm_to_vmem [thread:$0]  %s449_s13, 16, %s451_s19, [#allocation35]  }
 0x175   :  { %7251 = dma.done.wait [#allocation5], 16  }
 0x176   :  { %7252 = vsyncadd [#allocation5], 4294967280 }
 0x177   :  { %7253 = dma.done.wait [#allocation8], 32  }
 0x178   :  { %7254 = vsyncadd [#allocation8], 4294967264 }
 0x179   :  { %7255 = dma.done.wait [#allocation11], 32  }
 0x17a   :  { %7256 = vsyncadd [#allocation11], 4294967264 }
 0x17b   :  { %7257 = dma.done.wait [#allocation14], 32  }
 0x17c   :  { %7258 = vsyncadd [#allocation14], 4294967264 }
 0x17d   :  { %7259 = dma.done.wait [#allocation17], 32  }
 0x17e   :  { %7260 = vsyncadd [#allocation17], 4294967264 }
 0x17f   :  { %7261 = dma.done.wait [#allocation20], 32  }
 0x180   :  { %7262 = vsyncadd [#allocation20], 4294967264 }
 0x181   :  { %7263 = dma.done.wait [#allocation23], 32  }
 0x182   :  { %7264 = vsyncadd [#allocation23], 4294967264 }
 0x183   :  { %7265 = dma.done.wait [#allocation26], 32  }
 0x184   :  { %7266 = vsyncadd [#allocation26], 4294967264 }
 0x185   :  { %7267 = dma.done.wait [#allocation29], 32  }
 0x186   :  { %7268 = vsyncadd [#allocation29], 4294967264 }
 0x187   :  { %7269 = dma.done.wait [#allocation32], 32  }
 0x188   :  { %7270 = vsyncadd [#allocation32], 4294967264 }
 0x189   :  { %7271 = dma.done.wait [#allocation35], 16  }
 0x18a   :  { %7272 = vsyncadd [#allocation35], 4294967280  ;;  %s9616_s9 = sld [smem:[#allocation53_spill]]  ;;  %vm583_vm0 = vcmask 523264   ;;  %vm657_vm1 = vcmask 261120   ;;  %v7359_v43 = vmov 32.0  }
 0x18b   :  { %s9617_s8 = sld [smem:[#allocation49_spill]]  ;;  %6387 = vrcp.f32 %v7359_v43  ;;  %s7360_s1 = smov 96  }
 0x18c   :  { %s9618_s26 = sld [smem:[#allocation55_spill]]  ;;  %s7361_s12 = smov 64  }
 0x18d   :  { %s9619_s28 = sld [smem:[#allocation50_spill]]  ;;  %s7362_s5 = smov 88  }
 0x18e   :  { %s9620_s29 = sld [smem:[#allocation54_spill]]  ;;  %s7363_s10 = smov 120  }
 0x18f   :  { %s9621_s4 = sld [smem:[#allocation58_spill]]  ;;  %s7364_s6 = smov 72  }
 0x190   :  { %v569_v0 = vld [vmem:[%s9616_s9 + $0x78] sm:$0xff]  ;;  %v568_v1 = vld [vmem:[%s9616_s9 + $0x70] sm:$0xff]  ;;  %v567_v2 = vld [vmem:[%s9616_s9 + $0x68] sm:$0xff]  ;;  %s9622_s0 = sld [smem:[#allocation56_spill]]  ;;  %s7365_s3 = smov 80  }
 0x191   :  { %596 = vmatpush.msra.mxu0 %v569_v0  ;;  %v577_v3 = vld [vmem:[%s9616_s9 + $0xb8] sm:$0xff]  ;;  %v566_v4 = vld [vmem:[%s9616_s9 + $0x60] sm:$0xff]  ;;  %v576_v5 = vld [vmem:[%s9616_s9 + $0xb0] sm:$0xff]  ;;  %v6388_v47 = vpop.eup %6387  ;;  %s9623_s20 = sld [smem:[#allocation57_spill]]  ;;  %s7366_s2 = smov 104  }
 0x192   :  { %633 = vmatpush.msra.mxu1 %v577_v3  ;;  %v575_v6 = vld [vmem:[%s9616_s9 + $0xa8] sm:$0xff]  ;;  %v565_v7 = vld [vmem:[%s9616_s9 + $0x58] sm:$0xff]  ;;  %v574_v8 = vld [vmem:[%s9616_s9 + $0xa0] sm:$0xff]  ;;  %v725_v52 = vmul.f32 32.0, %v6388_v47  ;;  %vm729_vm2 = vweird.f32 %v6388_v47  ;;  %s9624_s27 = sld [smem:[#allocation59_spill]]  ;;  %s7367_s11 = smov 112  }
 0x193   :  { %597 = vmatpush.msra.mxu0 %v568_v1  ;;  %v564_v9 = vld [vmem:[%s9616_s9 + $0x50] sm:$0xff]  ;;  %v563_v10 = vld [vmem:[%s9616_s9 + $0x48] sm:$0xff]  ;;  %v573_v11 = vld [vmem:[%s9616_s9 + $0x98] sm:$0xff]  ;;  %s9625_s7 = sld [smem:[#allocation51_spill]]  ;;  %s7368_s25 = smov 56  }
 0x194   :  { %634 = vmatpush.msra.mxu1 %v576_v5  ;;  %v572_v12 = vld [vmem:[%s9616_s9 + $0x90] sm:$0xff]  ;;  %v562_v13 = vld [vmem:[%s9616_s9 + $0x40] sm:$0xff]  ;;  %v571_v14 = vld [vmem:[%s9616_s9 + $0x88] sm:$0xff]  ;;  %v726_v57 = vsub.f32 1.0, %v725_v52  ;;  %s9626_s13 = sld [smem:[#allocation60_spill]]  ;;  %s7369_s15 = smov 40  }
 0x195   :  { %598 = vmatpush.msra.mxu0 %v567_v2  ;;  %v561_v15 = vld [vmem:[%s9616_s9 + $0x38] sm:$0xff]  ;;  %v570_v16 = vld [vmem:[%s9616_s9 + $0x80] sm:$0xff]  ;;  %v560_v17 = vld [vmem:[%s9616_s9 + $0x30] sm:$0xff]  ;;  %s7370_s16 = smov 48   ;;  %s9627_s22 = sld [smem:[#allocation61_spill]] }
 0x196   :  { %635 = vmatpush.msra.mxu1 %v575_v6  ;;  %v559_v18 = vld [vmem:[%s9616_s9 + $0x28] sm:$0xff]  ;;  %v558_v20 = vld [vmem:[%s9616_s9 + $0x20] sm:$0xff]  ;;  %v557_v21 = vld [vmem:[%s9616_s9 + $0x18] sm:$0xff]  ;;  %v727_v61 = vmul.f32 %v6388_v47, %v726_v57  ;;  %s9628_s14 = sld [smem:[#allocation64_spill]] }
 0x197   :  { %599 = vmatpush.msra.mxu0 %v566_v4  ;;  %v535_v19 = vld [vmem:[%s9617_s8 + $0x8] sm:$0xff]  ;;  %v556_v22 = vld [vmem:[%s9616_s9 + $0x10] sm:$0xff]  ;;  %v537_v23 = vld [vmem:[%s9617_s8 + $0x18] sm:$0xff]  ;;  %s9629_s24 = sld [smem:[#allocation62_spill]] }
 0x198   :  { %636 = vmatpush.msra.mxu1 %v574_v8  ;;  %v6346_v24 = vld [vmem:[%s9618_s26] ss:$0 sm:$0xff]  ;;  %v555_v25 = vld [vmem:[%s9616_s9 + $0x8] sm:$0xff]  ;;  %v536_v33 = vld [vmem:[%s9617_s8 + $0x10] sm:$0xff]  ;;  %v728_v3 = vadd.f32 %v6388_v47, %v727_v61  ;;  %s9630_s19 = sld [smem:[#allocation63_spill]] }
 0x199   :  { %600 = vmatpush.msra.mxu0 %v565_v7  ;;  %658 = vst.msk [vmem:[#allocation2] sm:$0xff] %vm657_vm1, %v6346_v24  ;;  %v554_v26 = vld [vmem:[%s9616_s9] sm:$0xff]  ;;  %v539_v29 = vld [vmem:[%s9617_s8 + $0x28] sm:$0xff]  ;;  %v541_v34 = vld [vmem:[%s9617_s8 + $0x38] sm:$0xff]  ;;  %s9631_s17 = sld [smem:[#allocation66_spill]] }
 0x19a   :  { %637 = vmatpush.msra.mxu1 %v573_v11  ;;  %v534_v27 = vld [vmem:[%s9617_s8] sm:$0xff]  ;;  %v540_v36 = vld [vmem:[%s9617_s8 + $0x30] sm:$0xff]  ;;  %v543_v46 = vld [vmem:[%s9619_s28 + $0x8] sm:$0xff]  ;;  %v7824_v7 = vsel %vm729_vm2, %v6388_v47, %v728_v3  ;;  %s9632_s18 = sld [smem:[#allocation65_spill]] }
 0x19b   :  { %601 = vmatpush.msra.mxu0 %v564_v9  ;;  %v542_v28 = vld [vmem:[%s9619_s28] sm:$0xff]  ;;  %v544_v56 = vld [vmem:[%s9619_s28 + $0x10] sm:$0xff]  ;;  %v545_v2 = vld [vmem:[%s9619_s28 + $0x18] sm:$0xff]  ;;  %s9633_s23 = sld [smem:[#allocation67_spill]] }
 0x19c   :  { %638 = vmatpush.msra.mxu1 %v572_v12  ;;  %v538_v35 = vld [vmem:[%s9617_s8 + $0x20] sm:$0xff]  ;;  %s9634_s9 = sld [smem:[#allocation70_spill]] }
 0x19d   :  { %602 = vmatpush.msra.mxu0 %v563_v10  ;;  %v6347_v38 = vld [vmem:[%s9620_s29] ss:$0 sm:$0xff]  ;;  %s9635_s8 = sld [smem:[#allocation68_spill]] }
 0x19e   :  { %639 = vmatpush.msra.mxu1 %v571_v14  ;;  %v546_v11 = vld [vmem:[%s9619_s28 + $0x20] sm:$0xff]  ;;  %s9636_s26 = sld [smem:[#allocation69_spill]] }
 0x19f   :  { %603 = vmatpush.msra.mxu0 %v562_v13  ;;  %s9637_s28 = sld [smem:[#allocation71_spill]] }
 0x1a0   :  { %640 = vmatpush.msra.mxu1 %v570_v16  ;;  %v663_v30 = vld [vmem:[#allocation2] sm:$0xff]  ;;  %s9638_s29 = sld [smem:[#allocation72_spill]] }
 0x1a1   :  { %604 = vmatpush.msra.mxu0 %v561_v15  ;;  %5898 = vmatmul.msk.f32.vlgmr.msra.gmra.mxu1 %vm583_vm0, %v535_v19  ;;  %v7796_v31 = vadd.f32 %v663_v30, %v542_v28 }
 0x1a3   :  { %605 = vmatpush.msra.mxu0 %v560_v17  ;;  %v709_v32 = vsel %vm657_vm1, %v7796_v31, 0.0 }
 0x1a4   :  { %710 = vadd.xlane.f32.xlu0 %v709_v32  ;;  %v678_v32 = vld [vmem:[%s9621_s4 + $0x18] sm:$0xff] }
 0x1a5   :  { %606 = vmatpush.msra.mxu0 %v559_v18  ;;  %872 = vmatpush.msra.mxu2 %v678_v32 }
 0x1a7   :  { %607 = vmatpush.msra.mxu0 %v558_v20 }
 0x1a9   :  { %608 = vmatpush.msra.mxu0 %v557_v21  ;;  %5899 = vmatmul.msk.f32.gmra.mxu1 %vm583_vm0, %v537_v23 }
 0x1ab   :  { %609 = vmatpush.msra.mxu0 %v556_v22 }
 0x1ad   :  { %610 = vmatpush.msra.mxu0 %v555_v25 }
 0x1af   :  { %611 = vmatpush.msra.mxu0 %v554_v26 }
 0x1b0   :  { %612 = vmatmul.f32.vlgmr.msra.gmra.mxu0 %v534_v27 }
 0x1b1   :  { %5900 = vmatmul.msk.f32.gmra.mxu1 %vm583_vm0, %v539_v29 }
 0x1b8   :  { %615 = vmatmul.f32.gmra.mxu0 %v536_v33  ;;  %v677_v33 = vld [vmem:[%s9621_s4 + $0x10] sm:$0xff] }
 0x1b9   :  { %5901 = vmatmul.msk.f32.gmra.mxu1 %vm583_vm0, %v541_v34  ;;  %873 = vmatpush.msra.mxu2 %v677_v33 }
 0x1c0   :  { %618 = vmatmul.f32.gmra.mxu0 %v538_v35  ;;  %v676_v35 = vld [vmem:[%s9621_s4 + $0x8] sm:$0xff] }
 0x1c1   :  { %874 = vmatpush.msra.mxu2 %v676_v35 }
 0x1c8   :  { %621 = vmatmul.f32.gmra.mxu0 %v540_v36 }
 0x217   :  { %v711_v8 = vpop.xlane.xlu0 %710 }
 0x218   :  { %v731_v10 = vmul.f32 %v7824_v7, %v711_v8 }
 0x21a   :  { %v736_v13 = vsub.f32 %v7796_v31, %v731_v10 }
 0x21c   :  { %v741_v16 = vmul.f32 %v736_v13, %v736_v13 }
 0x21e   :  { %v642_v37 = vpop.f32.mrf.mxu1  ;;  %v746_v17 = vsel %vm657_vm1, %v741_v16, 0.0 }
 0x226   :  { %v645_v42 = vpop.f32.mrf.mxu1 }
 0x22d   :  { %v613_v39 = vpop.f32.mrf.mxu0 }
 0x22e   :  { %v614_v40 = vadd.f32 %v6347_v38, %v613_v39  ;;  %v648_v51 = vpop.f32.mrf.mxu1 }
 0x230   :  { %v643_v41 = vadd.f32 %v642_v37, %v614_v40 }
 0x232   :  { %659 = vst.msk [vmem:[#allocation2 + $0x8] sm:$0xff] %vm657_vm1, %v643_v41 }
 0x235   :  { %v616_v44 = vpop.f32.mrf.mxu0 }
 0x236   :  { %v617_v45 = vadd.f32 %v6347_v38, %v616_v44  ;;  %v651_v0 = vpop.f32.mrf.mxu1 }
 0x238   :  { %v646_v48 = vadd.f32 %v645_v42, %v617_v45 }
 0x239   :  { %v664_v49 = vld [vmem:[#allocation2 + $0x8] sm:$0xff] }
 0x23a   :  { %660 = vst.msk [vmem:[#allocation2 + $0x10] sm:$0xff] %vm657_vm1, %v646_v48  ;;  %v7810_v50 = vadd.f32 %v664_v49, %v543_v46 }
 0x23c   :  { %v712_v53 = vsel %vm657_vm1, %v7810_v50, 0.0 }
 0x23d   :  { %v619_v54 = vpop.f32.mrf.mxu0  ;;  %713 = vadd.xlane.f32.xlu0 %v712_v53  ;;  %v7870_v53 = vld [vmem:[%s9622_s0] ss:$0 sm:$0xff]  ;;  %s9640_s0 = sld [smem:[#allocation76_spill]] }
 0x23e   :  { %v620_v55 = vadd.f32 %v6347_v38, %v619_v54 }
 0x240   :  { %v649_v58 = vadd.f32 %v648_v51, %v620_v55 }
 0x241   :  { %v665_v59 = vld [vmem:[#allocation2 + $0x10] sm:$0xff] }
 0x242   :  { %661 = vst.msk [vmem:[#allocation2 + $0x18] sm:$0xff] %vm657_vm1, %v649_v58  ;;  %v7816_v60 = vadd.f32 %v665_v59, %v544_v56  ;;  %v7873_v56 = vld [vmem:[%s9623_s20] ss:$0 sm:$0xff]  ;;  %s9641_s20 = sld [smem:[#allocation74_spill]] }
 0x244   :  { %v715_v62 = vsel %vm657_vm1, %v7816_v60, 0.0 }
 0x245   :  { %v622_v63 = vpop.f32.mrf.mxu0  ;;  %716 = vadd.xlane.f32.xlu1 %v715_v62 }
 0x246   :  { %v623_v1 = vadd.f32 %v6347_v38, %v622_v63  ;;  %v675_v38 = vld [vmem:[%s9621_s4] sm:$0xff]  ;;  %s9639_s4 = sld [smem:[#allocation73_spill]] }
 0x247   :  { %875 = vmatpush.msra.mxu2 %v675_v38 }
 0x248   :  { %v652_v4 = vadd.f32 %v651_v0, %v623_v1 }
 0x249   :  { %v666_v5 = vld [vmem:[#allocation2 + $0x18] sm:$0xff] }
 0x24a   :  { %662 = vst.msk [vmem:[#allocation2 + $0x20] sm:$0xff] %vm657_vm1, %v652_v4  ;;  %v7822_v6 = vadd.f32 %v666_v5, %v545_v2 }
 0x24c   :  { %v718_v9 = vsel %vm657_vm1, %v7822_v6, 0.0 }
 0x24d   :  { %719 = vadd.xlane.f32.xlu1 %v718_v9 }
 0x251   :  { %v667_v12 = vld [vmem:[#allocation2 + $0x20] sm:$0xff] }
 0x252   :  { %v7831_v14 = vadd.f32 %v667_v12, %v546_v11 }
 0x254   :  { %v721_v15 = vsel %vm657_vm1, %v7831_v14, 0.0 }
 0x255   :  { %722 = vadd.xlane.f32.xlu2 %v721_v15 }
 0x25d   :  { %747 = vadd.xlane.f32.xlu2 %v746_v17 }
 0x2b0   :  { %v714_v18 = vpop.xlane.xlu0 %713 }
 0x2b1   :  { %v732_v19 = vmul.f32 %v7824_v7, %v714_v18 }
 0x2b3   :  { %v7838_v20 = vsub.f32 %v7810_v50, %v732_v19 }
 0x2b5   :  { %v742_v21 = vmul.f32 %v7838_v20, %v7838_v20 }
 0x2b7   :  { %v749_v22 = vsel %vm657_vm1, %v742_v21, 0.0 }
 0x2b8   :  { %v717_v23 = vpop.xlane.xlu1 %716  ;;  %750 = vadd.xlane.f32.xlu0 %v749_v22 }
 0x2b9   :  { %v733_v24 = vmul.f32 %v7824_v7, %v717_v23 }
 0x2bb   :  { %v7845_v25 = vsub.f32 %v7816_v60, %v733_v24 }
 0x2bd   :  { %v743_v26 = vmul.f32 %v7845_v25, %v7845_v25 }
 0x2bf   :  { %v752_v27 = vsel %vm657_vm1, %v743_v26, 0.0 }
 0x2c0   :  { %753 = vadd.xlane.f32.xlu1 %v752_v27  ;;  %v720_v28 = vpop.xlane.xlu1 %719 }
 0x2c1   :  { %v734_v29 = vmul.f32 %v7824_v7, %v720_v28 }
 0x2c3   :  { %v7852_v30 = vsub.f32 %v7822_v6, %v734_v29 }
 0x2c5   :  { %v744_v34 = vmul.f32 %v7852_v30, %v7852_v30 }
 0x2c7   :  { %v755_v36 = vsel %vm657_vm1, %v744_v34, 0.0 }
 0x2c8   :  { %v723_v37 = vpop.xlane.xlu2 %722  ;;  %756 = vadd.xlane.f32.xlu2 %v755_v36 }
 0x2c9   :  { %v735_v39 = vmul.f32 %v7824_v7, %v723_v37 }
 0x2cb   :  { %v7863_v40 = vsub.f32 %v7831_v14, %v735_v39 }
 0x2cd   :  { %v745_v41 = vmul.f32 %v7863_v40, %v7863_v40 }
 0x2cf   :  { %v758_v42 = vsel %vm657_vm1, %v745_v41, 0.0 }
 0x2d0   :  { %v748_v43 = vpop.xlane.xlu2 %747  ;;  %759 = vadd.xlane.f32.xlu0 %v758_v42 }
 0x2d1   :  { %v761_v44 = vmul.f32 %v748_v43, %v7824_v7 }
 0x2d3   :  { %v766_v45 = vadd.f32 1e-06, %v761_v44 }
 0x2d5   :  { %6389 = vrsqrt.f32 %v766_v45  ;;  %vm777_vm3 = vweird.f32 %v766_v45 }
 0x2db   :  { %v6390_v46 = vpop.eup %6389 }
 0x2dc   :  { %v772_v47 = vmul.f32 %v6390_v46, %v766_v45  ;;  %vm778_vm4 = vweird.f32 %v6390_v46 }
 0x2dd   :  { %vm779_vm5 = vmor %vm777_vm3, %vm778_vm4  ;;  %vm907_vm4 = vcmask 64512  }
 0x2de   :  { %v773_v48 = vmul.f32 %v6390_v46, %v772_v47 }
 0x2e0   :  { %v774_v49 = vmul.f32 0.5, %v773_v48 }
 0x2e2   :  { %v775_v51 = vsub.f32 1.5, %v774_v49 }
 0x2e4   :  { %v776_v52 = vmul.f32 %v6390_v46, %v775_v51 }
 0x2e6   :  { %v780_v54 = vsel %vm779_vm5, %v6390_v46, %v776_v52  ;;  %vm970_vm5 = vcmask 326656  }
 0x2e7   :  { %v821_v55 = vmul.f32 %v780_v54, %v736_v13 }
 0x2e9   :  { %v829_v57 = vmul.f32 %v7870_v53, %v821_v55 }
 0x2eb   :  { %v837_v58 = vadd.f32 %v7873_v56, %v829_v57 }
 0x2ed   :  { %5902 = vmatmul.msk.f32.vlgmr.msra.gmra.mxu2 %vm657_vm1, %v837_v58  ;;  %v6350_v58 = vld [vmem:[%s9624_s27] ss:$0 sm:$0xff]  ;;  %s9642_s27 = sld [smem:[#allocation75_spill]] }
 0x32b   :  { %v751_v59 = vpop.xlane.xlu0 %750 }
 0x32c   :  { %v762_v61 = vmul.f32 %v751_v59, %v7824_v7 }
 0x32e   :  { %v767_v62 = vadd.f32 1e-06, %v762_v61 }
 0x330   :  { %6391 = vrsqrt.f32 %v767_v62  ;;  %vm787_vm7 = vweird.f32 %v767_v62 }
 0x333   :  { %v754_v63 = vpop.xlane.xlu1 %753 }
 0x334   :  { %v763_v0 = vmul.f32 %v754_v63, %v7824_v7 }
 0x336   :  { %v6392_v1 = vpop.eup %6391  ;;  %v768_v2 = vadd.f32 1e-06, %v763_v0 }
 0x337   :  { %v782_v3 = vmul.f32 %v6392_v1, %v767_v62  ;;  %vm788_vm6 = vweird.f32 %v6392_v1 }
 0x338   :  { %6393 = vrsqrt.f32 %v768_v2  ;;  %vm789_vm8 = vmor %vm787_vm7, %vm788_vm6  ;;  %vm797_vm10 = vweird.f32 %v768_v2 }
 0x339   :  { %v783_v4 = vmul.f32 %v6392_v1, %v782_v3 }
 0x33b   :  { %v784_v5 = vmul.f32 0.5, %v783_v4  ;;  %v757_v8 = vpop.xlane.xlu2 %756 }
 0x33c   :  { %v764_v9 = vmul.f32 %v757_v8, %v7824_v7 }
 0x33d   :  { %v785_v10 = vsub.f32 1.5, %v784_v5 }
 0x33e   :  { %v6394_v11 = vpop.eup %6393  ;;  %v769_v12 = vadd.f32 1e-06, %v764_v9  ;;  %v7935_v9 = vld [vmem:[%s9625_s7] sm:$0xff] }
 0x33f   :  { %v786_v13 = vmul.f32 %v6392_v1, %v785_v10  ;;  %v792_v15 = vmul.f32 %v6394_v11, %v768_v2  ;;  %vm798_vm9 = vweird.f32 %v6394_v11 }
 0x340   :  { %6395 = vrsqrt.f32 %v769_v12  ;;  %vm799_vm11 = vmor %vm797_vm10, %vm798_vm9  ;;  %vm807_vm13 = vweird.f32 %v769_v12 }
 0x341   :  { %v793_v16 = vmul.f32 %v6394_v11, %v792_v15  ;;  %v790_v17 = vsel %vm789_vm8, %v6392_v1, %v786_v13  ;;  %v7940_v15 = vld [vmem:[%s9625_s7 + $0x8] sm:$0xff] }
 0x342   :  { %v822_v18 = vmul.f32 %v790_v17, %v7838_v20 }
 0x343   :  { %v794_v19 = vmul.f32 0.5, %v793_v16  ;;  %v760_v21 = vpop.xlane.xlu0 %759 }
 0x344   :  { %v765_v22 = vmul.f32 %v760_v21, %v7824_v7  ;;  %v830_v23 = vmul.f32 %v7870_v53, %v822_v18  ;;  %v7945_v21 = vld [vmem:[%s9625_s7 + $0x10] sm:$0xff] }
 0x345   :  { %v795_v24 = vsub.f32 1.5, %v794_v19 }
 0x346   :  { %v6396_v26 = vpop.eup %6395  ;;  %v770_v27 = vadd.f32 1e-06, %v765_v22  ;;  %v838_v28 = vadd.f32 %v7873_v56, %v830_v23 }
 0x347   :  { %v796_v29 = vmul.f32 %v6394_v11, %v795_v24  ;;  %v802_v32 = vmul.f32 %v6396_v26, %v769_v12  ;;  %vm808_vm12 = vweird.f32 %v6396_v26 }
 0x348   :  { %6397 = vrsqrt.f32 %v770_v27  ;;  %5903 = vmatmul.msk.f32.gmra.mxu2 %vm657_vm1, %v838_v28  ;;  %vm809_vm14 = vmor %vm807_vm13, %vm808_vm12  ;;  %vm817_vm2 = vweird.f32 %v770_v27 }
 0x349   :  { %v803_v20 = vmul.f32 %v6396_v26, %v802_v32  ;;  %v800_v33 = vsel %vm799_vm11, %v6394_v11, %v796_v29 }
 0x34a   :  { %v823_v34 = vmul.f32 %v800_v33, %v7845_v25  ;;  %v7955_v33 = vld [vmem:[%s9625_s7 + $0x20] sm:$0xff] }
 0x34b   :  { %v804_v35 = vmul.f32 0.5, %v803_v20 }
 0x34c   :  { %v831_v36 = vmul.f32 %v7870_v53, %v823_v34 }
 0x34d   :  { %v805_v37 = vsub.f32 1.5, %v804_v35 }
 0x34e   :  { %v6398_v38 = vpop.eup %6397  ;;  %v839_v39 = vadd.f32 %v7873_v56, %v831_v36 }
 0x34f   :  { %v806_v41 = vmul.f32 %v6396_v26, %v805_v37  ;;  %v812_v42 = vmul.f32 %v6398_v38, %v770_v27  ;;  %vm818_vm15 = vweird.f32 %v6398_v38  ;;  %v7950_v27 = vld [vmem:[%s9625_s7 + $0x18] sm:$0xff] }
 0x350   :  { %5904 = vmatmul.msk.f32.gmra.mxu2 %vm657_vm1, %v839_v39  ;;  %vm819_vm3 = vmor %vm817_vm2, %vm818_vm15 }
 0x351   :  { %v813_v43 = vmul.f32 %v6398_v38, %v812_v42  ;;  %v810_v44 = vsel %vm809_vm14, %v6396_v26, %v806_v41 }
 0x352   :  { %v824_v45 = vmul.f32 %v810_v44, %v7852_v30 }
 0x353   :  { %v814_v46 = vmul.f32 0.5, %v813_v43 }
 0x354   :  { %v832_v25 = vmul.f32 %v7870_v53, %v824_v45 }
 0x355   :  { %v815_v47 = vsub.f32 1.5, %v814_v46 }
 0x356   :  { %v840_v48 = vadd.f32 %v7873_v56, %v832_v25 }
 0x357   :  { %v816_v49 = vmul.f32 %v6398_v38, %v815_v47 }
 0x358   :  { %5905 = vmatmul.msk.f32.gmra.mxu2 %vm657_vm1, %v840_v48 }
 0x359   :  { %v820_v51 = vsel %vm819_vm3, %v6398_v38, %v816_v49 }
 0x35a   :  { %v825_v52 = vmul.f32 %v820_v51, %v7863_v40 }
 0x35c   :  { %v833_v54 = vmul.f32 %v7870_v53, %v825_v52 }
 0x35e   :  { %v841_v30 = vadd.f32 %v7873_v56, %v833_v54 }
 0x360   :  { %5906 = vmatmul.msk.f32.gmra.mxu2 %vm657_vm1, %v841_v30 }
 0x370   :  { %v877_v55 = vpop.f32.mrf.mxu2 }
 0x371   :  { %v7915_v0 = vadd.f32 %v6350_v58, %v877_v55 }
 0x3cb   :  { %v880_v57 = vpop.f32.mrf.mxu2 }
 0x3cc   :  { %v7907_v53 = vadd.f32 %v6350_v58, %v880_v57 }
 0x3d3   :  { %v883_v59 = vpop.f32.mrf.mxu2 }
 0x3d4   :  { %v7899_v61 = vadd.f32 %v6350_v58, %v883_v59 }
 0x3d6   :  { %901 = vrot.lane.b32.xlu0 %v7899_v61, %s7360_s1  ;;  %v7967_v38 = vpack.i.bf16 %v7907_v53, %v7899_v61 }
 0x3db   :  { %v886_v62 = vpop.f32.mrf.mxu2 }
 0x3dc   :  { %v7903_v63 = vadd.f32 %v6350_v58, %v886_v62 }
 0x3de   :  { %903 = vrot.lane.b32.xlu2 %v7903_v63, %s7360_s1 }
 0x3e3   :  { %v889_v40 = vpop.f32.mrf.mxu2 }
 0x3e4   :  { %v7909_v56 = vadd.f32 %v6350_v58, %v889_v40 }
 0x3e6   :  { %899 = vrot.lane.b32.xlu2 %v7907_v53, %s7360_s1  ;;  %905 = vrot.lane.b32.xlu1 %v7909_v56, %s7360_s1  ;;  %v7961_v37 = vpack.i.bf16 %v7903_v63, %v7909_v56 }
 0x3ee   :  { %897 = vrot.lane.b32.xlu1 %v7915_v0, %s7360_s1 }
 0x438   :  { %v904_v2 = vpop.permute.xlu2 %903 }
 0x440   :  { %v900_v4 = vpop.permute.xlu2 %899 }
 0x448   :  { %v902_v3 = vpop.permute.xlu0 %901 }
 0x458   :  { %v906_v1 = vpop.permute.xlu1 %905 }
 0x459   :  { %5907 = vmatpush.xpose.msk.msra.mxu3 %vm907_vm4, %v906_v1 }
 0x45d   :  { %5908 = vmatpush.xpose.msk.msra.mxu3 %vm907_vm4, %v904_v2 }
 0x460   :  { %v898_v5 = vpop.permute.xlu1 %897 }
 0x461   :  { %5909 = vmatpush.xpose.msk.msra.mxu3 %vm907_vm4, %v902_v3 }
 0x465   :  { %5910 = vmatpush.xpose.msk.msra.mxu3 %vm907_vm4, %v900_v4 }
 0x469   :  { %5911 = vmatpush.xpose.msk.msra.mxu3 %vm907_vm4, %v898_v5 }
 0x46c   :  { %5912 = vmatmul.msk.f32.vlgmr.msra.gmra.mxu3 %vm907_vm4, %v7915_v0 }
 0x474   :  { %5913 = vmatmul.msk.f32.gmra.mxu3 %vm907_vm4, %v7907_v53 }
 0x47c   :  { %5914 = vmatmul.msk.f32.gmra.mxu3 %vm907_vm4, %v7899_v61 }
 0x484   :  { %5915 = vmatmul.msk.f32.gmra.mxu3 %vm907_vm4, %v7903_v63 }
 0x48c   :  { %5916 = vmatmul.msk.f32.gmra.mxu3 %vm907_vm4, %v7909_v56 }
 0x4ef   :  { %v945_v8 = vpop.f32.mrf.mxu3 }
 0x4f0   :  { %v960_v10 = vmul.f32 0.35355338, %v945_v8 }
 0x4f2   :  { %v965_v11 = vadd.f32 %v960_v10, %v7935_v9 }
 0x4f4   :  { %v971_v12 = vsel %vm970_vm5, %v965_v11, -inf }
 0x4f5   :  { %972 = vmax.xlane.f32.xlu0 %v971_v12 }
 0x4f7   :  { %v948_v13 = vpop.f32.mrf.mxu3 }
 0x4f8   :  { %v961_v16 = vmul.f32 0.35355338, %v948_v13 }
 0x4fa   :  { %v966_v17 = vadd.f32 %v961_v16, %v7940_v15 }
 0x4fc   :  { %v974_v18 = vsel %vm970_vm5, %v966_v17, -inf }
 0x4fd   :  { %975 = vmax.xlane.f32.xlu2 %v974_v18 }
 0x4ff   :  { %v951_v19 = vpop.f32.mrf.mxu3 }
 0x500   :  { %v962_v22 = vmul.f32 0.35355338, %v951_v19 }
 0x502   :  { %v967_v23 = vadd.f32 %v962_v22, %v7945_v21 }
 0x504   :  { %v977_v24 = vsel %vm970_vm5, %v967_v23, -inf }
 0x505   :  { %978 = vmax.xlane.f32.xlu1 %v977_v24 }
 0x507   :  { %v954_v26 = vpop.f32.mrf.mxu3 }
 0x508   :  { %v963_v28 = vmul.f32 0.35355338, %v954_v26 }
 0x50a   :  { %v968_v29 = vadd.f32 %v963_v28, %v7950_v27 }
 0x50c   :  { %v980_v32 = vsel %vm970_vm5, %v968_v29, -inf }
 0x50d   :  { %981 = vmax.xlane.f32.xlu0 %v980_v32 }
 0x50f   :  { %v957_v20 = vpop.f32.mrf.mxu3 }
 0x510   :  { %v964_v34 = vmul.f32 0.35355338, %v957_v20 }
 0x512   :  { %v969_v35 = vadd.f32 %v964_v34, %v7955_v33 }
 0x514   :  { %v983_v36 = vsel %vm970_vm5, %v969_v35, -inf }
 0x515   :  { %984 = vmax.xlane.f32.xlu2 %v983_v36 }
 0x521   :  { %6267 = vrot.lane.b32.xlu0 %v7961_v37, %s7361_s12 }
 0x52d   :  { %6272 = vrot.lane.b32.xlu2 %v7967_v38, %s7361_s12 }
 0x568   :  { %v973_v39 = vpop.xlane.xlu0 %972 }
 0x569   :  { %v986_v41 = vsub.f32 %v965_v11, %v973_v39 }
 0x56b   :  { %v991_v42 = vmul.f32 1.442695, %v986_v41 }
 0x56d   :  { %6399 = vpow2.f32 %v991_v42 }
 0x570   :  { %v976_v43 = vpop.xlane.xlu2 %975 }
 0x571   :  { %v987_v44 = vsub.f32 %v966_v17, %v976_v43 }
 0x573   :  { %v7971_v45 = vpop.eup %6399  ;;  %v993_v46 = vmul.f32 1.442695, %v987_v44 }
 0x574   :  { %v1001_v25 = vsel %vm970_vm5, %v7971_v45, 0.0 }
 0x575   :  { %6401 = vpow2.f32 %v993_v46  ;;  %1002 = vadd.xlane.f32.xlu1 %v1001_v25 }
 0x578   :  { %v979_v47 = vpop.xlane.xlu1 %978 }
 0x579   :  { %v988_v48 = vsub.f32 %v967_v23, %v979_v47 }
 0x57b   :  { %v7975_v49 = vpop.eup %6401  ;;  %v995_v51 = vmul.f32 1.442695, %v988_v48 }
 0x57c   :  { %v1004_v52 = vsel %vm970_vm5, %v7975_v49, 0.0 }
 0x57d   :  { %6403 = vpow2.f32 %v995_v51  ;;  %1005 = vadd.xlane.f32.xlu1 %v1004_v52 }
 0x580   :  { %v982_v54 = vpop.xlane.xlu0 %981 }
 0x581   :  { %v989_v30 = vsub.f32 %v968_v29, %v982_v54 }
 0x583   :  { %v7979_v55 = vpop.eup %6403  ;;  %v997_v57 = vmul.f32 1.442695, %v989_v30 }
 0x584   :  { %v1007_v58 = vsel %vm970_vm5, %v7979_v55, 0.0 }
 0x585   :  { %6405 = vpow2.f32 %v997_v57  ;;  %1008 = vadd.xlane.f32.xlu0 %v1007_v58 }
 0x588   :  { %v985_v62 = vpop.xlane.xlu2 %984 }
 0x589   :  { %v990_v10 = vsub.f32 %v969_v35, %v985_v62 }
 0x58b   :  { %v7983_v59 = vpop.eup %6405  ;;  %v999_v11 = vmul.f32 1.442695, %v990_v10 }
 0x58c   :  { %v1010_v40 = vsel %vm970_vm5, %v7983_v59, 0.0 }
 0x58d   :  { %1011 = vadd.xlane.f32.xlu2 %v1010_v40  ;;  %6407 = vpow2.f32 %v999_v11 }
 0x590   :  { %v6273_v3 = vpop.permute.xlu2 %6272 }
 0x591   :  { %v6274_v5 = vunpack.i.l.bf16 %v6273_v3  ;;  %v6275_v8 = vunpack.i.h.bf16 %v6273_v3 }
 0x593   :  { %v6268_v1 = vpop.permute.xlu0 %6267  ;;  %v8005_v12 = vpop.eup %6407 }
 0x594   :  { %v6269_v2 = vunpack.i.l.bf16 %v6268_v1  ;;  %v6270_v4 = vunpack.i.h.bf16 %v6268_v1  ;;  %v1013_v13 = vsel %vm970_vm5, %v8005_v12, 0.0 }
 0x596   :  { %1026 = vrot.lane.b32.xlu1 %v7915_v0, %s7361_s12  ;;  %1067 = vmatpush.msrb.mxu1 %v6269_v2 }
 0x598   :  { %1068 = vmatpush.msrb.mxu1 %v6270_v4 }
 0x599   :  { %1106 = vrot.lane.b32.xlu0 %v7909_v56, %s7362_s5 }
 0x59a   :  { %1069 = vmatpush.msrb.mxu1 %v6274_v5 }
 0x59c   :  { %1070 = vmatpush.msrb.mxu1 %v6275_v8 }
 0x5a1   :  { %1100 = vrot.lane.b32.xlu0 %v7907_v53, %s7362_s5 }
 0x5a5   :  { %1104 = vrot.lane.b32.xlu2 %v7903_v63, %s7362_s5 }
 0x5a9   :  { %1098 = vrot.lane.b32.xlu0 %v7915_v0, %s7362_s5 }
 0x5ad   :  { %1088 = vrot.lane.b32.xlu2 %v7915_v0, %s7363_s10 }
 0x5b1   :  { %1090 = vrot.lane.b32.xlu0 %v7907_v53, %s7363_s10 }
 0x5b5   :  { %1092 = vrot.lane.b32.xlu2 %v7899_v61, %s7363_s10 }
 0x5b9   :  { %1650 = vrot.lane.b32.xlu0 %v7909_v56, %s7364_s6 }
 0x5bd   :  { %1094 = vrot.lane.b32.xlu2 %v7903_v63, %s7363_s10 }
 0x5c0   :  { %1014 = vadd.xlane.f32.xlu1 %v1013_v13 }
 0x5c1   :  { %1648 = vrot.lane.b32.xlu0 %v7903_v63, %s7364_s6 }
 0x5c5   :  { %1395 = vrot.lane.b32.xlu2 %v7899_v61, %s7365_s3 }
 0x5c9   :  { %1096 = vrot.lane.b32.xlu0 %v7909_v56, %s7363_s10 }
 0x5cd   :  { %1393 = vrot.lane.b32.xlu2 %v7907_v53, %s7365_s3 }
 0x5d1   :  { %1391 = vrot.lane.b32.xlu0 %v7915_v0, %s7365_s3 }
 0x5d5   :  { %1642 = vrot.lane.b32.xlu2 %v7915_v0, %s7364_s6 }
 0x5d9   :  { %1632 = vrot.lane.b32.xlu0 %v7915_v0, %s7366_s2  ;;  %1102 = vrot.lane.b32.xlu1 %v7899_v61, %s7362_s5 }
 0x5dd   :  { %1383 = vrot.lane.b32.xlu2 %v7907_v53, %s7367_s11 }
 0x5e1   :  { %1385 = vrot.lane.b32.xlu0 %v7899_v61, %s7367_s11  ;;  %1399 = vrot.lane.b32.xlu1 %v7909_v56, %s7365_s3 }
 0x5e5   :  { %1636 = vrot.lane.b32.xlu2 %v7899_v61, %s7366_s2 }
 0x5e8   :  { %v1003_v16 = vpop.xlane.xlu1 %1002 }
 0x5e9   :  { %1638 = vrot.lane.b32.xlu0 %v7903_v63, %s7366_s2  ;;  %1397 = vrot.lane.b32.xlu1 %v7903_v63, %s7365_s3  ;;  %6409 = vrcp.f32 %v1003_v16 }
 0x5ed   :  { %1389 = vrot.lane.b32.xlu2 %v7909_v56, %s7367_s11 }
 0x5ef   :  { %v6410_v19 = vpop.eup %6409 }
 0x5f0   :  { %v1006_v17 = vpop.xlane.xlu1 %1005  ;;  %v1021_v24 = vmul.f32 %v6410_v19, %v7971_v45 }
 0x5f1   :  { %1646 = vrot.lane.b32.xlu1 %v7899_v61, %s7364_s6  ;;  %6411 = vrcp.f32 %v1006_v17  ;;  %v680_v61 = vld [vmem:[%s9626_s13] sm:$0xff] }
 0x5f7   :  { %v6412_v28 = vpop.eup %6411 }
 0x5f8   :  { %v1009_v18 = vpop.xlane.xlu0 %1008  ;;  %v1022_v32 = vmul.f32 %v6412_v28, %v7975_v49 }
 0x5f9   :  { %1644 = vrot.lane.b32.xlu1 %v7907_v53, %s7364_s6  ;;  %6413 = vrcp.f32 %v1009_v18 }
 0x5ff   :  { %v6414_v20 = vpop.eup %6413 }
 0x600   :  { %v1012_v22 = vpop.xlane.xlu2 %1011  ;;  %v1023_v34 = vmul.f32 %v6414_v20, %v7979_v55 }
 0x601   :  { %1381 = vrot.lane.b32.xlu1 %v7915_v0, %s7367_s11  ;;  %6415 = vrcp.f32 %v1012_v22 }
 0x607   :  { %v6416_v36 = vpop.eup %6415 }
 0x608   :  { %v1027_v23 = vpop.permute.xlu1 %1026  ;;  %v1105_v29 = vpop.permute.xlu2 %1104  ;;  %v1024_v39 = vmul.f32 %v6416_v36, %v7983_v59 }
 0x609   :  { %1634 = vrot.lane.b32.xlu1 %v7907_v53, %s7366_s2  ;;  %1071 = vmatpush.msrb.mxu1 %v1027_v23 }
 0x60a   :  { %5917 = vmatmul.msk.f32.vlgmr.msrb.gmra.mxu1 %vm970_vm5, %v1021_v24 }
 0x60b   :  { %v1107_v26 = vpop.permute.xlu0 %1106  ;;  %1364 = vmatpush.msra.mxu1 %v680_v61 }
 0x60c   :  { %5922 = vmatpush.xpose.msk.msrb.mxu2 %vm907_vm4, %v1107_v26 }
 0x610   :  { %5923 = vmatpush.xpose.msk.msrb.mxu2 %vm907_vm4, %v1105_v29  ;;  %v1089_v45 = vpop.permute.xlu2 %1088 }
 0x611   :  { %1387 = vrot.lane.b32.xlu1 %v7903_v63, %s7367_s11 }
 0x612   :  { %5918 = vmatmul.msk.f32.gmra.mxu1 %vm970_vm5, %v1022_v32 }
 0x613   :  { %v1101_v53 = vpop.permute.xlu0 %1100 }
 0x618   :  { %v1093_v46 = vpop.permute.xlu2 %1092 }
 0x619   :  { %1640 = vrot.lane.b32.xlu1 %v7909_v56, %s7366_s2 }
 0x61a   :  { %5919 = vmatmul.msk.f32.gmra.mxu1 %vm970_vm5, %v1023_v34 }
 0x61b   :  { %v1099_v35 = vpop.permute.xlu0 %1098 }
 0x620   :  { %v1095_v47 = vpop.permute.xlu2 %1094 }
 0x622   :  { %5920 = vmatmul.msk.f32.gmra.mxu1 %vm970_vm5, %v1024_v39 }
 0x623   :  { %v1091_v41 = vpop.permute.xlu0 %1090 }
 0x628   :  { %v1396_v49 = vpop.permute.xlu2 %1395 }
 0x62b   :  { %v1651_v63 = vpop.permute.xlu0 %1650 }
 0x62c   :  { %5967 = vmatpush.xpose.msk.msrb.mxu1 %vm907_vm4, %v1651_v63 }
 0x630   :  { %v1394_v54 = vpop.permute.xlu2 %1393 }
 0x633   :  { %v1649_v42 = vpop.permute.xlu0 %1648  ;;  %v1015_v43 = vpop.xlane.xlu1 %1014 }
 0x634   :  { %6417 = vrcp.f32 %v1015_v43  ;;  %5968 = vmatpush.xpose.msk.msrb.mxu1 %vm907_vm4, %v1649_v42 }
 0x638   :  { %v1643_v58 = vpop.permute.xlu2 %1642 }
 0x63a   :  { %v6418_v44 = vpop.eup %6417 }
 0x63b   :  { %v1025_v56 = vmul.f32 %v6418_v44, %v8005_v12  ;;  %v1097_v52 = vpop.permute.xlu0 %1096 }
 0x63d   :  { %5921 = vmatmul.msk.f32.gmra.mxu1 %vm970_vm5, %v1025_v56 }
 0x640   :  { %v1384_v40 = vpop.permute.xlu2 %1383 }
 0x643   :  { %v1392_v55 = vpop.permute.xlu0 %1391 }
 0x648   :  { %v1637_v5 = vpop.permute.xlu2 %1636 }
 0x64b   :  { %v1103_v25 = vpop.permute.xlu1 %1102  ;;  %v1633_v62 = vpop.permute.xlu0 %1632 }
 0x64c   :  { %5924 = vmatpush.xpose.msk.msrb.mxu2 %vm907_vm4, %v1103_v25 }
 0x650   :  { %5925 = vmatpush.xpose.msk.msrb.mxu2 %vm907_vm4, %v1101_v53  ;;  %v1390_v11 = vpop.permute.xlu2 %1389 }
 0x653   :  { %v1400_v48 = vpop.permute.xlu1 %1399  ;;  %v1386_v3 = vpop.permute.xlu0 %1385 }
 0x654   :  { %5926 = vmatpush.xpose.msk.msrb.mxu2 %vm907_vm4, %v1099_v35 }
 0x657   :  { %5927 = vmatmul.msk.f32.vlgmr.msrb.gmra.mxu2 %vm907_vm4, %v1089_v45 }
 0x658   :  { %5947 = vmatpush.xpose.msk.msra.mxu2 %vm907_vm4, %v1400_v48 }
 0x65b   :  { %v1398_v51 = vpop.permute.xlu1 %1397  ;;  %v1639_v16 = vpop.permute.xlu0 %1638 }
 0x65c   :  { %5948 = vmatpush.xpose.msk.msra.mxu2 %vm907_vm4, %v1398_v51 }
 0x65f   :  { %5928 = vmatmul.msk.f32.gmra.mxu2 %vm907_vm4, %v1091_v41 }
 0x660   :  { %5949 = vmatpush.xpose.msk.msra.mxu2 %vm907_vm4, %v1396_v49 }
 0x663   :  { %v1647_v30 = vpop.permute.xlu1 %1646 }
 0x664   :  { %5950 = vmatpush.xpose.msk.msra.mxu2 %vm907_vm4, %v1394_v54  ;;  %5969 = vmatpush.xpose.msk.msrb.mxu1 %vm907_vm4, %v1647_v30 }
 0x667   :  { %5929 = vmatmul.msk.f32.gmra.mxu2 %vm907_vm4, %v1093_v46 }
 0x668   :  { %5951 = vmatpush.xpose.msk.msra.mxu2 %vm907_vm4, %v1392_v55 }
 0x66b   :  { %v1645_v57 = vpop.permute.xlu1 %1644 }
 0x66c   :  { %5970 = vmatpush.xpose.msk.msrb.mxu1 %vm907_vm4, %v1645_v57 }
 0x66f   :  { %5930 = vmatmul.msk.f32.gmra.mxu2 %vm907_vm4, %v1095_v47 }
 0x670   :  { %5971 = vmatpush.xpose.msk.msrb.mxu1 %vm907_vm4, %v1643_v58 }
 0x673   :  { %v1382_v59 = vpop.permute.xlu1 %1381 }
 0x677   :  { %5931 = vmatmul.msk.f32.gmra.mxu2 %vm907_vm4, %v1097_v52 }
 0x67b   :  { %v1635_v2 = vpop.permute.xlu1 %1634 }
 0x67f   :  { %5952 = vmatmul.msk.f32.vlgmr.msra.gmra.mxu2 %vm907_vm4, %v1382_v59 }
 0x683   :  { %v1388_v8 = vpop.permute.xlu1 %1387 }
 0x687   :  { %v1073_v1 = vpop.f32.mrf.mxu1  ;;  %5953 = vmatmul.msk.f32.gmra.mxu2 %vm907_vm4, %v1384_v40 }
 0x688   :  { %5942 = vmatmul.msk.f32.vlgmr.msra.gmra.mxu1 %vm907_vm4, %v1073_v1 }
 0x68b   :  { %v1641_v23 = vpop.permute.xlu1 %1640 }
 0x68f   :  { %v1076_v4 = vpop.f32.mrf.mxu1  ;;  %5954 = vmatmul.msk.f32.gmra.mxu2 %vm907_vm4, %v1386_v3 }
 0x690   :  { %5943 = vmatmul.msk.f32.gmra.mxu1 %vm907_vm4, %v1076_v4 }
 0x697   :  { %v1079_v10 = vpop.f32.mrf.mxu1  ;;  %5955 = vmatmul.msk.f32.gmra.mxu2 %vm907_vm4, %v1388_v8 }
 0x698   :  { %5944 = vmatmul.msk.f32.gmra.mxu1 %vm907_vm4, %v1079_v10 }
 0x69f   :  { %v1082_v12 = vpop.f32.mrf.mxu1  ;;  %5956 = vmatmul.msk.f32.gmra.mxu2 %vm907_vm4, %v1390_v11 }
 0x6a0   :  { %5945 = vmatmul.msk.f32.gmra.mxu1 %vm907_vm4, %v1082_v12 }
 0x6ba   :  { %v1085_v13 = vpop.f32.mrf.mxu1 }
 0x6bb   :  { %5946 = vmatmul.msk.f32.gmra.mxu1 %vm907_vm4, %v1085_v13 }
 0x6c3   :  { %5972 = vmatmul.msk.f32.vlgmr.msrb.gmra.mxu1 %vm907_vm4, %v1633_v62 }
 0x6cb   :  { %5973 = vmatmul.msk.f32.gmra.mxu1 %vm907_vm4, %v1635_v2 }
 0x6d3   :  { %5974 = vmatmul.msk.f32.gmra.mxu1 %vm907_vm4, %v1637_v5 }
 0x6da   :  { %v1145_v17 = vpop.f32.mrf.mxu2 }
 0x6db   :  { %v1160_v18 = vmul.f32 0.35355338, %v1145_v17  ;;  %5975 = vmatmul.msk.f32.gmra.mxu1 %vm907_vm4, %v1639_v16 }
 0x6dd   :  { %v1165_v19 = vadd.f32 %v1160_v18, %v7935_v9 }
 0x6df   :  { %v1170_v22 = vsel %vm970_vm5, %v1165_v19, -inf }
 0x6e0   :  { %1171 = vmax.xlane.f32.xlu0 %v1170_v22 }
 0x6e2   :  { %v1148_v24 = vpop.f32.mrf.mxu2 }
 0x6e3   :  { %v1161_v61 = vmul.f32 0.35355338, %v1148_v24  ;;  %5976 = vmatmul.msk.f32.gmra.mxu1 %vm907_vm4, %v1641_v23 }
 0x6e5   :  { %v1166_v26 = vadd.f32 %v1161_v61, %v7940_v15 }
 0x6e7   :  { %v1173_v28 = vsel %vm970_vm5, %v1166_v26, -inf }
 0x6e8   :  { %1174 = vmax.xlane.f32.xlu2 %v1173_v28 }
 0x6ea   :  { %v1151_v29 = vpop.f32.mrf.mxu2 }
 0x6eb   :  { %v1162_v32 = vmul.f32 0.35355338, %v1151_v29 }
 0x6ed   :  { %v1167_v53 = vadd.f32 %v1162_v32, %v7945_v21 }
 0x6ef   :  { %v1176_v20 = vsel %vm970_vm5, %v1167_v53, -inf }
 0x6f0   :  { %1177 = vmax.xlane.f32.xlu1 %v1176_v20 }
 0x6f2   :  { %v1154_v34 = vpop.f32.mrf.mxu2 }
 0x6f3   :  { %v1163_v35 = vmul.f32 0.35355338, %v1154_v34 }
 0x6f5   :  { %v1168_v36 = vadd.f32 %v1163_v35, %v7950_v27 }
 0x6f7   :  { %v1179_v39 = vsel %vm970_vm5, %v1168_v36, -inf }
 0x6f8   :  { %1180 = vmax.xlane.f32.xlu0 %v1179_v39 }
 0x6fa   :  { %v1157_v41 = vpop.f32.mrf.mxu2 }
 0x6fb   :  { %v1164_v63 = vmul.f32 0.35355338, %v1157_v41 }
 0x6fd   :  { %v8108_v42 = vadd.f32 %v1164_v63, %v7955_v33 }
 0x6ff   :  { %v1182_v43 = vsel %vm970_vm5, %v8108_v42, -inf }
 0x700   :  { %1183 = vmax.xlane.f32.xlu2 %v1182_v43 }
 0x702   :  { %v1438_v44 = vpop.f32.mrf.mxu2 }
 0x703   :  { %v1453_v45 = vmul.f32 0.35355338, %v1438_v44 }
 0x705   :  { %v8113_v56 = vadd.f32 %v1453_v45, %v7935_v9  ;;  %v8126_v54 = vpop.f32.mrf.mxu1 }
 0x707   :  { %v1463_v46 = vsel %vm970_vm5, %v8113_v56, -inf }
 0x708   :  { %1464 = vmax.xlane.f32.xlu0 %v1463_v46 }
 0x70a   :  { %v1441_v25 = vpop.f32.mrf.mxu2 }
 0x70b   :  { %v1454_v47 = vmul.f32 0.35355338, %v1441_v25 }
 0x70d   :  { %v8118_v48 = vadd.f32 %v1454_v47, %v7940_v15  ;;  %v8131_v58 = vpop.f32.mrf.mxu1 }
 0x70f   :  { %v1466_v49 = vsel %vm970_vm5, %v8118_v48, -inf }
 0x710   :  { %1467 = vmax.xlane.f32.xlu1 %v1466_v49 }
 0x712   :  { %v1444_v51 = vpop.f32.mrf.mxu2 }
 0x713   :  { %v1455_v12 = vmul.f32 0.35355338, %v1444_v51 }
 0x715   :  { %v8140_v8 = vpop.f32.mrf.mxu1  ;;  %v8147_v18 = vadd.f32 %v1455_v12, %v7945_v21 }
 0x717   :  { %v1469_v24 = vsel %vm970_vm5, %v8147_v18, -inf }
 0x718   :  { %6282 = vrot.lane.b32.xlu2 %v7967_v38, %s7368_s25 }
 0x71a   :  { %v1447_v52 = vpop.f32.mrf.mxu2 }
 0x71b   :  { %v1456_v30 = vmul.f32 0.35355338, %v1447_v52 }
 0x71d   :  { %v8129_v55 = vadd.f32 %v1456_v30, %v7950_v27  ;;  %v8149_v22 = vpop.f32.mrf.mxu1 }
 0x71f   :  { %v1472_v62 = vsel %vm970_vm5, %v8129_v55, -inf }
 0x722   :  { %v1450_v57 = vpop.f32.mrf.mxu2 }
 0x723   :  { %v1457_v59 = vmul.f32 0.35355338, %v1450_v57 }
 0x725   :  { %v8136_v3 = vadd.f32 %v1457_v59, %v7955_v33 }
 0x727   :  { %v1475_v4 = vsel %vm970_vm5, %v8136_v3, -inf }
 0x729   :  { %6277 = vrot.lane.b32.xlu1 %v7961_v37, %s7368_s25 }
 0x738   :  { %v8157_v32 = vpop.f32.mrf.mxu1 }
 0x740   :  { %v1689_v39 = vpop.f32.mrf.mxu1 }
 0x748   :  { %v1692_v44 = vpop.f32.mrf.mxu1 }
 0x749   :  { %v1705_v46 = vmul.f32 0.35355338, %v1692_v44 }
 0x74b   :  { %v8177_v49 = vadd.f32 %v1705_v46, %v7940_v15 }
 0x74d   :  { %v1717_v30 = vsel %vm970_vm5, %v8177_v49, -inf }
 0x750   :  { %v1695_v51 = vpop.f32.mrf.mxu1 }
 0x751   :  { %v1706_v52 = vmul.f32 0.35355338, %v1695_v51 }
 0x753   :  { %v1172_v40 = vpop.xlane.xlu0 %1171  ;;  %1473 = vmax.xlane.f32.xlu1 %v1472_v62  ;;  %v8183_v62 = vadd.f32 %v1706_v52, %v7945_v21 }
 0x754   :  { %v1185_v1 = vsub.f32 %v1165_v19, %v1172_v40 }
 0x755   :  { %v1720_v40 = vsel %vm970_vm5, %v8183_v62, -inf }
 0x756   :  { %v1190_v2 = vmul.f32 1.442695, %v1185_v1 }
 0x758   :  { %6419 = vpow2.f32 %v1190_v2  ;;  %v1698_v12 = vpop.f32.mrf.mxu1 }
 0x75b   :  { %1476 = vmax.xlane.f32.xlu1 %v1475_v4  ;;  %v1175_v5 = vpop.xlane.xlu2 %1174 }
 0x75c   :  { %v1186_v11 = vsub.f32 %v1166_v26, %v1175_v5 }
 0x75e   :  { %v8142_v10 = vpop.eup %6419  ;;  %v1192_v16 = vmul.f32 1.442695, %v1186_v11 }
 0x75f   :  { %v1200_v13 = vsel %vm970_vm5, %v8142_v10, 0.0 }
 0x760   :  { %1201 = vadd.xlane.f32.xlu0 %v1200_v13  ;;  %6421 = vpow2.f32 %v1192_v16 }
 0x763   :  { %v1178_v17 = vpop.xlane.xlu1 %1177 }
 0x764   :  { %v1187_v19 = vsub.f32 %v1167_v53, %v1178_v17  ;;  %v1707_v17 = vmul.f32 0.35355338, %v1698_v12 }
 0x766   :  { %v1194_v23 = vmul.f32 1.442695, %v1187_v19  ;;  %v8153_v26 = vpop.eup %6421 }
 0x767   :  { %v1203_v34 = vsel %vm970_vm5, %v8153_v26, 0.0 }
 0x768   :  { %6423 = vpow2.f32 %v1194_v23  ;;  %1470 = vmax.xlane.f32.xlu0 %v1469_v24  ;;  %v8197_v23 = vadd.f32 %v1707_v17, %v7950_v27  ;;  %v1701_v24 = vpop.f32.mrf.mxu1 }
 0x76b   :  { %v1181_v61 = vpop.xlane.xlu0 %1180 }
 0x76c   :  { %v1188_v28 = vsub.f32 %v1168_v36, %v1181_v61  ;;  %v1708_v61 = vmul.f32 0.35355338, %v1701_v24 }
 0x76e   :  { %v8155_v29 = vpop.eup %6423  ;;  %v1196_v20 = vmul.f32 1.442695, %v1188_v28  ;;  %v1723_v28 = vsel %vm970_vm5, %v8197_v23, -inf }
 0x76f   :  { %v1206_v53 = vsel %vm970_vm5, %v8155_v29, 0.0 }
 0x770   :  { %6425 = vpow2.f32 %v1196_v20  ;;  %1207 = vadd.xlane.f32.xlu2 %v1206_v53  ;;  %1204 = vadd.xlane.f32.xlu0 %v1203_v34 }
 0x773   :  { %v1184_v47 = vpop.xlane.xlu2 %1183 }
 0x774   :  { %6287 = vrot.lane.b32.xlu1 %v7961_v37, %s7369_s15 }
 0x776   :  { %v8165_v35 = vpop.eup %6425 }
 0x777   :  { %v1209_v36 = vsel %vm970_vm5, %v8165_v35, 0.0 }
 0x778   :  { %1210 = vadd.xlane.f32.xlu2 %v1209_v36 }
 0x77b   :  { %v1465_v41 = vpop.xlane.xlu0 %1464  ;;  %v6283_v4 = vpop.permute.xlu2 %6282 }
 0x77c   :  { %v1478_v63 = vsub.f32 %v8113_v56, %v1465_v41  ;;  %v1189_v56 = vsub.f32 %v8108_v42, %v1184_v47  ;;  %v1704_v42 = vmul.f32 0.35355338, %v1689_v39  ;;  %v6284_v21 = vunpack.i.l.bf16 %v6283_v4 }
 0x77d   :  { %v6285_v16 = vunpack.i.h.bf16 %v6283_v4 }
 0x77e   :  { %v1483_v43 = vmul.f32 1.442695, %v1478_v63  ;;  %v1198_v57 = vmul.f32 1.442695, %v1189_v56  ;;  %v8192_v13 = vadd.f32 %v1704_v42, %v7935_v9  ;;  %v8204_v9 = vadd.f32 %v1708_v61, %v7955_v33 }
 0x780   :  { %6427 = vpow2.f32 %v1483_v43  ;;  %v1714_v19 = vsel %vm970_vm5, %v8192_v13, -inf  ;;  %v1726_v20 = vsel %vm970_vm5, %v8204_v9, -inf }
 0x781   :  { %6429 = vpow2.f32 %v1198_v57 }
 0x783   :  { %v1468_v59 = vpop.xlane.xlu1 %1467 }
 0x784   :  { %1225 = vrot.lane.b32.xlu0 %v7915_v0, %s7368_s25  ;;  %v1479_v53 = vsub.f32 %v8118_v48, %v1468_v59 }
 0x786   :  { %v8172_v45 = vpop.eup %6427  ;;  %v1485_v33 = vmul.f32 1.442695, %v1479_v53 }
 0x787   :  { %v1493_v25 = vsel %vm970_vm5, %v8172_v45, 0.0  ;;  %v8187_v15 = vpop.eup %6429 }
 0x788   :  { %1494 = vadd.xlane.f32.xlu2 %v1493_v25  ;;  %v1212_v5 = vsel %vm970_vm5, %v8187_v15, 0.0  ;;  %6431 = vpow2.f32 %v1485_v33 }
 0x78e   :  { %v8216_v43 = vpop.eup %6431 }
 0x790   :  { %1718 = vmax.xlane.f32.xlu2 %v1717_v30 }
 0x798   :  { %1721 = vmax.xlane.f32.xlu2 %v1720_v40 }
 0x79b   :  { %v6278_v1 = vpop.permute.xlu1 %6277 }
 0x79c   :  { %v6279_v2 = vunpack.i.l.bf16 %v6278_v1  ;;  %v6280_v11 = vunpack.i.h.bf16 %v6278_v1 }
 0x79e   :  { %1266 = vmatpush.msrb.mxu3 %v6279_v2  ;;  %1213 = vadd.xlane.f32.xlu1 %v1212_v5 }
 0x7a0   :  { %1267 = vmatpush.msrb.mxu3 %v6280_v11 }
 0x7a2   :  { %1268 = vmatpush.msrb.mxu3 %v6284_v21 }
 0x7a4   :  { %1269 = vmatpush.msrb.mxu3 %v6285_v16 }
 0x7a6   :  { %1715 = vmax.xlane.f32.xlu1 %v1714_v19 }
 0x7ae   :  { %1724 = vmax.xlane.f32.xlu0 %v1723_v28 }
 0x7b0   :  { %6297 = vrot.lane.b32.xlu2 %v7967_v38, %s7369_s15 }
 0x7b6   :  { %1727 = vmax.xlane.f32.xlu0 %v1726_v20 }
 0x7b8   :  { %1769 = vrot.lane.b32.xlu2 %v7915_v0, %s7369_s15 }
 0x7bf   :  { %6302 = vrot.lane.b32.xlu1 %v7967_v38, %s7370_s16 }
 0x7c6   :  { %v1474_v27 = vpop.xlane.xlu1 %1473 }
 0x7c7   :  { %v1481_v39 = vsub.f32 %v8129_v55, %v1474_v27 }
 0x7c9   :  { %v1489_v41 = vmul.f32 1.442695, %v1481_v39 }
 0x7ca   :  { %6292 = vrot.lane.b32.xlu0 %v7961_v37, %s7370_s16  ;;  %v1496_v37 = vsel %vm970_vm5, %v8216_v43, 0.0 }
 0x7cb   :  { %6433 = vpow2.f32 %v1489_v41 }
 0x7ce   :  { %v1477_v36 = vpop.xlane.xlu1 %1476 }
 0x7cf   :  { %v1482_v38 = vsub.f32 %v8136_v3, %v1477_v36 }
 0x7d1   :  { %v1491_v47 = vmul.f32 1.442695, %v1482_v38  ;;  %v8221_v51 = vpop.eup %6433 }
 0x7d2   :  { %v1502_v56 = vsel %vm970_vm5, %v8221_v51, 0.0 }
 0x7d3   :  { %v1202_v34 = vpop.xlane.xlu0 %1201 }
 0x7d4   :  { %6435 = vrcp.f32 %v1202_v34 }
 0x7d5   :  { %6437 = vpow2.f32 %v1491_v47 }
 0x7da   :  { %v6436_v3 = vpop.eup %6435 }
 0x7db   :  { %v1471_v63 = vpop.xlane.xlu0 %1470  ;;  %v8225_v30 = vpop.eup %6437  ;;  %v1220_v59 = vmul.f32 %v6436_v3, %v8142_v10 }
 0x7dc   :  { %v1505_v40 = vsel %vm970_vm5, %v8225_v30, 0.0  ;;  %v1480_v10 = vsub.f32 %v8147_v18, %v1471_v63 }
 0x7de   :  { %v1487_v16 = vmul.f32 1.442695, %v1480_v10 }
 0x7e3   :  { %v1208_v25 = vpop.xlane.xlu2 %1207  ;;  %v1205_v55 = vpop.xlane.xlu0 %1204 }
 0x7e4   :  { %6439 = vrcp.f32 %v1205_v55 }
 0x7e5   :  { %6441 = vrcp.f32 %v1208_v25 }
 0x7e6   :  { %v6288_v44 = vpop.permute.xlu1 %6287 }
 0x7e7   :  { %v6289_v46 = vunpack.i.l.bf16 %v6288_v44  ;;  %v6290_v48 = vunpack.i.h.bf16 %v6288_v44 }
 0x7e9   :  { %1810 = vmatpush.msrb.mxu2 %v6289_v46  ;;  %1497 = vadd.xlane.f32.xlu1 %v1496_v37 }
 0x7ea   :  { %v6440_v1 = vpop.eup %6439 }
 0x7eb   :  { %1811 = vmatpush.msrb.mxu2 %v6290_v48  ;;  %v1211_v52 = vpop.xlane.xlu2 %1210  ;;  %v1221_v42 = vmul.f32 %v6440_v1, %v8153_v26  ;;  %v6442_v4 = vpop.eup %6441  ;;  %v681_v1 = vld [vmem:[%s9626_s13 + $0x8] sm:$0xff] }
 0x7ec   :  { %6443 = vrcp.f32 %v1211_v52  ;;  %v1222_v21 = vmul.f32 %v6442_v4, %v8155_v29  ;;  %1317 = vmatpush.msrb.mxu0 %v681_v1 }
 0x7f1   :  { %1503 = vadd.xlane.f32.xlu1 %v1502_v56 }
 0x7f2   :  { %v6444_v17 = vpop.eup %6443 }
 0x7f3   :  { %v1223_v26 = vmul.f32 %v6444_v17, %v8165_v35 }
 0x7f6   :  { %v1226_v57 = vpop.permute.xlu0 %1225 }
 0x7f7   :  { %1270 = vmatpush.msrb.mxu3 %v1226_v57 }
 0x7f8   :  { %5932 = vmatmul.msk.f32.vlgmr.msrb.gmra.mxu3 %vm970_vm5, %v1220_v59 }
 0x7f9   :  { %1506 = vadd.xlane.f32.xlu1 %v1505_v40 }
 0x7fb   :  { %v8231_v2 = vpop.xlane.xlu2 %1494 }
 0x800   :  { %5933 = vmatmul.msk.f32.gmra.mxu3 %vm970_vm5, %v1221_v42 }
 0x803   :  { %v1719_v5 = vpop.xlane.xlu2 %1718 }
 0x804   :  { %v1730_v11 = vsub.f32 %v8177_v49, %v1719_v5 }
 0x806   :  { %v1736_v12 = vmul.f32 1.442695, %v1730_v11 }
 0x808   :  { %6445 = vpow2.f32 %v1736_v12  ;;  %5934 = vmatmul.msk.f32.gmra.mxu3 %vm970_vm5, %v1222_v21 }
 0x809   :  { %6447 = vpow2.f32 %v1487_v16 }
 0x80b   :  { %v1722_v19 = vpop.xlane.xlu2 %1721 }
 0x80c   :  { %v1731_v59 = vsub.f32 %v8183_v62, %v1722_v19 }
 0x80e   :  { %v8239_v24 = vpop.eup %6445  ;;  %v1738_v40 = vmul.f32 1.442695, %v1731_v59 }
 0x80f   :  { %v1747_v49 = vsel %vm970_vm5, %v8239_v24, 0.0  ;;  %v8245_v61 = vpop.eup %6447 }
 0x810   :  { %5935 = vmatmul.msk.f32.gmra.mxu3 %vm970_vm5, %v1223_v26  ;;  %1748 = vadd.xlane.f32.xlu0 %v1747_v49  ;;  %v1499_v27 = vsel %vm970_vm5, %v8245_v61, 0.0 }
 0x811   :  { %v1214_v18 = vpop.xlane.xlu1 %1213 }
 0x812   :  { %6449 = vrcp.f32 %v1214_v18 }
 0x813   :  { %v6298_v29 = vpop.permute.xlu2 %6297 }
 0x814   :  { %v6299_v28 = vunpack.i.l.bf16 %v6298_v29  ;;  %v6300_v20 = vunpack.i.h.bf16 %v6298_v29 }
 0x816   :  { %1812 = vmatpush.msrb.mxu2 %v6299_v28 }
 0x818   :  { %v6450_v53 = vpop.eup %6449  ;;  %1813 = vmatpush.msrb.mxu2 %v6300_v20  ;;  %1500 = vadd.xlane.f32.xlu0 %v1499_v27 }
 0x819   :  { %v1716_v35 = vpop.xlane.xlu1 %1715  ;;  %v1224_v34 = vmul.f32 %v6450_v53, %v8187_v15 }
 0x81a   :  { %v1729_v33 = vsub.f32 %v8192_v13, %v1716_v35 }
 0x81b   :  { %5936 = vmatmul.msk.f32.gmra.mxu3 %vm970_vm5, %v1224_v34  ;;  %v1770_v36 = vpop.permute.xlu2 %1769 }
 0x81c   :  { %v1734_v39 = vmul.f32 1.442695, %v1729_v33  ;;  %1814 = vmatpush.msrb.mxu2 %v1770_v36 }
 0x81e   :  { %6451 = vpow2.f32 %v1734_v39 }
 0x821   :  { %v1725_v41 = vpop.xlane.xlu0 %1724 }
 0x822   :  { %v1732_v63 = vsub.f32 %v8197_v23, %v1725_v41 }
 0x824   :  { %v6452_v44 = vpop.eup %6451  ;;  %v1740_v38 = vmul.f32 1.442695, %v1732_v63 }
 0x825   :  { %v1744_v46 = vsel %vm970_vm5, %v6452_v44, 0.0 }
 0x826   :  { %6453 = vpow2.f32 %v1740_v38  ;;  %1745 = vadd.xlane.f32.xlu2 %v1744_v46 }
 0x829   :  { %v1728_v37 = vpop.xlane.xlu0 %1727 }
 0x82a   :  { %v1733_v15 = vsub.f32 %v8204_v9, %v1728_v37  ;;  %v682_v37 = vld [vmem:[%s9626_s13 + $0x10] sm:$0xff] }
 0x82b   :  { %1610 = vmatpush.msra.mxu0 %v682_v37 }
 0x82c   :  { %v8255_v25 = vpop.eup %6453  ;;  %v1742_v13 = vmul.f32 1.442695, %v1733_v15  ;;  %v683_v15 = vld [vmem:[%s9626_s13 + $0x18] sm:$0xff]  ;;  %s9643_s13 = sld [smem:[#allocation78_spill]] }
 0x82d   :  { %v1753_v48 = vsel %vm970_vm5, %v8255_v25, 0.0 }
 0x82e   :  { %6455 = vpow2.f32 %v1742_v13  ;;  %1754 = vadd.xlane.f32.xlu0 %v1753_v48 }
 0x82f   :  { %6457 = vpow2.f32 %v1738_v40 }
 0x830   :  { %6459 = vrcp.f32 %v8231_v2 }
 0x831   :  { %v6303_v3 = vpop.permute.xlu1 %6302 }
 0x832   :  { %v6304_v52 = vunpack.i.l.bf16 %v6303_v3  ;;  %v6305_v57 = vunpack.i.h.bf16 %v6303_v3 }
 0x834   :  { %v8259_v47 = vpop.eup %6455 }
 0x835   :  { %v1756_v23 = vsel %vm970_vm5, %v8259_v47, 0.0  ;;  %v6458_v42 = vpop.eup %6457 }
 0x836   :  { %1757 = vadd.xlane.f32.xlu0 %v1756_v23  ;;  %v1750_v4 = vsel %vm970_vm5, %v6458_v42, 0.0  ;;  %v6460_v16 = vpop.eup %6459 }
 0x837   :  { %v1513_v26 = vmul.f32 %v6460_v16, %v8172_v45 }
 0x83c   :  { %v6293_v55 = vpop.permute.xlu0 %6292 }
 0x83d   :  { %v6294_v56 = vunpack.i.l.bf16 %v6293_v55  ;;  %v6295_v9 = vunpack.i.h.bf16 %v6293_v55 }
 0x83e   :  { %1518 = vrot.lane.b32.xlu2 %v7915_v0, %s7370_s16 }
 0x83f   :  { %1559 = vmatpush.msra.mxu3 %v6294_v56 }
 0x841   :  { %1560 = vmatpush.msra.mxu3 %v6295_v9 }
 0x843   :  { %1561 = vmatpush.msra.mxu3 %v6304_v52 }
 0x845   :  { %1562 = vmatpush.msra.mxu3 %v6305_v57 }
 0x85c   :  { %v1498_v21 = vpop.xlane.xlu1 %1497 }
 0x864   :  { %v1504_v53 = vpop.xlane.xlu1 %1503 }
 0x867   :  { %1751 = vadd.xlane.f32.xlu2 %v1750_v4 }
 0x86c   :  { %v1507_v34 = vpop.xlane.xlu1 %1506 }
 0x87b   :  { %v1272_v5 = vpop.f32.mrf.mxu3 }
 0x87c   :  { %5937 = vmatmul.msk.f32.vlgmr.msrb.gmra.mxu0 %vm907_vm4, %v1272_v5 }
 0x883   :  { %v1275_v0 = vpop.f32.mrf.mxu3  ;;  %v1749_v12 = vpop.xlane.xlu0 %1748 }
 0x884   :  { %5938 = vmatmul.msk.f32.gmra.mxu0 %vm907_vm4, %v1275_v0 }
 0x88b   :  { %v1278_v11 = vpop.f32.mrf.mxu3  ;;  %v1501_v29 = vpop.xlane.xlu0 %1500 }
 0x88c   :  { %5939 = vmatmul.msk.f32.gmra.mxu0 %vm907_vm4, %v1278_v11 }
 0x893   :  { %v1281_v10 = vpop.f32.mrf.mxu3 }
 0x894   :  { %5940 = vmatmul.msk.f32.gmra.mxu0 %vm907_vm4, %v1281_v10 }
 0x899   :  { %v1746_v62 = vpop.xlane.xlu2 %1745 }
 0x89a   :  { %6461 = vrcp.f32 %v1746_v62  ;;  %v6351_v62 = vld [vmem:[%s9627_s22] ss:$0 sm:$0xff]  ;;  %s9644_s22 = sld [smem:[#allocation77_spill]] }
 0x89b   :  { %6463 = vrcp.f32 %v1498_v21 }
 0x89c   :  { %6465 = vrcp.f32 %v1749_v12 }
 0x89d   :  { %6467 = vrcp.f32 %v1501_v29 }
 0x89e   :  { %v1284_v17 = vpop.f32.mrf.mxu3  ;;  %6469 = vrcp.f32 %v1504_v53 }
 0x89f   :  { %5941 = vmatmul.msk.f32.gmra.mxu0 %vm907_vm4, %v1284_v17  ;;  %6471 = vrcp.f32 %v1507_v34 }
 0x8a0   :  { %v6462_v19 = vpop.eup %6461 }
 0x8a1   :  { %v1764_v49 = vmul.f32 %v6462_v19, %v6452_v44  ;;  %v1519_v18 = vpop.permute.xlu2 %1518  ;;  %v6464_v2 = vpop.eup %6463 }
 0x8a2   :  { %1563 = vmatpush.msra.mxu3 %v1519_v18  ;;  %v6466_v28 = vpop.eup %6465  ;;  %v1514_v20 = vmul.f32 %v6464_v2, %v8216_v43  ;;  %v1755_v41 = vpop.xlane.xlu0 %1754 }
 0x8a3   :  { %5957 = vmatmul.msk.f32.vlgmr.msra.gmra.mxu3 %vm970_vm5, %v1513_v26  ;;  %5977 = vmatmul.msk.f32.vlgmr.msrb.gmra.mxu2 %vm970_vm5, %v1764_v49  ;;  %v1765_v27 = vmul.f32 %v6466_v28, %v8239_v24  ;;  %v6468_v45 = vpop.eup %6467 }
 0x8a4   :  { %v1515_v35 = vmul.f32 %v6468_v45, %v8245_v61  ;;  %v6470_v33 = vpop.eup %6469  ;;  %1861 = vmatpush.msrb.mxu3 %v683_v15 }
 0x8a5   :  { %v1516_v36 = vmul.f32 %v6470_v33, %v8221_v51  ;;  %v6472_v43 = vpop.eup %6471 }
 0x8a6   :  { %v1517_v24 = vmul.f32 %v6472_v43, %v8225_v30 }
 0x8aa   :  { %v1758_v44 = vpop.xlane.xlu0 %1757 }
 0x8ab   :  { %5958 = vmatmul.msk.f32.gmra.mxu3 %vm970_vm5, %v1514_v20  ;;  %5978 = vmatmul.msk.f32.gmra.mxu2 %vm970_vm5, %v1765_v27 }
 0x8b3   :  { %5959 = vmatmul.msk.f32.gmra.mxu3 %vm970_vm5, %v1515_v35 }
 0x8bb   :  { %5960 = vmatmul.msk.f32.gmra.mxu3 %vm970_vm5, %v1516_v36 }
 0x8c3   :  { %5961 = vmatmul.msk.f32.gmra.mxu3 %vm970_vm5, %v1517_v24 }
 0x8da   :  { %v1752_v39 = vpop.xlane.xlu2 %1751 }
 0x8db   :  { %6473 = vrcp.f32 %v1752_v39 }
 0x8dc   :  { %6475 = vrcp.f32 %v1755_v41 }
 0x8dd   :  { %6477 = vrcp.f32 %v1758_v44 }
 0x8e1   :  { %v6474_v61 = vpop.eup %6473 }
 0x8e2   :  { %v1766_v63 = vmul.f32 %v6474_v61, %v6458_v42  ;;  %v6476_v38 = vpop.eup %6475 }
 0x8e3   :  { %v1767_v51 = vmul.f32 %v6476_v38, %v8255_v25  ;;  %v6478_v30 = vpop.eup %6477 }
 0x8e4   :  { %5979 = vmatmul.msk.f32.gmra.mxu2 %vm970_vm5, %v1766_v63  ;;  %v1768_v46 = vmul.f32 %v6478_v30, %v8259_v47 }
 0x8ec   :  { %5980 = vmatmul.msk.f32.gmra.mxu2 %vm970_vm5, %v1767_v51 }
 0x8f4   :  { %5981 = vmatmul.msk.f32.gmra.mxu2 %vm970_vm5, %v1768_v46 }
 0x8f9   :  { %v1319_v52 = vpop.f32.mrf.mxu0 }
 0x8fa   :  { %v1367_v5 = vadd.f32 %v8126_v54, %v1319_v52 }
 0x901   :  { %v1322_v59 = vpop.f32.mrf.mxu0 }
 0x902   :  { %v1370_v16 = vadd.f32 %v8131_v58, %v1322_v59 }
 0x909   :  { %v1325_v40 = vpop.f32.mrf.mxu0 }
 0x90a   :  { %v1373_v58 = vadd.f32 %v8140_v8, %v1325_v40 }
 0x911   :  { %v1328_v1 = vpop.f32.mrf.mxu0 }
 0x912   :  { %v1376_v35 = vadd.f32 %v8149_v22, %v1328_v1 }
 0x91c   :  { %v1331_v42 = vpop.f32.mrf.mxu0 }
 0x91d   :  { %v1379_v39 = vadd.f32 %v8157_v32, %v1331_v42 }
 0x926   :  { %v1565_v13 = vpop.f32.mrf.mxu3  ;;  %v1816_v48 = vpop.f32.mrf.mxu2 }
 0x927   :  { %5962 = vmatmul.msk.f32.vlgmr.msra.gmra.mxu0 %vm907_vm4, %v1565_v13  ;;  %5982 = vmatmul.msk.f32.vlgmr.msrb.gmra.mxu3 %vm907_vm4, %v1816_v48 }
 0x92e   :  { %v1568_v23 = vpop.f32.mrf.mxu3  ;;  %v1819_v55 = vpop.f32.mrf.mxu2 }
 0x92f   :  { %5963 = vmatmul.msk.f32.gmra.mxu0 %vm907_vm4, %v1568_v23  ;;  %5983 = vmatmul.msk.f32.gmra.mxu3 %vm907_vm4, %v1819_v55 }
 0x936   :  { %v1571_v25 = vpop.f32.mrf.mxu3 }
 0x937   :  { %5964 = vmatmul.msk.f32.gmra.mxu0 %vm907_vm4, %v1571_v25 }
 0x93e   :  { %v1574_v47 = vpop.f32.mrf.mxu3 }
 0x93f   :  { %5965 = vmatmul.msk.f32.gmra.mxu0 %vm907_vm4, %v1574_v47 }
 0x946   :  { %v1577_v56 = vpop.f32.mrf.mxu3 }
 0x947   :  { %5966 = vmatmul.msk.f32.gmra.mxu0 %vm907_vm4, %v1577_v56 }
 0x967   :  { %v1822_v3 = vpop.f32.mrf.mxu2 }
 0x968   :  { %5984 = vmatmul.msk.f32.gmra.mxu3 %vm907_vm4, %v1822_v3 }
 0x96f   :  { %v1825_v9 = vpop.f32.mrf.mxu2 }
 0x970   :  { %5985 = vmatmul.msk.f32.gmra.mxu3 %vm907_vm4, %v1825_v9 }
 0x977   :  { %v1828_v57 = vpop.f32.mrf.mxu2 }
 0x978   :  { %5986 = vmatmul.msk.f32.gmra.mxu3 %vm907_vm4, %v1828_v57 }
 0x9a4   :  { %v1612_v4 = vpop.f32.mrf.mxu0 }
 0x9a5   :  { %v1627_v0 = vadd.f32 %v1612_v4, %v1367_v5 }
 0x9aa   :  { %v1863_v11 = vpop.f32.mrf.mxu3 }
 0x9ab   :  { %v1878_v10 = vadd.f32 %v1863_v11, %v1627_v0  ;;  %v690_v11 = vld [vmem:[%s9628_s14 + $0x18] sm:$0xff] }
 0x9ac   :  { %v1615_v21 = vpop.f32.mrf.mxu0  ;;  %2052 = vmatpush.msrb.mxu0 %v690_v11 }
 0x9ad   :  { %v1883_v12 = vadd.f32 %v1878_v10, %v7796_v31  ;;  %v1628_v19 = vadd.f32 %v1615_v21, %v1370_v16  ;;  %v689_v10 = vld [vmem:[%s9628_s14 + $0x10] sm:$0xff] }
 0x9ae   :  { %2053 = vmatpush.msrb.mxu0 %v689_v10 }
 0x9af   :  { %v8308_v17 = vadd.f32 %v6351_v62, %v1883_v12  ;;  %v687_v12 = vld [vmem:[%s9628_s14] sm:$0xff] }
 0x9b1   :  { %v1896_v26 = vsel %vm657_vm1, %v8308_v17, 0.0 }
 0x9b2   :  { %v1866_v49 = vpop.f32.mrf.mxu3  ;;  %1897 = vadd.xlane.f32.xlu2 %v1896_v26 }
 0x9b3   :  { %v1879_v18 = vadd.f32 %v1866_v49, %v1628_v19 }
 0x9b4   :  { %v1618_v31 = vpop.f32.mrf.mxu0 }
 0x9b5   :  { %v1884_v54 = vadd.f32 %v1879_v18, %v7810_v50  ;;  %v1629_v28 = vadd.f32 %v1618_v31, %v1373_v58 }
 0x9b7   :  { %v8313_v2 = vadd.f32 %v6351_v62, %v1884_v54 }
 0x9b9   :  { %v1899_v29 = vsel %vm657_vm1, %v8313_v2, 0.0 }
 0x9ba   :  { %1900 = vadd.xlane.f32.xlu0 %v1899_v29 }
 0x9bc   :  { %v1621_v53 = vpop.f32.mrf.mxu0 }
 0x9bd   :  { %v1630_v50 = vadd.f32 %v1621_v53, %v1376_v35 }
 0x9c4   :  { %v1624_v8 = vpop.f32.mrf.mxu0 }
 0x9c5   :  { %v1631_v61 = vadd.f32 %v1624_v8, %v1379_v39 }
 0x9eb   :  { %v1869_v20 = vpop.f32.mrf.mxu3 }
 0x9ec   :  { %v1880_v27 = vadd.f32 %v1869_v20, %v1629_v28 }
 0x9ee   :  { %v1885_v45 = vadd.f32 %v1880_v27, %v7816_v60 }
 0x9f0   :  { %v8320_v34 = vadd.f32 %v6351_v62, %v1885_v45  ;;  %v8373_v45 = vld [vmem:[%s9629_s24] ss:$0 sm:$0xff]  ;;  %s9646_s24 = sld [smem:[#allocation80_spill]] }
 0x9f2   :  { %v1902_v33 = vsel %vm657_vm1, %v8320_v34, 0.0 }
 0x9f3   :  { %v1872_v36 = vpop.f32.mrf.mxu3  ;;  %1903 = vadd.xlane.f32.xlu1 %v1902_v33 }
 0x9f4   :  { %v1881_v43 = vadd.f32 %v1872_v36, %v1630_v50  ;;  %v8376_v36 = vld [vmem:[%s9630_s19] ss:$0 sm:$0xff]  ;;  %s9647_s19 = sld [smem:[#allocation81_spill]] }
 0x9f6   :  { %v1886_v24 = vadd.f32 %v1881_v43, %v7822_v6 }
 0x9f8   :  { %v8326_v41 = vadd.f32 %v6351_v62, %v1886_v24 }
 0x9fa   :  { %v1905_v60 = vsel %vm657_vm1, %v8326_v41, 0.0 }
 0x9fb   :  { %v1875_v22 = vpop.f32.mrf.mxu3  ;;  %1906 = vadd.xlane.f32.xlu2 %v1905_v60 }
 0x9fc   :  { %v1882_v63 = vadd.f32 %v1875_v22, %v1631_v61 }
 0x9fe   :  { %v1887_v44 = vadd.f32 %v1882_v63, %v7831_v14 }
 0xa00   :  { %v8331_v38 = vadd.f32 %v6351_v62, %v1887_v44  ;;  %v688_v62 = vld [vmem:[%s9628_s14 + $0x8] sm:$0xff]  ;;  %s9645_s14 = sld [smem:[#allocation79_spill]] }
 0xa01   :  { %2054 = vmatpush.msrb.mxu0 %v688_v62 }
 0xa02   :  { %v1908_v51 = vsel %vm657_vm1, %v8331_v38, 0.0 }
 0xa03   :  { %1909 = vadd.xlane.f32.xlu0 %v1908_v51  ;;  %2055 = vmatpush.msrb.mxu0 %v687_v12 }
 0xa25   :  { %v1898_v6 = vpop.xlane.xlu2 %1897 }
 0xa26   :  { %v1911_v32 = vmul.f32 %v1898_v6, %v7824_v7 }
 0xa28   :  { %v1916_v30 = vsub.f32 %v8308_v17, %v1911_v32 }
 0xa2a   :  { %v1921_v46 = vmul.f32 %v1916_v30, %v1916_v30 }
 0xa2c   :  { %v1926_v37 = vsel %vm657_vm1, %v1921_v46, 0.0 }
 0xa2d   :  { %v1901_v15 = vpop.xlane.xlu0 %1900  ;;  %1927 = vadd.xlane.f32.xlu1 %v1926_v37 }
 0xa2e   :  { %v1912_v13 = vmul.f32 %v1901_v15, %v7824_v7 }
 0xa30   :  { %v8340_v14 = vsub.f32 %v8313_v2, %v1912_v13 }
 0xa32   :  { %v1922_v48 = vmul.f32 %v8340_v14, %v8340_v14 }
 0xa34   :  { %v1929_v23 = vsel %vm657_vm1, %v1922_v48, 0.0 }
 0xa35   :  { %1930 = vadd.xlane.f32.xlu2 %v1929_v23 }
 0xa66   :  { %v1904_v55 = vpop.xlane.xlu1 %1903 }
 0xa67   :  { %v1913_v25 = vmul.f32 %v1904_v55, %v7824_v7 }
 0xa69   :  { %v8347_v47 = vsub.f32 %v8320_v34, %v1913_v25 }
 0xa6b   :  { %v1923_v56 = vmul.f32 %v8347_v47, %v8347_v47 }
 0xa6d   :  { %v1932_v3 = vsel %vm657_vm1, %v1923_v56, 0.0 }
 0xa6e   :  { %1933 = vadd.xlane.f32.xlu0 %v1932_v3  ;;  %v1907_v9 = vpop.xlane.xlu2 %1906 }
 0xa6f   :  { %v1914_v52 = vmul.f32 %v1907_v9, %v7824_v7 }
 0xa71   :  { %v8354_v57 = vsub.f32 %v8326_v41, %v1914_v52 }
 0xa73   :  { %v1924_v59 = vmul.f32 %v8354_v57, %v8354_v57 }
 0xa75   :  { %v1935_v40 = vsel %vm657_vm1, %v1924_v59, 0.0 }
 0xa76   :  { %v1910_v1 = vpop.xlane.xlu0 %1909  ;;  %1936 = vadd.xlane.f32.xlu1 %v1935_v40 }
 0xa77   :  { %v1915_v42 = vmul.f32 %v1910_v1, %v7824_v7 }
 0xa79   :  { %v8361_v4 = vsub.f32 %v8331_v38, %v1915_v42 }
 0xa7b   :  { %v1925_v5 = vmul.f32 %v8361_v4, %v8361_v4 }
 0xa7d   :  { %v1938_v0 = vsel %vm657_vm1, %v1925_v5, 0.0 }
 0xa7e   :  { %1939 = vadd.xlane.f32.xlu2 %v1938_v0 }
 0xaa0   :  { %v1928_v21 = vpop.xlane.xlu1 %1927 }
 0xaa1   :  { %v1941_v16 = vmul.f32 %v1928_v21, %v7824_v7 }
 0xaa3   :  { %v1946_v19 = vadd.f32 1e-06, %v1941_v16 }
 0xaa5   :  { %6479 = vrsqrt.f32 %v1946_v19  ;;  %vm1957_vm7 = vweird.f32 %v1946_v19 }
 0xaa8   :  { %v1931_v26 = vpop.xlane.xlu2 %1930 }
 0xaa9   :  { %v1942_v49 = vmul.f32 %v1931_v26, %v7824_v7 }
 0xaab   :  { %v6480_v18 = vpop.eup %6479  ;;  %v1947_v54 = vadd.f32 1e-06, %v1942_v49 }
 0xaac   :  { %v1952_v29 = vmul.f32 %v6480_v18, %v1946_v19  ;;  %vm1958_vm6 = vweird.f32 %v6480_v18 }
 0xaad   :  { %6481 = vrsqrt.f32 %v1947_v54  ;;  %vm1959_vm8 = vmor %vm1957_vm7, %vm1958_vm6  ;;  %vm1967_vm10 = vweird.f32 %v1947_v54 }
 0xaae   :  { %v1953_v31 = vmul.f32 %v6480_v18, %v1952_v29 }
 0xab0   :  { %v1954_v58 = vmul.f32 0.5, %v1953_v31 }
 0xab2   :  { %v1955_v28 = vsub.f32 1.5, %v1954_v58 }
 0xab3   :  { %v6482_v20 = vpop.eup %6481 }
 0xab4   :  { %v1956_v27 = vmul.f32 %v6480_v18, %v1955_v28  ;;  %v1962_v53 = vmul.f32 %v6482_v20, %v1947_v54  ;;  %vm1968_vm9 = vweird.f32 %v6482_v20  ;;  %v707_v28 = vld [vmem:[%s9631_s17 + $0x78] sm:$0xff] }
 0xab5   :  { %vm1969_vm11 = vmor %vm1967_vm10, %vm1968_vm9  ;;  %2272 = vmatpush.msra.mxu1 %v707_v28 }
 0xab6   :  { %v1960_v35 = vsel %vm1959_vm8, %v6480_v18, %v1956_v27  ;;  %v1963_v50 = vmul.f32 %v6482_v20, %v1962_v53  ;;  %v8403_v27 = vld [vmem:[%s9632_s18] ss:$0 sm:$0xff]  ;;  %v705_v53 = vld [vmem:[%s9631_s17 + $0x68] sm:$0xff]  ;;  %s9650_s18 = sld [smem:[#allocation84_spill]] }
 0xab7   :  { %v2001_v33 = vmul.f32 %v1960_v35, %v1916_v30  ;;  %v704_v35 = vld [vmem:[%s9631_s17 + $0x60] sm:$0xff] }
 0xab8   :  { %v1964_v43 = vmul.f32 0.5, %v1963_v50 }
 0xab9   :  { %v2009_v24 = vmul.f32 %v8373_v45, %v2001_v33 }
 0xaba   :  { %v1965_v8 = vsub.f32 1.5, %v1964_v43 }
 0xabb   :  { %v2017_v39 = vadd.f32 %v8376_v36, %v2009_v24  ;;  %v701_v24 = vld [vmem:[%s9631_s17 + $0x48] sm:$0xff] }
 0xabc   :  { %v1966_v61 = vmul.f32 %v6482_v20, %v1965_v8 }
 0xabd   :  { %5987 = vmatmul.msk.f32.vlgmr.msrb.gmra.mxu0 %vm657_vm1, %v2017_v39  ;;  %v700_v39 = vld [vmem:[%s9631_s17 + $0x40] sm:$0xff] }
 0xabe   :  { %v1970_v60 = vsel %vm1969_vm11, %v6482_v20, %v1966_v61  ;;  %v706_v20 = vld [vmem:[%s9631_s17 + $0x70] sm:$0xff] }
 0xabf   :  { %v2002_v22 = vmul.f32 %v1970_v60, %v8340_v14  ;;  %2273 = vmatpush.msra.mxu1 %v706_v20 }
 0xac1   :  { %v2010_v63 = vmul.f32 %v8373_v45, %v2002_v22  ;;  %2274 = vmatpush.msra.mxu1 %v705_v53 }
 0xac3   :  { %v2018_v44 = vadd.f32 %v8376_v36, %v2010_v63  ;;  %2275 = vmatpush.msra.mxu1 %v704_v35  ;;  %v699_v63 = vld [vmem:[%s9631_s17 + $0x38] sm:$0xff] }
 0xac5   :  { %5988 = vmatmul.msk.f32.gmra.mxu0 %vm657_vm1, %v2018_v44  ;;  %v698_v44 = vld [vmem:[%s9631_s17 + $0x30] sm:$0xff] }
 0xae1   :  { %v1934_v51 = vpop.xlane.xlu0 %1933 }
 0xae2   :  { %v1943_v6 = vmul.f32 %v1934_v51, %v7824_v7 }
 0xae4   :  { %v1948_v32 = vadd.f32 1e-06, %v1943_v6  ;;  %v697_v6 = vld [vmem:[%s9631_s17 + $0x28] sm:$0xff] }
 0xae6   :  { %6483 = vrsqrt.f32 %v1948_v32  ;;  %vm1977_vm13 = vweird.f32 %v1948_v32 }
 0xae9   :  { %v1937_v30 = vpop.xlane.xlu1 %1936 }
 0xaea   :  { %v1944_v46 = vmul.f32 %v1937_v30, %v7824_v7  ;;  %v696_v30 = vld [vmem:[%s9631_s17 + $0x20] sm:$0xff] }
 0xaec   :  { %v6484_v37 = vpop.eup %6483  ;;  %v1949_v15 = vadd.f32 1e-06, %v1944_v46 }
 0xaed   :  { %v1972_v13 = vmul.f32 %v6484_v37, %v1948_v32  ;;  %vm1978_vm12 = vweird.f32 %v6484_v37 }
 0xaee   :  { %6485 = vrsqrt.f32 %v1949_v15  ;;  %vm1979_vm14 = vmor %vm1977_vm13, %vm1978_vm12  ;;  %vm1987_vm2 = vweird.f32 %v1949_v15 }
 0xaef   :  { %v1973_v48 = vmul.f32 %v6484_v37, %v1972_v13 }
 0xaf1   :  { %v1974_v14 = vmul.f32 0.5, %v1973_v48  ;;  %v1940_v23 = vpop.xlane.xlu2 %1939 }
 0xaf2   :  { %v1945_v55 = vmul.f32 %v1940_v23, %v7824_v7 }
 0xaf3   :  { %v1975_v25 = vsub.f32 1.5, %v1974_v14  ;;  %v694_v14 = vld [vmem:[%s9631_s17 + $0x10] sm:$0xff] }
 0xaf4   :  { %v6486_v56 = vpop.eup %6485  ;;  %v1950_v3 = vadd.f32 1e-06, %v1945_v55 }
 0xaf5   :  { %v1976_v9 = vmul.f32 %v6484_v37, %v1975_v25  ;;  %v1982_v52 = vmul.f32 %v6486_v56, %v1949_v15  ;;  %vm1988_vm15 = vweird.f32 %v6486_v56  ;;  %v695_v15 = vld [vmem:[%s9631_s17 + $0x18] sm:$0xff]  ;;  %v693_v25 = vld [vmem:[%s9631_s17 + $0x8] sm:$0xff] }
 0xaf6   :  { %6487 = vrsqrt.f32 %v1950_v3  ;;  %vm1989_vm3 = vmor %vm1987_vm2, %vm1988_vm15  ;;  %vm1997_vm7 = vweird.f32 %v1950_v3 }
 0xaf7   :  { %v1983_v59 = vmul.f32 %v6486_v56, %v1982_v52  ;;  %v1980_v40 = vsel %vm1979_vm14, %v6484_v37, %v1976_v9  ;;  %v692_v9 = vld [vmem:[%s9631_s17] sm:$0xff] }
 0xaf8   :  { %v2003_v1 = vmul.f32 %v1980_v40, %v8347_v47 }
 0xaf9   :  { %v1984_v42 = vmul.f32 0.5, %v1983_v59 }
 0xafa   :  { %v2011_v5 = vmul.f32 %v8373_v45, %v2003_v1 }
 0xafb   :  { %v1985_v0 = vsub.f32 1.5, %v1984_v42 }
 0xafc   :  { %v6488_v11 = vpop.eup %6487  ;;  %v2019_v10 = vadd.f32 %v8376_v36, %v2011_v5 }
 0xafd   :  { %v1986_v62 = vmul.f32 %v6486_v56, %v1985_v0  ;;  %v1992_v12 = vmul.f32 %v6488_v11, %v1950_v3  ;;  %vm1998_vm6 = vweird.f32 %v6488_v11 }
 0xafe   :  { %5989 = vmatmul.msk.f32.gmra.mxu0 %vm657_vm1, %v2019_v10  ;;  %vm1999_vm8 = vmor %vm1997_vm7, %vm1998_vm6 }
 0xaff   :  { %v1993_v21 = vmul.f32 %v6488_v11, %v1992_v12  ;;  %v1990_v16 = vsel %vm1989_vm3, %v6486_v56, %v1986_v62 }
 0xb00   :  { %v2004_v19 = vmul.f32 %v1990_v16, %v8354_v57 }
 0xb01   :  { %v1994_v47 = vmul.f32 0.5, %v1993_v21 }
 0xb02   :  { %v2012_v26 = vmul.f32 %v8373_v45, %v2004_v19 }
 0xb03   :  { %v1995_v49 = vsub.f32 1.5, %v1994_v47 }
 0xb04   :  { %v2020_v18 = vadd.f32 %v8376_v36, %v2012_v26 }
 0xb05   :  { %v1996_v54 = vmul.f32 %v6488_v11, %v1995_v49 }
 0xb06   :  { %5990 = vmatmul.msk.f32.gmra.mxu0 %vm657_vm1, %v2020_v18 }
 0xb07   :  { %v2000_v29 = vsel %vm1999_vm8, %v6488_v11, %v1996_v54 }
 0xb08   :  { %v2005_v57 = vmul.f32 %v2000_v29, %v8361_v4 }
 0xb0a   :  { %v2013_v31 = vmul.f32 %v8373_v45, %v2005_v57  ;;  %v703_v45 = vld [vmem:[%s9631_s17 + $0x58] sm:$0xff] }
 0xb0b   :  { %2276 = vmatpush.msra.mxu1 %v703_v45 }
 0xb0c   :  { %v2021_v58 = vadd.f32 %v8376_v36, %v2013_v31  ;;  %v702_v36 = vld [vmem:[%s9631_s17 + $0x50] sm:$0xff]  ;;  %s9649_s17 = sld [smem:[#allocation82_spill]] }
 0xb0d   :  { %2277 = vmatpush.msra.mxu1 %v702_v36 }
 0xb0e   :  { %5991 = vmatmul.msk.f32.gmra.mxu0 %vm657_vm1, %v2021_v58 }
 0xb0f   :  { %2278 = vmatpush.msra.mxu1 %v701_v24 }
 0xb11   :  { %2279 = vmatpush.msra.mxu1 %v700_v39 }
 0xb13   :  { %2280 = vmatpush.msra.mxu1 %v699_v63 }
 0xb15   :  { %2281 = vmatpush.msra.mxu1 %v698_v44 }
 0xb17   :  { %2282 = vmatpush.msra.mxu1 %v697_v6  ;;  %v7371_v6 = vmov -1.0  }
 0xb19   :  { %2283 = vmatpush.msra.mxu1 %v696_v30 }
 0xb1b   :  { %2284 = vmatpush.msra.mxu1 %v695_v15 }
 0xb1d   :  { %2285 = vmatpush.msra.mxu1 %v694_v14 }
 0xb1f   :  { %2286 = vmatpush.msra.mxu1 %v693_v25 }
 0xb21   :  { %2287 = vmatpush.msra.mxu1 %v692_v9 }
 0xb3a   :  { %v2057_v50 = vpop.f32.mrf.mxu0 }
 0xb3b   :  { %v8408_v4 = vadd.f32 %v8403_v27, %v2057_v50 }
 0xb3d   :  { %v8412_v33 = vmul.f32 0.70710677, %v8408_v4 }
 0xb3f   :  { %v2092_v43 = vand.u32 2147483647, %v8412_v33  ;;  %vm2082_vm3 = vcmp.ge.f32.partialorder %v8412_v33, 0.0 }
 0xb40   :  { %v2087_v30 = vsel %vm2082_vm3, 1.0, %v7371_v6 }
 0xb41   :  { %v2097_v8 = vmul.f32 0.3275911, %v2092_v43  ;;  %v2227_v5 = vsub.f32 0.0, %v2092_v43 }
 0xb42   :  { %v2060_v61 = vpop.f32.mrf.mxu0 }
 0xb43   :  { %v2102_v60 = vadd.f32 1.0, %v2097_v8  ;;  %v8419_v22 = vadd.f32 %v8403_v27, %v2060_v61  ;;  %v2232_v21 = vmul.f32 %v2227_v5, %v2092_v43 }
 0xb45   :  { %6489 = vrcp.f32 %v2102_v60  ;;  %v8424_v51 = vmul.f32 0.70710677, %v8419_v22  ;;  %v2118_v55 = vand.u32 2147483648, %v2102_v60  ;;  %v2116_v3 = vand.u32 2147483647, %v2102_v60 }
 0xb46   :  { %vm2112_vm10 = vweird.f32 %v2102_v60  ;;  %v2237_v54 = vmul.f32 1.442695, %v2232_v21 }
 0xb47   :  { %v2093_v32 = vand.u32 2147483647, %v8424_v51  ;;  %v2119_v59 = vor.u32 1.1754944e-38, %v2118_v55  ;;  %vm2117_vm12 = vcmp.eq.f32.partialorder %v2116_v3, 8.507059e+37  ;;  %vm2083_vm6 = vcmp.ge.f32.partialorder %v8424_v51, 0.0 }
 0xb48   :  { %v2088_v25 = vsel %vm2083_vm6, 1.0, %v7371_v6  ;;  %v2073_v3 = vmul.f32 0.5, %v8419_v22 }
 0xb49   :  { %v2098_v46 = vmul.f32 0.3275911, %v2093_v32  ;;  %v2228_v31 = vsub.f32 0.0, %v2093_v32 }
 0xb4b   :  { %v6490_v37 = vpop.eup %6489  ;;  %v2103_v48 = vadd.f32 1.0, %v2098_v46  ;;  %v2233_v50 = vmul.f32 %v2228_v31, %v2093_v32  ;;  %v2072_v32 = vmul.f32 0.5, %v8408_v4 }
 0xb4c   :  { %v2108_v13 = vmul.f32 %v6490_v37, %v2102_v60  ;;  %vm2113_vm9 = vweird.f32 %v6490_v37 }
 0xb4d   :  { %6491 = vrcp.f32 %v2103_v48  ;;  %vm2114_vm11 = vmor %vm2112_vm10, %vm2113_vm9  ;;  %v2133_v12 = vand.u32 2147483648, %v2103_v48  ;;  %v2131_v19 = vand.u32 2147483647, %v2103_v48  ;;  %vm2127_vm14 = vweird.f32 %v2103_v48 }
 0xb4e   :  { %v2109_v23 = vsub.f32 1.0, %v2108_v13  ;;  %6493 = vpow2.f32 %v2237_v54  ;;  %v2239_v8 = vmul.f32 1.442695, %v2233_v50 }
 0xb4f   :  { %v2134_v18 = vor.u32 1.1754944e-38, %v2133_v12  ;;  %vm2132_vm2 = vcmp.eq.f32.partialorder %v2131_v19, 8.507059e+37 }
 0xb50   :  { %v2110_v56 = vmul.f32 %v6490_v37, %v2109_v23  ;;  %6495 = vpow2.f32 %v2239_v8 }
 0xb52   :  { %v2111_v52 = vadd.f32 %v6490_v37, %v2110_v56 }
 0xb53   :  { %v6492_v40 = vpop.eup %6491 }
 0xb54   :  { %v2115_v1 = vsel %vm2114_vm11, %v6490_v37, %v2111_v52  ;;  %v2123_v0 = vmul.f32 %v6492_v40, %v2103_v48  ;;  %vm2128_vm13 = vweird.f32 %v6492_v40  ;;  %v6494_v39 = vpop.eup %6493 }
 0xb55   :  { %v2120_v42 = vsel %vm2117_vm12, %v2119_v59, %v2115_v1  ;;  %vm2129_vm15 = vmor %vm2127_vm14, %vm2128_vm13 }
 0xb56   :  { %v2182_v11 = vmul.f32 1.0614054, %v2120_v42  ;;  %v2124_v10 = vsub.f32 1.0, %v2123_v0  ;;  %v6496_v14 = vpop.eup %6495 }
 0xb58   :  { %v2187_v62 = vadd.f32 -1.4531521, %v2182_v11  ;;  %v2125_v16 = vmul.f32 %v6492_v40, %v2124_v10 }
 0xb5a   :  { %v2192_v47 = vmul.f32 %v2187_v62, %v2120_v42  ;;  %v2126_v26 = vadd.f32 %v6492_v40, %v2125_v16 }
 0xb5c   :  { %v2197_v49 = vadd.f32 1.4214138, %v2192_v47  ;;  %v2130_v29 = vsel %vm2129_vm15, %v6492_v40, %v2126_v26 }
 0xb5d   :  { %v2135_v58 = vsel %vm2132_vm2, %v2134_v18, %v2130_v29 }
 0xb5e   :  { %v2202_v57 = vmul.f32 %v2197_v49, %v2120_v42  ;;  %v2183_v28 = vmul.f32 1.0614054, %v2135_v58 }
 0xb60   :  { %v2207_v20 = vadd.f32 -0.28449672, %v2202_v57  ;;  %v2188_v53 = vadd.f32 -1.4531521, %v2183_v28 }
 0xb62   :  { %v2212_v35 = vmul.f32 %v2207_v20, %v2120_v42  ;;  %v2193_v45 = vmul.f32 %v2188_v53, %v2135_v58 }
 0xb64   :  { %v2217_v36 = vadd.f32 0.2548296, %v2212_v35  ;;  %v2198_v43 = vadd.f32 1.4214138, %v2193_v45 }
 0xb66   :  { %v2222_v24 = vmul.f32 %v2217_v36, %v2120_v42  ;;  %v2203_v61 = vmul.f32 %v2198_v43, %v2135_v58 }
 0xb68   :  { %v2247_v60 = vmul.f32 %v6494_v39, %v2222_v24  ;;  %v2208_v63 = vadd.f32 -0.28449672, %v2203_v61 }
 0xb6a   :  { %v2252_v44 = vsub.f32 1.0, %v2247_v60  ;;  %v2213_v46 = vmul.f32 %v2208_v63, %v2135_v58 }
 0xb6c   :  { %v2257_v37 = vmul.f32 %v2252_v44, %v2087_v30  ;;  %v2218_v15 = vadd.f32 0.2548296, %v2213_v46 }
 0xb6e   :  { %v2262_v13 = vadd.f32 1.0, %v2257_v37  ;;  %v2223_v48 = vmul.f32 %v2218_v15, %v2135_v58 }
 0xb70   :  { %v2267_v23 = vmul.f32 %v2262_v13, %v2072_v32  ;;  %v2248_v55 = vmul.f32 %v6496_v14, %v2223_v48 }
 0xb72   :  { %2288 = vmatmul.f32.vlgmr.msra.gmra.mxu1 %v2267_v23  ;;  %v2253_v33 = vsub.f32 1.0, %v2248_v55 }
 0xb74   :  { %v2258_v56 = vmul.f32 %v2253_v33, %v2088_v25 }
 0xb76   :  { %v2263_v9 = vadd.f32 1.0, %v2258_v56 }
 0xb78   :  { %v2268_v52 = vmul.f32 %v2263_v9, %v2073_v3 }
 0xb7a   :  { %2291 = vmatmul.f32.gmra.mxu1 %v2268_v52 }
 0xb7b   :  { %v2063_v59 = vpop.f32.mrf.mxu0 }
 0xb7c   :  { %v8440_v4 = vadd.f32 %v8403_v27, %v2063_v59 }
 0xb7e   :  { %v8443_v40 = vmul.f32 0.70710677, %v8440_v4 }
 0xb80   :  { %v2094_v51 = vand.u32 2147483647, %v8443_v40 }
 0xb82   :  { %v2099_v1 = vmul.f32 0.3275911, %v2094_v51  ;;  %v2229_v35 = vsub.f32 0.0, %v2094_v51 }
 0xb83   :  { %v2066_v42 = vpop.f32.mrf.mxu0 }
 0xb84   :  { %v2104_v5 = vadd.f32 1.0, %v2099_v1  ;;  %v8447_v0 = vadd.f32 %v8403_v27, %v2066_v42  ;;  %v2234_v61 = vmul.f32 %v2229_v35, %v2094_v51 }
 0xb86   :  { %6497 = vrcp.f32 %v2104_v5  ;;  %v8450_v22 = vmul.f32 0.70710677, %v8447_v0  ;;  %v2148_v18 = vand.u32 2147483648, %v2104_v5  ;;  %v2146_v29 = vand.u32 2147483647, %v2104_v5 }
 0xb87   :  { %vm2142_vm8 = vweird.f32 %v2104_v5  ;;  %v2241_v32 = vmul.f32 1.442695, %v2234_v61 }
 0xb88   :  { %v2095_v11 = vand.u32 2147483647, %v8450_v22  ;;  %v2149_v28 = vor.u32 1.1754944e-38, %v2148_v18  ;;  %vm2147_vm10 = vcmp.eq.f32.partialorder %v2146_v29, 8.507059e+37 }
 0xb8a   :  { %v2100_v10 = vmul.f32 0.3275911, %v2095_v11  ;;  %v2230_v13 = vsub.f32 0.0, %v2095_v11 }
 0xb8b   :  { %v2069_v62 = vpop.f32.mrf.mxu0 }
 0xb8c   :  { %v6498_v12 = vpop.eup %6497  ;;  %v2105_v21 = vadd.f32 1.0, %v2100_v10  ;;  %v8454_v16 = vadd.f32 %v8403_v27, %v2069_v62  ;;  %v2235_v52 = vmul.f32 %v2230_v13, %v2095_v11 }
 0xb8d   :  { %v2138_v19 = vmul.f32 %v6498_v12, %v2104_v5  ;;  %vm2143_vm7 = vweird.f32 %v6498_v12 }
 0xb8e   :  { %6499 = vrcp.f32 %v2105_v21  ;;  %v8457_v47 = vmul.f32 0.70710677, %v8454_v16  ;;  %vm2144_vm9 = vmor %vm2142_vm8, %vm2143_vm7  ;;  %v2163_v43 = vand.u32 2147483648, %v2105_v21  ;;  %v2161_v39 = vand.u32 2147483647, %v2105_v21 }
 0xb8f   :  { %v2139_v26 = vsub.f32 1.0, %v2138_v19  ;;  %vm2157_vm12 = vweird.f32 %v2105_v21  ;;  %vm2084_vm7 = vcmp.ge.f32.partialorder %v8443_v40, 0.0  ;;  %vm2085_vm8 = vcmp.ge.f32.partialorder %v8450_v22, 0.0 }
 0xb90   :  { %v8460_v49 = vand.u32 2147483647, %v8457_v47  ;;  %v2164_v30 = vor.u32 1.1754944e-38, %v2163_v43  ;;  %vm2162_vm14 = vcmp.eq.f32.partialorder %v2161_v39, 8.507059e+37  ;;  %v2074_v43 = vmul.f32 0.5, %v8440_v4 }
 0xb91   :  { %v2140_v54 = vmul.f32 %v6498_v12, %v2139_v26  ;;  %v2075_v4 = vmul.f32 0.5, %v8447_v0 }
 0xb92   :  { %v2101_v57 = vmul.f32 0.3275911, %v8460_v49 }
 0xb93   :  { %v2141_v31 = vadd.f32 %v6498_v12, %v2140_v54 }
 0xb94   :  { %v6500_v58 = vpop.eup %6499  ;;  %v2106_v27 = vadd.f32 1.0, %v2101_v57 }
 0xb95   :  { %v2153_v20 = vmul.f32 %v6500_v58, %v2105_v21  ;;  %v2145_v53 = vsel %vm2144_vm9, %v6498_v12, %v2141_v31  ;;  %vm2158_vm11 = vweird.f32 %v6500_v58  ;;  %v2243_v12 = vmul.f32 1.442695, %v2235_v52 }
 0xb96   :  { %6501 = vrcp.f32 %v2106_v27  ;;  %v2150_v50 = vsel %vm2147_vm10, %v2149_v28, %v2145_v53  ;;  %vm2159_vm13 = vmor %vm2157_vm12, %vm2158_vm11  ;;  %v2176_v33 = vand.u32 2147483647, %v2106_v27  ;;  %v2178_v25 = vand.u32 2147483648, %v2106_v27 }
 0xb97   :  { %v2154_v45 = vsub.f32 1.0, %v2153_v20  ;;  %v2184_v36 = vmul.f32 1.0614054, %v2150_v50  ;;  %6503 = vpow2.f32 %v2241_v32  ;;  %vm2172_vm2 = vweird.f32 %v2106_v27 }
 0xb98   :  { %v2179_v42 = vor.u32 1.1754944e-38, %v2178_v25  ;;  %vm2177_vm6 = vcmp.eq.f32.partialorder %v2176_v33, 8.507059e+37  ;;  %v2231_v21 = vsub.f32 0.0, %v8460_v49  ;;  %6505 = vpow2.f32 %v2243_v12 }
 0xb99   :  { %v2189_v24 = vadd.f32 -1.4531521, %v2184_v36  ;;  %v2155_v8 = vmul.f32 %v6500_v58, %v2154_v45  ;;  %v2089_v53 = vsel %vm2084_vm7, 1.0, %v7371_v6  ;;  %vm2086_vm9 = vcmp.ge.f32.partialorder %v8457_v47, 0.0 }
 0xb9a   :  { %v2076_v33 = vmul.f32 0.5, %v8454_v16 }
 0xb9b   :  { %v2194_v60 = vmul.f32 %v2189_v24, %v2150_v50  ;;  %v2156_v63 = vadd.f32 %v6500_v58, %v2155_v8 }
 0xb9c   :  { %v6502_v44 = vpop.eup %6501 }
 0xb9d   :  { %v2168_v46 = vmul.f32 %v6502_v44, %v2106_v27  ;;  %v2199_v37 = vadd.f32 1.4214138, %v2194_v60  ;;  %v2160_v15 = vsel %vm2159_vm13, %v6500_v58, %v2156_v63  ;;  %vm2173_vm15 = vweird.f32 %v6502_v44  ;;  %v6504_v29 = vpop.eup %6503 }
 0xb9e   :  { %v2165_v48 = vsel %vm2162_vm14, %v2164_v30, %v2160_v15  ;;  %vm2174_vm3 = vmor %vm2172_vm2, %vm2173_vm15  ;;  %v2236_v58 = vmul.f32 %v2231_v21, %v8460_v49  ;;  %v6506_v39 = vpop.eup %6505  ;;  %v2090_v30 = vsel %vm2085_vm8, 1.0, %v7371_v6 }
 0xb9f   :  { %v2169_v14 = vsub.f32 1.0, %v2168_v46  ;;  %v2204_v23 = vmul.f32 %v2199_v37, %v2150_v50  ;;  %v2185_v55 = vmul.f32 1.0614054, %v2165_v48 }
 0xba1   :  { %v2209_v56 = vadd.f32 -0.28449672, %v2204_v23  ;;  %v2190_v3 = vadd.f32 -1.4531521, %v2185_v55  ;;  %v2170_v9 = vmul.f32 %v6502_v44, %v2169_v14  ;;  %v2091_v23 = vsel %vm2086_vm9, 1.0, %v7371_v6 }
 0xba3   :  { %v2214_v59 = vmul.f32 %v2209_v56, %v2150_v50  ;;  %v2195_v51 = vmul.f32 %v2190_v3, %v2165_v48  ;;  %v2171_v1 = vadd.f32 %v6502_v44, %v2170_v9  ;;  %v6355_v3 = vld [vmem:[%s9633_s23] ss:$0 sm:$0xff]  ;;  %s9651_s23 = sld [smem:[#allocation52_spill]] }
 0xba5   :  { %v2219_v5 = vadd.f32 0.2548296, %v2214_v59  ;;  %v2200_v10 = vadd.f32 1.4214138, %v2195_v51  ;;  %v2175_v62 = vsel %vm2174_vm3, %v6502_v44, %v2171_v1 }
 0xba6   :  { %v2180_v19 = vsel %vm2177_vm6, %v2179_v42, %v2175_v62 }
 0xba7   :  { %v2224_v26 = vmul.f32 %v2219_v5, %v2150_v50  ;;  %v2205_v18 = vmul.f32 %v2200_v10, %v2165_v48  ;;  %v2186_v54 = vmul.f32 1.0614054, %v2180_v19  ;;  %v2245_v50 = vmul.f32 1.442695, %v2236_v58 }
 0xba9   :  { %v2249_v11 = vmul.f32 %v6504_v29, %v2224_v26  ;;  %v2210_v57 = vadd.f32 -0.28449672, %v2205_v18  ;;  %v2191_v31 = vadd.f32 -1.4531521, %v2186_v54  ;;  %6507 = vpow2.f32 %v2245_v50 }
 0xbab   :  { %v2254_v27 = vsub.f32 1.0, %v2249_v11  ;;  %v2215_v28 = vmul.f32 %v2210_v57, %v2165_v48  ;;  %v2196_v20 = vmul.f32 %v2191_v31, %v2180_v19 }
 0xbad   :  { %v2259_v35 = vmul.f32 %v2254_v27, %v2089_v53  ;;  %v2220_v45 = vadd.f32 0.2548296, %v2215_v28  ;;  %v2201_v36 = vadd.f32 1.4214138, %v2196_v20 }
 0xbaf   :  { %v2264_v24 = vadd.f32 1.0, %v2259_v35  ;;  %v2225_v8 = vmul.f32 %v2220_v45, %v2165_v48  ;;  %v2206_v40 = vmul.f32 %v2201_v36, %v2180_v19  ;;  %v6508_v13 = vpop.eup %6507 }
 0xbb1   :  { %v2269_v61 = vmul.f32 %v2264_v24, %v2074_v43  ;;  %v2250_v60 = vmul.f32 %v6506_v39, %v2225_v8  ;;  %v2211_v49 = vadd.f32 -0.28449672, %v2206_v40 }
 0xbb3   :  { %2294 = vmatmul.f32.gmra.mxu1 %v2269_v61  ;;  %v2255_v63 = vsub.f32 1.0, %v2250_v60  ;;  %v2216_v44 = vmul.f32 %v2211_v49, %v2180_v19 }
 0xbb5   :  { %v2260_v46 = vmul.f32 %v2255_v63, %v2090_v30  ;;  %v2221_v37 = vadd.f32 0.2548296, %v2216_v44  ;;  %v2322_v44 = vld [vmem:[%s9634_s9 + $0x18] sm:$0xff]  ;;  %v2321_v30 = vld [vmem:[%s9634_s9 + $0x10] sm:$0xff] }
 0xbb6   :  { %2509 = vmatpush.msra.mxu2 %v2322_v44 }
 0xbb7   :  { %v2265_v15 = vadd.f32 1.0, %v2260_v46  ;;  %v2226_v32 = vmul.f32 %v2221_v37, %v2180_v19  ;;  %v2320_v46 = vld [vmem:[%s9634_s9 + $0x8] sm:$0xff]  ;;  %v2319_v37 = vld [vmem:[%s9634_s9] sm:$0xff]  ;;  %s9652_s9 = sld [smem:[#allocation85_spill]] }
 0xbb8   :  { %2510 = vmatpush.msra.mxu2 %v2321_v30 }
 0xbb9   :  { %v2270_v22 = vmul.f32 %v2265_v15, %v2075_v4  ;;  %v2251_v48 = vmul.f32 %v6508_v13, %v2226_v32 }
 0xbba   :  { %2511 = vmatpush.msra.mxu2 %v2320_v46 }
 0xbbb   :  { %2297 = vmatmul.f32.gmra.mxu1 %v2270_v22  ;;  %v2256_v14 = vsub.f32 1.0, %v2251_v48 }
 0xbbc   :  { %2512 = vmatpush.msra.mxu2 %v2319_v37 }
 0xbbd   :  { %v2261_v55 = vmul.f32 %v2256_v14, %v2091_v23 }
 0xbbf   :  { %v2266_v25 = vadd.f32 1.0, %v2261_v55 }
 0xbc1   :  { %v2271_v56 = vmul.f32 %v2266_v25, %v2076_v33 }
 0xbc3   :  { %2300 = vmatmul.f32.gmra.mxu1 %v2271_v56 }
 0xbef   :  { %v2289_v9 = vpop.f32.mrf.mxu1 }
 0xbf0   :  { %v2304_v0 = vadd.f32 %v2289_v9, %v8308_v17  ;;  %v8538_v9 = vld [vmem:[%s9635_s8] ss:$0 sm:$0xff]  ;;  %s9653_s8 = sld [smem:[#allocation86_spill]] }
 0xbf2   :  { %v8476_v52 = vadd.f32 %v6355_v3, %v2304_v0 }
 0xbf4   :  { %v2353_v47 = vsel %vm657_vm1, %v8476_v52, 0.0 }
 0xbf5   :  { %2354 = vadd.xlane.f32.xlu0 %v2353_v47 }
 0xbf7   :  { %v2292_v59 = vpop.f32.mrf.mxu1 }
 0xbf8   :  { %v2305_v51 = vadd.f32 %v2292_v59, %v8313_v2 }
 0xbfa   :  { %v8481_v1 = vadd.f32 %v6355_v3, %v2305_v51 }
 0xbfc   :  { %v2356_v16 = vsel %vm657_vm1, %v8481_v1, 0.0 }
 0xbfd   :  { %2357 = vadd.xlane.f32.xlu1 %v2356_v16  ;;  %v8541_v16 = vld [vmem:[%s9636_s26] ss:$0 sm:$0xff]  ;;  %s9654_s26 = sld [smem:[#allocation87_spill]] }
 0xc30   :  { %v2295_v42 = vpop.f32.mrf.mxu1 }
 0xc31   :  { %v2306_v5 = vadd.f32 %v2295_v42, %v8320_v34 }
 0xc33   :  { %v8486_v10 = vadd.f32 %v6355_v3, %v2306_v5 }
 0xc35   :  { %v2359_v17 = vsel %vm657_vm1, %v8486_v10, 0.0 }
 0xc36   :  { %2360 = vadd.xlane.f32.xlu2 %v2359_v17 }
 0xc38   :  { %v2298_v62 = vpop.f32.mrf.mxu1 }
 0xc39   :  { %v2307_v12 = vadd.f32 %v2298_v62, %v8326_v41 }
 0xc3b   :  { %v8491_v21 = vadd.f32 %v6355_v3, %v2307_v12 }
 0xc3d   :  { %v2362_v2 = vsel %vm657_vm1, %v8491_v21, 0.0 }
 0xc3e   :  { %2363 = vadd.xlane.f32.xlu0 %v2362_v2 }
 0xc40   :  { %v2301_v19 = vpop.f32.mrf.mxu1 }
 0xc41   :  { %v2308_v26 = vadd.f32 %v2301_v19, %v8331_v38 }
 0xc43   :  { %v8496_v18 = vadd.f32 %v6355_v3, %v2308_v26 }
 0xc45   :  { %v2365_v34 = vsel %vm657_vm1, %v8496_v18, 0.0 }
 0xc46   :  { %2366 = vadd.xlane.f32.xlu1 %v2365_v34 }
 0xc68   :  { %v2355_v54 = vpop.xlane.xlu0 %2354 }
 0xc69   :  { %v2368_v29 = vmul.f32 %v2355_v54, %v7824_v7 }
 0xc6b   :  { %v2373_v41 = vsub.f32 %v8476_v52, %v2368_v29 }
 0xc6d   :  { %v2378_v11 = vmul.f32 %v2373_v41, %v2373_v41 }
 0xc6f   :  { %v2383_v57 = vsel %vm657_vm1, %v2378_v11, 0.0 }
 0xc70   :  { %2384 = vadd.xlane.f32.xlu2 %v2383_v57  ;;  %v2358_v31 = vpop.xlane.xlu1 %2357 }
 0xc71   :  { %v2369_v58 = vmul.f32 %v2358_v31, %v7824_v7 }
 0xc73   :  { %v8505_v38 = vsub.f32 %v8481_v1, %v2369_v58 }
 0xc75   :  { %v2379_v27 = vmul.f32 %v8505_v38, %v8505_v38 }
 0xc77   :  { %v2386_v28 = vsel %vm657_vm1, %v2379_v27, 0.0 }
 0xc78   :  { %2387 = vadd.xlane.f32.xlu0 %v2386_v28 }
 0xca9   :  { %v2361_v20 = vpop.xlane.xlu2 %2360 }
 0xcaa   :  { %v2370_v53 = vmul.f32 %v2361_v20, %v7824_v7 }
 0xcac   :  { %v8512_v35 = vsub.f32 %v8486_v10, %v2370_v53 }
 0xcae   :  { %v2380_v45 = vmul.f32 %v8512_v35, %v8512_v35 }
 0xcb0   :  { %v2389_v36 = vsel %vm657_vm1, %v2380_v45, 0.0 }
 0xcb1   :  { %v2364_v50 = vpop.xlane.xlu0 %2363  ;;  %2390 = vadd.xlane.f32.xlu1 %v2389_v36 }
 0xcb2   :  { %v2371_v43 = vmul.f32 %v2364_v50, %v7824_v7 }
 0xcb4   :  { %v8519_v24 = vsub.f32 %v8491_v21, %v2371_v43 }
 0xcb6   :  { %v2381_v8 = vmul.f32 %v8519_v24, %v8519_v24 }
 0xcb8   :  { %v2392_v40 = vsel %vm657_vm1, %v2381_v8, 0.0 }
 0xcb9   :  { %2393 = vadd.xlane.f32.xlu2 %v2392_v40  ;;  %v2367_v39 = vpop.xlane.xlu1 %2366 }
 0xcba   :  { %v2372_v61 = vmul.f32 %v2367_v39, %v7824_v7 }
 0xcbc   :  { %v8526_v60 = vsub.f32 %v8496_v18, %v2372_v61 }
 0xcbe   :  { %v2382_v49 = vmul.f32 %v8526_v60, %v8526_v60 }
 0xcc0   :  { %v2395_v63 = vsel %vm657_vm1, %v2382_v49, 0.0 }
 0xcc1   :  { %2396 = vadd.xlane.f32.xlu0 %v2395_v63 }
 0xce3   :  { %v2385_v4 = vpop.xlane.xlu2 %2384 }
 0xce4   :  { %v2398_v15 = vmul.f32 %v2385_v4, %v7824_v7 }
 0xce6   :  { %v2403_v32 = vadd.f32 1e-06, %v2398_v15 }
 0xce8   :  { %6509 = vrsqrt.f32 %v2403_v32  ;;  %vm2414_vm11 = vweird.f32 %v2403_v32 }
 0xceb   :  { %v2388_v13 = vpop.xlane.xlu0 %2387 }
 0xcec   :  { %v2399_v22 = vmul.f32 %v2388_v13, %v7824_v7 }
 0xcee   :  { %v6510_v48 = vpop.eup %6509  ;;  %v2404_v23 = vadd.f32 1e-06, %v2399_v22 }
 0xcef   :  { %v2409_v14 = vmul.f32 %v6510_v48, %v2403_v32  ;;  %vm2415_vm10 = vweird.f32 %v6510_v48 }
 0xcf0   :  { %6511 = vrsqrt.f32 %v2404_v23  ;;  %vm2416_vm12 = vmor %vm2414_vm11, %vm2415_vm10  ;;  %vm2424_vm14 = vweird.f32 %v2404_v23 }
 0xcf1   :  { %v2410_v55 = vmul.f32 %v6510_v48, %v2409_v14 }
 0xcf3   :  { %v2411_v33 = vmul.f32 0.5, %v2410_v55 }
 0xcf5   :  { %v2412_v25 = vsub.f32 1.5, %v2411_v33 }
 0xcf6   :  { %v6512_v56 = vpop.eup %6511 }
 0xcf7   :  { %v2413_v3 = vmul.f32 %v6510_v48, %v2412_v25  ;;  %v2419_v0 = vmul.f32 %v6512_v56, %v2404_v23  ;;  %vm2425_vm13 = vweird.f32 %v6512_v56 }
 0xcf8   :  { %vm2426_vm15 = vmor %vm2424_vm14, %vm2425_vm13 }
 0xcf9   :  { %v2417_v47 = vsel %vm2416_vm12, %v6510_v48, %v2413_v3  ;;  %v2420_v51 = vmul.f32 %v6512_v56, %v2419_v0  ;;  %v6358_v0 = vld [vmem:[%s9637_s28] ss:$0 sm:$0xff]  ;;  %s9655_s28 = sld [smem:[#allocation89_spill]] }
 0xcfa   :  { %v2458_v59 = vmul.f32 %v2417_v47, %v2373_v41 }
 0xcfb   :  { %v2421_v5 = vmul.f32 0.5, %v2420_v51 }
 0xcfc   :  { %v2466_v42 = vmul.f32 %v8538_v9, %v2458_v59 }
 0xcfd   :  { %v2422_v17 = vsub.f32 1.5, %v2421_v5 }
 0xcfe   :  { %v2474_v62 = vadd.f32 %v8541_v16, %v2466_v42 }
 0xcff   :  { %v2423_v12 = vmul.f32 %v6512_v56, %v2422_v17 }
 0xd00   :  { %5992 = vmatmul.msk.f32.vlgmr.msra.gmra.mxu2 %vm657_vm1, %v2474_v62 }
 0xd01   :  { %v2427_v2 = vsel %vm2426_vm15, %v6512_v56, %v2423_v12 }
 0xd02   :  { %v2459_v19 = vmul.f32 %v2427_v2, %v8505_v38 }
 0xd04   :  { %v2467_v26 = vmul.f32 %v8538_v9, %v2459_v19 }
 0xd06   :  { %v2475_v34 = vadd.f32 %v8541_v16, %v2467_v26 }
 0xd08   :  { %5993 = vmatmul.msk.f32.gmra.mxu2 %vm657_vm1, %v2475_v34 }
 0xd24   :  { %v2391_v54 = vpop.xlane.xlu1 %2390 }
 0xd25   :  { %v2400_v29 = vmul.f32 %v2391_v54, %v7824_v7  ;;  %v8602_v54 = vld [vmem:[%s9625_s7] sm:$0xff] }
 0xd27   :  { %v2405_v41 = vadd.f32 1e-06, %v2400_v29 }
 0xd29   :  { %6513 = vrsqrt.f32 %v2405_v41  ;;  %vm2434_vm3 = vweird.f32 %v2405_v41 }
 0xd2c   :  { %v2394_v11 = vpop.xlane.xlu2 %2393 }
 0xd2d   :  { %v2401_v57 = vmul.f32 %v2394_v11, %v7824_v7 }
 0xd2f   :  { %v6514_v31 = vpop.eup %6513  ;;  %v2406_v58 = vadd.f32 1e-06, %v2401_v57 }
 0xd30   :  { %v2429_v27 = vmul.f32 %v6514_v31, %v2405_v41  ;;  %vm2435_vm2 = vweird.f32 %v6514_v31 }
 0xd31   :  { %6515 = vrsqrt.f32 %v2406_v58  ;;  %vm2436_vm6 = vmor %vm2434_vm3, %vm2435_vm2  ;;  %vm2444_vm8 = vweird.f32 %v2406_v58 }
 0xd32   :  { %v2430_v28 = vmul.f32 %v6514_v31, %v2429_v27 }
 0xd34   :  { %v2431_v38 = vmul.f32 0.5, %v2430_v28  ;;  %v2397_v20 = vpop.xlane.xlu0 %2396 }
 0xd35   :  { %v2402_v53 = vmul.f32 %v2397_v20, %v7824_v7  ;;  %v8612_v20 = vld [vmem:[%s9625_s7 + $0x10] sm:$0xff] }
 0xd36   :  { %v2432_v45 = vsub.f32 1.5, %v2431_v38 }
 0xd37   :  { %v6516_v36 = vpop.eup %6515  ;;  %v2407_v50 = vadd.f32 1e-06, %v2402_v53 }
 0xd38   :  { %v2433_v43 = vmul.f32 %v6514_v31, %v2432_v45  ;;  %v2439_v8 = vmul.f32 %v6516_v36, %v2406_v58  ;;  %vm2445_vm7 = vweird.f32 %v6516_v36 }
 0xd39   :  { %6517 = vrsqrt.f32 %v2407_v50  ;;  %vm2446_vm9 = vmor %vm2444_vm8, %vm2445_vm7  ;;  %vm2454_vm11 = vweird.f32 %v2407_v50 }
 0xd3a   :  { %v2440_v40 = vmul.f32 %v6516_v36, %v2439_v8  ;;  %v2437_v39 = vsel %vm2436_vm6, %v6514_v31, %v2433_v43  ;;  %v8607_v31 = vld [vmem:[%s9625_s7 + $0x8] sm:$0xff]  ;;  %v8617_v43 = vld [vmem:[%s9625_s7 + $0x18] sm:$0xff] }
 0xd3b   :  { %v2460_v61 = vmul.f32 %v2437_v39, %v8512_v35 }
 0xd3c   :  { %v2441_v49 = vmul.f32 0.5, %v2440_v40 }
 0xd3d   :  { %v2468_v63 = vmul.f32 %v8538_v9, %v2460_v61 }
 0xd3e   :  { %v2442_v44 = vsub.f32 1.5, %v2441_v49  ;;  %v8622_v49 = vld [vmem:[%s9625_s7 + $0x20] sm:$0xff] }
 0xd3f   :  { %v6518_v30 = vpop.eup %6517  ;;  %v2476_v46 = vadd.f32 %v8541_v16, %v2468_v63 }
 0xd40   :  { %v2443_v37 = vmul.f32 %v6516_v36, %v2442_v44  ;;  %v2449_v4 = vmul.f32 %v6518_v30, %v2407_v50  ;;  %vm2455_vm10 = vweird.f32 %v6518_v30 }
 0xd41   :  { %5994 = vmatmul.msk.f32.gmra.mxu2 %vm657_vm1, %v2476_v46  ;;  %vm2456_vm12 = vmor %vm2454_vm11, %vm2455_vm10 }
 0xd42   :  { %v2450_v15 = vmul.f32 %v6518_v30, %v2449_v4  ;;  %v2447_v32 = vsel %vm2446_vm9, %v6516_v36, %v2443_v37 }
 0xd43   :  { %v2461_v13 = vmul.f32 %v2447_v32, %v8519_v24 }
 0xd44   :  { %v2451_v22 = vmul.f32 0.5, %v2450_v15 }
 0xd45   :  { %v2469_v35 = vmul.f32 %v8538_v9, %v2461_v13 }
 0xd46   :  { %v2452_v48 = vsub.f32 1.5, %v2451_v22 }
 0xd47   :  { %v2477_v14 = vadd.f32 %v8541_v16, %v2469_v35 }
 0xd48   :  { %v2453_v23 = vmul.f32 %v6518_v30, %v2452_v48 }
 0xd49   :  { %5995 = vmatmul.msk.f32.gmra.mxu2 %vm657_vm1, %v2477_v14 }
 0xd4a   :  { %v2457_v55 = vsel %vm2456_vm12, %v6518_v30, %v2453_v23 }
 0xd4b   :  { %v2462_v33 = vmul.f32 %v2457_v55, %v8526_v60 }
 0xd4d   :  { %v2470_v25 = vmul.f32 %v8538_v9, %v2462_v33 }
 0xd4f   :  { %v2478_v24 = vadd.f32 %v8541_v16, %v2470_v25 }
 0xd51   :  { %5996 = vmatmul.msk.f32.gmra.mxu2 %vm657_vm1, %v2478_v24 }
 0xd83   :  { %v2514_v56 = vpop.f32.mrf.mxu2 }
 0xd84   :  { %v8570_v42 = vadd.f32 %v6358_v0, %v2514_v56 }
 0xd8b   :  { %v2517_v3 = vpop.f32.mrf.mxu2 }
 0xd8c   :  { %v8582_v16 = vadd.f32 %v6358_v0, %v2517_v3 }
 0xdc4   :  { %v2520_v47 = vpop.f32.mrf.mxu2 }
 0xdc5   :  { %v8566_v59 = vadd.f32 %v6358_v0, %v2520_v47 }
 0xdc7   :  { %2538 = vrot.lane.b32.xlu0 %v8566_v59, %s7360_s1  ;;  %v8634_v46 = vpack.i.bf16 %v8582_v16, %v8566_v59 }
 0xdcc   :  { %v2523_v51 = vpop.f32.mrf.mxu2 }
 0xdcd   :  { %v8572_v5 = vadd.f32 %v6358_v0, %v2523_v51 }
 0xdcf   :  { %2534 = vrot.lane.b32.xlu0 %v8570_v42, %s7360_s1  ;;  %2540 = vrot.lane.b32.xlu2 %v8572_v5, %s7360_s1 }
 0xdd4   :  { %v2526_v60 = vpop.f32.mrf.mxu2 }
 0xdd5   :  { %v8578_v9 = vadd.f32 %v6358_v0, %v2526_v60 }
 0xdd7   :  { %2542 = vrot.lane.b32.xlu1 %v8578_v9, %s7360_s1  ;;  %v8628_v30 = vpack.i.bf16 %v8572_v5, %v8578_v9 }
 0xddf   :  { %2536 = vrot.lane.b32.xlu1 %v8582_v16, %s7360_s1 }
 0xe29   :  { %v2541_v62 = vpop.permute.xlu2 %2540 }
 0xe39   :  { %v2539_v12 = vpop.permute.xlu0 %2538 }
 0xe41   :  { %v2535_v19 = vpop.permute.xlu0 %2534 }
 0xe49   :  { %v2543_v17 = vpop.permute.xlu1 %2542 }
 0xe4a   :  { %5997 = vmatpush.xpose.msk.msra.mxu3 %vm907_vm4, %v2543_v17 }
 0xe4e   :  { %5998 = vmatpush.xpose.msk.msra.mxu3 %vm907_vm4, %v2541_v62 }
 0xe51   :  { %v2537_v2 = vpop.permute.xlu1 %2536 }
 0xe52   :  { %5999 = vmatpush.xpose.msk.msra.mxu3 %vm907_vm4, %v2539_v12 }
 0xe56   :  { %6000 = vmatpush.xpose.msk.msra.mxu3 %vm907_vm4, %v2537_v2 }
 0xe5a   :  { %6001 = vmatpush.xpose.msk.msra.mxu3 %vm907_vm4, %v2535_v19 }
 0xe5d   :  { %6002 = vmatmul.msk.f32.vlgmr.msra.gmra.mxu3 %vm907_vm4, %v8570_v42 }
 0xe65   :  { %6003 = vmatmul.msk.f32.gmra.mxu3 %vm907_vm4, %v8582_v16 }
 0xe6d   :  { %6004 = vmatmul.msk.f32.gmra.mxu3 %vm907_vm4, %v8566_v59 }
 0xe75   :  { %6005 = vmatmul.msk.f32.gmra.mxu3 %vm907_vm4, %v8572_v5 }
 0xe7d   :  { %6006 = vmatmul.msk.f32.gmra.mxu3 %vm907_vm4, %v8578_v9 }
 0xee0   :  { %v2581_v26 = vpop.f32.mrf.mxu3 }
 0xee1   :  { %v2596_v34 = vmul.f32 0.35355338, %v2581_v26 }
 0xee3   :  { %v2601_v29 = vadd.f32 %v8602_v54, %v2596_v34 }
 0xee5   :  { %v2606_v41 = vsel %vm970_vm5, %v2601_v29, -inf }
 0xee6   :  { %2607 = vmax.xlane.f32.xlu2 %v2606_v41 }
 0xee8   :  { %v2584_v11 = vpop.f32.mrf.mxu3 }
 0xee9   :  { %v2597_v57 = vmul.f32 0.35355338, %v2584_v11 }
 0xeeb   :  { %v2602_v58 = vadd.f32 %v8607_v31, %v2597_v57 }
 0xeed   :  { %v2609_v27 = vsel %vm970_vm5, %v2602_v58, -inf }
 0xeee   :  { %2610 = vmax.xlane.f32.xlu1 %v2609_v27 }
 0xef0   :  { %v2587_v28 = vpop.f32.mrf.mxu3 }
 0xef1   :  { %v2598_v38 = vmul.f32 0.35355338, %v2587_v28 }
 0xef3   :  { %v2603_v53 = vadd.f32 %v8612_v20, %v2598_v38 }
 0xef5   :  { %v2612_v45 = vsel %vm970_vm5, %v2603_v53, -inf }
 0xef6   :  { %2613 = vmax.xlane.f32.xlu0 %v2612_v45 }
 0xef8   :  { %v2590_v36 = vpop.f32.mrf.mxu3 }
 0xef9   :  { %v2599_v50 = vmul.f32 0.35355338, %v2590_v36 }
 0xefb   :  { %v2604_v8 = vadd.f32 %v8617_v43, %v2599_v50  ;;  %v2324_v50 = vld [vmem:[%s9638_s29] sm:$0xff] }
 0xefd   :  { %v2615_v40 = vsel %vm970_vm5, %v2604_v8, -inf }
 0xefe   :  { %2616 = vmax.xlane.f32.xlu2 %v2615_v40 }
 0xf00   :  { %v2593_v39 = vpop.f32.mrf.mxu3 }
 0xf01   :  { %v2600_v61 = vmul.f32 0.35355338, %v2593_v39 }
 0xf03   :  { %v2605_v63 = vadd.f32 %v8622_v49, %v2600_v61 }
 0xf05   :  { %v2618_v44 = vsel %vm970_vm5, %v2605_v63, -inf }
 0xf06   :  { %2619 = vmax.xlane.f32.xlu1 %v2618_v44 }
 0xf16   :  { %6307 = vrot.lane.b32.xlu2 %v8628_v30, %s7361_s12 }
 0xf1f   :  { %6312 = vrot.lane.b32.xlu1 %v8634_v46, %s7361_s12 }
 0xf59   :  { %v2608_v37 = vpop.xlane.xlu2 %2607 }
 0xf5a   :  { %v2621_v4 = vsub.f32 %v2601_v29, %v2608_v37 }
 0xf5c   :  { %v2626_v15 = vmul.f32 1.442695, %v2621_v4 }
 0xf5e   :  { %6519 = vpow2.f32 %v2626_v15 }
 0xf61   :  { %v2611_v32 = vpop.xlane.xlu1 %2610 }
 0xf62   :  { %v2622_v13 = vsub.f32 %v2602_v58, %v2611_v32 }
 0xf64   :  { %v8638_v22 = vpop.eup %6519  ;;  %v2628_v35 = vmul.f32 1.442695, %v2622_v13 }
 0xf65   :  { %v2636_v48 = vsel %vm970_vm5, %v8638_v22, 0.0 }
 0xf66   :  { %6521 = vpow2.f32 %v2628_v35  ;;  %2637 = vadd.xlane.f32.xlu0 %v2636_v48 }
 0xf69   :  { %v2614_v14 = vpop.xlane.xlu0 %2613 }
 0xf6a   :  { %v2623_v23 = vsub.f32 %v2603_v53, %v2614_v14 }
 0xf6c   :  { %v8642_v55 = vpop.eup %6521  ;;  %v2630_v33 = vmul.f32 1.442695, %v2623_v23 }
 0xf6d   :  { %v2639_v25 = vsel %vm970_vm5, %v8642_v55, 0.0 }
 0xf6e   :  { %6523 = vpow2.f32 %v2630_v33  ;;  %2640 = vadd.xlane.f32.xlu0 %v2639_v25 }
 0xf71   :  { %v2617_v24 = vpop.xlane.xlu2 %2616 }
 0xf72   :  { %v2624_v56 = vsub.f32 %v2604_v8, %v2617_v24 }
 0xf74   :  { %v8646_v3 = vpop.eup %6523  ;;  %v2632_v0 = vmul.f32 1.442695, %v2624_v56 }
 0xf75   :  { %v2642_v47 = vsel %vm970_vm5, %v8646_v3, 0.0 }
 0xf76   :  { %6525 = vpow2.f32 %v2632_v0  ;;  %2643 = vadd.xlane.f32.xlu2 %v2642_v47 }
 0xf79   :  { %v6308_v51 = vpop.permute.xlu2 %6307  ;;  %v2620_v2 = vpop.xlane.xlu1 %2619 }
 0xf7a   :  { %v6309_v60 = vunpack.i.l.bf16 %v6308_v51  ;;  %v6310_v62 = vunpack.i.h.bf16 %v6308_v51  ;;  %v2625_v29 = vsub.f32 %v2605_v63, %v2620_v2 }
 0xf7c   :  { %v8650_v17 = vpop.eup %6525  ;;  %2702 = vmatpush.msra.mxu0 %v6309_v60  ;;  %v2634_v41 = vmul.f32 1.442695, %v2625_v29 }
 0xf7d   :  { %v2645_v12 = vsel %vm970_vm5, %v8650_v17, 0.0 }
 0xf7e   :  { %2703 = vmatpush.msra.mxu0 %v6310_v62  ;;  %2646 = vadd.xlane.f32.xlu1 %v2645_v12  ;;  %6527 = vpow2.f32 %v2634_v41 }
 0xf82   :  { %2661 = vrot.lane.b32.xlu0 %v8570_v42, %s7361_s12 }
 0xf84   :  { %v8670_v11 = vpop.eup %6527 }
 0xf85   :  { %v2648_v57 = vsel %vm970_vm5, %v8670_v11, 0.0 }
 0xf8e   :  { %2741 = vrot.lane.b32.xlu2 %v8578_v9, %s7362_s5 }
 0xf91   :  { %v6313_v19 = vpop.permute.xlu1 %6312 }
 0xf92   :  { %v6314_v26 = vunpack.i.l.bf16 %v6313_v19  ;;  %v6315_v34 = vunpack.i.h.bf16 %v6313_v19 }
 0xf94   :  { %2704 = vmatpush.msra.mxu0 %v6314_v26 }
 0xf96   :  { %2735 = vrot.lane.b32.xlu2 %v8582_v16, %s7362_s5  ;;  %2705 = vmatpush.msra.mxu0 %v6315_v34 }
 0xf97   :  { %2739 = vrot.lane.b32.xlu1 %v8572_v5, %s7362_s5 }
 0xf9e   :  { %2725 = vrot.lane.b32.xlu2 %v8582_v16, %s7363_s10 }
 0xf9f   :  { %2723 = vrot.lane.b32.xlu1 %v8570_v42, %s7363_s10 }
 0xfa6   :  { %2729 = vrot.lane.b32.xlu2 %v8572_v5, %s7363_s10 }
 0xfa7   :  { %3034 = vrot.lane.b32.xlu1 %v8578_v9, %s7365_s3 }
 0xfac   :  { %2649 = vadd.xlane.f32.xlu0 %v2648_v57 }
 0xfae   :  { %3285 = vrot.lane.b32.xlu2 %v8578_v9, %s7364_s6 }
 0xfaf   :  { %3030 = vrot.lane.b32.xlu1 %v8566_v59, %s7365_s3 }
 0xfb6   :  { %3283 = vrot.lane.b32.xlu2 %v8572_v5, %s7364_s6 }
 0xfb7   :  { %3028 = vrot.lane.b32.xlu1 %v8582_v16, %s7365_s3 }
 0xfbe   :  { %3016 = vrot.lane.b32.xlu2 %v8570_v42, %s7367_s11 }
 0xfbf   :  { %3281 = vrot.lane.b32.xlu1 %v8566_v59, %s7364_s6 }
 0xfc0   :  { %2737 = vrot.lane.b32.xlu0 %v8566_v59, %s7362_s5 }
 0xfc6   :  { %3267 = vrot.lane.b32.xlu2 %v8570_v42, %s7366_s2 }
 0xfc7   :  { %3277 = vrot.lane.b32.xlu1 %v8570_v42, %s7364_s6 }
 0xfc8   :  { %2733 = vrot.lane.b32.xlu0 %v8570_v42, %s7362_s5 }
 0xfce   :  { %3022 = vrot.lane.b32.xlu2 %v8572_v5, %s7367_s11 }
 0xfcf   :  { %3020 = vrot.lane.b32.xlu1 %v8566_v59, %s7367_s11 }
 0xfd0   :  { %2727 = vrot.lane.b32.xlu0 %v8566_v59, %s7363_s10 }
 0xfd8   :  { %3032 = vrot.lane.b32.xlu0 %v8572_v5, %s7365_s3 }
 0xfd9   :  { %v2638_v58 = vpop.xlane.xlu0 %2637 }
 0xfda   :  { %6529 = vrcp.f32 %v2638_v58 }
 0xfe0   :  { %2731 = vrot.lane.b32.xlu0 %v8578_v9, %s7363_s10  ;;  %v6530_v38 = vpop.eup %6529 }
 0xfe1   :  { %v2641_v28 = vpop.xlane.xlu0 %2640  ;;  %v2656_v45 = vmul.f32 %v6530_v38, %v8638_v22 }
 0xfe2   :  { %6531 = vrcp.f32 %v2641_v28 }
 0xfe8   :  { %3026 = vrot.lane.b32.xlu0 %v8570_v42, %s7365_s3  ;;  %v6532_v8 = vpop.eup %6531 }
 0xfe9   :  { %v2644_v27 = vpop.xlane.xlu2 %2643  ;;  %v2657_v39 = vmul.f32 %v6532_v8, %v8642_v55 }
 0xfea   :  { %6533 = vrcp.f32 %v2644_v27 }
 0xff0   :  { %3279 = vrot.lane.b32.xlu0 %v8582_v16, %s7364_s6  ;;  %v6534_v63 = vpop.eup %6533 }
 0xff1   :  { %v2742_v53 = vpop.permute.xlu2 %2741  ;;  %v2647_v61 = vpop.xlane.xlu1 %2646  ;;  %v2658_v37 = vmul.f32 %v6534_v63, %v8646_v3 }
 0xff2   :  { %6012 = vmatpush.xpose.msk.msrb.mxu1 %vm907_vm4, %v2742_v53  ;;  %6535 = vrcp.f32 %v2647_v61 }
 0xff4   :  { %v2662_v36 = vpop.permute.xlu0 %2661 }
 0xff5   :  { %2706 = vmatpush.msra.mxu0 %v2662_v36 }
 0xff6   :  { %6007 = vmatmul.msk.f32.vlgmr.msra.gmra.mxu0 %vm970_vm5, %v2656_v45 }
 0xff7   :  { %2999 = vmatpush.msrb.mxu0 %v2324_v50 }
 0xff8   :  { %3018 = vrot.lane.b32.xlu0 %v8582_v16, %s7367_s11  ;;  %v6536_v4 = vpop.eup %6535 }
 0xff9   :  { %v2736_v40 = vpop.permute.xlu2 %2735  ;;  %v2659_v13 = vmul.f32 %v6536_v4, %v8650_v17 }
 0xffe   :  { %6008 = vmatmul.msk.f32.gmra.mxu0 %vm970_vm5, %v2657_v39 }
0x1000   :  { %3024 = vrot.lane.b32.xlu0 %v8578_v9, %s7367_s11 }
0x1001   :  { %v2726_v44 = vpop.permute.xlu2 %2725 }
0x1006   :  { %6009 = vmatmul.msk.f32.gmra.mxu0 %vm970_vm5, %v2658_v37 }
0x1009   :  { %v2730_v15 = vpop.permute.xlu2 %2729  ;;  %v2740_v32 = vpop.permute.xlu1 %2739 }
0x100a   :  { %6013 = vmatpush.xpose.msk.msrb.mxu1 %vm907_vm4, %v2740_v32 }
0x100e   :  { %6010 = vmatmul.msk.f32.gmra.mxu0 %vm970_vm5, %v2659_v13 }
0x1011   :  { %v3286_v22 = vpop.permute.xlu2 %3285  ;;  %v2724_v35 = vpop.permute.xlu1 %2723 }
0x1012   :  { %6057 = vmatpush.xpose.msk.msra.mxu0 %vm907_vm4, %v3286_v22 }
0x1019   :  { %v3284_v48 = vpop.permute.xlu2 %3283  ;;  %v3035_v14 = vpop.permute.xlu1 %3034 }
0x101a   :  { %6058 = vmatpush.xpose.msk.msra.mxu0 %vm907_vm4, %v3284_v48 }
0x101f   :  { %v2650_v23 = vpop.xlane.xlu0 %2649 }
0x1020   :  { %6537 = vrcp.f32 %v2650_v23 }
0x1021   :  { %v3031_v55 = vpop.permute.xlu1 %3030  ;;  %v3017_v12 = vpop.permute.xlu2 %3016 }
0x1026   :  { %v6538_v33 = vpop.eup %6537 }
0x1027   :  { %v2660_v25 = vmul.f32 %v6538_v33, %v8670_v11 }
0x1029   :  { %v3029_v24 = vpop.permute.xlu1 %3028  ;;  %6011 = vmatmul.msk.f32.gmra.mxu0 %vm970_vm5, %v2660_v25  ;;  %v3268_v26 = vpop.permute.xlu2 %3267 }
0x1031   :  { %v3282_v56 = vpop.permute.xlu1 %3281  ;;  %v3023_v11 = vpop.permute.xlu2 %3022 }
0x1032   :  { %v2738_v3 = vpop.permute.xlu0 %2737  ;;  %6059 = vmatpush.xpose.msk.msra.mxu0 %vm907_vm4, %v3282_v56 }
0x1033   :  { %6014 = vmatpush.xpose.msk.msrb.mxu1 %vm907_vm4, %v2738_v3 }
0x1037   :  { %6015 = vmatpush.xpose.msk.msrb.mxu1 %vm907_vm4, %v2736_v40 }
0x1039   :  { %v3278_v2 = vpop.permute.xlu1 %3277 }
0x103a   :  { %v2734_v0 = vpop.permute.xlu0 %2733 }
0x103b   :  { %6016 = vmatpush.xpose.msk.msrb.mxu1 %vm907_vm4, %v2734_v0 }
0x103e   :  { %6017 = vmatmul.msk.f32.vlgmr.msrb.gmra.mxu1 %vm907_vm4, %v2724_v35 }
0x103f   :  { %6037 = vmatpush.xpose.msk.msra.mxu1 %vm907_vm4, %v3035_v14 }
0x1041   :  { %v3021_v29 = vpop.permute.xlu1 %3020 }
0x1042   :  { %v2728_v47 = vpop.permute.xlu0 %2727 }
0x1046   :  { %6018 = vmatmul.msk.f32.gmra.mxu1 %vm907_vm4, %v2726_v44 }
0x104a   :  { %v3033_v51 = vpop.permute.xlu0 %3032 }
0x104b   :  { %6038 = vmatpush.xpose.msk.msra.mxu1 %vm907_vm4, %v3033_v51 }
0x104e   :  { %6019 = vmatmul.msk.f32.gmra.mxu1 %vm907_vm4, %v2728_v47 }
0x104f   :  { %6039 = vmatpush.xpose.msk.msra.mxu1 %vm907_vm4, %v3031_v55 }
0x1052   :  { %v2732_v60 = vpop.permute.xlu0 %2731 }
0x1053   :  { %6040 = vmatpush.xpose.msk.msra.mxu1 %vm907_vm4, %v3029_v24 }
0x1056   :  { %6020 = vmatmul.msk.f32.gmra.mxu1 %vm907_vm4, %v2730_v15 }
0x105a   :  { %v3027_v17 = vpop.permute.xlu0 %3026 }
0x105b   :  { %6041 = vmatpush.xpose.msk.msra.mxu1 %vm907_vm4, %v3027_v17 }
0x105e   :  { %6021 = vmatmul.msk.f32.gmra.mxu1 %vm907_vm4, %v2732_v60 }
0x1062   :  { %v3280_v62 = vpop.permute.xlu0 %3279 }
0x1063   :  { %6060 = vmatpush.xpose.msk.msra.mxu0 %vm907_vm4, %v3280_v62 }
0x1066   :  { %6042 = vmatmul.msk.f32.vlgmr.msra.gmra.mxu1 %vm907_vm4, %v3017_v12 }
0x1067   :  { %6061 = vmatpush.xpose.msk.msra.mxu0 %vm907_vm4, %v3278_v2 }
0x106a   :  { %v3019_v19 = vpop.permute.xlu0 %3018 }
0x106e   :  { %6043 = vmatmul.msk.f32.gmra.mxu1 %vm907_vm4, %v3019_v19 }
0x1072   :  { %v3025_v58 = vpop.permute.xlu0 %3024 }
0x1073   :  { %v2708_v34 = vpop.f32.mrf.mxu0 }
0x1074   :  { %6032 = vmatmul.msk.f32.vlgmr.msrb.gmra.mxu0 %vm907_vm4, %v2708_v34 }
0x1076   :  { %6044 = vmatmul.msk.f32.gmra.mxu1 %vm907_vm4, %v3021_v29 }
0x107b   :  { %v2711_v41 = vpop.f32.mrf.mxu0 }
0x107c   :  { %6033 = vmatmul.msk.f32.gmra.mxu0 %vm907_vm4, %v2711_v41 }
0x107e   :  { %6045 = vmatmul.msk.f32.gmra.mxu1 %vm907_vm4, %v3023_v11 }
0x1083   :  { %v2714_v57 = vpop.f32.mrf.mxu0 }
0x1084   :  { %6034 = vmatmul.msk.f32.gmra.mxu0 %vm907_vm4, %v2714_v57 }
0x1086   :  { %6046 = vmatmul.msk.f32.gmra.mxu1 %vm907_vm4, %v3025_v58 }
0x108b   :  { %v2717_v27 = vpop.f32.mrf.mxu0 }
0x108c   :  { %6035 = vmatmul.msk.f32.gmra.mxu0 %vm907_vm4, %v2717_v27 }
0x10a6   :  { %v2720_v28 = vpop.f32.mrf.mxu0 }
0x10a7   :  { %6036 = vmatmul.msk.f32.gmra.mxu0 %vm907_vm4, %v2720_v28 }
0x10af   :  { %6062 = vmatmul.msk.f32.vlgmr.msra.gmra.mxu0 %vm907_vm4, %v3268_v26 }
0x10bb   :  { %v2780_v38 = vpop.f32.mrf.mxu1 }
0x10bc   :  { %v2795_v53 = vmul.f32 0.35355338, %v2780_v38 }
0x10be   :  { %v2800_v45 = vadd.f32 %v8602_v54, %v2795_v53 }
0x10c0   :  { %v2805_v36 = vsel %vm970_vm5, %v2800_v45, -inf }
0x10c1   :  { %2806 = vmax.xlane.f32.xlu1 %v2805_v36 }
0x10c3   :  { %v2783_v50 = vpop.f32.mrf.mxu1 }
0x10c4   :  { %v2796_v8 = vmul.f32 0.35355338, %v2783_v50 }
0x10c6   :  { %v2801_v40 = vadd.f32 %v8607_v31, %v2796_v8 }
0x10c8   :  { %v2808_v39 = vsel %vm970_vm5, %v2801_v40, -inf }
0x10c9   :  { %2809 = vmax.xlane.f32.xlu2 %v2808_v39 }
0x10cb   :  { %v2786_v61 = vpop.f32.mrf.mxu1 }
0x10cc   :  { %v2797_v63 = vmul.f32 0.35355338, %v2786_v61 }
0x10ce   :  { %v2802_v44 = vadd.f32 %v8612_v20, %v2797_v63 }
0x10d0   :  { %v2811_v37 = vsel %vm970_vm5, %v2802_v44, -inf }
0x10d1   :  { %2812 = vmax.xlane.f32.xlu0 %v2811_v37 }
0x10d3   :  { %v2789_v4 = vpop.f32.mrf.mxu1 }
0x10d4   :  { %v2798_v15 = vmul.f32 0.35355338, %v2789_v4 }
0x10d6   :  { %v2803_v32 = vadd.f32 %v8617_v43, %v2798_v15 }
0x10d8   :  { %v2814_v13 = vsel %vm970_vm5, %v2803_v32, -inf }
0x10d9   :  { %2815 = vmax.xlane.f32.xlu1 %v2814_v13 }
0x10db   :  { %v2792_v22 = vpop.f32.mrf.mxu1 }
0x10dc   :  { %v2799_v35 = vmul.f32 0.35355338, %v2792_v22 }
0x10de   :  { %v8763_v48 = vadd.f32 %v8622_v49, %v2799_v35 }
0x10e0   :  { %v2817_v14 = vsel %vm970_vm5, %v8763_v48, -inf }
0x10e1   :  { %2818 = vmax.xlane.f32.xlu2 %v2817_v14 }
0x10e3   :  { %v3073_v23 = vpop.f32.mrf.mxu1 }
0x10e4   :  { %v3088_v55 = vmul.f32 0.35355338, %v3073_v23 }
0x10e6   :  { %v3093_v33 = vadd.f32 %v8602_v54, %v3088_v55 }
0x10e8   :  { %v3098_v25 = vsel %vm970_vm5, %v3093_v33, -inf }
0x10e9   :  { %3099 = vmax.xlane.f32.xlu0 %v3098_v25 }
0x10f1   :  { %v8773_v24 = vpop.f32.mrf.mxu0 }
0x10f2   :  { %6322 = vrot.lane.b32.xlu1 %v8634_v46, %s7368_s25 }
0x10f9   :  { %v8775_v56 = vpop.f32.mrf.mxu0 }
0x10fd   :  { %6317 = vrot.lane.b32.xlu0 %v8628_v30, %s7368_s25 }
0x1101   :  { %v8777_v3 = vpop.f32.mrf.mxu0 }
0x1109   :  { %v8779_v0 = vpop.f32.mrf.mxu0 }
0x1124   :  { %v8781_v47 = vpop.f32.mrf.mxu0 }
0x112c   :  { %v3324_v51 = vpop.f32.mrf.mxu0 }
0x112d   :  { %v3339_v60 = vmul.f32 0.35355338, %v3324_v51 }
0x112f   :  { %v8784_v17 = vadd.f32 %v8602_v54, %v3339_v60 }
0x1131   :  { %v3349_v62 = vsel %vm970_vm5, %v8784_v17, -inf }
0x1132   :  { %3350 = vmax.xlane.f32.xlu1 %v3349_v62 }
0x1134   :  { %v2807_v12 = vpop.xlane.xlu1 %2806 }
0x1135   :  { %v2820_v2 = vsub.f32 %v2800_v45, %v2807_v12 }
0x1137   :  { %v2825_v19 = vmul.f32 1.442695, %v2820_v2 }
0x1139   :  { %6539 = vpow2.f32 %v2825_v19 }
0x113c   :  { %v2810_v26 = vpop.xlane.xlu2 %2809 }
0x113d   :  { %v2821_v34 = vsub.f32 %v2801_v40, %v2810_v26 }
0x113f   :  { %v8788_v29 = vpop.eup %6539  ;;  %v2827_v41 = vmul.f32 1.442695, %v2821_v34 }
0x1140   :  { %v2835_v11 = vsel %vm970_vm5, %v8788_v29, 0.0 }
0x1141   :  { %6541 = vpow2.f32 %v2827_v41  ;;  %2836 = vadd.xlane.f32.xlu2 %v2835_v11 }
0x1144   :  { %v2813_v54 = vpop.xlane.xlu0 %2812 }
0x1145   :  { %v2822_v57 = vsub.f32 %v2802_v44, %v2813_v54 }
0x1147   :  { %v8792_v58 = vpop.eup %6541  ;;  %v2829_v27 = vmul.f32 1.442695, %v2822_v57 }
0x1148   :  { %v2838_v28 = vsel %vm970_vm5, %v8792_v58, 0.0 }
0x1149   :  { %6543 = vpow2.f32 %v2829_v27  ;;  %2839 = vadd.xlane.f32.xlu2 %v2838_v28 }
0x114c   :  { %v2816_v38 = vpop.xlane.xlu1 %2815 }
0x114d   :  { %v2823_v53 = vsub.f32 %v2803_v32, %v2816_v38 }
0x114f   :  { %v8796_v45 = vpop.eup %6543  ;;  %v2831_v36 = vmul.f32 1.442695, %v2823_v53 }
0x1150   :  { %v2841_v50 = vsel %vm970_vm5, %v8796_v45, 0.0 }
0x1151   :  { %6545 = vpow2.f32 %v2831_v36  ;;  %2842 = vadd.xlane.f32.xlu0 %v2841_v50 }
0x1154   :  { %v2819_v35 = vpop.xlane.xlu2 %2818 }
0x1155   :  { %v2824_v23 = vsub.f32 %v8763_v48, %v2819_v35 }
0x1157   :  { %v8800_v8 = vpop.eup %6545  ;;  %v2833_v55 = vmul.f32 1.442695, %v2824_v23 }
0x1158   :  { %v2844_v40 = vsel %vm970_vm5, %v8800_v8, 0.0 }
0x1159   :  { %2845 = vadd.xlane.f32.xlu1 %v2844_v40 }
0x115c   :  { %v3100_v39 = vpop.xlane.xlu0 %3099 }
0x115d   :  { %v3113_v61 = vsub.f32 %v3093_v33, %v3100_v39  ;;  %v3076_v33 = vpop.f32.mrf.mxu1 }
0x115e   :  { %v3089_v62 = vmul.f32 0.35355338, %v3076_v33 }
0x115f   :  { %v3118_v63 = vmul.f32 1.442695, %v3113_v61 }
0x1160   :  { %v8826_v12 = vadd.f32 %v8607_v31, %v3089_v62 }
0x1161   :  { %6547 = vpow2.f32 %v3118_v63  ;;  %2860 = vrot.lane.b32.xlu2 %v8570_v42, %s7368_s25 }
0x1162   :  { %6549 = vpow2.f32 %v2833_v55 }
0x1164   :  { %v6323_v32 = vpop.permute.xlu1 %6322 }
0x1165   :  { %v6324_v22 = vunpack.i.l.bf16 %v6323_v32  ;;  %v6325_v14 = vunpack.i.h.bf16 %v6323_v32  ;;  %v3079_v48 = vpop.f32.mrf.mxu1 }
0x1167   :  { %v8806_v44 = vpop.eup %6547 }
0x1168   :  { %v3128_v37 = vsel %vm970_vm5, %v8806_v44, 0.0  ;;  %v8819_v25 = vpop.eup %6549 }
0x1169   :  { %3129 = vadd.xlane.f32.xlu0 %v3128_v37  ;;  %v2847_v51 = vsel %vm970_vm5, %v8819_v25, 0.0 }
0x116d   :  { %v3082_v60 = vpop.f32.mrf.mxu1 }
0x116e   :  { %v3091_v31 = vmul.f32 0.35355338, %v3082_v60 }
0x116f   :  { %v6318_v4 = vpop.permute.xlu0 %6317 }
0x1170   :  { %v6319_v15 = vunpack.i.l.bf16 %v6318_v4  ;;  %v6320_v13 = vunpack.i.h.bf16 %v6318_v4  ;;  %v8841_v27 = vadd.f32 %v8617_v43, %v3091_v31 }
0x1172   :  { %2901 = vmatpush.msrb.mxu2 %v6319_v15  ;;  %6327 = vrot.lane.b32.xlu1 %v8628_v30, %s7370_s16 }
0x1174   :  { %2902 = vmatpush.msrb.mxu2 %v6320_v13 }
0x1176   :  { %2903 = vmatpush.msrb.mxu2 %v6324_v22 }
0x1178   :  { %2904 = vmatpush.msrb.mxu2 %v6325_v14 }
0x117a   :  { %6342 = vrot.lane.b32.xlu1 %v8634_v46, %s7369_s15 }
0x117d   :  { %6332 = vrot.lane.b32.xlu0 %v8634_v46, %s7370_s16  ;;  %v3085_v46 = vpop.f32.mrf.mxu1 }
0x117e   :  { %v3092_v2 = vmul.f32 0.35355338, %v3085_v46 }
0x1180   :  { %v8832_v34 = vadd.f32 %v8622_v49, %v3092_v2  ;;  %v3107_v49 = vsel %vm970_vm5, %v8841_v27, -inf }
0x1182   :  { %v3110_v11 = vsel %vm970_vm5, %v8832_v34, -inf }
0x1185   :  { %6337 = vrot.lane.b32.xlu0 %v8628_v30, %s7369_s15  ;;  %v3101_v30 = vsel %vm970_vm5, %v8826_v12, -inf }
0x118a   :  { %2848 = vadd.xlane.f32.xlu2 %v2847_v51 }
0x118d   :  { %3404 = vrot.lane.b32.xlu0 %v8570_v42, %s7369_s15 }
0x11a4   :  { %3102 = vmax.xlane.f32.xlu1 %v3101_v30 }
0x11a5   :  { %v3351_v19 = vpop.xlane.xlu1 %3350 }
0x11a6   :  { %v3364_v26 = vsub.f32 %v8784_v17, %v3351_v19 }
0x11a8   :  { %v3369_v41 = vmul.f32 1.442695, %v3364_v26 }
0x11aa   :  { %6551 = vpow2.f32 %v3369_v41 }
0x11ac   :  { %3111 = vmax.xlane.f32.xlu1 %v3110_v11 }
0x11b0   :  { %v8836_v54 = vpop.eup %6551 }
0x11b1   :  { %v3379_v57 = vsel %vm970_vm5, %v8836_v54, 0.0 }
0x11b2   :  { %3380 = vadd.xlane.f32.xlu2 %v3379_v57 }
0x11b4   :  { %v2837_v17 = vpop.xlane.xlu2 %2836 }
0x11b5   :  { %6553 = vrcp.f32 %v2837_v17 }
0x11b7   :  { %3108 = vmax.xlane.f32.xlu0 %v3107_v49  ;;  %v2325_v49 = vld [vmem:[%s9638_s29 + $0x8] sm:$0xff] }
0x11b8   :  { %2952 = vmatpush.msrb.mxu3 %v2325_v49 }
0x11bb   :  { %v6554_v38 = vpop.eup %6553 }
0x11bc   :  { %v2840_v28 = vpop.xlane.xlu2 %2839  ;;  %v2855_v53 = vmul.f32 %v6554_v38, %v8788_v29 }
0x11bd   :  { %6555 = vrcp.f32 %v2840_v28 }
0x11c3   :  { %v6556_v40 = vpop.eup %6555 }
0x11c4   :  { %v2861_v36 = vpop.permute.xlu2 %2860  ;;  %v2843_v50 = vpop.xlane.xlu0 %2842  ;;  %v2856_v43 = vmul.f32 %v6556_v40, %v8792_v58  ;;  %v3090_v58 = vmul.f32 0.35355338, %v3079_v48 }
0x11c5   :  { %2905 = vmatpush.msrb.mxu2 %v2861_v36  ;;  %6557 = vrcp.f32 %v2843_v50 }
0x11c6   :  { %6022 = vmatmul.msk.f32.vlgmr.msrb.gmra.mxu2 %vm970_vm5, %v2855_v53  ;;  %v8856_v13 = vadd.f32 %v8612_v20, %v3090_v58 }
0x11c8   :  { %v3104_v14 = vsel %vm970_vm5, %v8856_v13, -inf }
0x11ca   :  { %3153 = vrot.lane.b32.xlu2 %v8570_v42, %s7370_s16 }
0x11cb   :  { %v6558_v61 = vpop.eup %6557 }
0x11cc   :  { %v2846_v39 = vpop.xlane.xlu1 %2845  ;;  %v2857_v63 = vmul.f32 %v6558_v61, %v8796_v45 }
0x11cd   :  { %6559 = vrcp.f32 %v2846_v39 }
0x11ce   :  { %6023 = vmatmul.msk.f32.gmra.mxu2 %vm970_vm5, %v2856_v43 }
0x11d3   :  { %v6560_v29 = vpop.eup %6559 }
0x11d4   :  { %v2858_v37 = vmul.f32 %v6560_v29, %v8800_v8 }
0x11d6   :  { %6024 = vmatmul.msk.f32.gmra.mxu2 %vm970_vm5, %v2857_v63 }
0x11dc   :  { %v3130_v42 = vpop.xlane.xlu0 %3129 }
0x11de   :  { %6025 = vmatmul.msk.f32.gmra.mxu2 %vm970_vm5, %v2858_v37 }
0x11e4   :  { %v6328_v4 = vpop.permute.xlu1 %6327 }
0x11e5   :  { %v6329_v15 = vunpack.i.l.bf16 %v6328_v4  ;;  %v6330_v32 = vunpack.i.h.bf16 %v6328_v4 }
0x11e7   :  { %3194 = vmatpush.msra.mxu2 %v6329_v15 }
0x11e9   :  { %3195 = vmatpush.msra.mxu2 %v6330_v32  ;;  %v2326_v32 = vld [vmem:[%s9638_s29 + $0x10] sm:$0xff] }
0x11ea   :  { %3245 = vmatpush.msra.mxu3 %v2326_v32  ;;  %v8929_v32 = vld [vmem:[%s9641_s20] ss:$0 sm:$0xff] }
0x11ec   :  { %v6343_v55 = vpop.permute.xlu1 %6342 }
0x11ed   :  { %v6344_v51 = vunpack.i.l.bf16 %v6343_v55  ;;  %v6345_v60 = vunpack.i.h.bf16 %v6343_v55 }
0x11ef   :  { %v6333_v22 = vpop.permute.xlu0 %6332 }
0x11f0   :  { %v6334_v35 = vunpack.i.l.bf16 %v6333_v22  ;;  %v6335_v45 = vunpack.i.h.bf16 %v6333_v22 }
0x11f2   :  { %3196 = vmatpush.msra.mxu2 %v6334_v35 }
0x11f3   :  { %3105 = vmax.xlane.f32.xlu2 %v3104_v14 }
0x11f4   :  { %3197 = vmatpush.msra.mxu2 %v6335_v45 }
0x11f7   :  { %v6338_v8 = vpop.permute.xlu0 %6337 }
0x11f8   :  { %v6339_v23 = vunpack.i.l.bf16 %v6338_v8  ;;  %v6340_v33 = vunpack.i.h.bf16 %v6338_v8  ;;  %v2327_v8 = vld [vmem:[%s9638_s29 + $0x18] sm:$0xff] }
0x11fa   :  { %3445 = vmatpush.msrb.mxu1 %v6339_v23 }
0x11fc   :  { %3446 = vmatpush.msrb.mxu1 %v6340_v33 }
0x11fd   :  { %v2849_v48 = vpop.xlane.xlu2 %2848 }
0x11fe   :  { %6561 = vrcp.f32 %v2849_v48  ;;  %3447 = vmatpush.msrb.mxu1 %v6344_v51 }
0x11ff   :  { %v3405_v20 = vpop.permute.xlu0 %3404 }
0x1200   :  { %3448 = vmatpush.msrb.mxu1 %v6345_v60 }
0x1202   :  { %3449 = vmatpush.msrb.mxu1 %v3405_v20 }
0x1204   :  { %v6562_v62 = vpop.eup %6561 }
0x1205   :  { %v2859_v46 = vmul.f32 %v6562_v62, %v8819_v25 }
0x1207   :  { %6026 = vmatmul.msk.f32.gmra.mxu2 %vm970_vm5, %v2859_v46 }
0x1217   :  { %v3103_v2 = vpop.xlane.xlu1 %3102 }
0x1218   :  { %v3114_v30 = vsub.f32 %v8826_v12, %v3103_v2 }
0x121a   :  { %v3120_v19 = vmul.f32 1.442695, %v3114_v30 }
0x121c   :  { %6563 = vpow2.f32 %v3120_v19 }
0x121d   :  { %6565 = vrcp.f32 %v3130_v42 }
0x121f   :  { %v3112_v26 = vpop.xlane.xlu1 %3111 }
0x1220   :  { %v3117_v41 = vsub.f32 %v8832_v34, %v3112_v26 }
0x1222   :  { %v6564_v11 = vpop.eup %6563  ;;  %v3126_v31 = vmul.f32 1.442695, %v3117_v41 }
0x1223   :  { %v3131_v57 = vsel %vm970_vm5, %v6564_v11, 0.0  ;;  %v6566_v25 = vpop.eup %6565 }
0x1224   :  { %6567 = vpow2.f32 %v3126_v31  ;;  %3132 = vadd.xlane.f32.xlu2 %v3131_v57  ;;  %v3148_v34 = vmul.f32 %v6566_v25, %v8806_v44 }
0x1225   :  { %v3381_v17 = vpop.xlane.xlu2 %3380 }
0x1226   :  { %6569 = vrcp.f32 %v3381_v17 }
0x122a   :  { %v6568_v28 = vpop.eup %6567  ;;  %v3109_v38 = vpop.xlane.xlu0 %3108 }
0x122b   :  { %v3116_v12 = vsub.f32 %v8841_v27, %v3109_v38  ;;  %v3140_v53 = vsel %vm970_vm5, %v6568_v28, 0.0 }
0x122c   :  { %v6570_v36 = vpop.eup %6569  ;;  %3141 = vadd.xlane.f32.xlu2 %v3140_v53  ;;  %v8905_v53 = vld [vmem:[%s9639_s4] ss:$0 sm:$0xff] }
0x122d   :  { %v3399_v50 = vmul.f32 %v6570_v36, %v8836_v54  ;;  %v3124_v40 = vmul.f32 1.442695, %v3116_v12  ;;  %v3154_v43 = vpop.permute.xlu2 %3153 }
0x122e   :  { %3198 = vmatpush.msra.mxu2 %v3154_v43 }
0x122f   :  { %6571 = vpow2.f32 %v3124_v40  ;;  %6047 = vmatmul.msk.f32.vlgmr.msra.gmra.mxu2 %vm970_vm5, %v3148_v34  ;;  %6067 = vmatmul.msk.f32.vlgmr.msrb.gmra.mxu1 %vm970_vm5, %v3399_v50 }
0x1230   :  { %3496 = vmatpush.msrb.mxu2 %v2327_v8 }
0x1235   :  { %v6572_v39 = vpop.eup %6571 }
0x1236   :  { %v3137_v61 = vsel %vm970_vm5, %v6572_v39, 0.0 }
0x1237   :  { %3138 = vadd.xlane.f32.xlu1 %v3137_v61 }
0x1244   :  { %3269 = vrot.lane.b32.xlu2 %v8582_v16, %s7366_s2 }
0x1249   :  { %v2907_v27 = vpop.f32.mrf.mxu2 }
0x124a   :  { %6027 = vmatmul.msk.f32.vlgmr.msrb.gmra.mxu3 %vm907_vm4, %v2907_v27  ;;  %v2333_v27 = vld [vmem:[%s9640_s0 + $0x10] sm:$0xff] }
0x1251   :  { %v2910_v44 = vpop.f32.mrf.mxu2 }
0x1252   :  { %6028 = vmatmul.msk.f32.gmra.mxu3 %vm907_vm4, %v2910_v44  ;;  %v2331_v44 = vld [vmem:[%s9640_s0] sm:$0xff] }
0x1259   :  { %v2913_v54 = vpop.f32.mrf.mxu2 }
0x125a   :  { %6029 = vmatmul.msk.f32.gmra.mxu3 %vm907_vm4, %v2913_v54 }
0x1261   :  { %v2916_v63 = vpop.f32.mrf.mxu2 }
0x1262   :  { %6030 = vmatmul.msk.f32.gmra.mxu3 %vm907_vm4, %v2916_v63 }
0x1266   :  { %v3106_v29 = vpop.xlane.xlu2 %3105 }
0x1267   :  { %v3115_v37 = vsub.f32 %v8856_v13, %v3106_v29 }
0x1269   :  { %v3122_v4 = vmul.f32 1.442695, %v3115_v37 }
0x126b   :  { %6573 = vpow2.f32 %v3122_v4 }
0x1271   :  { %v6574_v15 = vpop.eup %6573 }
0x1272   :  { %v3134_v16 = vsel %vm970_vm5, %v6574_v15, 0.0 }
0x1273   :  { %3135 = vadd.xlane.f32.xlu0 %v3134_v16 }
0x128a   :  { %v2919_v42 = vpop.f32.mrf.mxu2 }
0x128b   :  { %6031 = vmatmul.msk.f32.gmra.mxu3 %vm907_vm4, %v2919_v42 }
0x1297   :  { %v3133_v58 = vpop.xlane.xlu2 %3132 }
0x1298   :  { %6575 = vrcp.f32 %v3133_v58 }
0x129e   :  { %v6576_v22 = vpop.eup %6575 }
0x129f   :  { %v3142_v35 = vpop.xlane.xlu2 %3141  ;;  %v3149_v45 = vmul.f32 %v6576_v22, %v6564_v11  ;;  %v8932_v22 = vld [vmem:[%s9642_s27] ss:$0 sm:$0xff] }
0x12a1   :  { %6048 = vmatmul.msk.f32.gmra.mxu2 %vm970_vm5, %v3149_v45 }
0x12a7   :  { %v3270_v13 = vpop.permute.xlu2 %3269 }
0x12a8   :  { %6063 = vmatmul.msk.f32.gmra.mxu0 %vm907_vm4, %v3270_v13 }
0x12aa   :  { %v3139_v55 = vpop.xlane.xlu1 %3138 }
0x12ac   :  { %v3451_v46 = vpop.f32.mrf.mxu1 }
0x12b2   :  { %v3200_v14 = vpop.f32.mrf.mxu2 }
0x12b3   :  { %6052 = vmatmul.msk.f32.vlgmr.msra.gmra.mxu3 %vm907_vm4, %v3200_v14 }
0x12cd   :  { %v2954_v30 = vpop.f32.mrf.mxu3 }
0x12ce   :  { %v3002_v49 = vadd.f32 %v8773_v24, %v2954_v30 }
0x12d5   :  { %v8892_v19 = vpop.f32.mrf.mxu3 }
0x12dd   :  { %v8894_v26 = vpop.f32.mrf.mxu3 }
0x12e5   :  { %v8897_v11 = vpop.f32.mrf.mxu3 }
0x12e6   :  { %v3136_v23 = vpop.xlane.xlu0 %3135 }
0x12e7   :  { %6577 = vrcp.f32 %v3136_v23 }
0x12e8   :  { %6579 = vrcp.f32 %v3139_v55 }
0x12e9   :  { %6581 = vrcp.f32 %v3142_v35 }
0x12ed   :  { %v6578_v33 = vpop.eup %6577 }
0x12ee   :  { %v3150_v51 = vmul.f32 %v6578_v33, %v6574_v15  ;;  %v6580_v48 = vpop.eup %6579 }
0x12ef   :  { %v3151_v60 = vmul.f32 %v6580_v48, %v6572_v39  ;;  %v6582_v20 = vpop.eup %6581  ;;  %v2351_v48 = vld [vmem:[%s9643_s13 + $0x78] sm:$0xff] }
0x12f0   :  { %6049 = vmatmul.msk.f32.gmra.mxu2 %vm970_vm5, %v3150_v51  ;;  %v3152_v62 = vmul.f32 %v6582_v20, %v6568_v28  ;;  %3907 = vmatpush.msrb.mxu0 %v2351_v48  ;;  %v8950_v20 = vld [vmem:[%s9644_s22] ss:$0 sm:$0xff] }
0x12f8   :  { %6050 = vmatmul.msk.f32.gmra.mxu2 %vm970_vm5, %v3151_v60  ;;  %v2350_v60 = vld [vmem:[%s9643_s13 + $0x70] sm:$0xff] }
0x12f9   :  { %3908 = vmatpush.msrb.mxu0 %v2350_v60 }
0x1300   :  { %6051 = vmatmul.msk.f32.gmra.mxu2 %vm970_vm5, %v3152_v62  ;;  %v2349_v62 = vld [vmem:[%s9643_s13 + $0x68] sm:$0xff] }
0x1301   :  { %3909 = vmatpush.msrb.mxu0 %v2349_v62 }
0x1308   :  { %6072 = vmatmul.msk.f32.vlgmr.msrb.gmra.mxu2 %vm907_vm4, %v3451_v46 }
0x130e   :  { %v8900_v57 = vpop.f32.mrf.mxu3 }
0x1324   :  { %v3203_v2 = vpop.f32.mrf.mxu2 }
0x1325   :  { %6053 = vmatmul.msk.f32.gmra.mxu3 %vm907_vm4, %v3203_v2  ;;  %v2348_v2 = vld [vmem:[%s9643_s13 + $0x60] sm:$0xff] }
0x1326   :  { %3910 = vmatpush.msrb.mxu0 %v2348_v2 }
0x1336   :  { %v3247_v25 = vpop.f32.mrf.mxu3 }
0x1337   :  { %v3262_v28 = vadd.f32 %v3247_v25, %v3002_v49  ;;  %v2345_v49 = vld [vmem:[%s9643_s13 + $0x48] sm:$0xff] }
0x1373   :  { %v3206_v41 = vpop.f32.mrf.mxu2 }
0x1374   :  { %6054 = vmatmul.msk.f32.gmra.mxu3 %vm907_vm4, %v3206_v41  ;;  %v2347_v41 = vld [vmem:[%s9643_s13 + $0x58] sm:$0xff] }
0x1375   :  { %3911 = vmatpush.msrb.mxu0 %v2347_v41 }
0x137b   :  { %v3209_v31 = vpop.f32.mrf.mxu2 }
0x137c   :  { %6055 = vmatmul.msk.f32.gmra.mxu3 %vm907_vm4, %v3209_v31 }
0x1383   :  { %v3212_v17 = vpop.f32.mrf.mxu2 }
0x1384   :  { %6056 = vmatmul.msk.f32.gmra.mxu3 %vm907_vm4, %v3212_v17  ;;  %v2346_v17 = vld [vmem:[%s9643_s13 + $0x50] sm:$0xff] }
0x1385   :  { %3912 = vmatpush.msrb.mxu0 %v2346_v17 }
0x1387   :  { %3913 = vmatpush.msrb.mxu0 %v2345_v49 }
0x138b   :  { %v3498_v38 = vpop.f32.mrf.mxu2 }
0x138c   :  { %v3513_v12 = vadd.f32 %v3498_v38, %v3262_v28  ;;  %v2344_v38 = vld [vmem:[%s9643_s13 + $0x40] sm:$0xff] }
0x138d   :  { %3914 = vmatpush.msrb.mxu0 %v2344_v38 }
0x138e   :  { %v3518_v36 = vadd.f32 %v3513_v12, %v8476_v52 }
0x1390   :  { %v8909_v34 = vadd.f32 %v8905_v53, %v3518_v36  ;;  %v2343_v36 = vld [vmem:[%s9643_s13 + $0x38] sm:$0xff] }
0x1391   :  { %3915 = vmatpush.msrb.mxu0 %v2343_v36 }
0x1392   :  { %v3531_v50 = vsel %vm657_vm1, %v8909_v34, 0.0 }
0x1393   :  { %3532 = vadd.xlane.f32.xlu0 %v3531_v50  ;;  %v2342_v50 = vld [vmem:[%s9643_s13 + $0x30] sm:$0xff] }
0x1394   :  { %3916 = vmatpush.msrb.mxu0 %v2342_v50 }
0x13a7   :  { %3271 = vrot.lane.b32.xlu0 %v8566_v59, %s7366_s2  ;;  %v2334_v59 = vld [vmem:[%s9640_s0 + $0x18] sm:$0xff] }
0x13a8   :  { %3687 = vmatpush.msrb.mxu3 %v2334_v59  ;;  %v8939_v23 = vpop.f32.mrf.mxu3  ;;  %v2338_v59 = vld [vmem:[%s9643_s13 + $0x10] sm:$0xff] }
0x13aa   :  { %3688 = vmatpush.msrb.mxu3 %v2333_v27 }
0x13af   :  { %3275 = vrot.lane.b32.xlu0 %v8578_v9, %s7366_s2  ;;  %v2332_v9 = vld [vmem:[%s9640_s0 + $0x8] sm:$0xff] }
0x13b0   :  { %3689 = vmatpush.msrb.mxu3 %v2332_v9 }
0x13b2   :  { %3690 = vmatpush.msrb.mxu3 %v2331_v44 }
0x13f7   :  { %v8941_v55 = vpop.f32.mrf.mxu3 }
0x13ff   :  { %v8943_v33 = vpop.f32.mrf.mxu3 }
0x1406   :  { %v3533_v24 = vpop.xlane.xlu0 %3532 }
0x1407   :  { %v3546_v40 = vmul.f32 %v3533_v24, %v7824_v7  ;;  %v8945_v51 = vpop.f32.mrf.mxu3  ;;  %v2341_v24 = vld [vmem:[%s9643_s13 + $0x28] sm:$0xff] }
0x1408   :  { %3917 = vmatpush.msrb.mxu0 %v2341_v24 }
0x1409   :  { %v3551_v52 = vsub.f32 %v8909_v34, %v3546_v40  ;;  %v2340_v40 = vld [vmem:[%s9643_s13 + $0x20] sm:$0xff] }
0x140a   :  { %3918 = vmatpush.msrb.mxu0 %v2340_v40  ;;  %v6363_v40 = vld [vmem:[%s9645_s14] ss:$0 sm:$0xff] }
0x140b   :  { %v3556_v43 = vmul.f32 %v3551_v52, %v3551_v52 }
0x140d   :  { %v3561_v39 = vsel %vm657_vm1, %v3556_v43, 0.0 }
0x140e   :  { %3562 = vadd.xlane.f32.xlu1 %v3561_v39  ;;  %v2339_v39 = vld [vmem:[%s9643_s13 + $0x18] sm:$0xff] }
0x140f   :  { %3919 = vmatpush.msrb.mxu0 %v2339_v39 }
0x1411   :  { %3920 = vmatpush.msrb.mxu0 %v2338_v59  ;;  %v6738_v59 = vld [vmem:[%s9625_s7 + $0x8] sm:$0xff] }
0x1419   :  { %v3272_v61 = vpop.permute.xlu0 %3271 }
0x141a   :  { %6064 = vmatmul.msk.f32.gmra.mxu0 %vm907_vm4, %v3272_v61 }
0x1421   :  { %v3276_v8 = vpop.permute.xlu0 %3275 }
0x1427   :  { %3273 = vrot.lane.b32.xlu1 %v8572_v5, %s7366_s2 }
0x1481   :  { %v3563_v54 = vpop.xlane.xlu1 %3562 }
0x1482   :  { %v3576_v63 = vmul.f32 %v3563_v54, %v7824_v7  ;;  %v2337_v54 = vld [vmem:[%s9643_s13 + $0x8] sm:$0xff] }
0x1483   :  { %3921 = vmatpush.msrb.mxu0 %v2337_v54 }
0x1484   :  { %v3581_v29 = vadd.f32 1e-06, %v3576_v63  ;;  %v2336_v63 = vld [vmem:[%s9643_s13] sm:$0xff] }
0x1485   :  { %3922 = vmatpush.msrb.mxu0 %v2336_v63 }
0x1486   :  { %6583 = vrsqrt.f32 %v3581_v29  ;;  %vm3592_vm14 = vweird.f32 %v3581_v29 }
0x148c   :  { %v6584_v37 = vpop.eup %6583 }
0x148d   :  { %v3587_v4 = vmul.f32 %v6584_v37, %v3581_v29  ;;  %vm3593_vm13 = vweird.f32 %v6584_v37 }
0x148e   :  { %vm3594_vm15 = vmor %vm3592_vm14, %vm3593_vm13 }
0x148f   :  { %v3588_v15 = vmul.f32 %v6584_v37, %v3587_v4 }
0x1491   :  { %v3589_v16 = vmul.f32 0.5, %v3588_v15 }
0x1493   :  { %v3590_v5 = vsub.f32 1.5, %v3589_v16 }
0x1495   :  { %v3591_v42 = vmul.f32 %v6584_v37, %v3590_v5 }
0x1497   :  { %v3595_v58 = vsel %vm3594_vm15, %v6584_v37, %v3591_v42  ;;  %vm4056_vm15 = vcmask 254976  }
0x1498   :  { %v3636_v35 = vmul.f32 %v3595_v58, %v3551_v52 }
0x1499   :  { %v3274_v45 = vpop.permute.xlu1 %3273 }
0x149a   :  { %v3644_v13 = vmul.f32 %v8929_v32, %v3636_v35  ;;  %6065 = vmatmul.msk.f32.gmra.mxu0 %vm907_vm4, %v3274_v45 }
0x149c   :  { %v3652_v14 = vadd.f32 %v8932_v22, %v3644_v13 }
0x149e   :  { %6077 = vmatmul.msk.f32.vlgmr.msrb.gmra.mxu3 %vm657_vm1, %v3652_v14 }
0x14a2   :  { %6066 = vmatmul.msk.f32.gmra.mxu0 %vm907_vm4, %v3276_v8 }
0x1521   :  { %v3692_v46 = vpop.f32.mrf.mxu3 }
0x1522   :  { %v8955_v30 = vadd.f32 %v8950_v20, %v3692_v46 }
0x1524   :  { %v3712_v31 = vmul.f32 0.70710677, %v8955_v30 }
0x1526   :  { %v3727_v25 = vand.u32 2147483647, %v3712_v31  ;;  %vm3717_vm8 = vcmp.ge.f32.partialorder %v3712_v31, 0.0 }
0x1527   :  { %v3722_v17 = vsel %vm3717_vm8, 1.0, %v7371_v6 }
0x1528   :  { %v3732_v28 = vmul.f32 0.3275911, %v3727_v25  ;;  %v3862_v16 = vsub.f32 0.0, %v3727_v25 }
0x152a   :  { %v3737_v12 = vadd.f32 1.0, %v3732_v28  ;;  %v3867_v58 = vmul.f32 %v3862_v16, %v3727_v25  ;;  %v3707_v25 = vmul.f32 0.5, %v8955_v30 }
0x152c   :  { %6585 = vrcp.f32 %v3737_v12  ;;  %v3753_v27 = vand.u32 2147483648, %v3737_v12  ;;  %v3751_v44 = vand.u32 2147483647, %v3737_v12  ;;  %vm3747_vm3 = vweird.f32 %v3737_v12 }
0x152d   :  { %v3872_v13 = vmul.f32 1.442695, %v3867_v58 }
0x152e   :  { %v3754_v37 = vor.u32 1.1754944e-38, %v3753_v27  ;;  %vm3752_vm7 = vcmp.eq.f32.partialorder %v3751_v44, 8.507059e+37 }
0x152f   :  { %6587 = vpow2.f32 %v3872_v13 }
0x1532   :  { %v6586_v52 = vpop.eup %6585 }
0x1533   :  { %v3743_v43 = vmul.f32 %v6586_v52, %v3737_v12  ;;  %vm3748_vm2 = vweird.f32 %v6586_v52  ;;  %v3327_v12 = vpop.f32.mrf.mxu0 }
0x1534   :  { %vm3749_vm6 = vmor %vm3747_vm3, %vm3748_vm2  ;;  %v3340_v39 = vmul.f32 0.35355338, %v3327_v12 }
0x1535   :  { %v3744_v61 = vsub.f32 1.0, %v3743_v43  ;;  %v6588_v46 = vpop.eup %6587 }
0x1536   :  { %v3345_v30 = vadd.f32 %v6738_v59, %v3340_v39 }
0x1537   :  { %v3745_v9 = vmul.f32 %v6586_v52, %v3744_v61 }
0x1538   :  { %v3352_v27 = vsel %vm970_vm5, %v3345_v30, -inf }
0x1539   :  { %v3746_v29 = vadd.f32 %v6586_v52, %v3745_v9 }
0x153b   :  { %v3750_v4 = vsel %vm3749_vm6, %v6586_v52, %v3746_v29  ;;  %v3330_v36 = vpop.f32.mrf.mxu0 }
0x153c   :  { %v3755_v15 = vsel %vm3752_vm7, %v3754_v37, %v3750_v4  ;;  %v3341_v29 = vmul.f32 0.35355338, %v3330_v36  ;;  %v6739_v37 = vld [vmem:[%s9625_s7 + $0x10] sm:$0xff] }
0x153d   :  { %v3817_v5 = vmul.f32 1.0614054, %v3755_v15 }
0x153e   :  { %v3346_v4 = vadd.f32 %v6739_v37, %v3341_v29 }
0x153f   :  { %v3822_v42 = vadd.f32 -1.4531521, %v3817_v5  ;;  %v6740_v5 = vld [vmem:[%s9625_s7 + $0x20] sm:$0xff] }
0x1540   :  { %v3355_v16 = vsel %vm970_vm5, %v3346_v4, -inf }
0x1541   :  { %v3827_v35 = vmul.f32 %v3822_v42, %v3755_v15 }
0x1543   :  { %v3832_v45 = vadd.f32 1.4214138, %v3827_v35  ;;  %v3333_v50 = vpop.f32.mrf.mxu0 }
0x1545   :  { %v3837_v14 = vmul.f32 %v3832_v45, %v3755_v15 }
0x1547   :  { %v3842_v8 = vadd.f32 -0.28449672, %v3837_v14 }
0x1549   :  { %v3847_v48 = vmul.f32 %v3842_v8, %v3755_v15 }
0x154b   :  { %v3852_v60 = vadd.f32 0.2548296, %v3847_v48  ;;  %v3336_v24 = vpop.f32.mrf.mxu0 }
0x154d   :  { %v3857_v62 = vmul.f32 %v3852_v60, %v3755_v15  ;;  %v3343_v15 = vmul.f32 0.35355338, %v3336_v24  ;;  %v3342_v24 = vmul.f32 0.35355338, %v3333_v50 }
0x154f   :  { %v3882_v2 = vmul.f32 %v6588_v46, %v3857_v62  ;;  %v8982_v42 = vadd.f32 %v6740_v5, %v3343_v15 }
0x1551   :  { %v3887_v41 = vsub.f32 1.0, %v3882_v2  ;;  %v3361_v58 = vsel %vm970_vm5, %v8982_v42, -inf  ;;  %v6364_v2 = vld [vmem:[%s9646_s24] ss:$0 sm:$0xff] }
0x1553   :  { %v3892_v49 = vmul.f32 %v3887_v41, %v3722_v17 }
0x1555   :  { %v3897_v28 = vadd.f32 1.0, %v3892_v49  ;;  %v6365_v49 = vld [vmem:[%s9647_s19] ss:$0 sm:$0xff] }
0x1557   :  { %v3902_v38 = vmul.f32 %v3897_v28, %v3707_v25 }
0x1559   :  { %3923 = vmatmul.f32.vlgmr.msrb.gmra.mxu0 %v3902_v38 }
0x15d6   :  { %v3924_v52 = vpop.f32.mrf.mxu0 }
0x15d7   :  { %v3935_v43 = vadd.f32 %v3924_v52, %v8909_v34 }
0x15d9   :  { %v3939_v31 = vadd.f32 %v6363_v40, %v3935_v43  ;;  %v6741_v43 = vld [vmem:[%s9625_s7 + $0x18] sm:$0xff]  ;;  %s9648_s7 = sld [smem:[#allocation83_spill]] }
0x15db   :  { %v3942_v61 = vsel %vm657_vm1, %v3939_v31, 0.0 }
0x15dc   :  { %3943 = vadd.xlane.f32.xlu2 %v3942_v61 }
0x15e4   :  { %3353 = vmax.xlane.f32.xlu2 %v3352_v27 }
0x164f   :  { %v3944_v9 = vpop.xlane.xlu2 %3943 }
0x1650   :  { %v3945_v44 = vmul.f32 %v3944_v9, %v7824_v7 }
0x1652   :  { %v3946_v54 = vsub.f32 %v3939_v31, %v3945_v44  ;;  %v3347_v31 = vadd.f32 %v6741_v43, %v3342_v24 }
0x1654   :  { %v3947_v63 = vmul.f32 %v3946_v54, %v3946_v54  ;;  %v3358_v39 = vsel %vm970_vm5, %v3347_v31, -inf }
0x1656   :  { %v3948_v34 = vsel %vm657_vm1, %v3947_v63, 0.0 }
0x1657   :  { %3949 = vadd.xlane.f32.xlu1 %v3948_v34  ;;  %v3354_v28 = vpop.xlane.xlu2 %3353 }
0x1658   :  { %v3365_v36 = vsub.f32 %v3345_v30, %v3354_v28 }
0x165a   :  { %v3371_v52 = vmul.f32 1.442695, %v3365_v36 }
0x165f   :  { %3356 = vmax.xlane.f32.xlu1 %v3355_v16 }
0x1667   :  { %3362 = vmax.xlane.f32.xlu1 %v3361_v58 }
0x16ca   :  { %v3950_v35 = vpop.xlane.xlu1 %3949 }
0x16cb   :  { %v3951_v45 = vmul.f32 %v3950_v35, %v7824_v7 }
0x16cd   :  { %v3952_v13 = vadd.f32 1e-06, %v3951_v45 }
0x16cf   :  { %6589 = vrsqrt.f32 %v3952_v13  ;;  %vm3959_vm10 = vweird.f32 %v3952_v13 }
0x16d0   :  { %6591 = vpow2.f32 %v3371_v52 }
0x16d2   :  { %v3357_v50 = vpop.xlane.xlu1 %3356 }
0x16d3   :  { %v3366_v37 = vsub.f32 %v3346_v4, %v3357_v50  ;;  %v3991_v50 = vld [vmem:[%s9648_s7 + $0x8] sm:$0xff] }
0x16d5   :  { %v6590_v14 = vpop.eup %6589  ;;  %v3373_v58 = vmul.f32 1.442695, %v3366_v37  ;;  %v6368_v37 = vld [vmem:[#allocation9] ss:$0 sm:$0xff] }
0x16d6   :  { %v3954_v8 = vmul.f32 %v6590_v14, %v3952_v13  ;;  %vm3960_vm9 = vweird.f32 %v6590_v14  ;;  %v6592_v61 = vpop.eup %6591  ;;  %4057 = vst.msk [vmem:[#allocation3 + $0x8] sm:$0x3] %vm4056_vm15, %v6368_v37 }
0x16d7   :  { %vm3961_vm11 = vmor %vm3959_vm10, %vm3960_vm9  ;;  %v3382_v59 = vsel %vm970_vm5, %v6592_v61, 0.0 }
0x16d8   :  { %v3955_v48 = vmul.f32 %v6590_v14, %v3954_v8 }
0x16da   :  { %v3956_v60 = vmul.f32 0.5, %v3955_v48  ;;  %v3363_v13 = vpop.xlane.xlu1 %3362 }
0x16dc   :  { %v3957_v62 = vsub.f32 1.5, %v3956_v60  ;;  %v3368_v60 = vsub.f32 %v8982_v42, %v3363_v13 }
0x16de   :  { %v3958_v46 = vmul.f32 %v6590_v14, %v3957_v62 }
0x16e0   :  { %v3962_v41 = vsel %vm3961_vm11, %v6590_v14, %v3958_v46 }
0x16e1   :  { %v3963_v17 = vmul.f32 %v3962_v41, %v3946_v54 }
0x16e3   :  { %v3967_v25 = vmul.f32 %v6364_v2, %v3963_v17  ;;  %v3377_v2 = vmul.f32 1.442695, %v3368_v60 }
0x16e5   :  { %v3971_v38 = vadd.f32 %v6365_v49, %v3967_v25 }
0x16e7   :  { %v3972_v12 = vmul.f32 %v3971_v38, %v3971_v38 }
0x16e9   :  { %v3973_v40 = vsel %vm657_vm1, %v3972_v12, 0.0 }
0x16ea   :  { %3974 = vadd.xlane.f32.xlu0 %v3973_v40 }
0x16f2   :  { %3359 = vmax.xlane.f32.xlu0 %v3358_v39 }
0x16fa   :  { %3383 = vadd.xlane.f32.xlu0 %v3382_v59 }
0x175d   :  { %v3975_v27 = vpop.xlane.xlu0 %3974 }
0x175e   :  { %v3976_v9 = vmax.f32 %v3975_v27, 1e-24 }
0x1760   :  { %6593 = vrsqrt.f32 %v3976_v9  ;;  %vm3983_vm13 = vweird.f32 %v3976_v9 }
0x1765   :  { %v3360_v44 = vpop.xlane.xlu0 %3359 }
0x1766   :  { %v6594_v30 = vpop.eup %6593  ;;  %v3367_v54 = vsub.f32 %v3347_v31, %v3360_v44  ;;  %v3993_v44 = vld [vmem:[%s9648_s7 + $0x18] sm:$0xff] }
0x1767   :  { %v3978_v63 = vmul.f32 %v6594_v30, %v3976_v9  ;;  %vm3984_vm12 = vweird.f32 %v6594_v30  ;;  %4043 = vmatpush.msra.mxu1 %v3993_v44 }
0x1768   :  { %v3375_v29 = vmul.f32 1.442695, %v3367_v54  ;;  %vm3985_vm14 = vmor %vm3983_vm13, %vm3984_vm12  ;;  %v3990_v54 = vld [vmem:[%s9648_s7] sm:$0xff]  ;;  %vm4246_vm12 = vcmask 1041408  }
0x1769   :  { %v3979_v34 = vmul.f32 %v6594_v30, %v3978_v63 }
0x176a   :  { %6595 = vpow2.f32 %v3375_v29 }
0x176b   :  { %v3980_v15 = vmul.f32 0.5, %v3979_v34 }
0x176d   :  { %v3981_v16 = vsub.f32 1.5, %v3980_v15  ;;  %v3384_v5 = vpop.xlane.xlu0 %3383 }
0x176e   :  { %6597 = vrcp.f32 %v3384_v5 }
0x176f   :  { %v3982_v35 = vmul.f32 %v6594_v30, %v3981_v16  ;;  %6599 = vpow2.f32 %v3373_v58  ;;  %v4059_v58 = vld [vmem:[#allocation3 + $0x8] sm:$0x3] }
0x1770   :  { %v6596_v45 = vpop.eup %6595  ;;  %6601 = vpow2.f32 %v3377_v2 }
0x1771   :  { %v3388_v14 = vsel %vm970_vm5, %v6596_v45, 0.0  ;;  %v3986_v8 = vsel %vm3985_vm14, %v6594_v30, %v3982_v35  ;;  %v3992_v30 = vld [vmem:[%s9648_s7 + $0x10] sm:$0xff]  ;;  %v4090_v35 = vsel %vm4056_vm15, %v4059_v58, 0.0 }
0x1772   :  { %3389 = vadd.xlane.f32.xlu0 %v3388_v14  ;;  %v3987_v48 = vmul.f32 %v3986_v8, %v3971_v38  ;;  %4044 = vmatpush.msra.mxu1 %v3992_v30 }
0x1774   :  { %v6598_v4 = vpop.eup %6597  ;;  %v3995_v62 = vsel %vm657_vm1, %v3987_v48, 0.0  ;;  %4045 = vmatpush.msra.mxu1 %v3991_v50 }
0x1775   :  { %3996 = vadd.xlane.f32.xlu2 %v3995_v62  ;;  %v3400_v46 = vmul.f32 %v6598_v4, %v6592_v61  ;;  %v6600_v41 = vpop.eup %6599  ;;  %v6367_v4 = vld [vmem:[#allocation4] ss:$0 sm:$0xff] }
0x1776   :  { %v3385_v17 = vsel %vm970_vm5, %v6600_v41, 0.0  ;;  %v6602_v49 = vpop.eup %6601  ;;  %4046 = vmatpush.msra.mxu1 %v3990_v54 }
0x1777   :  { %6068 = vmatmul.msk.f32.gmra.mxu1 %vm970_vm5, %v3400_v46  ;;  %v3391_v25 = vsel %vm970_vm5, %v6602_v49, 0.0 }
0x177a   :  { %4091 = vadd.xlane.f32.xlu0 %v4090_v35 }
0x177d   :  { %3386 = vadd.xlane.f32.xlu2 %v3385_v17 }
0x1785   :  { %3392 = vadd.xlane.f32.xlu2 %v3391_v25  ;;  %v6369_v25 = vld [vmem:[#allocation7] ss:$0 sm:$0xff] }
0x17e5   :  { %v3390_v40 = vpop.xlane.xlu0 %3389 }
0x17e8   :  { %v3997_v28 = vpop.xlane.xlu2 %3996 }
0x17e9   :  { %v3998_v42 = vmul.f32 %v3997_v28, %v7824_v7 }
0x17eb   :  { %v3999_v38 = vsub.f32 %v3987_v48, %v3998_v42  ;;  %v6366_v48 = vld [vmem:[%s9649_s17] ss:$0 sm:$0xff] }
0x17ed   :  { %v4000_v12 = vmul.f32 %v3999_v38, %v3999_v38 }
0x17ef   :  { %v4001_v36 = vsel %vm657_vm1, %v4000_v12, 0.0 }
0x17f0   :  { %v3387_v24 = vpop.xlane.xlu2 %3386  ;;  %4002 = vadd.xlane.f32.xlu1 %v4001_v36  ;;  %v4092_v36 = vpop.xlane.xlu0 %4091 }
0x17f1   :  { %6603 = vrcp.f32 %v3387_v24  ;;  %v3011_v24 = vadd.f32 %v8779_v0, %v8897_v11 }
0x17f2   :  { %6605 = vrcp.f32 %v3390_v40  ;;  %v4094_v40 = vmul.f32 %v4092_v36, %v7824_v7 }
0x17f4   :  { %v3454_v52 = vpop.f32.mrf.mxu1 }
0x17f5   :  { %6073 = vmatmul.msk.f32.gmra.mxu2 %vm907_vm4, %v3454_v52 }
0x17f7   :  { %v6604_v43 = vpop.eup %6603 }
0x17f8   :  { %v3401_v31 = vmul.f32 %v6604_v43, %v6600_v41  ;;  %v3393_v39 = vpop.xlane.xlu2 %3392  ;;  %v6606_v61 = vpop.eup %6605 }
0x17f9   :  { %6607 = vrcp.f32 %v3393_v39  ;;  %v3402_v59 = vmul.f32 %v6606_v61, %v6596_v45  ;;  %v3005_v61 = vadd.f32 %v8775_v56, %v8892_v19 }
0x17fa   :  { %6069 = vmatmul.msk.f32.gmra.mxu1 %vm970_vm5, %v3401_v31  ;;  %v9024_v31 = vsub.f32 %v4059_v58, %v4094_v40 }
0x17fb   :  { %v3263_v0 = vadd.f32 %v8939_v23, %v3005_v61  ;;  %v3014_v23 = vadd.f32 %v8781_v47, %v8900_v57 }
0x17fc   :  { %v4098_v11 = vmul.f32 %v9024_v31, %v9024_v31 }
0x17ff   :  { %v6608_v27 = vpop.eup %6607 }
0x1800   :  { %v3403_v9 = vmul.f32 %v6608_v27, %v6602_v49  ;;  %v4102_v27 = vsel %vm4056_vm15, %v4098_v11, 0.0 }
0x1802   :  { %6070 = vmatmul.msk.f32.gmra.mxu1 %vm970_vm5, %v3402_v59 }
0x180a   :  { %6071 = vmatmul.msk.f32.gmra.mxu1 %vm970_vm5, %v3403_v9  ;;  %v3008_v9 = vadd.f32 %v8777_v3, %v8894_v26  ;;  %v3266_v3 = vadd.f32 %v8945_v51, %v3014_v23 }
0x180c   :  { %v3264_v30 = vadd.f32 %v8941_v55, %v3008_v9 }
0x1863   :  { %v4003_v63 = vpop.xlane.xlu1 %4002 }
0x1864   :  { %v4004_v29 = vmul.f32 %v4003_v63, %v7824_v7 }
0x1866   :  { %v4005_v34 = vadd.f32 1e-05, %v4004_v29 }
0x1868   :  { %6609 = vrsqrt.f32 %v4005_v34  ;;  %vm4012_vm2 = vweird.f32 %v4005_v34 }
0x186e   :  { %v6610_v15 = vpop.eup %6609 }
0x186f   :  { %v4007_v16 = vmul.f32 %v6610_v15, %v4005_v34  ;;  %vm4013_vm5 = vweird.f32 %v6610_v15 }
0x1870   :  { %vm4014_vm3 = vmor %vm4012_vm2, %vm4013_vm5 }
0x1871   :  { %v4008_v5 = vmul.f32 %v6610_v15, %v4007_v16 }
0x1873   :  { %v4009_v45 = vmul.f32 0.5, %v4008_v5 }
0x1875   :  { %v4010_v13 = vsub.f32 1.5, %v4009_v45 }
0x1877   :  { %v4011_v14 = vmul.f32 %v6610_v15, %v4010_v13  ;;  %v3457_v8 = vpop.f32.mrf.mxu1 }
0x1878   :  { %6074 = vmatmul.msk.f32.gmra.mxu2 %vm907_vm4, %v3457_v8  ;;  %v3501_v49 = vpop.f32.mrf.mxu2 }
0x1879   :  { %v4015_v60 = vsel %vm4014_vm3, %v6610_v15, %v4011_v14 }
0x187a   :  { %v4016_v62 = vmul.f32 %v4015_v60, %v3999_v38  ;;  %v3265_v38 = vadd.f32 %v8943_v33, %v3011_v24  ;;  %v3514_v33 = vadd.f32 %v3501_v49, %v3263_v0  ;;  %v4064_v60 = vld [vmem:[%s9650_s18 + $0x10] sm:$0xff] }
0x187c   :  { %v4020_v46 = vmul.f32 %v6366_v48, %v4016_v62  ;;  %v3519_v44 = vadd.f32 %v3514_v33, %v8481_v1  ;;  %v4065_v48 = vld [vmem:[%s9650_s18 + $0x18] sm:$0xff]  ;;  %v4062_v62 = vld [vmem:[%s9650_s18] sm:$0xff] }
0x187d   :  { %4159 = vmatpush.msra.mxu2 %v4065_v48  ;;  %v6371_v33 = vld [vmem:[#allocation12] ss:$0 sm:$0xff] }
0x187e   :  { %v4024_v2 = vadd.f32 %v6367_v4, %v4020_v46  ;;  %v9038_v19 = vadd.f32 %v8905_v53, %v3519_v44  ;;  %v4063_v4 = vld [vmem:[%s9650_s18 + $0x8] sm:$0xff] }
0x187f   :  { %v3460_v41 = vpop.f32.mrf.mxu1  ;;  %4160 = vmatpush.msra.mxu2 %v4064_v60 }
0x1880   :  { %6075 = vmatmul.msk.f32.gmra.mxu2 %vm907_vm4, %v3460_v41  ;;  %6082 = vmatmul.msk.f32.vlgmr.msra.gmra.mxu1 %vm657_vm1, %v4024_v2  ;;  %v3534_v54 = vsel %vm657_vm1, %v9038_v19, 0.0 }
0x1881   :  { %4161 = vmatpush.msra.mxu2 %v4063_v4 }
0x1883   :  { %4162 = vmatpush.msra.mxu2 %v4062_v62 }
0x1887   :  { %v3463_v17 = vpop.f32.mrf.mxu1 }
0x1888   :  { %6076 = vmatmul.msk.f32.gmra.mxu2 %vm907_vm4, %v3463_v17 }
0x18fb   :  { %v3504_v28 = vpop.f32.mrf.mxu2 }
0x18fc   :  { %v3515_v56 = vadd.f32 %v3504_v28, %v3264_v30 }
0x18fd   :  { %v4048_v42 = vpop.f32.mrf.mxu1 }
0x18fe   :  { %v4049_v12 = vadd.f32 %v6369_v25, %v4048_v42  ;;  %v3520_v50 = vadd.f32 %v3515_v56, %v8486_v10 }
0x1900   :  { %4052 = vst.msk [vmem:[#allocation3] sm:$0xff] %vm657_vm1, %v4049_v12  ;;  %v3528_v26 = vadd.f32 %v8905_v53, %v3520_v50 }
0x1902   :  { %v3537_v29 = vsel %vm657_vm1, %v3528_v26, 0.0 }
0x1903   :  { %v3507_v52 = vpop.f32.mrf.mxu2 }
0x1904   :  { %v9022_v43 = vadd.f32 %v3507_v52, %v3265_v38 }
0x1907   :  { %v4058_v39 = vld [vmem:[#allocation3] sm:$0xff] }
0x1908   :  { %v4087_v59 = vsel %vm657_vm1, %v4058_v39, 0.0 }
0x1909   :  { %4088 = vadd.xlane.f32.xlu1 %v4087_v59  ;;  %v6370_v59 = vld [vmem:[#allocation10] ss:$0 sm:$0xff] }
0x190b   :  { %v3510_v63 = vpop.f32.mrf.mxu2 }
0x190c   :  { %v3517_v1 = vadd.f32 %v3510_v63, %v3266_v3 }
0x190e   :  { %v3522_v55 = vadd.f32 %v3517_v1, %v8496_v18  ;;  %v3521_v1 = vadd.f32 %v9022_v43, %v8491_v21 }
0x1910   :  { %v9050_v34 = vadd.f32 %v8905_v53, %v3522_v55 }
0x1911   :  { %4103 = vadd.xlane.f32.xlu1 %v4102_v27 }
0x1912   :  { %v3543_v10 = vsel %vm657_vm1, %v9050_v34, 0.0 }
0x1919   :  { %3535 = vadd.xlane.f32.xlu1 %v3534_v54 }
0x1921   :  { %3538 = vadd.xlane.f32.xlu1 %v3537_v29 }
0x1929   :  { %3544 = vadd.xlane.f32.xlu1 %v3543_v10 }
0x197c   :  { %v4089_v47 = vpop.xlane.xlu1 %4088 }
0x197d   :  { %v4093_v57 = vmul.f32 %v4089_v47, %v7824_v7 }
0x197f   :  { %v4095_v51 = vsub.f32 %v4058_v39, %v4093_v57 }
0x1981   :  { %v4097_v37 = vmul.f32 %v4095_v51, %v4095_v51 }
0x1983   :  { %v4099_v15 = vsel %vm657_vm1, %v4097_v37, 0.0 }
0x1984   :  { %4100 = vadd.xlane.f32.xlu2 %v4099_v15  ;;  %v4104_v18 = vpop.xlane.xlu1 %4103 }
0x1985   :  { %v4106_v14 = vmul.f32 %v4104_v18, %v7824_v7 }
0x1987   :  { %v4108_v8 = vadd.f32 1e-05, %v4106_v14 }
0x1989   :  { %6611 = vrsqrt.f32 %v4108_v8  ;;  %vm4125_vm6 = vweird.f32 %v4108_v8 }
0x198c   :  { %v3536_v16 = vpop.xlane.xlu1 %3535 }
0x198d   :  { %v3547_v54 = vmul.f32 %v3536_v16, %v7824_v7 }
0x198f   :  { %v6612_v2 = vpop.eup %6611 }
0x1990   :  { %v4120_v49 = vmul.f32 %v6612_v2, %v4108_v8  ;;  %vm4126_vm7 = vweird.f32 %v6612_v2 }
0x1991   :  { %vm4127_vm9 = vmor %vm4125_vm6, %vm4126_vm7  ;;  %vm4211_vm7 = vcmask 80896  }
0x1992   :  { %v4121_v25 = vmul.f32 %v6612_v2, %v4120_v49 }
0x1994   :  { %v3539_v5 = vpop.xlane.xlu1 %3538  ;;  %v4122_v42 = vmul.f32 0.5, %v4121_v25 }
0x1995   :  { %v3548_v58 = vmul.f32 %v3539_v5, %v7824_v7 }
0x1996   :  { %v4123_v24 = vsub.f32 1.5, %v4122_v42 }
0x1997   :  { %v9057_v35 = vsub.f32 %v3528_v26, %v3548_v58  ;;  %v3529_v26 = vadd.f32 %v8905_v53, %v3521_v1 }
0x1998   :  { %v4124_v52 = vmul.f32 %v6612_v2, %v4123_v24 }
0x1999   :  { %v3558_v45 = vmul.f32 %v9057_v35, %v9057_v35  ;;  %v3540_v55 = vsel %vm657_vm1, %v3529_v26, 0.0 }
0x199a   :  { %v4128_v11 = vsel %vm4127_vm9, %v6612_v2, %v4124_v52 }
0x199b   :  { %v3567_v13 = vsel %vm657_vm1, %v3558_v45, 0.0  ;;  %v4130_v9 = vmul.f32 %v4128_v11, %v9024_v31  ;;  %v3552_v31 = vsub.f32 %v9038_v19, %v3547_v54 }
0x199c   :  { %3568 = vadd.xlane.f32.xlu1 %v3567_v13  ;;  %v3545_v43 = vpop.xlane.xlu1 %3544 }
0x199d   :  { %v4135_v30 = vmul.f32 %v6370_v59, %v4130_v9  ;;  %v3557_v63 = vmul.f32 %v3552_v31, %v3552_v31  ;;  %v3550_v13 = vmul.f32 %v3545_v43, %v7824_v7 }
0x199f   :  { %v4140_v56 = vadd.f32 %v6371_v33, %v4135_v30  ;;  %v3564_v3 = vsel %vm657_vm1, %v3557_v63, 0.0  ;;  %v9112_v62 = vsub.f32 %v9050_v34, %v3550_v13 }
0x19a1   :  { %v3560_v49 = vmul.f32 %v9112_v62, %v9112_v62 }
0x19f7   :  { %v4101_v46 = vpop.xlane.xlu2 %4100 }
0x19f8   :  { %v4105_v41 = vmul.f32 %v4101_v46, %v7824_v7 }
0x19fa   :  { %v4107_v17 = vadd.f32 1e-05, %v4105_v41 }
0x19fc   :  { %6613 = vrsqrt.f32 %v4107_v17  ;;  %vm4115_vm10 = vweird.f32 %v4107_v17 }
0x1a02   :  { %v6614_v28 = vpop.eup %6613 }
0x1a03   :  { %v4110_v12 = vmul.f32 %v6614_v28, %v4107_v17  ;;  %vm4116_vm8 = vweird.f32 %v6614_v28 }
0x1a04   :  { %vm4117_vm11 = vmor %vm4115_vm10, %vm4116_vm8  ;;  %vm4215_vm8 = vcmask 74752  }
0x1a05   :  { %v4111_v36 = vmul.f32 %v6614_v28, %v4110_v12 }
0x1a07   :  { %v4112_v38 = vmul.f32 0.5, %v4111_v36  ;;  %v3573_v36 = vsel %vm657_vm1, %v3560_v49, 0.0 }
0x1a09   :  { %v4113_v40 = vsub.f32 1.5, %v4112_v38 }
0x1a0b   :  { %v4114_v39 = vmul.f32 %v6614_v28, %v4113_v40 }
0x1a0d   :  { %v4118_v61 = vsel %vm4117_vm11, %v6614_v28, %v4114_v39 }
0x1a0e   :  { %v4129_v0 = vmul.f32 %v4118_v61, %v4095_v51  ;;  %v9126_v61 = vld [vmem:[%s9651_s23] sm:$0xff] }
0x1a0f   :  { %v3569_v19 = vpop.xlane.xlu1 %3568 }
0x1a10   :  { %v4134_v27 = vmul.f32 %v6370_v59, %v4129_v0  ;;  %v3578_v29 = vmul.f32 %v3569_v19, %v7824_v7 }
0x1a12   :  { %v4139_v44 = vadd.f32 %v6371_v33, %v4134_v27  ;;  %v3583_v10 = vadd.f32 1e-06, %v3578_v29  ;;  %v9134_v33 = vld [vmem:[%s9651_s23 + $0x8] sm:$0x3] }
0x1a14   :  { %6083 = vmatmul.msk.f32.vlgmr.msra.gmra.mxu2 %vm657_vm1, %v4139_v44  ;;  %6615 = vrsqrt.f32 %v3583_v10  ;;  %vm3612_vm3 = vweird.f32 %v3583_v10 }
0x1a1a   :  { %v6616_v57 = vpop.eup %6615 }
0x1a1b   :  { %v3607_v15 = vmul.f32 %v6616_v57, %v3583_v10  ;;  %vm3613_vm14 = vweird.f32 %v6616_v57 }
0x1a1c   :  { %6084 = vmatmul.msk.f32.gmra.mxu2 %vm657_vm1, %v4140_v56  ;;  %vm3614_vm6 = vmor %vm3612_vm3, %vm3613_vm14 }
0x1a1d   :  { %v3608_v18 = vmul.f32 %v6616_v57, %v3607_v15 }
0x1a1f   :  { %v3609_v14 = vmul.f32 0.5, %v3608_v18 }
0x1a21   :  { %v3610_v46 = vsub.f32 1.5, %v3609_v14 }
0x1a23   :  { %v3611_v25 = vmul.f32 %v6616_v57, %v3610_v46 }
0x1a25   :  { %v3615_v12 = vsel %vm3614_vm6, %v6616_v57, %v3611_v25 }
0x1a26   :  { %v3638_v38 = vmul.f32 %v3615_v12, %v9057_v35 }
0x1a28   :  { %v3646_v52 = vmul.f32 %v8929_v32, %v3638_v38 }
0x1a2a   :  { %v3654_v39 = vadd.f32 %v8932_v22, %v3646_v52 }
0x1a97   :  { %v9071_v23 = vpop.f32.mrf.mxu2 }
0x1a98   :  { %4172 = vrot.lane.b32.xlu2 %v9071_v23, %s7360_s1 }
0x1a9f   :  { %v9075_v50 = vpop.f32.mrf.mxu2 }
0x1aa0   :  { %4174 = vrot.lane.b32.xlu0 %v9075_v50, %s7360_s1 }
0x1ac1   :  { %3565 = vadd.xlane.f32.xlu2 %v3564_v3 }
0x1aca   :  { %3541 = vadd.xlane.f32.xlu0 %v3540_v55 }
0x1ad9   :  { %4237 = vrot.lane.b32.xlu2 %v9075_v50, %s7361_s12 }
0x1ae1   :  { %4276 = vrot.lane.b32.xlu2 %v9071_v23, %s7362_s5 }
0x1ae9   :  { %4274 = vrot.lane.b32.xlu2 %v9075_v50, %s7363_s10 }
0x1af1   :  { %4563 = vrot.lane.b32.xlu2 %v9071_v23, %s7366_s2 }
0x1af2   :  { %v4173_v53 = vpop.permute.xlu2 %4172 }
0x1af9   :  { %4565 = vrot.lane.b32.xlu2 %v9075_v50, %s7366_s2 }
0x1b12   :  { %v4175_v21 = vpop.permute.xlu0 %4174 }
0x1b13   :  { %6085 = vmatpush.xpose.msk.msrb.mxu1 %vm907_vm4, %v4175_v21 }
0x1b17   :  { %6086 = vmatpush.xpose.msk.msrb.mxu1 %vm907_vm4, %v4173_v53 }
0x1b1a   :  { %6087 = vmatmul.msk.f32.vlgmr.msrb.gmra.mxu1 %vm907_vm4, %v9071_v23 }
0x1b22   :  { %6088 = vmatmul.msk.f32.gmra.mxu1 %vm907_vm4, %v9075_v50 }
0x1b34   :  { %v3566_v47 = vpop.xlane.xlu2 %3565 }
0x1b35   :  { %v3577_v51 = vmul.f32 %v3566_v47, %v7824_v7 }
0x1b37   :  { %v3582_v37 = vadd.f32 1e-06, %v3577_v51 }
0x1b39   :  { %6617 = vrsqrt.f32 %v3582_v37  ;;  %vm3602_vm5 = vweird.f32 %v3582_v37 }
0x1b3c   :  { %v4238_v16 = vpop.permute.xlu2 %4237 }
0x1b3d   :  { %v3542_v5 = vpop.xlane.xlu0 %3541  ;;  %6089 = vmatpush.msk.msra.mxu3 %vm4246_vm12, %v4238_v16 }
0x1b3e   :  { %v3549_v58 = vmul.f32 %v3542_v5, %v7824_v7 }
0x1b3f   :  { %v6618_v45 = vpop.eup %6617 }
0x1b40   :  { %v3597_v8 = vmul.f32 %v6618_v45, %v3582_v37  ;;  %v9107_v48 = vsub.f32 %v3529_v26, %v3549_v58  ;;  %vm3603_vm13 = vweird.f32 %v6618_v45 }
0x1b41   :  { %vm3604_vm2 = vmor %vm3602_vm5, %vm3603_vm13 }
0x1b42   :  { %v3598_v60 = vmul.f32 %v6618_v45, %v3597_v8  ;;  %v3559_v4 = vmul.f32 %v9107_v48, %v9107_v48 }
0x1b44   :  { %v3599_v2 = vmul.f32 0.5, %v3598_v60  ;;  %v3570_v41 = vsel %vm657_vm1, %v3559_v4, 0.0 }
0x1b45   :  { %3571 = vadd.xlane.f32.xlu1 %v3570_v41 }
0x1b46   :  { %v3600_v17 = vsub.f32 1.5, %v3599_v2 }
0x1b48   :  { %v3601_v28 = vmul.f32 %v6618_v45, %v3600_v17 }
0x1b4a   :  { %v3605_v42 = vsel %vm3604_vm2, %v6618_v45, %v3601_v28 }
0x1b4b   :  { %v3637_v34 = vmul.f32 %v3605_v42, %v3552_v31 }
0x1b4d   :  { %3574 = vadd.xlane.f32.xlu1 %v3573_v36  ;;  %v3645_v24 = vmul.f32 %v8929_v32, %v3637_v34 }
0x1b4f   :  { %v3653_v40 = vadd.f32 %v8932_v22, %v3645_v24 }
0x1b51   :  { %6078 = vmatmul.msk.f32.gmra.mxu3 %vm657_vm1, %v3653_v40 }
0x1b59   :  { %6079 = vmatmul.msk.f32.gmra.mxu3 %vm657_vm1, %v3654_v39 }
0x1b97   :  { %v4201_v59 = vpop.f32.mrf.mxu1 }
0x1b98   :  { %v4207_v0 = vmul.f32 0.35355338, %v4201_v59 }
0x1b9a   :  { %v9129_v11 = vadd.f32 %v4207_v0, %v9126_v61 }
0x1b9c   :  { %v4212_v35 = vsel %vm4211_vm7, %v9129_v11, -inf }
0x1b9d   :  { %4213 = vmax.xlane.f32.xlu1 %v4212_v35 }
0x1b9f   :  { %v4204_v27 = vpop.f32.mrf.mxu1 }
0x1ba0   :  { %v4208_v9 = vmul.f32 0.35355338, %v4204_v27 }
0x1ba2   :  { %v9137_v44 = vadd.f32 %v4208_v9, %v9134_v33 }
0x1ba4   :  { %v4216_v30 = vsel %vm4215_vm8, %v9137_v44, -inf }
0x1ba5   :  { %4217 = vmax.xlane.f32.xlu0 %v4216_v30 }
0x1bb8   :  { %v3572_v56 = vpop.xlane.xlu1 %3571 }
0x1bb9   :  { %v3579_v54 = vmul.f32 %v3572_v56, %v7824_v7 }
0x1bbb   :  { %v3584_v31 = vadd.f32 1e-06, %v3579_v54 }
0x1bbd   :  { %6619 = vrsqrt.f32 %v3584_v31  ;;  %vm3622_vm10 = vweird.f32 %v3584_v31 }
0x1bc0   :  { %v3575_v63 = vpop.xlane.xlu1 %3574 }
0x1bc1   :  { %v3580_v3 = vmul.f32 %v3575_v63, %v7824_v7 }
0x1bc3   :  { %v6620_v1 = vpop.eup %6619  ;;  %v3585_v26 = vadd.f32 1e-06, %v3580_v3 }
0x1bc4   :  { %v3617_v55 = vmul.f32 %v6620_v1, %v3584_v31  ;;  %vm3623_vm9 = vweird.f32 %v6620_v1 }
0x1bc5   :  { %6621 = vrsqrt.f32 %v3585_v26  ;;  %vm3624_vm11 = vmor %vm3622_vm10, %vm3623_vm9  ;;  %vm3632_vm14 = vweird.f32 %v3585_v26 }
0x1bc6   :  { %v3618_v21 = vmul.f32 %v6620_v1, %v3617_v55 }
0x1bc8   :  { %v3619_v53 = vmul.f32 0.5, %v3618_v21 }
0x1bca   :  { %v3620_v43 = vsub.f32 1.5, %v3619_v53 }
0x1bcb   :  { %v6622_v19 = vpop.eup %6621 }
0x1bcc   :  { %v3621_v29 = vmul.f32 %v6620_v1, %v3620_v43  ;;  %v3627_v10 = vmul.f32 %v6622_v19, %v3585_v26  ;;  %vm3633_vm13 = vweird.f32 %v6622_v19 }
0x1bcd   :  { %vm3634_vm5 = vmor %vm3632_vm14, %vm3633_vm13 }
0x1bce   :  { %v3625_v47 = vsel %vm3624_vm11, %v6620_v1, %v3621_v29  ;;  %v3628_v57 = vmul.f32 %v6622_v19, %v3627_v10 }
0x1bcf   :  { %v3639_v51 = vmul.f32 %v3625_v47, %v9107_v48 }
0x1bd0   :  { %v3629_v37 = vmul.f32 0.5, %v3628_v57 }
0x1bd1   :  { %v3647_v15 = vmul.f32 %v8929_v32, %v3639_v51 }
0x1bd2   :  { %v3630_v18 = vsub.f32 1.5, %v3629_v37 }
0x1bd3   :  { %v3655_v16 = vadd.f32 %v8932_v22, %v3647_v15 }
0x1bd4   :  { %v3631_v5 = vmul.f32 %v6622_v19, %v3630_v18  ;;  %v3695_v58 = vpop.f32.mrf.mxu3 }
0x1bd5   :  { %v9147_v45 = vadd.f32 %v8950_v20, %v3695_v58  ;;  %6080 = vmatmul.msk.f32.gmra.mxu3 %vm657_vm1, %v3655_v16 }
0x1bd6   :  { %v3635_v13 = vsel %vm3634_vm5, %v6622_v19, %v3631_v5 }
0x1bd7   :  { %v3640_v14 = vmul.f32 %v3635_v13, %v9112_v62  ;;  %v9152_v8 = vmul.f32 0.70710677, %v9147_v45 }
0x1bd9   :  { %v3728_v48 = vand.u32 2147483647, %v9152_v8  ;;  %v3648_v60 = vmul.f32 %v8929_v32, %v3640_v14  ;;  %vm3718_vm5 = vcmp.ge.f32.partialorder %v9152_v8, 0.0 }
0x1bdb   :  { %v3733_v4 = vmul.f32 0.3275911, %v3728_v48  ;;  %v3656_v46 = vadd.f32 %v8932_v22, %v3648_v60  ;;  %v3863_v52 = vsub.f32 0.0, %v3728_v48  ;;  %v3723_v60 = vsel %vm3718_vm5, 1.0, %v7371_v6 }
0x1bdc   :  { %v3698_v2 = vpop.f32.mrf.mxu3 }
0x1bdd   :  { %v3738_v41 = vadd.f32 1.0, %v3733_v4  ;;  %v9158_v17 = vadd.f32 %v8950_v20, %v3698_v2  ;;  %6081 = vmatmul.msk.f32.gmra.mxu3 %vm657_vm1, %v3656_v46  ;;  %v3868_v30 = vmul.f32 %v3863_v52, %v3728_v48 }
0x1bdf   :  { %6623 = vrcp.f32 %v3738_v41  ;;  %v9162_v62 = vmul.f32 0.70710677, %v9158_v17  ;;  %v3768_v22 = vand.u32 2147483648, %v3738_v41  ;;  %v3766_v36 = vand.u32 2147483647, %v3738_v41 }
0x1be0   :  { %vm3762_vm3 = vweird.f32 %v3738_v41  ;;  %v3874_v26 = vmul.f32 1.442695, %v3868_v30 }
0x1be1   :  { %v3729_v49 = vand.u32 2147483647, %v9162_v62  ;;  %v3769_v24 = vor.u32 1.1754944e-38, %v3768_v22  ;;  %vm3767_vm9 = vcmp.eq.f32.partialorder %v3766_v36, 8.507059e+37  ;;  %v3709_v36 = vmul.f32 0.5, %v9158_v17 }
0x1be3   :  { %v3734_v25 = vmul.f32 0.3275911, %v3729_v49  ;;  %v3864_v21 = vsub.f32 0.0, %v3729_v49 }
0x1be5   :  { %v6624_v28 = vpop.eup %6623  ;;  %v3739_v32 = vadd.f32 1.0, %v3734_v25  ;;  %v3869_v47 = vmul.f32 %v3864_v21, %v3729_v49 }
0x1be6   :  { %v3758_v42 = vmul.f32 %v6624_v28, %v3738_v41  ;;  %vm3763_vm2 = vweird.f32 %v6624_v28  ;;  %v3708_v41 = vmul.f32 0.5, %v9147_v45 }
0x1be7   :  { %6625 = vrcp.f32 %v3739_v32  ;;  %vm3764_vm6 = vmor %vm3762_vm3, %vm3763_vm2  ;;  %v3783_v27 = vand.u32 2147483648, %v3739_v32  ;;  %v3781_v54 = vand.u32 2147483647, %v3739_v32  ;;  %vm3777_vm11 = vweird.f32 %v3739_v32 }
0x1be8   :  { %v3759_v34 = vsub.f32 1.0, %v3758_v42  ;;  %6627 = vpow2.f32 %v3874_v26  ;;  %v3876_v18 = vmul.f32 1.442695, %v3869_v47  ;;  %vm3719_vm2 = vcmp.ge.f32.partialorder %v9162_v62, 0.0 }
0x1be9   :  { %v3784_v1 = vor.u32 1.1754944e-38, %v3783_v27  ;;  %vm3782_vm14 = vcmp.eq.f32.partialorder %v3781_v54, 8.507059e+37 }
0x1bea   :  { %v3760_v12 = vmul.f32 %v6624_v28, %v3759_v34  ;;  %6629 = vpow2.f32 %v3876_v18  ;;  %v3724_v34 = vsel %vm3719_vm2, 1.0, %v7371_v6 }
0x1bec   :  { %v3761_v20 = vadd.f32 %v6624_v28, %v3760_v12 }
0x1bed   :  { %v6626_v38 = vpop.eup %6625 }
0x1bee   :  { %v3765_v40 = vsel %vm3764_vm6, %v6624_v28, %v3761_v20  ;;  %v3773_v39 = vmul.f32 %v6626_v38, %v3739_v32  ;;  %vm3778_vm10 = vweird.f32 %v6626_v38  ;;  %v6628_v5 = vpop.eup %6627 }
0x1bef   :  { %v3770_v59 = vsel %vm3767_vm9, %v3769_v24, %v3765_v40  ;;  %vm3779_vm13 = vmor %vm3777_vm11, %vm3778_vm10 }
0x1bf0   :  { %v3818_v0 = vmul.f32 1.0614054, %v3770_v59  ;;  %v3774_v35 = vsub.f32 1.0, %v3773_v39  ;;  %v6630_v28 = vpop.eup %6629 }
0x1bf2   :  { %v3823_v9 = vadd.f32 -1.4531521, %v3818_v0  ;;  %v3775_v56 = vmul.f32 %v6626_v38, %v3774_v35  ;;  %v6742_v0 = vld [vmem:[%s9644_s22] ss:$0 sm:$0xff] }
0x1bf4   :  { %v3828_v31 = vmul.f32 %v3823_v9, %v3770_v59  ;;  %v3776_v63 = vadd.f32 %v6626_v38, %v3775_v56 }
0x1bf6   :  { %v3833_v3 = vadd.f32 1.4214138, %v3828_v31  ;;  %v3780_v55 = vsel %vm3779_vm13, %v6626_v38, %v3776_v63 }
0x1bf7   :  { %v3785_v43 = vsel %vm3782_vm14, %v3784_v1, %v3780_v55 }
0x1bf8   :  { %v3838_v53 = vmul.f32 %v3833_v3, %v3770_v59  ;;  %v3819_v19 = vmul.f32 1.0614054, %v3785_v43 }
0x1bfa   :  { %v3843_v29 = vadd.f32 -0.28449672, %v3838_v53  ;;  %v3824_v10 = vadd.f32 -1.4531521, %v3819_v19 }
0x1bfc   :  { %v3848_v57 = vmul.f32 %v3843_v29, %v3770_v59  ;;  %v3829_v51 = vmul.f32 %v3824_v10, %v3785_v43 }
0x1bfe   :  { %v3853_v37 = vadd.f32 0.2548296, %v3848_v57  ;;  %v3834_v15 = vadd.f32 1.4214138, %v3829_v51 }
0x1c00   :  { %v3858_v16 = vmul.f32 %v3853_v37, %v3770_v59  ;;  %v3839_v58 = vmul.f32 %v3834_v15, %v3785_v43 }
0x1c02   :  { %v3883_v13 = vmul.f32 %v6628_v5, %v3858_v16  ;;  %v3844_v14 = vadd.f32 -0.28449672, %v3839_v58 }
0x1c04   :  { %v3888_v48 = vsub.f32 1.0, %v3883_v13  ;;  %v3849_v4 = vmul.f32 %v3844_v14, %v3785_v43 }
0x1c06   :  { %v3893_v46 = vmul.f32 %v3888_v48, %v3723_v60  ;;  %v3854_v2 = vadd.f32 0.2548296, %v3849_v4 }
0x1c08   :  { %v3898_v49 = vadd.f32 1.0, %v3893_v46  ;;  %v3859_v25 = vmul.f32 %v3854_v2, %v3785_v43 }
0x1c0a   :  { %v3903_v42 = vmul.f32 %v3898_v49, %v3708_v41  ;;  %v3884_v32 = vmul.f32 %v6630_v28, %v3859_v25 }
0x1c0c   :  { %3926 = vmatmul.f32.gmra.mxu0 %v3903_v42  ;;  %v3889_v8 = vsub.f32 1.0, %v3884_v32 }
0x1c0e   :  { %v3894_v22 = vmul.f32 %v3889_v8, %v3724_v34 }
0x1c10   :  { %v4214_v12 = vpop.xlane.xlu1 %4213  ;;  %v3899_v24 = vadd.f32 1.0, %v3894_v22 }
0x1c11   :  { %v4219_v20 = vsub.f32 %v9129_v11, %v4214_v12 }
0x1c12   :  { %v3904_v45 = vmul.f32 %v3899_v24, %v3709_v36 }
0x1c13   :  { %v4221_v38 = vmul.f32 1.442695, %v4219_v20 }
0x1c14   :  { %3928 = vmatmul.f32.gmra.mxu0 %v3904_v45 }
0x1c15   :  { %6631 = vpow2.f32 %v4221_v38 }
0x1c18   :  { %v4218_v40 = vpop.xlane.xlu0 %4217 }
0x1c19   :  { %v4220_v52 = vsub.f32 %v9137_v44, %v4218_v40 }
0x1c1b   :  { %v9173_v62 = vpop.eup %6631  ;;  %v4223_v39 = vmul.f32 1.442695, %v4220_v52 }
0x1c1c   :  { %v4225_v59 = vsel %vm4211_vm7, %v9173_v62, 0.0 }
0x1c1d   :  { %6633 = vpow2.f32 %v4223_v39  ;;  %4226 = vadd.xlane.f32.xlu1 %v4225_v59 }
0x1c23   :  { %v9177_v17 = vpop.eup %6633 }
0x1c24   :  { %v4228_v11 = vsel %vm4215_vm8, %v9177_v17, 0.0 }
0x1c25   :  { %4229 = vadd.xlane.f32.xlu0 %v4228_v11 }
0x1c36   :  { %4235 = vrot.lane.b32.xlu1 %v9071_v23, %s7361_s12 }
0x1c39   :  { %4278 = vrot.lane.b32.xlu0 %v9075_v50, %s7362_s5 }
0x1c3e   :  { %4272 = vrot.lane.b32.xlu1 %v9071_v23, %s7363_s10 }
0x1c41   :  { %4569 = vrot.lane.b32.xlu0 %v9075_v50, %s7364_s6 }
0x1c46   :  { %4437 = vrot.lane.b32.xlu1 %v9075_v50, %s7365_s3 }
0x1c49   :  { %4567 = vrot.lane.b32.xlu0 %v9071_v23, %s7364_s6 }
0x1c4e   :  { %4435 = vrot.lane.b32.xlu1 %v9071_v23, %s7365_s3 }
0x1c51   :  { %4431 = vrot.lane.b32.xlu0 %v9071_v23, %s7367_s11 }
0x1c56   :  { %4433 = vrot.lane.b32.xlu1 %v9075_v50, %s7367_s11 }
0x1c58   :  { %v3701_v44 = vpop.f32.mrf.mxu3 }
0x1c59   :  { %v9200_v35 = vadd.f32 %v6742_v0, %v3701_v44 }
0x1c5b   :  { %v9203_v27 = vmul.f32 0.70710677, %v9200_v35 }
0x1c5d   :  { %v3730_v9 = vand.u32 2147483647, %v9203_v27  ;;  %vm3720_vm2 = vcmp.ge.f32.partialorder %v9203_v27, 0.0 }
0x1c5f   :  { %v3735_v30 = vmul.f32 0.3275911, %v3730_v9  ;;  %v3865_v37 = vsub.f32 0.0, %v3730_v9 }
0x1c60   :  { %v3704_v56 = vpop.f32.mrf.mxu3 }
0x1c61   :  { %v3740_v54 = vadd.f32 1.0, %v3735_v30  ;;  %v9206_v31 = vadd.f32 %v6742_v0, %v3704_v56  ;;  %v3870_v14 = vmul.f32 %v3865_v37, %v3730_v9  ;;  %v3725_v0 = vsel %vm3720_vm2, 1.0, %v7371_v6 }
0x1c63   :  { %6635 = vrcp.f32 %v3740_v54  ;;  %v9209_v63 = vmul.f32 0.70710677, %v9206_v31  ;;  %v3798_v43 = vand.u32 2147483648, %v3740_v54  ;;  %v3796_v29 = vand.u32 2147483647, %v3740_v54 }
0x1c64   :  { %vm3792_vm6 = vweird.f32 %v3740_v54  ;;  %v3878_v49 = vmul.f32 1.442695, %v3870_v14 }
0x1c65   :  { %v3731_v3 = vand.u32 2147483647, %v9209_v63  ;;  %v3799_v47 = vor.u32 1.1754944e-38, %v3798_v43  ;;  %vm3797_vm10 = vcmp.eq.f32.partialorder %v3796_v29, 8.507059e+37 }
0x1c67   :  { %v3736_v1 = vmul.f32 0.3275911, %v3731_v3  ;;  %v3866_v28 = vsub.f32 0.0, %v3731_v3 }
0x1c69   :  { %v6636_v26 = vpop.eup %6635  ;;  %v3741_v21 = vadd.f32 1.0, %v3736_v1  ;;  %v3871_v12 = vmul.f32 %v3866_v28, %v3731_v3  ;;  %v3710_v3 = vmul.f32 0.5, %v9200_v35 }
0x1c6a   :  { %v3788_v55 = vmul.f32 %v6636_v26, %v3740_v54  ;;  %vm3793_vm3 = vweird.f32 %v6636_v26 }
0x1c6b   :  { %6637 = vrcp.f32 %v3741_v21  ;;  %vm3794_vm9 = vmor %vm3792_vm6, %vm3793_vm3  ;;  %v3813_v58 = vand.u32 2147483648, %v3741_v21  ;;  %v3811_v60 = vand.u32 2147483647, %v3741_v21  ;;  %vm3807_vm13 = vweird.f32 %v3741_v21 }
0x1c6c   :  { %v3789_v53 = vsub.f32 1.0, %v3788_v55  ;;  %6639 = vpow2.f32 %v3878_v49  ;;  %v3880_v45 = vmul.f32 1.442695, %v3871_v12  ;;  %vm3721_vm3 = vcmp.ge.f32.partialorder %v9209_v63, 0.0 }
0x1c6d   :  { %v3814_v41 = vor.u32 1.1754944e-38, %v3813_v58  ;;  %vm3812_vm5 = vcmp.eq.f32.partialorder %v3811_v60, 8.507059e+37  ;;  %v3726_v43 = vsel %vm3721_vm3, 1.0, %v7371_v6 }
0x1c6e   :  { %v3790_v19 = vmul.f32 %v6636_v26, %v3789_v53  ;;  %6641 = vpow2.f32 %v3880_v45 }
0x1c70   :  { %v3791_v10 = vadd.f32 %v6636_v26, %v3790_v19 }
0x1c71   :  { %v6638_v57 = vpop.eup %6637 }
0x1c72   :  { %v3795_v51 = vsel %vm3794_vm9, %v6636_v26, %v3791_v10  ;;  %v3803_v15 = vmul.f32 %v6638_v57, %v3741_v21  ;;  %vm3808_vm11 = vweird.f32 %v6638_v57  ;;  %v6640_v52 = vpop.eup %6639  ;;  %v3711_v10 = vmul.f32 0.5, %v9206_v31 }
0x1c73   :  { %v3800_v18 = vsel %vm3797_vm10, %v3799_v47, %v3795_v51  ;;  %vm3809_vm14 = vmor %vm3807_vm13, %vm3808_vm11 }
0x1c74   :  { %v3820_v16 = vmul.f32 1.0614054, %v3800_v18  ;;  %v3804_v5 = vsub.f32 1.0, %v3803_v15  ;;  %v6642_v55 = vpop.eup %6641 }
0x1c76   :  { %v3825_v13 = vadd.f32 -1.4531521, %v3820_v16  ;;  %v3805_v48 = vmul.f32 %v6638_v57, %v3804_v5  ;;  %v4277_v5 = vpop.permute.xlu2 %4276 }
0x1c78   :  { %v3830_v4 = vmul.f32 %v3825_v13, %v3800_v18  ;;  %v3806_v46 = vadd.f32 %v6638_v57, %v3805_v48 }
0x1c7a   :  { %v3835_v2 = vadd.f32 1.4214138, %v3830_v4  ;;  %v3810_v25 = vsel %vm3809_vm14, %v6638_v57, %v3806_v46 }
0x1c7b   :  { %v3815_v32 = vsel %vm3812_vm5, %v3814_v41, %v3810_v25 }
0x1c7c   :  { %v3840_v42 = vmul.f32 %v3835_v2, %v3800_v18  ;;  %v3821_v8 = vmul.f32 1.0614054, %v3815_v32 }
0x1c7e   :  { %v3845_v34 = vadd.f32 -0.28449672, %v3840_v42  ;;  %v3826_v22 = vadd.f32 -1.4531521, %v3821_v8  ;;  %v4275_v48 = vpop.permute.xlu2 %4274 }
0x1c80   :  { %v3850_v36 = vmul.f32 %v3845_v34, %v3800_v18  ;;  %v3831_v20 = vmul.f32 %v3826_v22, %v3815_v32 }
0x1c82   :  { %v3855_v24 = vadd.f32 0.2548296, %v3850_v36  ;;  %v3836_v38 = vadd.f32 1.4214138, %v3831_v20 }
0x1c84   :  { %v3860_v40 = vmul.f32 %v3855_v24, %v3800_v18  ;;  %v3841_v39 = vmul.f32 %v3836_v38, %v3815_v32  ;;  %v4066_v18 = vld [vmem:[%s9652_s9] sm:$0xff] }
0x1c86   :  { %v3885_v59 = vmul.f32 %v6640_v52, %v3860_v40  ;;  %v3846_v11 = vadd.f32 -0.28449672, %v3841_v39  ;;  %v4564_v12 = vpop.permute.xlu2 %4563 }
0x1c88   :  { %v3890_v44 = vsub.f32 1.0, %v3885_v59  ;;  %v3851_v30 = vmul.f32 %v3846_v11, %v3815_v32 }
0x1c89   :  { %v3927_v9 = vpop.f32.mrf.mxu0 }
0x1c8a   :  { %v3895_v56 = vmul.f32 %v3890_v44, %v3725_v0  ;;  %v3856_v54 = vadd.f32 0.2548296, %v3851_v30 }
0x1c8c   :  { %v3900_v1 = vadd.f32 1.0, %v3895_v56  ;;  %v3861_v26 = vmul.f32 %v3856_v54, %v3815_v32 }
0x1c8e   :  { %v3905_v21 = vmul.f32 %v3900_v1, %v3710_v3  ;;  %v3886_v53 = vmul.f32 %v6642_v55, %v3861_v26  ;;  %v4566_v40 = vpop.permute.xlu2 %4565 }
0x1c90   :  { %3930 = vmatmul.f32.gmra.mxu0 %v3905_v21  ;;  %v3891_v27 = vsub.f32 1.0, %v3886_v53  ;;  %v4227_v35 = vpop.xlane.xlu1 %4226 }
0x1c91   :  { %v3929_v19 = vpop.f32.mrf.mxu0  ;;  %6643 = vrcp.f32 %v4227_v35 }
0x1c92   :  { %v3896_v29 = vmul.f32 %v3891_v27, %v3726_v43 }
0x1c94   :  { %v3901_v47 = vadd.f32 1.0, %v3896_v29 }
0x1c96   :  { %v3906_v57 = vmul.f32 %v3901_v47, %v3711_v10 }
0x1c97   :  { %v6644_v37 = vpop.eup %6643 }
0x1c98   :  { %3932 = vmatmul.f32.gmra.mxu0 %v3906_v57  ;;  %v4230_v51 = vpop.xlane.xlu0 %4229  ;;  %v4233_v63 = vmul.f32 %v6644_v37, %v9173_v62 }
0x1c99   :  { %6645 = vrcp.f32 %v4230_v51 }
0x1c9f   :  { %v6646_v31 = vpop.eup %6645 }
0x1ca0   :  { %v4234_v13 = vmul.f32 %v6646_v31, %v9177_v17 }
0x1ca8   :  { %v4236_v15 = vpop.permute.xlu1 %4235 }
0x1ca9   :  { %4264 = vmatpush.msra.mxu3 %v4236_v15 }
0x1caa   :  { %6090 = vmatmul.msk.f32.vlgmr.msra.gmra.mxu3 %vm4211_vm7, %v4233_v63 }
0x1cab   :  { %v4279_v16 = vpop.permute.xlu0 %4278  ;;  %4423 = vmatpush.msrb.mxu3 %v4066_v18 }
0x1cac   :  { %6092 = vmatpush.xpose.msk.msra.mxu0 %vm907_vm4, %v4279_v16 }
0x1cb0   :  { %6093 = vmatpush.xpose.msk.msra.mxu0 %vm907_vm4, %v4277_v5  ;;  %v4273_v58 = vpop.permute.xlu1 %4272 }
0x1cb2   :  { %6091 = vmatmul.msk.f32.gmra.mxu3 %vm4211_vm7, %v4234_v13 }
0x1cb3   :  { %v4570_v14 = vpop.permute.xlu0 %4569  ;;  %6094 = vmatmul.msk.f32.vlgmr.msra.gmra.mxu0 %vm907_vm4, %v4273_v58 }
0x1cb4   :  { %6112 = vmatpush.xpose.msk.msra.mxu3 %vm907_vm4, %v4570_v14 }
0x1cb8   :  { %v4438_v62 = vpop.permute.xlu1 %4437 }
0x1cb9   :  { %6103 = vmatpush.xpose.msk.msrb.mxu0 %vm907_vm4, %v4438_v62 }
0x1cbb   :  { %v4568_v60 = vpop.permute.xlu0 %4567  ;;  %6095 = vmatmul.msk.f32.gmra.mxu0 %vm907_vm4, %v4275_v48 }
0x1cbc   :  { %6113 = vmatpush.xpose.msk.msra.mxu3 %vm907_vm4, %v4568_v60 }
0x1cc0   :  { %v4436_v4 = vpop.permute.xlu1 %4435 }
0x1cc1   :  { %6104 = vmatpush.xpose.msk.msrb.mxu0 %vm907_vm4, %v4436_v4 }
0x1cc3   :  { %v4432_v17 = vpop.permute.xlu0 %4431 }
0x1cc4   :  { %6105 = vmatmul.msk.f32.vlgmr.msrb.gmra.mxu0 %vm907_vm4, %v4432_v17 }
0x1cc8   :  { %v4434_v46 = vpop.permute.xlu1 %4433 }
0x1ccc   :  { %6106 = vmatmul.msk.f32.gmra.mxu0 %vm907_vm4, %v4434_v46 }
0x1d0d   :  { %v3931_v2 = vpop.f32.mrf.mxu0 }
0x1d15   :  { %v3933_v41 = vpop.f32.mrf.mxu0 }
0x1d2d   :  { %v4266_v49 = vpop.f32.mrf.mxu3 }
0x1d2e   :  { %6101 = vmatmul.msk.f32.vlgmr.msrb.gmra.mxu3 %vm907_vm4, %v4266_v49 }
0x1d30   :  { %v4305_v25 = vpop.f32.mrf.mxu0 }
0x1d31   :  { %v4311_v28 = vmul.f32 0.35355338, %v4305_v25 }
0x1d33   :  { %v4313_v42 = vadd.f32 %v4311_v28, %v9126_v61 }
0x1d35   :  { %v4269_v32 = vpop.f32.mrf.mxu3  ;;  %v4315_v8 = vsel %vm4211_vm7, %v4313_v42, -inf }
0x1d36   :  { %6102 = vmatmul.msk.f32.gmra.mxu3 %vm907_vm4, %v4269_v32  ;;  %4316 = vmax.xlane.f32.xlu0 %v4315_v8 }
0x1d38   :  { %v4308_v34 = vpop.f32.mrf.mxu0 }
0x1d39   :  { %v4312_v22 = vmul.f32 0.35355338, %v4308_v34 }
0x1d3b   :  { %v4314_v36 = vadd.f32 %v4312_v22, %v9134_v33 }
0x1d3d   :  { %v4318_v20 = vsel %vm4215_vm8, %v4314_v36, -inf }
0x1d3e   :  { %6114 = vmatmul.msk.f32.vlgmr.msra.gmra.mxu3 %vm907_vm4, %v4564_v12  ;;  %4319 = vmax.xlane.f32.xlu2 %v4318_v20 }
0x1d41   :  { %v4464_v24 = vpop.f32.mrf.mxu0 }
0x1d42   :  { %v4470_v38 = vmul.f32 0.35355338, %v4464_v24 }
0x1d44   :  { %v4472_v45 = vadd.f32 %v4470_v38, %v9126_v61 }
0x1d46   :  { %6115 = vmatmul.msk.f32.gmra.mxu3 %vm907_vm4, %v4566_v40  ;;  %v4474_v52 = vsel %vm4211_vm7, %v4472_v45, -inf }
0x1d47   :  { %4475 = vmax.xlane.f32.xlu1 %v4474_v52 }
0x1d49   :  { %v4467_v39 = vpop.f32.mrf.mxu0 }
0x1d4a   :  { %v4471_v59 = vmul.f32 0.35355338, %v4467_v39  ;;  %v4067_v39 = vld [vmem:[%s9652_s9 + $0x8] sm:$0xff] }
0x1d4b   :  { %4394 = vmatpush.msra.mxu1 %v4067_v39 }
0x1d4c   :  { %v4473_v11 = vadd.f32 %v4471_v59, %v9134_v33 }
0x1d4e   :  { %v4477_v44 = vsel %vm4215_vm8, %v4473_v11, -inf }
0x1d4f   :  { %4478 = vmax.xlane.f32.xlu0 %v4477_v44 }
0x1d63   :  { %4339 = vrot.lane.b32.xlu0 %v9075_v50, %s7368_s25 }
0x1da9   :  { %v4317_v0 = vpop.xlane.xlu0 %4316 }
0x1daa   :  { %v4321_v9 = vsub.f32 %v4313_v42, %v4317_v0 }
0x1dac   :  { %v4323_v30 = vmul.f32 1.442695, %v4321_v9 }
0x1dae   :  { %6647 = vpow2.f32 %v4323_v30  ;;  %v4068_v30 = vld [vmem:[%s9652_s9 + $0x10] sm:$0xff] }
0x1daf   :  { %4553 = vmatpush.msrb.mxu1 %v4068_v30 }
0x1db1   :  { %v9247_v56 = vpop.f32.mrf.mxu3  ;;  %v4320_v54 = vpop.xlane.xlu2 %4319 }
0x1db2   :  { %v4322_v3 = vsub.f32 %v4314_v36, %v4320_v54 }
0x1db4   :  { %v6648_v1 = vpop.eup %6647  ;;  %v4325_v26 = vmul.f32 1.442695, %v4322_v3 }
0x1db5   :  { %v4327_v55 = vsel %vm4211_vm7, %v6648_v1, 0.0 }
0x1db6   :  { %6649 = vpow2.f32 %v4325_v26  ;;  %4328 = vadd.xlane.f32.xlu2 %v4327_v55  ;;  %v4069_v55 = vld [vmem:[%s9652_s9 + $0x18] sm:$0xff] }
0x1db9   :  { %v9250_v21 = vpop.f32.mrf.mxu3 }
0x1dba   :  { %v4476_v53 = vpop.xlane.xlu1 %4475 }
0x1dbb   :  { %v4480_v27 = vsub.f32 %v4472_v45, %v4476_v53 }
0x1dbc   :  { %v6650_v43 = vpop.eup %6649 }
0x1dbd   :  { %v4482_v19 = vmul.f32 1.442695, %v4480_v27  ;;  %v4330_v29 = vsel %vm4215_vm8, %v6650_v43, 0.0 }
0x1dbe   :  { %4331 = vadd.xlane.f32.xlu1 %v4330_v29 }
0x1dbf   :  { %6651 = vpow2.f32 %v4482_v19 }
0x1dc1   :  { %v4596_v10 = vpop.f32.mrf.mxu3 }
0x1dc2   :  { %v4602_v47 = vmul.f32 0.35355338, %v4596_v10  ;;  %v4479_v63 = vpop.xlane.xlu0 %4478 }
0x1dc3   :  { %v4481_v18 = vsub.f32 %v4473_v11, %v4479_v63  ;;  %v6743_v63 = vld [vmem:[#allocation3] sm:$0xff] }
0x1dc4   :  { %v4604_v57 = vadd.f32 %v4602_v47, %v9126_v61 }
0x1dc5   :  { %v6652_v35 = vpop.eup %6651  ;;  %v4484_v16 = vmul.f32 1.442695, %v4481_v18 }
0x1dc6   :  { %v4606_v51 = vsel %vm4211_vm7, %v4604_v57, -inf  ;;  %v4486_v37 = vsel %vm4211_vm7, %v6652_v35, 0.0 }
0x1dc7   :  { %4607 = vmax.xlane.f32.xlu2 %v4606_v51  ;;  %4487 = vadd.xlane.f32.xlu1 %v4486_v37  ;;  %6653 = vpow2.f32 %v4484_v16  ;;  %v6372_v37 = vld [vmem:[#allocation13] ss:$0 sm:$0xff] }
0x1dc9   :  { %v4599_v61 = vpop.f32.mrf.mxu3 }
0x1dca   :  { %v4603_v31 = vmul.f32 0.35355338, %v4599_v61 }
0x1dcc   :  { %v4605_v58 = vadd.f32 %v4603_v31, %v9134_v33 }
0x1dcd   :  { %v6654_v5 = vpop.eup %6653 }
0x1dce   :  { %v4489_v13 = vsel %vm4215_vm8, %v6654_v5, 0.0  ;;  %v4609_v14 = vsel %vm4215_vm8, %v4605_v58, -inf }
0x1dd5   :  { %v4340_v15 = vpop.permute.xlu0 %4339 }
0x1dd6   :  { %6096 = vmatpush.msk.msrb.mxu2 %vm4246_vm12, %v4340_v15 }
0x1ddf   :  { %4337 = vrot.lane.b32.xlu2 %v9071_v23, %s7368_s25 }
0x1de0   :  { %4498 = vrot.lane.b32.xlu1 %v9075_v50, %s7370_s16 }
0x1e08   :  { %4490 = vadd.xlane.f32.xlu2 %v4489_v13 }
0x1e0a   :  { %4610 = vmax.xlane.f32.xlu1 %v4609_v14  ;;  %v6744_v14 = vld [vmem:[#allocation3 + $0x8] sm:$0x3] }
0x1e23   :  { %4496 = vrot.lane.b32.xlu1 %v9071_v23, %s7370_s16 }
0x1e29   :  { %v4329_v62 = vpop.xlane.xlu2 %4328 }
0x1e2a   :  { %6655 = vrcp.f32 %v4329_v62 }
0x1e2b   :  { %4630 = vrot.lane.b32.xlu1 %v9075_v50, %s7369_s15 }
0x1e30   :  { %v6656_v17 = vpop.eup %6655 }
0x1e31   :  { %v4332_v4 = vpop.xlane.xlu1 %4331  ;;  %v4335_v46 = vmul.f32 %v6656_v17, %v6648_v1 }
0x1e33   :  { %4628 = vrot.lane.b32.xlu1 %v9071_v23, %s7369_s15 }
0x1e3a   :  { %v4608_v48 = vpop.xlane.xlu2 %4607  ;;  %v4488_v25 = vpop.xlane.xlu1 %4487 }
0x1e3b   :  { %v4612_v60 = vsub.f32 %v4604_v57, %v4608_v48 }
0x1e3d   :  { %v4614_v33 = vmul.f32 1.442695, %v4612_v60 }
0x1e3f   :  { %6657 = vpow2.f32 %v4614_v33 }
0x1e40   :  { %6659 = vrcp.f32 %v4332_v4 }
0x1e42   :  { %v4338_v2 = vpop.permute.xlu2 %4337 }
0x1e43   :  { %4365 = vmatpush.msrb.mxu2 %v4338_v2 }
0x1e44   :  { %6097 = vmatmul.msk.f32.vlgmr.msrb.gmra.mxu2 %vm4211_vm7, %v4335_v46 }
0x1e45   :  { %v6658_v41 = vpop.eup %6657 }
0x1e46   :  { %v4618_v50 = vsel %vm4211_vm7, %v6658_v41, 0.0  ;;  %v6660_v49 = vpop.eup %6659 }
0x1e47   :  { %4619 = vadd.xlane.f32.xlu0 %v4618_v50  ;;  %v4336_v23 = vmul.f32 %v6660_v49, %v6650_v43 }
0x1e4c   :  { %6098 = vmatmul.msk.f32.gmra.mxu2 %vm4211_vm7, %v4336_v23  ;;  %v4075_v23 = vld [vmem:[%s9653_s8 + $0x10] sm:$0xff] }
0x1e52   :  { %v4499_v28 = vpop.permute.xlu1 %4498 }
0x1e53   :  { %6107 = vmatpush.msk.msra.mxu2 %vm4246_vm12, %v4499_v28  ;;  %v4074_v28 = vld [vmem:[%s9653_s8 + $0x8] sm:$0xff] }
0x1e7b   :  { %v4491_v12 = vpop.xlane.xlu2 %4490 }
0x1e7d   :  { %v4611_v42 = vpop.xlane.xlu1 %4610 }
0x1e7e   :  { %v4613_v32 = vsub.f32 %v4605_v58, %v4611_v42  ;;  %v4073_v42 = vld [vmem:[%s9653_s8] sm:$0xff] }
0x1e80   :  { %v4616_v8 = vmul.f32 1.442695, %v4613_v32 }
0x1e82   :  { %6661 = vpow2.f32 %v4616_v8 }
0x1e83   :  { %6663 = vrcp.f32 %v4488_v25  ;;  %v4076_v25 = vld [vmem:[%s9653_s8 + $0x18] sm:$0xff] }
0x1e84   :  { %6665 = vrcp.f32 %v4491_v12 }
0x1e88   :  { %v6662_v34 = vpop.eup %6661 }
0x1e89   :  { %v4621_v22 = vsel %vm4215_vm8, %v6662_v34, 0.0  ;;  %v6664_v36 = vpop.eup %6663 }
0x1e8a   :  { %4622 = vadd.xlane.f32.xlu0 %v4621_v22  ;;  %v4494_v20 = vmul.f32 %v6664_v36, %v6652_v35  ;;  %v6666_v38 = vpop.eup %6665 }
0x1e8b   :  { %v4495_v40 = vmul.f32 %v6666_v38, %v6654_v5 }
0x1e95   :  { %v4497_v24 = vpop.permute.xlu1 %4496 }
0x1e96   :  { %4524 = vmatpush.msra.mxu2 %v4497_v24 }
0x1e97   :  { %6108 = vmatmul.msk.f32.vlgmr.msra.gmra.mxu2 %vm4211_vm7, %v4494_v20 }
0x1e98   :  { %4685 = vmatpush.msrb.mxu2 %v4069_v55 }
0x1e9d   :  { %v4631_v45 = vpop.permute.xlu1 %4630 }
0x1e9e   :  { %6116 = vmatpush.msk.msra.mxu0 %vm4246_vm12, %v4631_v45  ;;  %v6373_v45 = vld [vmem:[#allocation15] ss:$0 sm:$0xff] }
0x1e9f   :  { %6109 = vmatmul.msk.f32.gmra.mxu2 %vm4211_vm7, %v4495_v40 }
0x1ea5   :  { %v4629_v52 = vpop.permute.xlu1 %4628 }
0x1ea6   :  { %4656 = vmatpush.msra.mxu0 %v4629_v52  ;;  %v6374_v52 = vld [vmem:[#allocation16] ss:$0 sm:$0xff] }
0x1eba   :  { %v4620_v59 = vpop.xlane.xlu0 %4619 }
0x1ebb   :  { %6667 = vrcp.f32 %v4620_v59 }
0x1ec1   :  { %v6668_v11 = vpop.eup %6667 }
0x1ec2   :  { %v4626_v44 = vmul.f32 %v6668_v11, %v6658_v41 }
0x1ec4   :  { %6117 = vmatmul.msk.f32.vlgmr.msra.gmra.mxu0 %vm4211_vm7, %v4626_v44 }
0x1ec7   :  { %v4367_v0 = vpop.f32.mrf.mxu2 }
0x1ec8   :  { %6099 = vmatmul.msk.f32.vlgmr.msra.gmra.mxu1 %vm907_vm4, %v4367_v0 }
0x1ec9   :  { %4777 = vmatpush.msra.mxu1 %v4076_v25 }
0x1ecb   :  { %4778 = vmatpush.msra.mxu1 %v4075_v23 }
0x1ecd   :  { %4779 = vmatpush.msra.mxu1 %v4074_v28 }
0x1ecf   :  { %v4370_v9 = vpop.f32.mrf.mxu2  ;;  %4780 = vmatpush.msra.mxu1 %v4073_v42 }
0x1ed0   :  { %6100 = vmatmul.msk.f32.gmra.mxu1 %vm907_vm4, %v4370_v9 }
0x1efd   :  { %v4623_v54 = vpop.xlane.xlu0 %4622 }
0x1efe   :  { %6669 = vrcp.f32 %v4623_v54 }
0x1f04   :  { %v6670_v3 = vpop.eup %6669 }
0x1f05   :  { %v4627_v1 = vmul.f32 %v6670_v3, %v6662_v34 }
0x1f07   :  { %6118 = vmatmul.msk.f32.gmra.mxu0 %vm4211_vm7, %v4627_v1 }
0x1f1a   :  { %v4526_v26 = vpop.f32.mrf.mxu2 }
0x1f1b   :  { %6110 = vmatmul.msk.f32.vlgmr.msrb.gmra.mxu1 %vm907_vm4, %v4526_v26 }
0x1f22   :  { %v4529_v53 = vpop.f32.mrf.mxu2 }
0x1f23   :  { %6111 = vmatmul.msk.f32.gmra.mxu1 %vm907_vm4, %v4529_v53 }
0x1f41   :  { %v4658_v27 = vpop.f32.mrf.mxu0 }
0x1f42   :  { %6119 = vmatmul.msk.f32.vlgmr.msrb.gmra.mxu2 %vm907_vm4, %v4658_v27 }
0x1f45   :  { %v4396_v19 = vpop.f32.mrf.mxu1 }
0x1f46   :  { %v4426_v47 = vadd.f32 %v9247_v56, %v4396_v19 }
0x1f4d   :  { %v4399_v29 = vpop.f32.mrf.mxu1 }
0x1f4e   :  { %v4429_v31 = vadd.f32 %v9250_v21, %v4399_v29  ;;  %v6375_v29 = vld [vmem:[#allocation18] ss:$0 sm:$0xff] }
0x1f84   :  { %v4661_v43 = vpop.f32.mrf.mxu0 }
0x1f85   :  { %6120 = vmatmul.msk.f32.gmra.mxu2 %vm907_vm4, %v4661_v43 }
0x1f98   :  { %v4555_v10 = vpop.f32.mrf.mxu1 }
0x1f99   :  { %v4561_v57 = vadd.f32 %v4555_v10, %v4426_v47 }
0x1fa0   :  { %v4558_v61 = vpop.f32.mrf.mxu1 }
0x1fa1   :  { %v4562_v5 = vadd.f32 %v4558_v61, %v4429_v31  ;;  %v4082_v61 = vld [vmem:[%s9654_s26 + $0x20] sm:$0xff] }
0x1fc5   :  { %v4687_v35 = vpop.f32.mrf.mxu2 }
0x1fc6   :  { %v4693_v51 = vadd.f32 %v4687_v35, %v4561_v57 }
0x1fc8   :  { %v4695_v15 = vadd.f32 %v6743_v63, %v4693_v51  ;;  %v4085_v63 = vld [vmem:[%s9654_s26 + $0x38] sm:$0xff] }
0x1fc9   :  { %4882 = vmatpush.msrb.mxu3 %v4085_v63 }
0x1fca   :  { %v9290_v18 = vadd.f32 %v6372_v37, %v4695_v15  ;;  %v4084_v15 = vld [vmem:[%s9654_s26 + $0x30] sm:$0xff] }
0x1fcb   :  { %4883 = vmatpush.msrb.mxu3 %v4084_v15 }
0x1fcc   :  { %v4702_v16 = vsel %vm657_vm1, %v9290_v18, 0.0 }
0x1fcd   :  { %4703 = vadd.xlane.f32.xlu0 %v4702_v16  ;;  %v4083_v16 = vld [vmem:[%s9654_s26 + $0x28] sm:$0xff] }
0x1fce   :  { %4884 = vmatpush.msrb.mxu3 %v4083_v16 }
0x1fd0   :  { %4885 = vmatpush.msrb.mxu3 %v4082_v61 }
0x2008   :  { %v4690_v58 = vpop.f32.mrf.mxu2 }
0x2009   :  { %v4694_v13 = vadd.f32 %v4690_v58, %v4562_v5  ;;  %v4081_v58 = vld [vmem:[%s9654_s26 + $0x18] sm:$0xff] }
0x200a   :  { %4886 = vmatpush.msrb.mxu3 %v4081_v58 }
0x200b   :  { %v4696_v56 = vadd.f32 %v6744_v14, %v4694_v13  ;;  %v4080_v14 = vld [vmem:[%s9654_s26 + $0x10] sm:$0xff] }
0x200c   :  { %4887 = vmatpush.msrb.mxu3 %v4080_v14 }
0x200d   :  { %v9295_v62 = vadd.f32 %v6372_v37, %v4696_v56 }
0x200f   :  { %v4705_v48 = vsel %vm4056_vm15, %v9295_v62, 0.0 }
0x2010   :  { %4706 = vadd.xlane.f32.xlu1 %v4705_v48 }
0x2040   :  { %v4704_v60 = vpop.xlane.xlu0 %4703 }
0x2041   :  { %v4708_v33 = vmul.f32 %v4704_v60, %v7824_v7 }
0x2043   :  { %v4710_v21 = vsub.f32 %v9290_v18, %v4708_v33  ;;  %v4079_v33 = vld [vmem:[%s9654_s26 + $0x8] sm:$0xff] }
0x2044   :  { %4888 = vmatpush.msrb.mxu3 %v4079_v33 }
0x2045   :  { %v4712_v4 = vmul.f32 %v4710_v21, %v4710_v21 }
0x2047   :  { %v4714_v17 = vsel %vm657_vm1, %v4712_v4, 0.0 }
0x2048   :  { %4715 = vadd.xlane.f32.xlu2 %v4714_v17 }
0x2083   :  { %v4707_v46 = vpop.xlane.xlu1 %4706 }
0x2084   :  { %v4709_v2 = vmul.f32 %v4707_v46, %v7824_v7 }
0x2086   :  { %v4711_v41 = vsub.f32 %v9295_v62, %v4709_v2 }
0x2088   :  { %v4713_v50 = vmul.f32 %v4711_v41, %v4711_v41 }
0x208a   :  { %v4717_v49 = vsel %vm4056_vm15, %v4713_v50, 0.0 }
0x208b   :  { %4718 = vadd.xlane.f32.xlu0 %v4717_v49 }
0x20bb   :  { %v4716_v32 = vpop.xlane.xlu2 %4715 }
0x20bc   :  { %v4720_v8 = vmul.f32 %v4716_v32, %v7824_v7 }
0x20be   :  { %v4722_v34 = vadd.f32 1e-05, %v4720_v8 }
0x20c0   :  { %6671 = vrsqrt.f32 %v4722_v34  ;;  %vm4730_vm9 = vweird.f32 %v4722_v34 }
0x20c6   :  { %v6672_v22 = vpop.eup %6671 }
0x20c7   :  { %v4725_v12 = vmul.f32 %v6672_v22, %v4722_v34  ;;  %vm4731_vm6 = vweird.f32 %v6672_v22 }
0x20c8   :  { %vm4732_vm10 = vmor %vm4730_vm9, %vm4731_vm6 }
0x20c9   :  { %v4726_v36 = vmul.f32 %v6672_v22, %v4725_v12 }
0x20cb   :  { %v4727_v20 = vmul.f32 0.5, %v4726_v36 }
0x20cd   :  { %v4728_v24 = vsub.f32 1.5, %v4727_v20 }
0x20cf   :  { %v4729_v38 = vmul.f32 %v6672_v22, %v4728_v24 }
0x20d1   :  { %v4733_v40 = vsel %vm4732_vm10, %v6672_v22, %v4729_v38 }
0x20d2   :  { %v4744_v39 = vmul.f32 %v4733_v40, %v4710_v21  ;;  %v4078_v21 = vld [vmem:[%s9654_s26] sm:$0xff] }
0x20d3   :  { %4889 = vmatpush.msrb.mxu3 %v4078_v21 }
0x20d4   :  { %v4749_v59 = vmul.f32 %v6373_v45, %v4744_v39 }
0x20d6   :  { %v4754_v11 = vadd.f32 %v6374_v52, %v4749_v59 }
0x20d8   :  { %6121 = vmatmul.msk.f32.vlgmr.msra.gmra.mxu1 %vm657_vm1, %v4754_v11 }
0x20fe   :  { %v4719_v44 = vpop.xlane.xlu0 %4718 }
0x20ff   :  { %v4721_v0 = vmul.f32 %v4719_v44, %v7824_v7 }
0x2101   :  { %v4723_v9 = vadd.f32 1e-05, %v4721_v0 }
0x2103   :  { %6673 = vrsqrt.f32 %v4723_v9  ;;  %vm4740_vm13 = vweird.f32 %v4723_v9 }
0x2109   :  { %v6674_v30 = vpop.eup %6673 }
0x210a   :  { %v4735_v54 = vmul.f32 %v6674_v30, %v4723_v9  ;;  %vm4741_vm11 = vweird.f32 %v6674_v30 }
0x210b   :  { %vm4742_vm14 = vmor %vm4740_vm13, %vm4741_vm11 }
0x210c   :  { %v4736_v3 = vmul.f32 %v6674_v30, %v4735_v54 }
0x210e   :  { %v4737_v1 = vmul.f32 0.5, %v4736_v3 }
0x2110   :  { %v4738_v26 = vsub.f32 1.5, %v4737_v1 }
0x2112   :  { %v4739_v55 = vmul.f32 %v6674_v30, %v4738_v26 }
0x2114   :  { %v4743_v53 = vsel %vm4742_vm14, %v6674_v30, %v4739_v55 }
0x2115   :  { %v4745_v27 = vmul.f32 %v4743_v53, %v4711_v41 }
0x2117   :  { %v4750_v43 = vmul.f32 %v6373_v45, %v4745_v27 }
0x2119   :  { %v4755_v19 = vadd.f32 %v6374_v52, %v4750_v43 }
0x211b   :  { %6122 = vmatmul.msk.f32.gmra.mxu1 %vm657_vm1, %v4755_v19 }
0x2155   :  { %v4782_v10 = vpop.f32.mrf.mxu1 }
0x2156   :  { %v4783_v47 = vadd.f32 %v6375_v29, %v4782_v10 }
0x2158   :  { %v4790_v57 = vmul.f32 0.70710677, %v4783_v47  ;;  %v4788_v40 = vmul.f32 0.5, %v4783_v47 }
0x215a   :  { %v4796_v35 = vand.u32 2147483647, %v4790_v57  ;;  %vm4792_vm9 = vcmp.ge.f32.partialorder %v4790_v57, 0.0 }
0x215b   :  { %v4794_v38 = vsel %vm4792_vm9, 1.0, %v7371_v6 }
0x215c   :  { %v4798_v51 = vmul.f32 0.3275911, %v4796_v35  ;;  %v4850_v41 = vsub.f32 0.0, %v4796_v35 }
0x215e   :  { %v4800_v37 = vadd.f32 1.0, %v4798_v51  ;;  %v4852_v25 = vmul.f32 %v4850_v41, %v4796_v35 }
0x2160   :  { %6675 = vrcp.f32 %v4800_v37  ;;  %v4813_v56 = vand.u32 2147483648, %v4800_v37  ;;  %v4811_v60 = vand.u32 2147483647, %v4800_v37  ;;  %vm4807_vm2 = vweird.f32 %v4800_v37 }
0x2161   :  { %v4854_v42 = vmul.f32 1.442695, %v4852_v25 }
0x2162   :  { %v4814_v17 = vor.u32 1.1754944e-38, %v4813_v56  ;;  %vm4812_vm6 = vcmp.eq.f32.partialorder %v4811_v60, 8.507059e+37 }
0x2163   :  { %6677 = vpow2.f32 %v4854_v42 }
0x2166   :  { %v6676_v31 = vpop.eup %6675 }
0x2167   :  { %v4803_v5 = vmul.f32 %v6676_v31, %v4800_v37  ;;  %vm4808_vm5 = vweird.f32 %v6676_v31 }
0x2168   :  { %vm4809_vm3 = vmor %vm4807_vm2, %vm4808_vm5 }
0x2169   :  { %v4804_v13 = vsub.f32 1.0, %v4803_v5  ;;  %v6678_v36 = vpop.eup %6677 }
0x216b   :  { %v4805_v48 = vmul.f32 %v6676_v31, %v4804_v13 }
0x216d   :  { %v4806_v4 = vadd.f32 %v6676_v31, %v4805_v48 }
0x216f   :  { %v4810_v46 = vsel %vm4809_vm3, %v6676_v31, %v4806_v4  ;;  %v6376_v4 = vld [vmem:[#allocation19] ss:$0 sm:$0xff] }
0x2170   :  { %v4815_v2 = vsel %vm4812_vm6, %v4814_v17, %v4810_v46 }
0x2171   :  { %v4832_v50 = vmul.f32 1.0614054, %v4815_v2 }
0x2173   :  { %v4834_v49 = vadd.f32 -1.4531521, %v4832_v50 }
0x2175   :  { %v4836_v23 = vmul.f32 %v4834_v49, %v4815_v2 }
0x2177   :  { %v4838_v28 = vadd.f32 1.4214138, %v4836_v23 }
0x2179   :  { %v4840_v32 = vmul.f32 %v4838_v28, %v4815_v2 }
0x217b   :  { %v4842_v8 = vadd.f32 -0.28449672, %v4840_v32 }
0x217d   :  { %v4844_v34 = vmul.f32 %v4842_v8, %v4815_v2 }
0x217f   :  { %v4846_v22 = vadd.f32 0.2548296, %v4844_v34 }
0x2181   :  { %v4848_v12 = vmul.f32 %v4846_v22, %v4815_v2 }
0x2183   :  { %v4858_v20 = vmul.f32 %v6678_v36, %v4848_v12 }
0x2185   :  { %v4860_v24 = vsub.f32 1.0, %v4858_v20  ;;  %v4909_v20 = vld [vmem:[%s9655_s28 + $0x18] sm:$0xff] }
0x2186   :  { %5003 = vmatpush.msrb.mxu0 %v4909_v20 }
0x2187   :  { %v4862_v45 = vmul.f32 %v4860_v24, %v4794_v38  ;;  %v4908_v24 = vld [vmem:[%s9655_s28 + $0x10] sm:$0xff]  ;;  %v4907_v38 = vld [vmem:[%s9655_s28 + $0x8] sm:$0xff] }
0x2188   :  { %5004 = vmatpush.msrb.mxu0 %v4908_v24 }
0x2189   :  { %v4864_v52 = vadd.f32 1.0, %v4862_v45  ;;  %v4906_v45 = vld [vmem:[%s9655_s28] sm:$0xff] }
0x218a   :  { %5005 = vmatpush.msrb.mxu0 %v4907_v38 }
0x218b   :  { %v4866_v39 = vmul.f32 %v4864_v52, %v4788_v40 }
0x218c   :  { %5006 = vmatpush.msrb.mxu0 %v4906_v45 }
0x218d   :  { %6123 = vmatmul.msk.f32.vlgmr.msrb.gmra.mxu3 %vm583_vm0, %v4866_v39 }
0x2198   :  { %v4785_v59 = vpop.f32.mrf.mxu1 }
0x2199   :  { %v4786_v11 = vadd.f32 %v6375_v29, %v4785_v59 }
0x219b   :  { %v4791_v44 = vmul.f32 0.70710677, %v4786_v11  ;;  %v4789_v60 = vmul.f32 0.5, %v4786_v11 }
0x219d   :  { %v4797_v0 = vand.u32 2147483647, %v4791_v44  ;;  %vm4793_vm5 = vcmp.ge.f32.partialorder %v4791_v44, 0.0 }
0x219e   :  { %v4795_v56 = vsel %vm4793_vm5, 1.0, %v7371_v6 }
0x219f   :  { %v4799_v9 = vmul.f32 0.3275911, %v4797_v0  ;;  %v4851_v29 = vsub.f32 0.0, %v4797_v0 }
0x21a1   :  { %v4801_v30 = vadd.f32 1.0, %v4799_v9  ;;  %v4853_v35 = vmul.f32 %v4851_v29, %v4797_v0 }
0x21a3   :  { %6679 = vrcp.f32 %v4801_v30  ;;  %v4828_v26 = vand.u32 2147483648, %v4801_v30  ;;  %v4826_v53 = vand.u32 2147483647, %v4801_v30  ;;  %vm4822_vm11 = vweird.f32 %v4801_v30 }
0x21a4   :  { %v4856_v63 = vmul.f32 1.442695, %v4853_v35 }
0x21a5   :  { %v4829_v43 = vor.u32 1.1754944e-38, %v4828_v26  ;;  %vm4827_vm14 = vcmp.eq.f32.partialorder %v4826_v53, 8.507059e+37 }
0x21a6   :  { %6681 = vpow2.f32 %v4856_v63 }
0x21a9   :  { %v6680_v54 = vpop.eup %6679 }
0x21aa   :  { %v4818_v3 = vmul.f32 %v6680_v54, %v4801_v30  ;;  %vm4823_vm10 = vweird.f32 %v6680_v54 }
0x21ab   :  { %vm4824_vm13 = vmor %vm4822_vm11, %vm4823_vm10 }
0x21ac   :  { %v4819_v1 = vsub.f32 1.0, %v4818_v3  ;;  %v6682_v58 = vpop.eup %6681 }
0x21ae   :  { %v4820_v55 = vmul.f32 %v6680_v54, %v4819_v1  ;;  %v6378_v1 = vld [vmem:[#allocation22] ss:$0 sm:$0xff] }
0x21b0   :  { %v4821_v27 = vadd.f32 %v6680_v54, %v4820_v55 }
0x21b2   :  { %v4825_v19 = vsel %vm4824_vm13, %v6680_v54, %v4821_v27  ;;  %v6377_v54 = vld [vmem:[#allocation21] ss:$0 sm:$0xff] }
0x21b3   :  { %v4830_v10 = vsel %vm4827_vm14, %v4829_v43, %v4825_v19 }
0x21b4   :  { %v4833_v47 = vmul.f32 1.0614054, %v4830_v10 }
0x21b6   :  { %v4835_v57 = vadd.f32 -1.4531521, %v4833_v47 }
0x21b8   :  { %v4837_v51 = vmul.f32 %v4835_v57, %v4830_v10 }
0x21ba   :  { %v4839_v37 = vadd.f32 1.4214138, %v4837_v51 }
0x21bc   :  { %v4841_v15 = vmul.f32 %v4839_v37, %v4830_v10 }
0x21be   :  { %v4843_v16 = vadd.f32 -0.28449672, %v4841_v15 }
0x21c0   :  { %v4845_v61 = vmul.f32 %v4843_v16, %v4830_v10 }
0x21c2   :  { %v4847_v31 = vadd.f32 0.2548296, %v4845_v61 }
0x21c4   :  { %v4849_v5 = vmul.f32 %v4847_v31, %v4830_v10 }
0x21c6   :  { %v4859_v13 = vmul.f32 %v6682_v58, %v4849_v5 }
0x21c8   :  { %v4861_v14 = vsub.f32 1.0, %v4859_v13 }
0x21ca   :  { %v4863_v48 = vmul.f32 %v4861_v14, %v4795_v56 }
0x21cc   :  { %v4865_v33 = vadd.f32 1.0, %v4863_v48 }
0x21ce   :  { %v4867_v21 = vmul.f32 %v4865_v33, %v4789_v60  ;;  %v9381_v60 = vld [vmem:[%s9651_s23] sm:$0xff] }
0x21d0   :  { %6124 = vmatmul.msk.f32.gmra.mxu3 %vm583_vm0, %v4867_v21 }
0x2210   :  { %v4891_v17 = vpop.f32.mrf.mxu3 }
0x2211   :  { %v4897_v46 = vadd.f32 %v4891_v17, %v9290_v18 }
0x2213   :  { %v9326_v2 = vadd.f32 %v6376_v4, %v4897_v46  ;;  %v9386_v46 = vld [vmem:[%s9651_s23 + $0x8] sm:$0x3] }
0x2215   :  { %v4931_v41 = vsel %vm657_vm1, %v9326_v2, 0.0 }
0x2216   :  { %4932 = vadd.xlane.f32.xlu2 %v4931_v41 }
0x2253   :  { %v4894_v50 = vpop.f32.mrf.mxu3 }
0x2254   :  { %v4898_v49 = vadd.f32 %v4894_v50, %v9295_v62 }
0x2256   :  { %v9331_v25 = vadd.f32 %v6376_v4, %v4898_v49 }
0x2258   :  { %v4934_v23 = vsel %vm4056_vm15, %v9331_v25, 0.0 }
0x2259   :  { %4935 = vadd.xlane.f32.xlu0 %v4934_v23 }
0x2289   :  { %v4933_v28 = vpop.xlane.xlu2 %4932 }
0x228a   :  { %v4937_v18 = vmul.f32 %v4933_v28, %v7824_v7 }
0x228c   :  { %v4939_v42 = vsub.f32 %v9326_v2, %v4937_v18 }
0x228e   :  { %v4941_v32 = vmul.f32 %v4939_v42, %v4939_v42 }
0x2290   :  { %v4943_v8 = vsel %vm657_vm1, %v4941_v32, 0.0 }
0x2291   :  { %4944 = vadd.xlane.f32.xlu2 %v4943_v8 }
0x22cc   :  { %v4936_v62 = vpop.xlane.xlu0 %4935 }
0x22cd   :  { %v4938_v34 = vmul.f32 %v4936_v62, %v7824_v7 }
0x22cf   :  { %v4940_v22 = vsub.f32 %v9331_v25, %v4938_v34 }
0x22d1   :  { %v4942_v12 = vmul.f32 %v4940_v22, %v4940_v22 }
0x22d3   :  { %v4946_v36 = vsel %vm4056_vm15, %v4942_v12, 0.0 }
0x22d4   :  { %4947 = vadd.xlane.f32.xlu0 %v4946_v36 }
0x2304   :  { %v4945_v40 = vpop.xlane.xlu2 %4944 }
0x2305   :  { %v4949_v52 = vmul.f32 %v4945_v40, %v7824_v7 }
0x2307   :  { %v4951_v39 = vadd.f32 1e-05, %v4949_v52 }
0x2309   :  { %6683 = vrsqrt.f32 %v4951_v39  ;;  %vm4959_vm3 = vweird.f32 %v4951_v39 }
0x230f   :  { %v6684_v59 = vpop.eup %6683 }
0x2310   :  { %v4954_v11 = vmul.f32 %v6684_v59, %v4951_v39  ;;  %vm4960_vm2 = vweird.f32 %v6684_v59 }
0x2311   :  { %vm4961_vm6 = vmor %vm4959_vm3, %vm4960_vm2 }
0x2312   :  { %v4955_v44 = vmul.f32 %v6684_v59, %v4954_v11 }
0x2314   :  { %v4956_v0 = vmul.f32 0.5, %v4955_v44 }
0x2316   :  { %v4957_v9 = vsub.f32 1.5, %v4956_v0 }
0x2318   :  { %v4958_v30 = vmul.f32 %v6684_v59, %v4957_v9 }
0x231a   :  { %v4962_v3 = vsel %vm4961_vm6, %v6684_v59, %v4958_v30 }
0x231b   :  { %v4973_v26 = vmul.f32 %v4962_v3, %v4939_v42 }
0x231d   :  { %v4978_v55 = vmul.f32 %v6377_v54, %v4973_v26 }
0x231f   :  { %v4983_v53 = vadd.f32 %v6378_v1, %v4978_v55 }
0x2321   :  { %6125 = vmatmul.msk.f32.vlgmr.msrb.gmra.mxu0 %vm657_vm1, %v4983_v53 }
0x2347   :  { %v4948_v27 = vpop.xlane.xlu0 %4947 }
0x2348   :  { %v4950_v43 = vmul.f32 %v4948_v27, %v7824_v7 }
0x234a   :  { %v4952_v19 = vadd.f32 1e-05, %v4950_v43 }
0x234c   :  { %6685 = vrsqrt.f32 %v4952_v19  ;;  %vm4969_vm10 = vweird.f32 %v4952_v19 }
0x2352   :  { %v6686_v10 = vpop.eup %6685 }
0x2353   :  { %v4964_v29 = vmul.f32 %v6686_v10, %v4952_v19  ;;  %vm4970_vm9 = vweird.f32 %v6686_v10 }
0x2354   :  { %vm4971_vm11 = vmor %vm4969_vm10, %vm4970_vm9 }
0x2355   :  { %v4965_v47 = vmul.f32 %v6686_v10, %v4964_v29 }
0x2357   :  { %v4966_v57 = vmul.f32 0.5, %v4965_v47 }
0x2359   :  { %v4967_v35 = vsub.f32 1.5, %v4966_v57 }
0x235b   :  { %v4968_v51 = vmul.f32 %v6686_v10, %v4967_v35 }
0x235d   :  { %v4972_v37 = vsel %vm4971_vm11, %v6686_v10, %v4968_v51 }
0x235e   :  { %v4974_v63 = vmul.f32 %v4972_v37, %v4940_v22 }
0x2360   :  { %v4979_v15 = vmul.f32 %v6377_v54, %v4974_v63 }
0x2362   :  { %v4984_v16 = vadd.f32 %v6378_v1, %v4979_v15 }
0x2364   :  { %6126 = vmatmul.msk.f32.gmra.mxu0 %vm657_vm1, %v4984_v16 }
0x239e   :  { %v9349_v61 = vpop.f32.mrf.mxu0 }
0x239f   :  { %5016 = vrot.lane.b32.xlu0 %v9349_v61, %s7360_s1 }
0x23e1   :  { %v9353_v31 = vpop.f32.mrf.mxu0 }
0x23e2   :  { %5079 = vrot.lane.b32.xlu0 %v9353_v31, %s7361_s12  ;;  %5018 = vrot.lane.b32.xlu2 %v9353_v31, %s7360_s1  ;;  %s9656_s1 = sld [smem:[#allocation90_spill]] }
0x23e8   :  { %v4910_v36 = vld [vmem:[%s9656_s1] sm:$0xff] }
0x23ea   :  { %5077 = vrot.lane.b32.xlu0 %v9349_v61, %s7361_s12  ;;  %s9657_s12 = sld [smem:[#allocation93_spill]] }
0x23f2   :  { %5117 = vrot.lane.b32.xlu0 %v9349_v61, %s7362_s5 }
0x23fa   :  { %5113 = vrot.lane.b32.xlu0 %v9349_v61, %s7363_s10 }
0x2402   :  { %5115 = vrot.lane.b32.xlu0 %v9353_v31, %s7363_s10 }
0x240a   :  { %5276 = vrot.lane.b32.xlu0 %v9349_v61, %s7365_s3 }
0x2411   :  { %v5017_v58 = vpop.permute.xlu0 %5016 }
0x2412   :  { %5410 = vrot.lane.b32.xlu0 %v9353_v31, %s7364_s6 }
0x241a   :  { %5404 = vrot.lane.b32.xlu0 %v9349_v61, %s7366_s2 }
0x243c   :  { %v5019_v5 = vpop.permute.xlu2 %5018 }
0x243d   :  { %6127 = vmatpush.xpose.msk.msra.mxu2 %vm907_vm4, %v5019_v5 }
0x2441   :  { %6128 = vmatpush.xpose.msk.msra.mxu2 %vm907_vm4, %v5017_v58 }
0x2444   :  { %6129 = vmatmul.msk.f32.vlgmr.msra.gmra.mxu2 %vm907_vm4, %v9349_v61 }
0x244c   :  { %6130 = vmatmul.msk.f32.gmra.mxu2 %vm907_vm4, %v9353_v31 }
0x2454   :  { %v5080_v13 = vpop.permute.xlu0 %5079 }
0x2455   :  { %6131 = vmatpush.msk.msrb.mxu1 %vm4246_vm12, %v5080_v13 }
0x245c   :  { %v5078_v14 = vpop.permute.xlu0 %5077 }
0x245d   :  { %5105 = vmatpush.msrb.mxu1 %v5078_v14 }
0x245f   :  { %5264 = vmatpush.msra.mxu1 %v4910_v36 }
0x2464   :  { %v5118_v12 = vpop.permute.xlu0 %5117 }
0x246c   :  { %v5114_v20 = vpop.permute.xlu0 %5113 }
0x2474   :  { %v5116_v24 = vpop.permute.xlu0 %5115 }
0x247c   :  { %v5277_v38 = vpop.permute.xlu0 %5276 }
0x2484   :  { %v5411_v59 = vpop.permute.xlu0 %5410 }
0x248c   :  { %v5405_v55 = vpop.permute.xlu0 %5404 }
0x24c7   :  { %v5045_v56 = vpop.f32.mrf.mxu2 }
0x24c8   :  { %v5051_v48 = vmul.f32 0.35355338, %v5045_v56 }
0x24ca   :  { %v5053_v33 = vadd.f32 %v9381_v60, %v5051_v48 }
0x24cc   :  { %v5055_v21 = vsel %vm4211_vm7, %v5053_v33, -inf }
0x24cd   :  { %5056 = vmax.xlane.f32.xlu1 %v5055_v21 }
0x24cf   :  { %v5048_v4 = vpop.f32.mrf.mxu2 }
0x24d0   :  { %v5052_v17 = vmul.f32 0.35355338, %v5048_v4 }
0x24d2   :  { %v5054_v41 = vadd.f32 %v9386_v46, %v5052_v17 }
0x24d4   :  { %v5058_v50 = vsel %vm4215_vm8, %v5054_v41, -inf }
0x24d5   :  { %5059 = vmax.xlane.f32.xlu2 %v5058_v50 }
0x24ed   :  { %5278 = vrot.lane.b32.xlu2 %v9353_v31, %s7365_s3 }
0x2540   :  { %v5057_v49 = vpop.xlane.xlu1 %5056 }
0x2541   :  { %v5061_v23 = vsub.f32 %v5053_v33, %v5057_v49 }
0x2543   :  { %v5063_v28 = vmul.f32 1.442695, %v5061_v23 }
0x2545   :  { %6687 = vpow2.f32 %v5063_v28 }
0x2548   :  { %v5060_v18 = vpop.xlane.xlu2 %5059 }
0x2549   :  { %v5062_v42 = vsub.f32 %v5054_v41, %v5060_v18 }
0x254b   :  { %v6688_v32 = vpop.eup %6687  ;;  %v5065_v8 = vmul.f32 1.442695, %v5062_v42 }
0x254c   :  { %v5067_v62 = vsel %vm4211_vm7, %v6688_v32, 0.0 }
0x254d   :  { %6689 = vpow2.f32 %v5065_v8  ;;  %5068 = vadd.xlane.f32.xlu1 %v5067_v62 }
0x2550   :  { %v5279_v9 = vpop.permute.xlu2 %5278 }
0x2553   :  { %v6690_v34 = vpop.eup %6689 }
0x2554   :  { %v5070_v22 = vsel %vm4215_vm8, %v6690_v34, 0.0 }
0x2555   :  { %5071 = vadd.xlane.f32.xlu1 %v5070_v22 }
0x256e   :  { %5119 = vrot.lane.b32.xlu1 %v9353_v31, %s7362_s5  ;;  %s9658_s5 = sld [smem:[#allocation94_spill]] }
0x2576   :  { %5272 = vrot.lane.b32.xlu1 %v9349_v61, %s7367_s11 }
0x257e   :  { %5408 = vrot.lane.b32.xlu1 %v9349_v61, %s7364_s6  ;;  %s5814_s6 = sshll.u32 %s7701_s30, 4  ;;  %s5815_s6 = int_to_ptr.hbm [resolvable:$true] %s5814_s6 }
0x257f   :  { %s7239_s3 = sshra.s32 %s5815_s6, 4  ;;  %s7240_s3 = int_to_ptr.hbm [resolvable:$true] %s7239_s3 }
0x2580   :  { %p7244_p3 = scmp.lt.s32.totalorder %s7240_s3, %s7701_s30 }
0x2586   :  { %5274 = vrot.lane.b32.xlu1 %v9353_v31, %s7367_s11  ;;  %s7243_s11 = scalar_lea.hbm %s7701_s30, 8 }
0x25c0   :  { %v5069_v45 = vpop.xlane.xlu1 %5068 }
0x25c1   :  { %6691 = vrcp.f32 %v5069_v45 }
0x25c7   :  { %v6692_v40 = vpop.eup %6691 }
0x25c8   :  { %v5075_v52 = vmul.f32 %v6692_v40, %v6688_v32  ;;  %v5072_v39 = vpop.xlane.xlu1 %5071 }
0x25c9   :  { %6693 = vrcp.f32 %v5072_v39 }
0x25ca   :  { %6132 = vmatmul.msk.f32.vlgmr.msrb.gmra.mxu1 %vm4211_vm7, %v5075_v52 }
0x25cb   :  { %6154 = vmatpush.xpose.msk.msrb.mxu1 %vm907_vm4, %v5411_v59 }
0x25cf   :  { %v6694_v11 = vpop.eup %6693 }
0x25d0   :  { %v5076_v44 = vmul.f32 %v6694_v11, %v6690_v34 }
0x25d2   :  { %6133 = vmatmul.msk.f32.gmra.mxu1 %vm4211_vm7, %v5076_v44 }
0x25e0   :  { %v5120_v0 = vpop.permute.xlu1 %5119 }
0x25e1   :  { %6134 = vmatpush.xpose.msk.msra.mxu3 %vm907_vm4, %v5120_v0 }
0x25e5   :  { %6135 = vmatpush.xpose.msk.msra.mxu3 %vm907_vm4, %v5118_v12 }
0x25e8   :  { %v5273_v30 = vpop.permute.xlu1 %5272  ;;  %6136 = vmatmul.msk.f32.vlgmr.msra.gmra.mxu3 %vm907_vm4, %v5114_v20 }
0x25e9   :  { %6145 = vmatpush.xpose.msk.msrb.mxu3 %vm907_vm4, %v5279_v9 }
0x25ed   :  { %6146 = vmatpush.xpose.msk.msrb.mxu3 %vm907_vm4, %v5277_v38 }
0x25f0   :  { %v5409_v54 = vpop.permute.xlu1 %5408  ;;  %6137 = vmatmul.msk.f32.gmra.mxu3 %vm907_vm4, %v5116_v24 }
0x25f1   :  { %6155 = vmatpush.xpose.msk.msrb.mxu1 %vm907_vm4, %v5409_v54 }
0x25f8   :  { %6147 = vmatmul.msk.f32.vlgmr.msrb.gmra.mxu3 %vm907_vm4, %v5273_v30  ;;  %v5275_v3 = vpop.permute.xlu1 %5274 }
0x2600   :  { %6148 = vmatmul.msk.f32.gmra.mxu3 %vm907_vm4, %v5275_v3 }
0x2647   :  { %v5107_v1 = vpop.f32.mrf.mxu1 }
0x2648   :  { %6143 = vmatmul.msk.f32.vlgmr.msra.gmra.mxu1 %vm907_vm4, %v5107_v1 }
0x264f   :  { %v5110_v26 = vpop.f32.mrf.mxu1 }
0x2650   :  { %6144 = vmatmul.msk.f32.gmra.mxu1 %vm907_vm4, %v5110_v26 }
0x2658   :  { %6156 = vmatmul.msk.f32.vlgmr.msrb.gmra.mxu1 %vm907_vm4, %v5405_v55 }
0x266b   :  { %v5146_v53 = vpop.f32.mrf.mxu3 }
0x266c   :  { %v5152_v27 = vmul.f32 0.35355338, %v5146_v53 }
0x266e   :  { %v5154_v43 = vadd.f32 %v9381_v60, %v5152_v27 }
0x2670   :  { %v5156_v19 = vsel %vm4211_vm7, %v5154_v43, -inf }
0x2671   :  { %5157 = vmax.xlane.f32.xlu2 %v5156_v19 }
0x2673   :  { %v5149_v10 = vpop.f32.mrf.mxu3 }
0x2674   :  { %v5153_v29 = vmul.f32 0.35355338, %v5149_v10 }
0x2676   :  { %v5155_v47 = vadd.f32 %v9386_v46, %v5153_v29 }
0x2678   :  { %v5159_v57 = vsel %vm4215_vm8, %v5155_v47, -inf }
0x2679   :  { %5160 = vmax.xlane.f32.xlu0 %v5159_v57 }
0x267b   :  { %v5305_v35 = vpop.f32.mrf.mxu3 }
0x267c   :  { %v5311_v51 = vmul.f32 0.35355338, %v5305_v35 }
0x267e   :  { %v5313_v37 = vadd.f32 %v9381_v60, %v5311_v51  ;;  %v4911_v51 = vld [vmem:[%s9656_s1 + $0x8] sm:$0xff] }
0x267f   :  { %5235 = vmatpush.msrb.mxu2 %v4911_v51 }
0x2680   :  { %v5315_v63 = vsel %vm4211_vm7, %v5313_v37, -inf }
0x2681   :  { %5316 = vmax.xlane.f32.xlu1 %v5315_v63  ;;  %v4912_v63 = vld [vmem:[%s9656_s1 + $0x10] sm:$0xff] }
0x2682   :  { %5394 = vmatpush.msra.mxu2 %v4912_v63 }
0x2683   :  { %v5308_v16 = vpop.f32.mrf.mxu3 }
0x2684   :  { %v5312_v5 = vmul.f32 0.35355338, %v5308_v16 }
0x2686   :  { %v5314_v13 = vadd.f32 %v9386_v46, %v5312_v5 }
0x2688   :  { %v5318_v14 = vsel %vm4215_vm8, %v5314_v13, -inf }
0x269a   :  { %5180 = vrot.lane.b32.xlu1 %v9353_v31, %s7368_s25 }
0x26a2   :  { %5339 = vrot.lane.b32.xlu1 %v9353_v31, %s7370_s16 }
0x26aa   :  { %5469 = vrot.lane.b32.xlu1 %v9349_v61, %s7369_s15 }
0x26c5   :  { %v9430_v15 = vpop.f32.mrf.mxu1 }
0x26cd   :  { %v9432_v58 = vpop.f32.mrf.mxu1 }
0x26d4   :  { %5319 = vmax.xlane.f32.xlu1 %v5318_v14 }
0x26d5   :  { %v5437_v56 = vpop.f32.mrf.mxu1 }
0x26d6   :  { %v5443_v48 = vmul.f32 0.35355338, %v5437_v56 }
0x26d8   :  { %v5445_v33 = vadd.f32 %v9381_v60, %v5443_v48 }
0x26da   :  { %v5447_v21 = vsel %vm4211_vm7, %v5445_v33, -inf }
0x26db   :  { %5448 = vmax.xlane.f32.xlu2 %v5447_v21  ;;  %v4913_v21 = vld [vmem:[%s9656_s1 + $0x18] sm:$0xff] }
0x26e4   :  { %v5158_v4 = vpop.xlane.xlu2 %5157 }
0x26e5   :  { %v5162_v17 = vsub.f32 %v5154_v43, %v5158_v4 }
0x26e7   :  { %v5164_v41 = vmul.f32 1.442695, %v5162_v17 }
0x26e9   :  { %6695 = vpow2.f32 %v5164_v41 }
0x26ec   :  { %v5161_v50 = vpop.xlane.xlu0 %5160 }
0x26ed   :  { %v5163_v49 = vsub.f32 %v5155_v47, %v5161_v50 }
0x26ef   :  { %v6696_v23 = vpop.eup %6695  ;;  %v5166_v28 = vmul.f32 1.442695, %v5163_v49 }
0x26f0   :  { %v5168_v18 = vsel %vm4211_vm7, %v6696_v23, 0.0 }
0x26f1   :  { %6697 = vpow2.f32 %v5166_v28  ;;  %5169 = vadd.xlane.f32.xlu0 %v5168_v18 }
0x26f4   :  { %v5317_v42 = vpop.xlane.xlu1 %5316 }
0x26f5   :  { %v5321_v32 = vsub.f32 %v5313_v37, %v5317_v42 }
0x26f7   :  { %v6698_v8 = vpop.eup %6697  ;;  %v5323_v62 = vmul.f32 1.442695, %v5321_v32 }
0x26f8   :  { %v5171_v60 = vsel %vm4215_vm8, %v6698_v8, 0.0 }
0x26f9   :  { %6699 = vpow2.f32 %v5323_v62  ;;  %5172 = vadd.xlane.f32.xlu2 %v5171_v60 }
0x26ff   :  { %v6700_v34 = vpop.eup %6699 }
0x2700   :  { %v5327_v22 = vsel %vm4211_vm7, %v6700_v34, 0.0 }
0x2701   :  { %5328 = vadd.xlane.f32.xlu2 %v5327_v22 }
0x2705   :  { %5178 = vrot.lane.b32.xlu0 %v9349_v61, %s7368_s25 }
0x270c   :  { %v5181_v12 = vpop.permute.xlu1 %5180 }
0x270d   :  { %5337 = vrot.lane.b32.xlu0 %v9349_v61, %s7370_s16  ;;  %6138 = vmatpush.msk.msra.mxu0 %vm4246_vm12, %v5181_v12 }
0x2714   :  { %v5340_v36 = vpop.permute.xlu1 %5339 }
0x2715   :  { %5406 = vrot.lane.b32.xlu0 %v9353_v31, %s7366_s2  ;;  %s7241_s2 = scalar_lea.hbm %s7240_s3, 8 }
0x2716   :  { %p7242_p2 = scmp.ne.s32.totalorder %s7240_s3, %s7241_s2  ;;  %p7245_p4 = scmp.lt.s32.totalorder %s7243_s11, %s7241_s2 }
0x2718   :  { %p7246_p5 = por %p7245_p4, %p7244_p3 }
0x271a   :  { %p7247_p6 = pnand %p7246_p5, %p7242_p2 }
0x271c   :  { %v5470_v20 = vpop.permute.xlu1 %5469 }
0x2747   :  { %v5320_v24 = vpop.xlane.xlu1 %5319 }
0x2748   :  { %v5322_v38 = vsub.f32 %v5314_v13, %v5320_v24 }
0x274a   :  { %v5325_v45 = vmul.f32 1.442695, %v5322_v38 }
0x274c   :  { %6701 = vpow2.f32 %v5325_v45 }
0x274e   :  { %v5449_v40 = vpop.xlane.xlu2 %5448 }
0x274f   :  { %v5453_v52 = vsub.f32 %v5445_v33, %v5449_v40 }
0x2751   :  { %v5455_v39 = vmul.f32 1.442695, %v5453_v52 }
0x2752   :  { %v6702_v59 = vpop.eup %6701 }
0x2753   :  { %6703 = vpow2.f32 %v5455_v39  ;;  %v5330_v11 = vsel %vm4215_vm8, %v6702_v59, 0.0 }
0x2754   :  { %5331 = vadd.xlane.f32.xlu0 %v5330_v11  ;;  %v4919_v11 = vld [vmem:[%s9657_s12 + $0x10] sm:$0xff] }
0x2759   :  { %v6704_v61 = vpop.eup %6703 }
0x275a   :  { %v5459_v44 = vsel %vm4211_vm7, %v6704_v61, 0.0 }
0x275b   :  { %5460 = vadd.xlane.f32.xlu2 %v5459_v44  ;;  %v4917_v44 = vld [vmem:[%s9657_s12] sm:$0xff] }
0x2764   :  { %v5170_v0 = vpop.xlane.xlu0 %5169 }
0x2765   :  { %6705 = vrcp.f32 %v5170_v0 }
0x276b   :  { %v6706_v30 = vpop.eup %6705 }
0x276c   :  { %v5173_v9 = vpop.xlane.xlu2 %5172  ;;  %v5176_v54 = vmul.f32 %v6706_v30, %v6696_v23 }
0x276d   :  { %6707 = vrcp.f32 %v5173_v9 }
0x2773   :  { %5471 = vrot.lane.b32.xlu2 %v9353_v31, %s7369_s15  ;;  %v6708_v26 = vpop.eup %6707 }
0x2774   :  { %v5329_v1 = vpop.xlane.xlu2 %5328  ;;  %v5177_v53 = vmul.f32 %v6708_v26, %v6698_v8 }
0x2775   :  { %6709 = vrcp.f32 %v5329_v1 }
0x2777   :  { %v5179_v3 = vpop.permute.xlu0 %5178 }
0x2778   :  { %5206 = vmatpush.msra.mxu0 %v5179_v3 }
0x2779   :  { %6139 = vmatmul.msk.f32.vlgmr.msra.gmra.mxu0 %vm4211_vm7, %v5176_v54 }
0x277a   :  { %6149 = vmatpush.msk.msrb.mxu0 %vm4246_vm12, %v5340_v36 }
0x277b   :  { %v6710_v27 = vpop.eup %6709 }
0x277c   :  { %v5335_v31 = vmul.f32 %v6710_v27, %v6700_v34  ;;  %v6379_v34 = vld [vmem:[#allocation24] ss:$0 sm:$0xff]  ;;  %v9487_v27 = vld [vmem:[#allocation25] ss:$0 sm:$0xff] }
0x277f   :  { %v5338_v55 = vpop.permute.xlu0 %5337 }
0x2780   :  { %5365 = vmatpush.msrb.mxu0 %v5338_v55 }
0x2781   :  { %6140 = vmatmul.msk.f32.gmra.mxu0 %vm4211_vm7, %v5177_v53 }
0x2782   :  { %5526 = vmatpush.msra.mxu0 %v4913_v21 }
0x2787   :  { %v5407_v43 = vpop.permute.xlu0 %5406 }
0x2788   :  { %6157 = vmatmul.msk.f32.gmra.mxu1 %vm907_vm4, %v5407_v43  ;;  %v9489_v43 = vld [vmem:[#allocation27] ss:$0 sm:$0xff] }
0x2789   :  { %6150 = vmatmul.msk.f32.vlgmr.msrb.gmra.mxu0 %vm4211_vm7, %v5335_v31 }
0x27c7   :  { %v5332_v19 = vpop.xlane.xlu0 %5331 }
0x27c8   :  { %6711 = vrcp.f32 %v5332_v19 }
0x27ce   :  { %v6712_v10 = vpop.eup %6711  ;;  %v5461_v29 = vpop.xlane.xlu2 %5460 }
0x27cf   :  { %6713 = vrcp.f32 %v5461_v29  ;;  %v5336_v47 = vmul.f32 %v6712_v10, %v6702_v59  ;;  %v4920_v59 = vld [vmem:[%s9657_s12 + $0x18] sm:$0xff] }
0x27d1   :  { %6151 = vmatmul.msk.f32.gmra.mxu0 %vm4211_vm7, %v5336_v47 }
0x27d5   :  { %v6714_v57 = vpop.eup %6713 }
0x27d6   :  { %v5472_v35 = vpop.permute.xlu2 %5471  ;;  %v5467_v37 = vmul.f32 %v6714_v57, %v6704_v61  ;;  %v4918_v61 = vld [vmem:[%s9657_s12 + $0x8] sm:$0xff] }
0x27d7   :  { %6158 = vmatpush.msk.msra.mxu3 %vm4246_vm12, %v5472_v35 }
0x27d9   :  { %5497 = vmatpush.msra.mxu3 %v5470_v20 }
0x27da   :  { %6159 = vmatmul.msk.f32.vlgmr.msra.gmra.mxu3 %vm4211_vm7, %v5467_v37 }
0x27f6   :  { %v5208_v16 = vpop.f32.mrf.mxu0 }
0x27f7   :  { %6141 = vmatmul.msk.f32.vlgmr.msrb.gmra.mxu2 %vm907_vm4, %v5208_v16 }
0x27f8   :  { %5618 = vmatpush.msrb.mxu2 %v4920_v59 }
0x27fa   :  { %5619 = vmatpush.msrb.mxu2 %v4919_v11 }
0x27fc   :  { %5620 = vmatpush.msrb.mxu2 %v4918_v61 }
0x27fe   :  { %v5211_v5 = vpop.f32.mrf.mxu0  ;;  %5621 = vmatpush.msrb.mxu2 %v4917_v44 }
0x27ff   :  { %6142 = vmatmul.msk.f32.gmra.mxu2 %vm907_vm4, %v5211_v5 }
0x2805   :  { %v5440_v13 = vpop.f32.mrf.mxu1 }
0x2806   :  { %v5444_v14 = vmul.f32 0.35355338, %v5440_v13  ;;  %v5367_v56 = vpop.f32.mrf.mxu0  ;;  %v9497_v13 = vld [vmem:[#allocation28] ss:$0 sm:$0xff] }
0x2807   :  { %6152 = vmatmul.msk.f32.vlgmr.msra.gmra.mxu2 %vm907_vm4, %v5367_v56 }
0x2808   :  { %v5446_v48 = vadd.f32 %v9386_v46, %v5444_v14 }
0x280a   :  { %v5450_v33 = vsel %vm4215_vm8, %v5446_v48, -inf }
0x280b   :  { %5451 = vmax.xlane.f32.xlu2 %v5450_v33 }
0x284e   :  { %v5370_v4 = vpop.f32.mrf.mxu0 }
0x284f   :  { %6153 = vmatmul.msk.f32.gmra.mxu2 %vm907_vm4, %v5370_v4  ;;  %v4929_v4 = vld [vmem:[%s9658_s5 + $0x38] sm:$0xff] }
0x2850   :  { %5723 = vmatpush.msra.mxu1 %v4929_v4 }
0x285d   :  { %v5499_v17 = vpop.f32.mrf.mxu3 }
0x285e   :  { %6161 = vmatmul.msk.f32.vlgmr.msra.gmra.mxu0 %vm907_vm4, %v5499_v17  ;;  %v4927_v17 = vld [vmem:[%s9658_s5 + $0x28] sm:$0xff] }
0x287a   :  { %v5237_v46 = vpop.f32.mrf.mxu2 }
0x287b   :  { %v5267_v32 = vadd.f32 %v9430_v15, %v5237_v46 }
0x287e   :  { %v5452_v41 = vpop.xlane.xlu2 %5451 }
0x287f   :  { %v5454_v50 = vsub.f32 %v5446_v48, %v5452_v41  ;;  %v4926_v41 = vld [vmem:[%s9658_s5 + $0x20] sm:$0xff] }
0x2881   :  { %v5457_v49 = vmul.f32 1.442695, %v5454_v50 }
0x2882   :  { %v5240_v18 = vpop.f32.mrf.mxu2 }
0x2883   :  { %6715 = vpow2.f32 %v5457_v49  ;;  %v5270_v57 = vadd.f32 %v9432_v58, %v5240_v18 }
0x2889   :  { %v6716_v23 = vpop.eup %6715 }
0x288a   :  { %v5462_v28 = vsel %vm4215_vm8, %v6716_v23, 0.0  ;;  %v5396_v42 = vpop.f32.mrf.mxu2 }
0x288b   :  { %5463 = vadd.xlane.f32.xlu1 %v5462_v28  ;;  %v5402_v8 = vadd.f32 %v5396_v42, %v5267_v32  ;;  %v4924_v42 = vld [vmem:[%s9658_s5 + $0x10] sm:$0xff] }
0x28d2   :  { %v5399_v47 = vpop.f32.mrf.mxu2 }
0x28d3   :  { %v5403_v35 = vadd.f32 %v5399_v47, %v5270_v57 }
0x28db   :  { %v5528_v62 = vpop.f32.mrf.mxu0 }
0x28dc   :  { %v5534_v60 = vadd.f32 %v5528_v62, %v5402_v8 }
0x28de   :  { %v5536_v22 = vadd.f32 %v5534_v60, %v9326_v2 }
0x28e0   :  { %v9473_v12 = vadd.f32 %v6379_v34, %v5536_v22  ;;  %v4922_v22 = vld [vmem:[%s9658_s5] sm:$0xff] }
0x28e2   :  { %v5543_v36 = vsel %vm657_vm1, %v9473_v12, 0.0 }
0x28e3   :  { %5544 = vadd.xlane.f32.xlu0 %v5543_v36 }
0x28fe   :  { %v5464_v20 = vpop.xlane.xlu1 %5463 }
0x28ff   :  { %6717 = vrcp.f32 %v5464_v20 }
0x2905   :  { %v6718_v24 = vpop.eup %6717 }
0x2906   :  { %v5468_v15 = vmul.f32 %v6718_v24, %v6716_v23  ;;  %v4925_v23 = vld [vmem:[%s9658_s5 + $0x18] sm:$0xff] }
0x2908   :  { %6160 = vmatmul.msk.f32.gmra.mxu3 %vm4211_vm7, %v5468_v15 }
0x2956   :  { %v5545_v38 = vpop.xlane.xlu0 %5544 }
0x2957   :  { %v5549_v45 = vmul.f32 %v5545_v38, %v7824_v7 }
0x2959   :  { %v5551_v2 = vsub.f32 %v9473_v12, %v5549_v45 }
0x295b   :  { %v5553_v40 = vmul.f32 %v5551_v2, %v5551_v2 }
0x295d   :  { %v5555_v52 = vsel %vm657_vm1, %v5553_v40, 0.0 }
0x295e   :  { %5556 = vadd.xlane.f32.xlu1 %v5555_v52 }
0x298b   :  { %v5502_v39 = vpop.f32.mrf.mxu3 }
0x298c   :  { %6162 = vmatmul.msk.f32.gmra.mxu0 %vm907_vm4, %v5502_v39 }
0x29d1   :  { %v5557_v0 = vpop.xlane.xlu1 %5556 }
0x29d2   :  { %v5561_v9 = vmul.f32 %v5557_v0, %v7824_v7 }
0x29d4   :  { %v5563_v30 = vadd.f32 1e-05, %v5561_v9 }
0x29d6   :  { %6719 = vrsqrt.f32 %v5563_v30  ;;  %vm5571_vm4 = vweird.f32 %v5563_v30 }
0x29dc   :  { %v6720_v54 = vpop.eup %6719 }
0x29dd   :  { %v5566_v3 = vmul.f32 %v6720_v54, %v5563_v30  ;;  %vm5572_vm12 = vweird.f32 %v6720_v54 }
0x29de   :  { %vm5573_vm7 = vmor %vm5571_vm4, %vm5572_vm12 }
0x29df   :  { %v5567_v1 = vmul.f32 %v6720_v54, %v5566_v3 }
0x29e1   :  { %v5568_v26 = vmul.f32 0.5, %v5567_v1 }
0x29e3   :  { %v5569_v55 = vsub.f32 1.5, %v5568_v26 }
0x29e5   :  { %v5570_v53 = vmul.f32 %v6720_v54, %v5569_v55 }
0x29e7   :  { %v5574_v31 = vsel %vm5573_vm7, %v6720_v54, %v5570_v53 }
0x29e8   :  { %v5585_v19 = vmul.f32 %v5574_v31, %v5551_v2 }
0x29ea   :  { %v5590_v10 = vmul.f32 %v9487_v27, %v5585_v19 }
0x29ec   :  { %v5595_v29 = vadd.f32 %v9489_v43, %v5590_v10 }
0x29ee   :  { %6163 = vmatmul.msk.f32.vlgmr.msrb.gmra.mxu2 %vm657_vm1, %v5595_v29 }
0x2a09   :  { %v5531_v51 = vpop.f32.mrf.mxu0 }
0x2a0a   :  { %v5535_v37 = vadd.f32 %v5531_v51, %v5403_v35 }
0x2a0c   :  { %v5537_v63 = vadd.f32 %v5535_v37, %v9331_v25  ;;  %v4928_v25 = vld [vmem:[%s9658_s5 + $0x30] sm:$0xff] }
0x2a0d   :  { %5724 = vmatpush.msra.mxu1 %v4928_v25 }
0x2a0e   :  { %v5542_v16 = vadd.f32 %v6379_v34, %v5537_v63  ;;  %v4923_v34 = vld [vmem:[%s9658_s5 + $0x8] sm:$0xff] }
0x2a0f   :  { %5725 = vmatpush.msra.mxu1 %v4927_v17 }
0x2a10   :  { %v5546_v5 = vsel %vm4056_vm15, %v5542_v16, 0.0 }
0x2a11   :  { %5547 = vadd.xlane.f32.xlu0 %v5546_v5  ;;  %5726 = vmatpush.msra.mxu1 %v4926_v41 }
0x2a13   :  { %5727 = vmatpush.msra.mxu1 %v4925_v23 }
0x2a15   :  { %5728 = vmatpush.msra.mxu1 %v4924_v42 }
0x2a17   :  { %5729 = vmatpush.msra.mxu1 %v4923_v34 }
0x2a19   :  { %5730 = vmatpush.msra.mxu1 %v4922_v22 }
0x2a71   :  { %v5623_v14 = vpop.f32.mrf.mxu2 }
0x2a72   :  { %v5624_v56 = vadd.f32 %v9497_v13, %v5623_v14 }
0x2a74   :  { %v5631_v48 = vmul.f32 0.70710677, %v5624_v56  ;;  %v5629_v31 = vmul.f32 0.5, %v5624_v56 }
0x2a76   :  { %v5637_v58 = vand.u32 2147483647, %v5631_v48  ;;  %vm5633_vm2 = vcmp.ge.f32.partialorder %v5631_v48, 0.0 }
0x2a77   :  { %v5635_v55 = vsel %vm5633_vm2, 1.0, %v7371_v6 }
0x2a78   :  { %v5639_v33 = vmul.f32 0.3275911, %v5637_v58  ;;  %v5691_v2 = vsub.f32 0.0, %v5637_v58 }
0x2a7a   :  { %v5641_v21 = vadd.f32 1.0, %v5639_v33  ;;  %v5693_v39 = vmul.f32 %v5691_v2, %v5637_v58  ;;  %v6383_v33 = vld [vmem:[#allocation30] ss:$0 sm:$0xff] }
0x2a7c   :  { %6721 = vrcp.f32 %v5641_v21  ;;  %v5654_v32 = vand.u32 2147483648, %v5641_v21  ;;  %v5652_v62 = vand.u32 2147483647, %v5641_v21  ;;  %vm5648_vm13 = vweird.f32 %v5641_v21 }
0x2a7d   :  { %v5695_v61 = vmul.f32 1.442695, %v5693_v39 }
0x2a7e   :  { %v5655_v24 = vor.u32 1.1754944e-38, %v5654_v32  ;;  %vm5653_vm5 = vcmp.eq.f32.partialorder %v5652_v62, 8.507059e+37 }
0x2a7f   :  { %6723 = vpow2.f32 %v5695_v61 }
0x2a82   :  { %v6722_v50 = vpop.eup %6721 }
0x2a83   :  { %v5644_v49 = vmul.f32 %v6722_v50, %v5641_v21  ;;  %vm5649_vm8 = vweird.f32 %v6722_v50 }
0x2a84   :  { %v5548_v28 = vpop.xlane.xlu0 %5547  ;;  %vm5650_vm14 = vmor %vm5648_vm13, %vm5649_vm8  ;;  %vm5805_vm13 = vcmask 130048  }
0x2a85   :  { %v5645_v46 = vsub.f32 1.0, %v5644_v49  ;;  %v5550_v18 = vmul.f32 %v5548_v28, %v7824_v7  ;;  %v6724_v3 = vpop.eup %6723 }
0x2a87   :  { %v5646_v8 = vmul.f32 %v6722_v50, %v5645_v46  ;;  %v5552_v60 = vsub.f32 %v5542_v16, %v5550_v18 }
0x2a89   :  { %v5647_v36 = vadd.f32 %v6722_v50, %v5646_v8  ;;  %v5554_v20 = vmul.f32 %v5552_v60, %v5552_v60 }
0x2a8b   :  { %v5651_v15 = vsel %vm5650_vm14, %v6722_v50, %v5647_v36  ;;  %v5558_v38 = vsel %vm4056_vm15, %v5554_v20, 0.0 }
0x2a8c   :  { %v5656_v45 = vsel %vm5653_vm5, %v5655_v24, %v5651_v15  ;;  %5559 = vadd.xlane.f32.xlu2 %v5558_v38 }
0x2a8d   :  { %v5673_v40 = vmul.f32 1.0614054, %v5656_v45 }
0x2a8f   :  { %v5675_v52 = vadd.f32 -1.4531521, %v5673_v40 }
0x2a91   :  { %v5677_v59 = vmul.f32 %v5675_v52, %v5656_v45 }
0x2a93   :  { %v5679_v11 = vadd.f32 1.4214138, %v5677_v59 }
0x2a95   :  { %v5681_v44 = vmul.f32 %v5679_v11, %v5656_v45 }
0x2a97   :  { %v5683_v0 = vadd.f32 -0.28449672, %v5681_v44 }
0x2a99   :  { %v5685_v9 = vmul.f32 %v5683_v0, %v5656_v45 }
0x2a9b   :  { %v5687_v30 = vadd.f32 0.2548296, %v5685_v9 }
0x2a9d   :  { %v5689_v54 = vmul.f32 %v5687_v30, %v5656_v45 }
0x2a9f   :  { %v5699_v1 = vmul.f32 %v6724_v3, %v5689_v54 }
0x2aa1   :  { %v5701_v26 = vsub.f32 1.0, %v5699_v1 }
0x2aa3   :  { %v5703_v53 = vmul.f32 %v5701_v26, %v5635_v55 }
0x2aa5   :  { %v5705_v19 = vadd.f32 1.0, %v5703_v53 }
0x2aa7   :  { %v5707_v10 = vmul.f32 %v5705_v19, %v5629_v31  ;;  %v5777_v31 = vld [vmem:[%s7691_s21 + $0x18] sm:$0xff]  ;;  %v5776_v19 = vld [vmem:[%s7691_s21 + $0x10] sm:$0xff] }
0x2aa8   :  { %5797 = vmatpush.msrb.mxu3 %v5777_v31 }
0x2aa9   :  { %6165 = vmatmul.msk.f32.vlgmr.msra.gmra.mxu1 %vm583_vm0, %v5707_v10  ;;  %v5775_v10 = vld [vmem:[%s7691_s21 + $0x8] sm:$0xff] }
0x2aaa   :  { %5798 = vmatpush.msrb.mxu3 %v5776_v19 }
0x2aac   :  { %5799 = vmatpush.msrb.mxu3 %v5775_v10 }
0x2aff   :  { %v5560_v29 = vpop.xlane.xlu2 %5559 }
0x2b00   :  { %v5562_v47 = vmul.f32 %v5560_v29, %v7824_v7  ;;  %v5774_v29 = vld [vmem:[%s7691_s21] sm:$0xff]  ;;  %s7372_s21 = smov [#allocation36]  }
0x2b01   :  { %5800 = vmatpush.msrb.mxu3 %v5774_v29  ;;  %s5812_s10 = sshll.u32 %s7372_s21, 4  ;;  %s5813_s10 = int_to_ptr.vmem [resolvable:$true] %s5812_s10 }
0x2b02   :  { %v5564_v57 = vadd.f32 1e-05, %v5562_v47 }
0x2b04   :  { %6725 = vrsqrt.f32 %v5564_v57  ;;  %vm5581_vm3 = vweird.f32 %v5564_v57 }
0x2b0a   :  { %v6726_v35 = vpop.eup %6725 }
0x2b0b   :  { %v5576_v51 = vmul.f32 %v6726_v35, %v5564_v57  ;;  %vm5582_vm15 = vweird.f32 %v6726_v35 }
0x2b0c   :  { %vm5583_vm6 = vmor %vm5581_vm3, %vm5582_vm15 }
0x2b0d   :  { %v5577_v37 = vmul.f32 %v6726_v35, %v5576_v51 }
0x2b0f   :  { %v5578_v63 = vmul.f32 0.5, %v5577_v37 }
0x2b11   :  { %v5579_v16 = vsub.f32 1.5, %v5578_v63 }
0x2b13   :  { %v5580_v5 = vmul.f32 %v6726_v35, %v5579_v16 }
0x2b15   :  { %v5584_v14 = vsel %vm5583_vm6, %v6726_v35, %v5580_v5 }
0x2b16   :  { %v5586_v56 = vmul.f32 %v5584_v14, %v5552_v60  ;;  %v6384_v14 = vld [vmem:[#allocation31] ss:$0 sm:$0xff] }
0x2b18   :  { %v5591_v48 = vmul.f32 %v9487_v27, %v5586_v56 }
0x2b1a   :  { %v5596_v58 = vadd.f32 %v9489_v43, %v5591_v48  ;;  %v6385_v48 = vld [vmem:[#allocation33] ss:$0 sm:$0xff] }
0x2b1c   :  { %6164 = vmatmul.msk.f32.gmra.mxu2 %vm657_vm1, %v5596_v58 }
0x2b26   :  { %v5732_v21 = vpop.f32.mrf.mxu1 }
0x2b27   :  { %v5737_v4 = vadd.f32 %v5732_v21, %v9473_v12 }
0x2b29   :  { %v5741_v25 = vadd.f32 %v6383_v33, %v5737_v4  ;;  %v6386_v4 = vld [vmem:[#allocation34] ss:$0 sm:$0xff] }
0x2b2b   :  { %v5744_v17 = vsel %vm657_vm1, %v5741_v25, 0.0 }
0x2b2c   :  { %5745 = vadd.xlane.f32.xlu1 %v5744_v17 }
0x2b9f   :  { %v5746_v41 = vpop.xlane.xlu1 %5745  ;;  %v5626_v50 = vpop.f32.mrf.mxu2 }
0x2ba0   :  { %v5747_v49 = vmul.f32 %v5746_v41, %v7824_v7  ;;  %v5627_v23 = vadd.f32 %v9497_v13, %v5626_v50 }
0x2ba2   :  { %v9520_v28 = vsub.f32 %v5741_v25, %v5747_v49  ;;  %v5632_v27 = vmul.f32 0.70710677, %v5627_v23  ;;  %v5630_v26 = vmul.f32 0.5, %v5627_v23 }
0x2ba4   :  { %v5638_v43 = vand.u32 2147483647, %v5632_v27  ;;  %v5749_v46 = vmul.f32 %v9520_v28, %v9520_v28  ;;  %vm5634_vm4 = vcmp.ge.f32.partialorder %v5632_v27, 0.0 }
0x2ba5   :  { %v5636_v3 = vsel %vm5634_vm4, 1.0, %v7371_v6 }
0x2ba6   :  { %v5640_v18 = vmul.f32 0.3275911, %v5638_v43  ;;  %v5750_v12 = vsel %vm657_vm1, %v5749_v46, 0.0  ;;  %v5692_v15 = vsub.f32 0.0, %v5638_v43 }
0x2ba7   :  { %5751 = vadd.xlane.f32.xlu0 %v5750_v12 }
0x2ba8   :  { %v5642_v42 = vadd.f32 1.0, %v5640_v18  ;;  %v5694_v2 = vmul.f32 %v5692_v15, %v5638_v43 }
0x2baa   :  { %6727 = vrcp.f32 %v5642_v42  ;;  %v5669_v60 = vand.u32 2147483648, %v5642_v42  ;;  %v5667_v13 = vand.u32 2147483647, %v5642_v42  ;;  %vm5663_vm10 = vweird.f32 %v5642_v42 }
0x2bab   :  { %v5697_v39 = vmul.f32 1.442695, %v5694_v2 }
0x2bac   :  { %v5670_v36 = vor.u32 1.1754944e-38, %v5669_v60  ;;  %vm5668_vm12 = vcmp.eq.f32.partialorder %v5667_v13, 8.507059e+37 }
0x2bad   :  { %6729 = vpow2.f32 %v5697_v39 }
0x2bb0   :  { %v6728_v32 = vpop.eup %6727 }
0x2bb1   :  { %v5659_v8 = vmul.f32 %v6728_v32, %v5642_v42  ;;  %vm5664_vm9 = vweird.f32 %v6728_v32 }
0x2bb2   :  { %vm5665_vm11 = vmor %vm5663_vm10, %vm5664_vm9 }
0x2bb3   :  { %v5660_v62 = vsub.f32 1.0, %v5659_v8  ;;  %v6730_v9 = vpop.eup %6729 }
0x2bb5   :  { %v5661_v34 = vmul.f32 %v6728_v32, %v5660_v62 }
0x2bb7   :  { %v5662_v22 = vadd.f32 %v6728_v32, %v5661_v34 }
0x2bb9   :  { %v5666_v20 = vsel %vm5665_vm11, %v6728_v32, %v5662_v22 }
0x2bba   :  { %v5671_v24 = vsel %vm5668_vm12, %v5670_v36, %v5666_v20 }
0x2bbb   :  { %v5674_v38 = vmul.f32 1.0614054, %v5671_v24 }
0x2bbd   :  { %v5676_v45 = vadd.f32 -1.4531521, %v5674_v38 }
0x2bbf   :  { %v5678_v40 = vmul.f32 %v5676_v45, %v5671_v24 }
0x2bc1   :  { %v5680_v52 = vadd.f32 1.4214138, %v5678_v40 }
0x2bc3   :  { %v5682_v59 = vmul.f32 %v5680_v52, %v5671_v24 }
0x2bc5   :  { %v5684_v11 = vadd.f32 -0.28449672, %v5682_v59 }
0x2bc7   :  { %v5686_v61 = vmul.f32 %v5684_v11, %v5671_v24 }
0x2bc9   :  { %v5688_v44 = vadd.f32 0.2548296, %v5686_v61 }
0x2bcb   :  { %v5690_v0 = vmul.f32 %v5688_v44, %v5671_v24 }
0x2bcd   :  { %v5700_v30 = vmul.f32 %v6730_v9, %v5690_v0 }
0x2bcf   :  { %v5702_v54 = vsub.f32 1.0, %v5700_v30 }
0x2bd1   :  { %v5704_v1 = vmul.f32 %v5702_v54, %v5636_v3 }
0x2bd3   :  { %v5706_v55 = vadd.f32 1.0, %v5704_v1 }
0x2bd5   :  { %v5708_v53 = vmul.f32 %v5706_v55, %v5630_v26 }
0x2bd7   :  { %6166 = vmatmul.msk.f32.gmra.mxu1 %vm583_vm0, %v5708_v53 }
0x2c1a   :  { %v5752_v47 = vpop.xlane.xlu0 %5751 }
0x2c1b   :  { %v5753_v57 = vmul.f32 %v5752_v47, %v7824_v7 }
0x2c1d   :  { %v5754_v35 = vadd.f32 1e-05, %v5753_v57 }
0x2c1f   :  { %6731 = vrsqrt.f32 %v5754_v35  ;;  %vm5761_vm7 = vweird.f32 %v5754_v35 }
0x2c25   :  { %v6732_v6 = vpop.eup %6731 }
0x2c26   :  { %v5756_v51 = vmul.f32 %v6732_v6, %v5754_v35  ;;  %vm5762_vm0 = vweird.f32 %v6732_v6 }
0x2c27   :  { %vm5763_vm8 = vmor %vm5761_vm7, %vm5762_vm0 }
0x2c28   :  { %v5757_v37 = vmul.f32 %v6732_v6, %v5756_v51 }
0x2c2a   :  { %v5758_v63 = vmul.f32 0.5, %v5757_v37 }
0x2c2c   :  { %v5759_v16 = vsub.f32 1.5, %v5758_v63 }
0x2c2e   :  { %v5760_v5 = vmul.f32 %v6732_v6, %v5759_v16 }
0x2c30   :  { %v5764_v56 = vsel %vm5763_vm8, %v6732_v6, %v5760_v5 }
0x2c31   :  { %v5765_v58 = vmul.f32 %v5764_v56, %v9520_v28 }
0x2c33   :  { %v5769_v33 = vmul.f32 %v6384_v14, %v5765_v58 }
0x2c35   :  { %v5773_v21 = vadd.f32 %v6385_v48, %v5769_v33 }
0x2c37   :  { %6167 = vmatmul.msk.f32.vlgmr.msrb.gmra.mxu3 %vm657_vm1, %v5773_v21 }
0x2c54   :  { %v5735_v7 = vpop.f32.mrf.mxu1 }
0x2cba   :  { %v5802_v25 = vpop.f32.mrf.mxu3 }
0x2cbb   :  { %v5803_v17 = vadd.f32 %v6386_v4, %v5802_v25 }
0x2cbd   :  { %5806 = vst.msk [vmem:[#allocation36] sm:$0xff] %vm5805_vm13, %v5803_v17 }
0x2cbe   :  { %7250 = shalt.err (!%p7247_p6)
}
0x2cbf   :  { %5817 = dma.vmem_to_hbm [thread:$0]  %s5813_s10, 128, %s5815_s6, [#allocation6]  }
0x2cc0   :  { %7273 = dma.done.wait [#allocation6], 128  }
0x2cc1   :  { %7274 = vsyncadd [#allocation6], 4294967168 }
0x2cc2   :  { %5822 = vsyncpa [#allocation5], 1 }
0x2cc3   :  { %5823 = vsyncpa [#allocation8], 1 }
0x2cc4   :  { %5824 = vsyncpa [#allocation11], 1 }
0x2cc5   :  { %5825 = vsyncpa [#allocation14], 1 }
0x2cc6   :  { %5826 = vsyncpa [#allocation17], 1 }
0x2cc7   :  { %5827 = vsyncpa [#allocation20], 1 }
0x2cc8   :  { %5828 = vsyncpa [#allocation23], 1 }
0x2cc9   :  { %5829 = vsyncpa [#allocation26], 1 }
0x2cca   :  { %5830 = vsyncpa [#allocation29], 1 }
0x2ccb   :  { %5831 = vsyncpa [#allocation32], 1 }
0x2ccc   :  { %5832 = vsyncpa [#allocation35], 1 }
0x2ccd   :  { %5833 = vsyncpa [#allocation6], 1 }

</bundles_post_ra>
